<compile_context>
chip_gen: v5e
topology: v5e:2x2
jax: 0.10.0
libtpu: 0.0.40
codegen_flags: <defaults>
</compile_context>

<pallas_src>
import functools
import numpy as np

import jax
import jax.numpy as jnp
from jax.experimental import pallas as pl
from jax.experimental.pallas import tpu as pltpu

# ----------------------------- small config -----------------------------
WIDTH = 128        # transformer_width == vision_width
EMBED = 128        # embed_dim (text_projection / visual proj output)
HEADS = 2          # transformer_heads (head_dim = 64)
LAYERS = 2         # transformer layers (text and vision)
CTX = 8            # context_length == max_words
VOCAB = 512
PATCH = 8
IMAGE = 32
GRID = IMAGE // PATCH          # 4
L_VIS = GRID * GRID + 1        # 17 tokens (CLS + patches)
L_PAD = 32                     # padded vision seq len (multiple of 16 for bf16 sublanes)
MAX_FRAMES = 4
VIS_TILE = 4                   # frames per grid tile in the fused vision encoder
NEG_INF = -1e9


def _vmem():
    return pl.BlockSpec(memory_space=pltpu.MemorySpace.VMEM)


def _ln(x2d, g, b, eps=1e-5):
    # x2d: (M, W) f32; g, b: (1, W) f32
    mu = jnp.mean(x2d, axis=-1, keepdims=True)
    xc = x2d - mu
    var = jnp.mean(xc * xc, axis=-1, keepdims=True)
    return xc * jax.lax.rsqrt(var + eps) * g + b


# ----------------------------- fused transformer encoder -----------------------------
_LAYER_PARAM_NAMES = ("ln1_g", "ln1_b", "in_w", "in_b", "out_w", "out_b",
                      "ln2_g", "ln2_b", "fc_w", "fc_b", "proj_w", "proj_b")


def _encoder_layer_kernel(*refs, n_heads, pre_ln):
    if pre_ln:
        (x_ref, mask_ref, pre_g, pre_b,
         ln1_g, ln1_b, in_w, in_b, out_w, out_b,
         ln2_g, ln2_b, fc_w, fc_b, proj_w, proj_b,
         o_ref, acc_ref) = refs
    else:
        (x_ref, mask_ref,
         ln1_g, ln1_b, in_w, in_b, out_w, out_b,
         ln2_g, ln2_b, fc_w, fc_b, proj_w, proj_b,
         o_ref, acc_ref) = refs

    layer = pl.program_id(1)
    TB, L, W = acc_ref.shape
    hd = W // n_heads
    scale = 1.0 / float(np.sqrt(hd))

    @pl.when(layer == 0)
    def _():
        x0 = x_ref[...]
        if pre_ln:  # ln_pre fused into the first grid step (vision encoder)
            x0 = _ln(x0.reshape(TB * L, W), pre_g[...], pre_b[...]).reshape(TB, L, W)
        acc_ref[...] = x0

    x2 = acc_ref[...].reshape(TB * L, W)                    # residual stream (f32)

    # ---- multi-head self attention ----
    h = _ln(x2, ln1_g[...], ln1_b[...])
    qkv = jnp.dot(h.astype(jnp.bfloat16), in_w[...],
                  preferred_element_type=jnp.float32) + in_b[...]
    qkv = qkv.reshape(TB, L, 3 * W)
    mask = mask_ref[...][None]                              # (1, L, L) additive mask
    heads = []
    for hh in range(n_heads):                               # static unrolled head loop
        qh = qkv[:, :, hh * hd:(hh + 1) * hd]
        kh = qkv[:, :, W + hh * hd:W + (hh + 1) * hd]
        vh = qkv[:, :, 2 * W + hh * hd:2 * W + (hh + 1) * hd]
        s = jnp.einsum("bqd,bkd->bqk",
                       qh.astype(jnp.bfloat16), kh.astype(jnp.bfloat16),
                       preferred_element_type=jnp.float32) * scale
        s = s + mask
        s = s - jnp.max(s, axis=-1, keepdims=True)
        p = jnp.exp(s)
        p = p * pl.reciprocal(jnp.sum(p, axis=-1, keepdims=True), approx=True)
        heads.append(jnp.einsum("bqk,bkd->bqd",
                                p.astype(jnp.bfloat16), vh.astype(jnp.bfloat16),
                                preferred_element_type=jnp.float32))
    attn = jnp.concatenate(heads, axis=-1).reshape(TB * L, W)      # lane-dense head merge
    attn = jnp.dot(attn.astype(jnp.bfloat16), out_w[...],
                   preferred_element_type=jnp.float32) + out_b[...]
    x2 = x2 + attn

    # ---- MLP (QuickGELU) ----
    h = _ln(x2, ln2_g[...], ln2_b[...])
    h = jnp.dot(h.astype(jnp.bfloat16), fc_w[...],
                preferred_element_type=jnp.float32) + fc_b[...]
    h = h * jax.nn.sigmoid(1.702 * h)
    h = jnp.dot(h.astype(jnp.bfloat16), proj_w[...],
                preferred_element_type=jnp.float32) + proj_b[...]
    x_new = (x2 + h).reshape(TB, L, W)
    acc_ref[...] = x_new

    @pl.when(layer == pl.num_programs(1) - 1)
    def _():
        o_ref[...] = x_new


def pallas_encoder(x, attn_mask, layers, n_heads, *, tile_rows, pre_ln=None):
    """x: (N, L, W) f32, attn_mask: (L, L) additive f32, layers: stacked per-layer params."""
    N, L, W = x.shape
    assert N % tile_rows == 0
    n_layers = layers["in_w"].shape[0]

    in_args = [x.astype(jnp.float32), attn_mask.astype(jnp.float32)]
    in_specs = [pl.BlockSpec((tile_rows, L, W), lambda t, l: (t, 0, 0)),
                pl.BlockSpec((L, L), lambda t, l: (0, 0))]
    if pre_ln is not None:
        g, b = pre_ln
        in_args += [g.reshape(1, W).astype(jnp.float32),
                    b.reshape(1, W).astype(jnp.float32)]
        in_specs += [pl.BlockSpec((1, W), lambda t, l: (0, 0)),
                     pl.BlockSpec((1, W), lambda t, l: (0, 0))]

    def layer_spec(trailing_shape):
        nd = len(trailing_shape)
        return pl.BlockSpec((None,) + tuple(trailing_shape),
                            lambda t, l: (l,) + (0,) * nd)

    for name in _LAYER_PARAM_NAMES:
        arr = layers[name]
        in_args.append(arr)
        in_specs.append(layer_spec(arr.shape[1:]))

    kernel = functools.partial(_encoder_layer_kernel, n_heads=n_heads,
                               pre_ln=pre_ln is not None)
    return pl.pallas_call(
        kernel,
        out_shape=jax.ShapeDtypeStruct((N, L, W), jnp.float32),
        grid=(N // tile_rows, n_layers),
        in_specs=in_specs,
        out_specs=pl.BlockSpec((tile_rows, L, W), lambda t, l: (t, 0, 0)),
        scratch_shapes=[pltpu.VMEM((tile_rows, L, W), jnp.float32)],
        compiler_params=pltpu.CompilerParams(
            dimension_semantics=("parallel", "arbitrary")),
    )(*in_args)


# ----------------------------- small helper kernels -----------------------------
def _matmul_kernel(x_ref, w_ref, o_ref):
    o_ref[...] = jnp.dot(x_ref[...], w_ref[...], preferred_element_type=jnp.float32)


def pallas_matmul_bf16(x, w, *, tm=64):
    """Row-tiled matmul (patch embedding): bf16 operands, f32 accumulate."""
    M, K = x.shape
    N = w.shape[1]
    tm = min(tm, M)
    assert M % tm == 0
    return pl.pallas_call(
        _matmul_kernel,
        out_shape=jax.ShapeDtypeStruct((M, N), jnp.float32),
        grid=(M // tm,),
        in_specs=[pl.BlockSpec((tm, K), lambda i: (i, 0)),
                  pl.BlockSpec((K, N), lambda i: (0, 0))],
        out_specs=pl.BlockSpec((tm, N), lambda i: (i, 0)),
        compiler_params=pltpu.CompilerParams(dimension_semantics=("parallel",)),
    )(x.astype(jnp.bfloat16), w.astype(jnp.bfloat16))


def _ln_proj_kernel(x_ref, g_ref, b_ref, w_ref, o_ref):
    h = _ln(x_ref[...], g_ref[...], b_ref[...])
    o_ref[...] = jnp.dot(h, w_ref[...], preferred_element_type=jnp.float32)


def pallas_ln_proj(x, g, b, w):
    """LayerNorm + projection, applied only to the rows that are actually used (CLS / EOT)."""
    M, K = x.shape
    N = w.shape[1]
    return pl.pallas_call(
        _ln_proj_kernel,
        out_shape=jax.ShapeDtypeStruct((M, N), jnp.float32),
        in_specs=[_vmem()] * 4,
        out_specs=_vmem(),
    )(x.astype(jnp.float32), g.reshape(1, K).astype(jnp.float32),
      b.reshape(1, K).astype(jnp.float32), w.astype(jnp.float32))


# ----------------------------- frame-text similarity + ITC loss -----------------------------
def _sim_itc_kernel(seq_ref, vis_ref, mask_ref, scale_ref, o_ref):
    seq = seq_ref[...]                  # (N, D)
    vis = vis_ref[...]                  # (M, T, D)
    mask = mask_ref[...]                # (M, T, 1)
    N, D = seq.shape
    M = vis.shape[0]

    seqn = seq * jax.lax.rsqrt(jnp.sum(seq * seq, axis=-1, keepdims=True))
    visn = vis * jax.lax.rsqrt(jnp.sum(vis * vis, axis=-1, keepdims=True))
    seqb = jnp.broadcast_to(seqn[None], (M, N, D))
    # MXU batched contraction: sim[m, t, n] = <visn[m, t], seqn[n]>
    sim = jnp.einsum("mtd,mnd->mtn", visn, seqb, preferred_element_type=jnp.float32)

    w = sim * mask
    # eps guards an all-masked / all-zero video row (reference would divide by zero here)
    w = w * jax.lax.rsqrt(jnp.sum(w * w, axis=1, keepdims=True) + 1e-12)
    w = jnp.where(mask > 0.5, 6.0 * w, -1e20)
    w = w - jnp.max(w, axis=1, keepdims=True)
    w = jnp.exp(w)
    w = w * pl.reciprocal(jnp.sum(w, axis=1, keepdims=True), approx=True)
    logits = jnp.exp(scale_ref[...]) * jnp.sum(w * sim, axis=1, keepdims=True)  # (M, 1, N)

    def log_softmax(s, axis):
        mx = jnp.max(s, axis=axis, keepdims=True)
        lse = jnp.log(jnp.sum(jnp.exp(s - mx), axis=axis, keepdims=True)) + mx
        return s - lse

    vids = jax.lax.broadcasted_iota(jnp.int32, logits.shape, 0)
    txts = jax.lax.broadcasted_iota(jnp.int32, logits.shape, 2)
    diag = vids == txts                                     # assumes text batch == video batch
    loss_t2v = -jnp.sum(jnp.where(diag, log_softmax(logits, 0), 0.0)) / N
    loss_v2t = -jnp.sum(jnp.where(diag, log_softmax(logits, 2), 0.0)) / N
    o_ref[...] = 0.5 * (loss_t2v + loss_v2t) * jnp.ones((1, 1), jnp.float32)


def pallas_sim_itc_loss(seq, vis, video_mask, logit_scale):
    out = pl.pallas_call(
        _sim_itc_kernel,
        out_shape=jax.ShapeDtypeStruct((1, 1), jnp.float32),
        in_specs=[_vmem()] * 4,
        out_specs=_vmem(),
    )(seq.astype(jnp.float32), vis.astype(jnp.float32),
      video_mask.astype(jnp.float32)[:, :, None],
      logit_scale.reshape(1, 1).astype(jnp.float32))
    return out[0, 0]


# ----------------------------- encoders -----------------------------
def encode_text(params, input_ids):
    tp = params["text"]
    B, L = input_ids.shape
    # TODO(synk): token-embedding gather left in XLA (no benefit from a DMA-gather kernel at this size).
    x = jnp.take(tp["token_embedding"], input_ids, axis=0) + tp["pos_emb"][None]
    causal = jnp.triu(jnp.full((L, L), NEG_INF, jnp.float32), 1)
    x = pallas_encoder(x, causal, tp["layers"], HEADS, tile_rows=B)
    eot = jnp.argmax(input_ids, axis=-1)            # CLIP convention: EOT token has max vocab id
    feats = x[jnp.arange(B), eot]                   # (B, W)
    return pallas_ln_proj(feats, tp["lnf_g"], tp["lnf_b"], tp["text_proj"])   # (B, EMBED)


def encode_image_cls(params, frames):
    """frames: (N, C, H, W) NCHW -> projected CLS feature per frame (N, EMBED)."""
    vp = params["visual"]
    N, C, H, Wimg = frames.shape
    p = PATCH
    gh, gw = H // p, Wimg // p
    # TODO(synk): at real resolutions fuse this im2col into the conv kernel's BlockSpec/DMA.
    patches = frames.reshape(N, C, gh, p, gw, p).transpose(0, 2, 4, 1, 3, 5)
    patches = patches.reshape(N * gh * gw, C * p * p)
    emb = pallas_matmul_bf16(patches, vp["conv1_w"], tm=64).reshape(N, gh * gw, WIDTH)
    cls = jnp.broadcast_to(vp["cls"][None, None, :], (N, 1, WIDTH))
    x = jnp.concatenate([cls, emb], axis=1) + vp["pos_emb"][None]       # (N, L_VIS, W)
    x = jnp.pad(x, ((0, 0), (0, L_PAD - L_VIS), (0, 0)))                # pad seq for bf16 tiles
    key_mask = jnp.where(jnp.arange(L_PAD) < L_VIS, 0.0, NEG_INF).astype(jnp.float32)
    attn_mask = jnp.broadcast_to(key_mask[None, :], (L_PAD, L_PAD))
    x = pallas_encoder(x, attn_mask, vp["layers"], HEADS, tile_rows=VIS_TILE,
                       pre_ln=(vp["ln_pre_g"], vp["ln_pre_b"]))
    cls_tok = x[:, 0, :]                                                # only CLS is used downstream
    return pallas_ln_proj(cls_tok, vp["ln_post_g"], vp["ln_post_b"], vp["proj"])  # (N, EMBED)


# ----------------------------- CLIP4Clip forward -----------------------------
def clip4clip_forward(params, input_ids, token_type_ids, attention_mask, video, video_mask):
    input_ids = input_ids.reshape(-1, input_ids.shape[-1])
    token_type_ids = token_type_ids.reshape(-1, token_type_ids.shape[-1])
    attention_mask = attention_mask.reshape(-1, attention_mask.shape[-1])
    video_mask = video_mask.reshape(-1, video_mask.shape[-1])
    video = video.astype(jnp.float32)
    b, pair, bs, ts, channel, h, w = video.shape
    frames = video.reshape(b * pair * bs * ts, channel, h, w)

    # --- get_sequence_output ---
    seq = encode_text(params, input_ids)                     # (B, EMBED)

    # --- get_visual_output (training branch) ---
    # select_num = L_VIS // 10 == 1 -> the torch randperm selection deterministically picks only
    # the CLS token; with sim_header='meanP' encode_temporal then takes token 0 per frame.
    # TODO(synk): general random patch selection (select_num > 1, torch.randperm) not replicated.
    assert L_VIS // 10 == 1
    cls_feats = encode_image_cls(params, frames)             # (B*T, EMBED)
    bs_pair = video_mask.shape[0]
    visual_output1 = cls_feats.reshape(bs_pair, -1, EMBED)   # (B, T, EMBED)

    # --- get_similarity_logits (loss_type='itc') ---
    # TODO(synk): AllGather / torch.distributed.barrier omitted — single-device identity.
    return pallas_sim_itc_loss(seq, visual_output1, video_mask.astype(jnp.float32),
                               params["logit_scale"])


# ----------------------------- parameter init -----------------------------
def init_params(key):
    keys = jax.random.split(key, 64)
    it = iter(range(64))

    def nrm(shape, std=0.02):
        return std * jax.random.normal(keys[next(it)], shape, dtype=jnp.float32)

    def layer_stack(n_layers, width):
        return dict(
            ln1_g=jnp.ones((n_layers, 1, width), jnp.float32),
            ln1_b=jnp.zeros((n_layers, 1, width), jnp.float32),
            in_w=nrm((n_layers, width, 3 * width)).astype(jnp.bfloat16),
            in_b=jnp.zeros((n_layers, 1, 3 * width), jnp.float32),
            out_w=nrm((n_layers, width, width)).astype(jnp.bfloat16),
            out_b=jnp.zeros((n_layers, 1, width), jnp.float32),
            ln2_g=jnp.ones((n_layers, 1, width), jnp.float32),
            ln2_b=jnp.zeros((n_layers, 1, width), jnp.float32),
            fc_w=nrm((n_layers, width, 4 * width)).astype(jnp.bfloat16),
            fc_b=jnp.zeros((n_layers, 1, 4 * width), jnp.float32),
            proj_w=nrm((n_layers, 4 * width, width)).astype(jnp.bfloat16),
            proj_b=jnp.zeros((n_layers, 1, width), jnp.float32),
        )

    text = dict(
        token_embedding=nrm((VOCAB, WIDTH)),
        pos_emb=nrm((CTX, WIDTH), 0.01),
        layers=layer_stack(LAYERS, WIDTH),
        lnf_g=jnp.ones((WIDTH,), jnp.float32), lnf_b=jnp.zeros((WIDTH,), jnp.float32),
        text_proj=nrm((WIDTH, EMBED)),
    )
    visual = dict(
        conv1_w=nrm((3 * PATCH * PATCH, WIDTH)).astype(jnp.bfloat16),
        cls=nrm((WIDTH,)),
        pos_emb=nrm((L_VIS, WIDTH), 0.01),
        ln_pre_g=jnp.ones((WIDTH,), jnp.float32), ln_pre_b=jnp.zeros((WIDTH,), jnp.float32),
        layers=layer_stack(LAYERS, WIDTH),
        ln_post_g=jnp.ones((WIDTH,), jnp.float32), ln_post_b=jnp.zeros((WIDTH,), jnp.float32),
        proj=nrm((WIDTH, EMBED)),
    )
    return dict(text=text, visual=visual,
                logit_scale=jnp.full((1, 1), np.log(1.0 / 0.07), jnp.float32))


# ----------------------------- main -----------------------------
if __name__ == "__main__":
    key = jax.random.PRNGKey(0)
    pkey, k1, k2 = jax.random.split(key, 3)
    params = init_params(pkey)

    Bsz = 2
    input_ids = jax.random.randint(k1, (Bsz, CTX), 1, VOCAB - 1, dtype=jnp.int32)
    input_ids = input_ids.at[:, -1].set(VOCAB - 1)           # EOT token (max id) at last position
    token_type_ids = jnp.zeros((Bsz, CTX), jnp.int32)
    attention_mask = jnp.ones((Bsz, CTX), jnp.int32)
    video = jax.random.normal(k2, (Bsz, 1, 1, MAX_FRAMES, 3, IMAGE, IMAGE), dtype=jnp.float32)
    video_mask = jnp.ones((Bsz, MAX_FRAMES), jnp.int32)

    fwd = jax.jit(clip4clip_forward)
    loss = fwd(params, input_ids, token_type_ids, attention_mask, video, video_mask)
    loss = jax.block_until_ready(loss)
    assert loss.shape == () and bool(jnp.isfinite(loss))
    print("KERNEL_OK")
</pallas_src>

<mosaic_0001>
module attributes {stable_mosaic.version = 11 : i64} {
  func.func @_matmul_kernel(%arg0: i32, %arg1: memref<64x192xbf16, #tpu.memory_space<vmem>>, %arg2: memref<192x128xbf16, #tpu.memory_space<vmem>>, %arg3: memref<64x128xf32, #tpu.memory_space<vmem>>) attributes {dimension_semantics = [#tpu.dimension_semantics<parallel>], iteration_bounds = array<i64: 2>, scalar_prefetch = 0 : i64, scratch_operands = 0 : i64, tpu.core_type = #tpu.core_type<tc>, window_params = [{transform_indices = @transform_0, window_bounds = array<i64: 64, 192>}, {pipeline_mode = #tpu.pipeline_mode<synchronous>, transform_indices = @transform_1, window_bounds = array<i64: 192, 128>}, {transform_indices = @transform_2, window_bounds = array<i64: 64, 128>}]} {
    %c0 = arith.constant 0 : index
    %c0_0 = arith.constant 0 : index
    %0 = vector.load %arg1[%c0, %c0_0] : memref<64x192xbf16, #tpu.memory_space<vmem>>, vector<64x192xbf16>
    %c0_1 = arith.constant 0 : index
    %c0_2 = arith.constant 0 : index
    %1 = vector.load %arg2[%c0_1, %c0_2] : memref<192x128xbf16, #tpu.memory_space<vmem>>, vector<192x128xbf16>
    %cst = arith.constant dense<0.000000e+00> : vector<64x128xf32>
    %2 = tpu.matmul %0, %1, %cst {dimension_numbers = #tpu.dot_dimension_numbers<[1], [0], [0], [1], [0, 0, 1, 1], [], []>} : vector<64x192xbf16>, vector<192x128xbf16>, vector<64x128xf32> -> vector<64x128xf32>
    %c0_3 = arith.constant 0 : index
    %c0_4 = arith.constant 0 : index
    %3 = vector.load %arg3[%c0_3, %c0_4] : memref<64x128xf32, #tpu.memory_space<vmem>>, vector<64x128xf32>
    tpu.vector_store %arg3[%c0_3, %c0_4], %2 {strides = array<i32>} : memref<64x128xf32, #tpu.memory_space<vmem>>, vector<64x128xf32>,
    return
  }
  func.func @transform_0(%arg0: i32) -> (i32, i32) {
    %c0_i32 = arith.constant 0 : i32
    %c0_i32_0 = arith.constant 0 : i32
    return %arg0, %c0_i32 : i32, i32
  }
  func.func @transform_1(%arg0: i32) -> (i32, i32) {
    %c0_i32 = arith.constant 0 : i32
    %c0_i32_0 = arith.constant 0 : i32
    %c0_i32_1 = arith.constant 0 : i32
    return %c0_i32, %c0_i32_0 : i32, i32
  }
  func.func @transform_2(%arg0: i32) -> (i32, i32) {
    %c0_i32 = arith.constant 0 : i32
    %c0_i32_0 = arith.constant 0 : i32
    return %arg0, %c0_i32 : i32, i32
  }
}

module attributes {stable_mosaic.version = 11 : i64} {
  func.func @_encoder_layer_kernel(%arg0: i32, %arg1: i32, %arg2: memref<4x32x128xf32, #tpu.memory_space<vmem>>, %arg3: memref<32x32xf32, #tpu.memory_space<vmem>>, %arg4: memref<1x128xf32, #tpu.memory_space<vmem>>, %arg5: memref<1x128xf32, #tpu.memory_space<vmem>>, %arg6: memref<1x1x128xf32, #tpu.memory_space<vmem>>, %arg7: memref<1x1x128xf32, #tpu.memory_space<vmem>>, %arg8: memref<1x128x384xbf16, #tpu.memory_space<vmem>>, %arg9: memref<1x1x384xf32, #tpu.memory_space<vmem>>, %arg10: memref<1x128x128xbf16, #tpu.memory_space<vmem>>, %arg11: memref<1x1x128xf32, #tpu.memory_space<vmem>>, %arg12: memref<1x1x128xf32, #tpu.memory_space<vmem>>, %arg13: memref<1x1x128xf32, #tpu.memory_space<vmem>>, %arg14: memref<1x128x512xbf16, #tpu.memory_space<vmem>>, %arg15: memref<1x1x512xf32, #tpu.memory_space<vmem>>, %arg16: memref<1x512x128xbf16, #tpu.memory_space<vmem>>, %arg17: memref<1x1x128xf32, #tpu.memory_space<vmem>>, %arg18: memref<4x32x128xf32, #tpu.memory_space<vmem>>, %arg19: memref<4x32x128xf32, #tpu.memory_space<vmem>>) attributes {dimension_semantics = [#tpu.dimension_semantics<parallel>, #tpu.dimension_semantics<arbitrary>], iteration_bounds = array<i64: 2, 2>, scalar_prefetch = 0 : i64, scratch_operands = 1 : i64, tpu.core_type = #tpu.core_type<tc>, window_params = [{transform_indices = @transform_0, window_bounds = array<i64: 4, 32, 128>}, {pipeline_mode = #tpu.pipeline_mode<synchronous>, transform_indices = @transform_1, window_bounds = array<i64: 32, 32>}, {pipeline_mode = #tpu.pipeline_mode<synchronous>, transform_indices = @transform_2, window_bounds = array<i64: 1, 128>}, {pipeline_mode = #tpu.pipeline_mode<synchronous>, transform_indices = @transform_3, window_bounds = array<i64: 1, 128>}, {transform_indices = @transform_4, window_bounds = array<i64: 1, 1, 128>}, {transform_indices = @transform_5, window_bounds = array<i64: 1, 1, 128>}, {transform_indices = @transform_6, window_bounds = array<i64: 1, 128, 384>}, {transform_indices = @transform_7, window_bounds = array<i64: 1, 1, 384>}, {transform_indices = @transform_8, window_bounds = array<i64: 1, 128, 128>}, {transform_indices = @transform_9, window_bounds = array<i64: 1, 1, 128>}, {transform_indices = @transform_10, window_bounds = array<i64: 1, 1, 128>}, {transform_indices = @transform_11, window_bounds = array<i64: 1, 1, 128>}, {transform_indices = @transform_12, window_bounds = array<i64: 1, 128, 512>}, {transform_indices = @transform_13, window_bounds = array<i64: 1, 1, 512>}, {transform_indices = @transform_14, window_bounds = array<i64: 1, 512, 128>}, {transform_indices = @transform_15, window_bounds = array<i64: 1, 1, 128>}, {transform_indices = @transform_16, window_bounds = array<i64: 4, 32, 128>}]} {
    %c0_i32 = arith.constant 0 : i32
    %0 = arith.cmpi eq, %arg1, %c0_i32 : i32
    %1 = arith.extui %0 : i1 to i32
    %c0_i32_0 = arith.constant 0 : i32
    %2 = arith.cmpi ne, %1, %c0_i32_0 : i32
    scf.if %2 {
      %c0_70 = arith.constant 0 : index
      %c0_71 = arith.constant 0 : index
      %c0_72 = arith.constant 0 : index
      %151 = vector.load %arg2[%c0_70, %c0_71, %c0_72] : memref<4x32x128xf32, #tpu.memory_space<vmem>>, vector<4x32x128xf32>
      %152 = vector.shape_cast %151 : vector<4x32x128xf32> to vector<128x128xf32>
      %c0_73 = arith.constant 0 : index
      %c0_74 = arith.constant 0 : index
      %153 = vector.load %arg4[%c0_73, %c0_74] : memref<1x128xf32, #tpu.memory_space<vmem>>, vector<1x128xf32>
      %c0_75 = arith.constant 0 : index
      %c0_76 = arith.constant 0 : index
      %154 = vector.load %arg5[%c0_75, %c0_76] : memref<1x128xf32, #tpu.memory_space<vmem>>, vector<1x128xf32>
      %cst_77 = arith.constant dense<0.000000e+00> : vector<128xf32>
      %155 = vector.multi_reduction <add>, %152, %cst_77 [1] : vector<128x128xf32> to vector<128xf32>
      %156 = vector.shape_cast %155 : vector<128xf32> to vector<128x1xf32>
      %cst_78 = arith.constant 1.280000e+02 : f32
      %157 = vector.broadcast %cst_78 : f32 to vector<128x1xf32>
      %158 = arith.divf %156, %157 : vector<128x1xf32>
      %159 = vector.broadcast %158 : vector<128x1xf32> to vector<128x128xf32>
      %160 = arith.subf %152, %159 : vector<128x128xf32>
      %161 = arith.mulf %160, %160 : vector<128x128xf32>
      %cst_79 = arith.constant dense<0.000000e+00> : vector<128xf32>
      %162 = vector.multi_reduction <add>, %161, %cst_79 [1] : vector<128x128xf32> to vector<128xf32>
      %163 = vector.shape_cast %162 : vector<128xf32> to vector<128x1xf32>
      %cst_80 = arith.constant 1.280000e+02 : f32
      %164 = vector.broadcast %cst_80 : f32 to vector<128x1xf32>
      %165 = arith.divf %163, %164 : vector<128x1xf32>
      %cst_81 = arith.constant 9.99999974E-6 : f32
      %166 = vector.broadcast %cst_81 : f32 to vector<128x1xf32>
      %167 = arith.addf %165, %166 : vector<128x1xf32>
      %168 = math.rsqrt %167 : vector<128x1xf32>
      %169 = vector.broadcast %168 : vector<128x1xf32> to vector<128x128xf32>
      %170 = arith.mulf %160, %169 : vector<128x128xf32>
      %171 = vector.broadcast %153 : vector<1x128xf32> to vector<128x128xf32>
      %172 = arith.mulf %170, %171 : vector<128x128xf32>
      %173 = vector.broadcast %154 : vector<1x128xf32> to vector<128x128xf32>
      %174 = arith.addf %172, %173 : vector<128x128xf32>
      %175 = vector.shape_cast %174 : vector<128x128xf32> to vector<4x32x128xf32>
      %c0_82 = arith.constant 0 : index
      %c0_83 = arith.constant 0 : index
      %c0_84 = arith.constant 0 : index
      %176 = vector.load %arg19[%c0_82, %c0_83, %c0_84] : memref<4x32x128xf32, #tpu.memory_space<vmem>>, vector<4x32x128xf32>
      tpu.vector_store %arg19[%c0_82, %c0_83, %c0_84], %175 {strides = array<i32>} : memref<4x32x128xf32, #tpu.memory_space<vmem>>, vector<4x32x128xf32>,
    } else {
    }
    %c0 = arith.constant 0 : index
    %c0_1 = arith.constant 0 : index
    %c0_2 = arith.constant 0 : index
    %3 = vector.load %arg19[%c0, %c0_1, %c0_2] : memref<4x32x128xf32, #tpu.memory_space<vmem>>, vector<4x32x128xf32>
    %4 = vector.shape_cast %3 : vector<4x32x128xf32> to vector<128x128xf32>
    %c0_3 = arith.constant 0 : index
    %c0_4 = arith.constant 0 : index
    %c0_5 = arith.constant 0 : index
    %5 = vector.load %arg6[%c0_3, %c0_4, %c0_5] : memref<1x1x128xf32, #tpu.memory_space<vmem>>, vector<1x1x128xf32>
    %6 = vector.shape_cast %5 : vector<1x1x128xf32> to vector<1x128xf32>
    %c0_6 = arith.constant 0 : index
    %c0_7 = arith.constant 0 : index
    %c0_8 = arith.constant 0 : index
    %7 = vector.load %arg7[%c0_6, %c0_7, %c0_8] : memref<1x1x128xf32, #tpu.memory_space<vmem>>, vector<1x1x128xf32>
    %8 = vector.shape_cast %7 : vector<1x1x128xf32> to vector<1x128xf32>
    %cst = arith.constant dense<0.000000e+00> : vector<128xf32>
    %9 = vector.multi_reduction <add>, %4, %cst [1] : vector<128x128xf32> to vector<128xf32>
    %10 = vector.shape_cast %9 : vector<128xf32> to vector<128x1xf32>
    %cst_9 = arith.constant 1.280000e+02 : f32
    %11 = vector.broadcast %cst_9 : f32 to vector<128x1xf32>
    %12 = arith.divf %10, %11 : vector<128x1xf32>
    %13 = vector.broadcast %12 : vector<128x1xf32> to vector<128x128xf32>
    %14 = arith.subf %4, %13 : vector<128x128xf32>
    %15 = arith.mulf %14, %14 : vector<128x128xf32>
    %cst_10 = arith.constant dense<0.000000e+00> : vector<128xf32>
    %16 = vector.multi_reduction <add>, %15, %cst_10 [1] : vector<128x128xf32> to vector<128xf32>
    %17 = vector.shape_cast %16 : vector<128xf32> to vector<128x1xf32>
    %cst_11 = arith.constant 1.280000e+02 : f32
    %18 = vector.broadcast %cst_11 : f32 to vector<128x1xf32>
    %19 = arith.divf %17, %18 : vector<128x1xf32>
    %cst_12 = arith.constant 9.99999974E-6 : f32
    %20 = vector.broadcast %cst_12 : f32 to vector<128x1xf32>
    %21 = arith.addf %19, %20 : vector<128x1xf32>
    %22 = math.rsqrt %21 : vector<128x1xf32>
    %23 = vector.broadcast %22 : vector<128x1xf32> to vector<128x128xf32>
    %24 = arith.mulf %14, %23 : vector<128x128xf32>
    %25 = vector.broadcast %6 : vector<1x128xf32> to vector<128x128xf32>
    %26 = arith.mulf %24, %25 : vector<128x128xf32>
    %27 = vector.broadcast %8 : vector<1x128xf32> to vector<128x128xf32>
    %28 = arith.addf %26, %27 : vector<128x128xf32>
    %29 = arith.truncf %28 : vector<128x128xf32> to vector<128x128xbf16>
    %c0_13 = arith.constant 0 : index
    %c0_14 = arith.constant 0 : index
    %c0_15 = arith.constant 0 : index
    %30 = vector.load %arg8[%c0_13, %c0_14, %c0_15] : memref<1x128x384xbf16, #tpu.memory_space<vmem>>, vector<1x128x384xbf16>
    %31 = vector.shape_cast %30 : vector<1x128x384xbf16> to vector<128x384xbf16>
    %cst_16 = arith.constant dense<0.000000e+00> : vector<128x384xf32>
    %32 = tpu.matmul %29, %31, %cst_16 {dimension_numbers = #tpu.dot_dimension_numbers<[1], [0], [0], [1], [0, 0, 1, 1], [], []>} : vector<128x128xbf16>, vector<128x384xbf16>, vector<128x384xf32> -> vector<128x384xf32>
    %c0_17 = arith.constant 0 : index
    %c0_18 = arith.constant 0 : index
    %c0_19 = arith.constant 0 : index
    %33 = vector.load %arg9[%c0_17, %c0_18, %c0_19] : memref<1x1x384xf32, #tpu.memory_space<vmem>>, vector<1x1x384xf32>
    %34 = vector.shape_cast %33 : vector<1x1x384xf32> to vector<1x384xf32>
    %35 = vector.broadcast %34 : vector<1x384xf32> to vector<128x384xf32>
    %36 = arith.addf %32, %35 : vector<128x384xf32>
    %37 = vector.shape_cast %36 : vector<128x384xf32> to vector<4x32x384xf32>
    %c0_20 = arith.constant 0 : index
    %c0_21 = arith.constant 0 : index
    %38 = vector.load %arg3[%c0_20, %c0_21] : memref<32x32xf32, #tpu.memory_space<vmem>>, vector<32x32xf32>
    %39 = vector.shape_cast %38 : vector<32x32xf32> to vector<1x32x32xf32>
    %40 = vector.extract_strided_slice %37 {offsets = [0, 0, 0], sizes = [4, 32, 64], strides = [1, 1, 1]} : vector<4x32x384xf32> to vector<4x32x64xf32>
    %41 = vector.extract_strided_slice %37 {offsets = [0, 0, 128], sizes = [4, 32, 64], strides = [1, 1, 1]} : vector<4x32x384xf32> to vector<4x32x64xf32>
    %42 = vector.extract_strided_slice %37 {offsets = [0, 0, 256], sizes = [4, 32, 64], strides = [1, 1, 1]} : vector<4x32x384xf32> to vector<4x32x64xf32>
    %43 = arith.truncf %40 : vector<4x32x64xf32> to vector<4x32x64xbf16>
    %44 = arith.truncf %41 : vector<4x32x64xf32> to vector<4x32x64xbf16>
    "tpu.trace_start"() <{level = 10 : i32, message = "bqd,bkd->bqk"}> : () -> ()
    %cst_22 = arith.constant dense<0.000000e+00> : vector<4x32x32xf32>
    %45 = tpu.matmul %43, %44, %cst_22 {dimension_numbers = #tpu.dot_dimension_numbers<[2], [2], [1], [1], [0, 0, 0, 1, 1, 1], [0], [0]>} : vector<4x32x64xbf16>, vector<4x32x64xbf16>, vector<4x32x32xf32> -> vector<4x32x32xf32>
    "tpu.trace_stop"() : () -> ()
    %cst_23 = arith.constant 1.250000e-01 : f32
    %46 = vector.broadcast %cst_23 : f32 to vector<4x32x32xf32>
    %47 = arith.mulf %45, %46 : vector<4x32x32xf32>
    %48 = vector.broadcast %39 : vector<1x32x32xf32> to vector<4x32x32xf32>
    %49 = arith.addf %47, %48 : vector<4x32x32xf32>
    %cst_24 = arith.constant dense<0xFF800000> : vector<4x32xf32>
    %50 = vector.multi_reduction <maximumf>, %49, %cst_24 [2] : vector<4x32x32xf32> to vector<4x32xf32>
    %51 = vector.shape_cast %50 : vector<4x32xf32> to vector<4x32x1xf32>
    %52 = vector.broadcast %51 : vector<4x32x1xf32> to vector<4x32x32xf32>
    %53 = arith.subf %49, %52 : vector<4x32x32xf32>
    %54 = math.exp %53 : vector<4x32x32xf32>
    %cst_25 = arith.constant dense<0.000000e+00> : vector<4x32xf32>
    %55 = vector.multi_reduction <add>, %54, %cst_25 [2] : vector<4x32x32xf32> to vector<4x32xf32>
    %56 = vector.shape_cast %55 : vector<4x32xf32> to vector<4x32x1xf32>
    %57 = tpu.reciprocal %56 {approx = true} : vector<4x32x1xf32> -> vector<4x32x1xf32>
    %58 = vector.broadcast %57 : vector<4x32x1xf32> to vector<4x32x32xf32>
    %59 = arith.mulf %54, %58 : vector<4x32x32xf32>
    %60 = arith.truncf %59 : vector<4x32x32xf32> to vector<4x32x32xbf16>
    %61 = arith.truncf %42 : vector<4x32x64xf32> to vector<4x32x64xbf16>
    "tpu.trace_start"() <{level = 10 : i32, message = "bqk,bkd->bqd"}> : () -> ()
    %cst_26 = arith.constant dense<0.000000e+00> : vector<4x32x64xf32>
    %62 = tpu.matmul %60, %61, %cst_26 {dimension_numbers = #tpu.dot_dimension_numbers<[2], [1], [1], [2], [0, 0, 0, 1, 1, 2], [0], [0]>} : vector<4x32x32xbf16>, vector<4x32x64xbf16>, vector<4x32x64xf32> -> vector<4x32x64xf32>
    "tpu.trace_stop"() : () -> ()
    %63 = vector.extract_strided_slice %37 {offsets = [0, 0, 64], sizes = [4, 32, 64], strides = [1, 1, 1]} : vector<4x32x384xf32> to vector<4x32x64xf32>
    %64 = vector.extract_strided_slice %37 {offsets = [0, 0, 192], sizes = [4, 32, 64], strides = [1, 1, 1]} : vector<4x32x384xf32> to vector<4x32x64xf32>
    %65 = vector.extract_strided_slice %37 {offsets = [0, 0, 320], sizes = [4, 32, 64], strides = [1, 1, 1]} : vector<4x32x384xf32> to vector<4x32x64xf32>
    %66 = arith.truncf %63 : vector<4x32x64xf32> to vector<4x32x64xbf16>
    %67 = arith.truncf %64 : vector<4x32x64xf32> to vector<4x32x64xbf16>
    "tpu.trace_start"() <{level = 10 : i32, message = "bqd,bkd->bqk"}> : () -> ()
    %cst_27 = arith.constant dense<0.000000e+00> : vector<4x32x32xf32>
    %68 = tpu.matmul %66, %67, %cst_27 {dimension_numbers = #tpu.dot_dimension_numbers<[2], [2], [1], [1], [0, 0, 0, 1, 1, 1], [0], [0]>} : vector<4x32x64xbf16>, vector<4x32x64xbf16>, vector<4x32x32xf32> -> vector<4x32x32xf32>
    "tpu.trace_stop"() : () -> ()
    %cst_28 = arith.constant 1.250000e-01 : f32
    %69 = vector.broadcast %cst_28 : f32 to vector<4x32x32xf32>
    %70 = arith.mulf %68, %69 : vector<4x32x32xf32>
    %71 = vector.broadcast %39 : vector<1x32x32xf32> to vector<4x32x32xf32>
    %72 = arith.addf %70, %71 : vector<4x32x32xf32>
    %cst_29 = arith.constant dense<0xFF800000> : vector<4x32xf32>
    %73 = vector.multi_reduction <maximumf>, %72, %cst_29 [2] : vector<4x32x32xf32> to vector<4x32xf32>
    %74 = vector.shape_cast %73 : vector<4x32xf32> to vector<4x32x1xf32>
    %75 = vector.broadcast %74 : vector<4x32x1xf32> to vector<4x32x32xf32>
    %76 = arith.subf %72, %75 : vector<4x32x32xf32>
    %77 = math.exp %76 : vector<4x32x32xf32>
    %cst_30 = arith.constant dense<0.000000e+00> : vector<4x32xf32>
    %78 = vector.multi_reduction <add>, %77, %cst_30 [2] : vector<4x32x32xf32> to vector<4x32xf32>
    %79 = vector.shape_cast %78 : vector<4x32xf32> to vector<4x32x1xf32>
    %80 = tpu.reciprocal %79 {approx = true} : vector<4x32x1xf32> -> vector<4x32x1xf32>
    %81 = vector.broadcast %80 : vector<4x32x1xf32> to vector<4x32x32xf32>
    %82 = arith.mulf %77, %81 : vector<4x32x32xf32>
    %83 = arith.truncf %82 : vector<4x32x32xf32> to vector<4x32x32xbf16>
    %84 = arith.truncf %65 : vector<4x32x64xf32> to vector<4x32x64xbf16>
    "tpu.trace_start"() <{level = 10 : i32, message = "bqk,bkd->bqd"}> : () -> ()
    %cst_31 = arith.constant dense<0.000000e+00> : vector<4x32x64xf32>
    %85 = tpu.matmul %83, %84, %cst_31 {dimension_numbers = #tpu.dot_dimension_numbers<[2], [1], [1], [2], [0, 0, 0, 1, 1, 2], [0], [0]>} : vector<4x32x32xbf16>, vector<4x32x64xbf16>, vector<4x32x64xf32> -> vector<4x32x64xf32>
    "tpu.trace_stop"() : () -> ()
    %86 = tpu.concatenate %62, %85 in 2 : vector<4x32x64xf32>, vector<4x32x64xf32> -> vector<4x32x128xf32>
    %87 = vector.shape_cast %86 : vector<4x32x128xf32> to vector<128x128xf32>
    %88 = arith.truncf %87 : vector<128x128xf32> to vector<128x128xbf16>
    %c0_32 = arith.constant 0 : index
    %c0_33 = arith.constant 0 : index
    %c0_34 = arith.constant 0 : index
    %89 = vector.load %arg10[%c0_32, %c0_33, %c0_34] : memref<1x128x128xbf16, #tpu.memory_space<vmem>>, vector<1x128x128xbf16>
    %90 = vector.shape_cast %89 : vector<1x128x128xbf16> to vector<128x128xbf16>
    %cst_35 = arith.constant dense<0.000000e+00> : vector<128x128xf32>
    %91 = tpu.matmul %88, %90, %cst_35 {dimension_numbers = #tpu.dot_dimension_numbers<[1], [0], [0], [1], [0, 0, 1, 1], [], []>} : vector<128x128xbf16>, vector<128x128xbf16>, vector<128x128xf32> -> vector<128x128xf32>
    %c0_36 = arith.constant 0 : index
    %c0_37 = arith.constant 0 : index
    %c0_38 = arith.constant 0 : index
    %92 = vector.load %arg11[%c0_36, %c0_37, %c0_38] : memref<1x1x128xf32, #tpu.memory_space<vmem>>, vector<1x1x128xf32>
    %93 = vector.shape_cast %92 : vector<1x1x128xf32> to vector<1x128xf32>
    %94 = vector.broadcast %93 : vector<1x128xf32> to vector<128x128xf32>
    %95 = arith.addf %91, %94 : vector<128x128xf32>
    %96 = arith.addf %4, %95 : vector<128x128xf32>
    %c0_39 = arith.constant 0 : index
    %c0_40 = arith.constant 0 : index
    %c0_41 = arith.constant 0 : index
    %97 = vector.load %arg12[%c0_39, %c0_40, %c0_41] : memref<1x1x128xf32, #tpu.memory_space<vmem>>, vector<1x1x128xf32>
    %98 = vector.shape_cast %97 : vector<1x1x128xf32> to vector<1x128xf32>
    %c0_42 = arith.constant 0 : index
    %c0_43 = arith.constant 0 : index
    %c0_44 = arith.constant 0 : index
    %99 = vector.load %arg13[%c0_42, %c0_43, %c0_44] : memref<1x1x128xf32, #tpu.memory_space<vmem>>, vector<1x1x128xf32>
    %100 = vector.shape_cast %99 : vector<1x1x128xf32> to vector<1x128xf32>
    %cst_45 = arith.constant dense<0.000000e+00> : vector<128xf32>
    %101 = vector.multi_reduction <add>, %96, %cst_45 [1] : vector<128x128xf32> to vector<128xf32>
    %102 = vector.shape_cast %101 : vector<128xf32> to vector<128x1xf32>
    %cst_46 = arith.constant 1.280000e+02 : f32
    %103 = vector.broadcast %cst_46 : f32 to vector<128x1xf32>
    %104 = arith.divf %102, %103 : vector<128x1xf32>
    %105 = vector.broadcast %104 : vector<128x1xf32> to vector<128x128xf32>
    %106 = arith.subf %96, %105 : vector<128x128xf32>
    %107 = arith.mulf %106, %106 : vector<128x128xf32>
    %cst_47 = arith.constant dense<0.000000e+00> : vector<128xf32>
    %108 = vector.multi_reduction <add>, %107, %cst_47 [1] : vector<128x128xf32> to vector<128xf32>
    %109 = vector.shape_cast %108 : vector<128xf32> to vector<128x1xf32>
    %cst_48 = arith.constant 1.280000e+02 : f32
    %110 = vector.broadcast %cst_48 : f32 to vector<128x1xf32>
    %111 = arith.divf %109, %110 : vector<128x1xf32>
    %cst_49 = arith.constant 9.99999974E-6 : f32
    %112 = vector.broadcast %cst_49 : f32 to vector<128x1xf32>
    %113 = arith.addf %111, %112 : vector<128x1xf32>
    %114 = math.rsqrt %113 : vector<128x1xf32>
    %115 = vector.broadcast %114 : vector<128x1xf32> to vector<128x128xf32>
    %116 = arith.mulf %106, %115 : vector<128x128xf32>
    %117 = vector.broadcast %98 : vector<1x128xf32> to vector<128x128xf32>
    %118 = arith.mulf %116, %117 : vector<128x128xf32>
    %119 = vector.broadcast %100 : vector<1x128xf32> to vector<128x128xf32>
    %120 = arith.addf %118, %119 : vector<128x128xf32>
    %121 = arith.truncf %120 : vector<128x128xf32> to vector<128x128xbf16>
    %c0_50 = arith.constant 0 : index
    %c0_51 = arith.constant 0 : index
    %c0_52 = arith.constant 0 : index
    %122 = vector.load %arg14[%c0_50, %c0_51, %c0_52] : memref<1x128x512xbf16, #tpu.memory_space<vmem>>, vector<1x128x512xbf16>
    %123 = vector.shape_cast %122 : vector<1x128x512xbf16> to vector<128x512xbf16>
    %cst_53 = arith.constant dense<0.000000e+00> : vector<128x512xf32>
    %124 = tpu.matmul %121, %123, %cst_53 {dimension_numbers = #tpu.dot_dimension_numbers<[1], [0], [0], [1], [0, 0, 1, 1], [], []>} : vector<128x128xbf16>, vector<128x512xbf16>, vector<128x512xf32> -> vector<128x512xf32>
    %c0_54 = arith.constant 0 : index
    %c0_55 = arith.constant 0 : index
    %c0_56 = arith.constant 0 : index
    %125 = vector.load %arg15[%c0_54, %c0_55, %c0_56] : memref<1x1x512xf32, #tpu.memory_space<vmem>>, vector<1x1x512xf32>
    %126 = vector.shape_cast %125 : vector<1x1x512xf32> to vector<1x512xf32>
    %127 = vector.broadcast %126 : vector<1x512xf32> to vector<128x512xf32>
    %128 = arith.addf %124, %127 : vector<128x512xf32>
    %cst_57 = arith.constant 1.702000e+00 : f32
    %129 = vector.broadcast %cst_57 : f32 to vector<128x512xf32>
    %130 = arith.mulf %129, %128 : vector<128x512xf32>
    %131 = arith.negf %130 : vector<128x512xf32>
    %132 = math.exp %131 : vector<128x512xf32>
    %cst_58 = arith.constant 1.000000e+00 : f32
    %133 = vector.broadcast %cst_58 : f32 to vector<128x512xf32>
    %134 = arith.addf %133, %132 : vector<128x512xf32>
    %135 = arith.divf %133, %134 : vector<128x512xf32>
    %136 = arith.mulf %128, %135 : vector<128x512xf32>
    %137 = arith.truncf %136 : vector<128x512xf32> to vector<128x512xbf16>
    %c0_59 = arith.constant 0 : index
    %c0_60 = arith.constant 0 : index
    %c0_61 = arith.constant 0 : index
    %138 = vector.load %arg16[%c0_59, %c0_60, %c0_61] : memref<1x512x128xbf16, #tpu.memory_space<vmem>>, vector<1x512x128xbf16>
    %139 = vector.shape_cast %138 : vector<1x512x128xbf16> to vector<512x128xbf16>
    %cst_62 = arith.constant dense<0.000000e+00> : vector<128x128xf32>
    %140 = tpu.matmul %137, %139, %cst_62 {dimension_numbers = #tpu.dot_dimension_numbers<[1], [0], [0], [1], [0, 0, 1, 1], [], []>} : vector<128x512xbf16>, vector<512x128xbf16>, vector<128x128xf32> -> vector<128x128xf32>
    %c0_63 = arith.constant 0 : index
    %c0_64 = arith.constant 0 : index
    %c0_65 = arith.constant 0 : index
    %141 = vector.load %arg17[%c0_63, %c0_64, %c0_65] : memref<1x1x128xf32, #tpu.memory_space<vmem>>, vector<1x1x128xf32>
    %142 = vector.shape_cast %141 : vector<1x1x128xf32> to vector<1x128xf32>
    %143 = vector.broadcast %142 : vector<1x128xf32> to vector<128x128xf32>
    %144 = arith.addf %140, %143 : vector<128x128xf32>
    %145 = arith.addf %96, %144 : vector<128x128xf32>
    %146 = vector.shape_cast %145 : vector<128x128xf32> to vector<4x32x128xf32>
    %c0_66 = arith.constant 0 : index
    %c0_67 = arith.constant 0 : index
    %c0_68 = arith.constant 0 : index
    %147 = vector.load %arg19[%c0_66, %c0_67, %c0_68] : memref<4x32x128xf32, #tpu.memory_space<vmem>>, vector<4x32x128xf32>
    tpu.vector_store %arg19[%c0_66, %c0_67, %c0_68], %146 {strides = array<i32>} : memref<4x32x128xf32, #tpu.memory_space<vmem>>, vector<4x32x128xf32>,
    %c1_i32 = arith.constant 1 : i32
    %148 = arith.cmpi eq, %arg1, %c1_i32 : i32
    %149 = arith.extui %148 : i1 to i32
    %c0_i32_69 = arith.constant 0 : i32
    %150 = arith.cmpi ne, %149, %c0_i32_69 : i32
    scf.if %150 {
      %c0_70 = arith.constant 0 : index
      %c0_71 = arith.constant 0 : index
      %c0_72 = arith.constant 0 : index
      %151 = vector.load %arg18[%c0_70, %c0_71, %c0_72] : memref<4x32x128xf32, #tpu.memory_space<vmem>>, vector<4x32x128xf32>
      tpu.vector_store %arg18[%c0_70, %c0_71, %c0_72], %146 {strides = array<i32>} : memref<4x32x128xf32, #tpu.memory_space<vmem>>, vector<4x32x128xf32>,
    } else {
    }
    return
  }
  func.func @transform_0(%arg0: i32, %arg1: i32) -> (i32, i32, i32) {
    %c0_i32 = arith.constant 0 : i32
    %c0_i32_0 = arith.constant 0 : i32
    %c0_i32_1 = arith.constant 0 : i32
    return %arg0, %c0_i32, %c0_i32_0 : i32, i32, i32
  }
  func.func @transform_1(%arg0: i32, %arg1: i32) -> (i32, i32) {
    %c0_i32 = arith.constant 0 : i32
    %c0_i32_0 = arith.constant 0 : i32
    %c0_i32_1 = arith.constant 0 : i32
    return %c0_i32, %c0_i32_0 : i32, i32
  }
  func.func @transform_2(%arg0: i32, %arg1: i32) -> (i32, i32) {
    %c0_i32 = arith.constant 0 : i32
    %c0_i32_0 = arith.constant 0 : i32
    %c0_i32_1 = arith.constant 0 : i32
    return %c0_i32, %c0_i32_0 : i32, i32
  }
  func.func @transform_3(%arg0: i32, %arg1: i32) -> (i32, i32) {
    %c0_i32 = arith.constant 0 : i32
    %c0_i32_0 = arith.constant 0 : i32
    %c0_i32_1 = arith.constant 0 : i32
    return %c0_i32, %c0_i32_0 : i32, i32
  }
  func.func @transform_4(%arg0: i32, %arg1: i32) -> (i32, i32, i32) {
    %c0_i32 = arith.constant 0 : i32
    %c0_i32_0 = arith.constant 0 : i32
    %c0_i32_1 = arith.constant 0 : i32
    return %arg1, %c0_i32, %c0_i32_0 : i32, i32, i32
  }
  func.func @transform_5(%arg0: i32, %arg1: i32) -> (i32, i32, i32) {
    %c0_i32 = arith.constant 0 : i32
    %c0_i32_0 = arith.constant 0 : i32
    %c0_i32_1 = arith.constant 0 : i32
    return %arg1, %c0_i32, %c0_i32_0 : i32, i32, i32
  }
  func.func @transform_6(%arg0: i32, %arg1: i32) -> (i32, i32, i32) {
    %c0_i32 = arith.constant 0 : i32
    %c0_i32_0 = arith.constant 0 : i32
    %c0_i32_1 = arith.constant 0 : i32
    return %arg1, %c0_i32, %c0_i32_0 : i32, i32, i32
  }
  func.func @transform_7(%arg0: i32, %arg1: i32) -> (i32, i32, i32) {
    %c0_i32 = arith.constant 0 : i32
    %c0_i32_0 = arith.constant 0 : i32
    %c0_i32_1 = arith.constant 0 : i32
    return %arg1, %c0_i32, %c0_i32_0 : i32, i32, i32
  }
  func.func @transform_8(%arg0: i32, %arg1: i32) -> (i32, i32, i32) {
    %c0_i32 = arith.constant 0 : i32
    %c0_i32_0 = arith.constant 0 : i32
    %c0_i32_1 = arith.constant 0 : i32
    return %arg1, %c0_i32, %c0_i32_0 : i32, i32, i32
  }
  func.func @transform_9(%arg0: i32, %arg1: i32) -> (i32, i32, i32) {
    %c0_i32 = arith.constant 0 : i32
    %c0_i32_0 = arith.constant 0 : i32
    %c0_i32_1 = arith.constant 0 : i32
    return %arg1, %c0_i32, %c0_i32_0 : i32, i32, i32
  }
  func.func @transform_10(%arg0: i32, %arg1: i32) -> (i32, i32, i32) {
    %c0_i32 = arith.constant 0 : i32
    %c0_i32_0 = arith.constant 0 : i32
    %c0_i32_1 = arith.constant 0 : i32
    return %arg1, %c0_i32, %c0_i32_0 : i32, i32, i32
  }
  func.func @transform_11(%arg0: i32, %arg1: i32) -> (i32, i32, i32) {
    %c0_i32 = arith.constant 0 : i32
    %c0_i32_0 = arith.constant 0 : i32
    %c0_i32_1 = arith.constant 0 : i32
    return %arg1, %c0_i32, %c0_i32_0 : i32, i32, i32
  }
  func.func @transform_12(%arg0: i32, %arg1: i32) -> (i32, i32, i32) {
    %c0_i32 = arith.constant 0 : i32
    %c0_i32_0 = arith.constant 0 : i32
    %c0_i32_1 = arith.constant 0 : i32
    return %arg1, %c0_i32, %c0_i32_0 : i32, i32, i32
  }
  func.func @transform_13(%arg0: i32, %arg1: i32) -> (i32, i32, i32) {
    %c0_i32 = arith.constant 0 : i32
    %c0_i32_0 = arith.constant 0 : i32
    %c0_i32_1 = arith.constant 0 : i32
    return %arg1, %c0_i32, %c0_i32_0 : i32, i32, i32
  }
  func.func @transform_14(%arg0: i32, %arg1: i32) -> (i32, i32, i32) {
    %c0_i32 = arith.constant 0 : i32
    %c0_i32_0 = arith.constant 0 : i32
    %c0_i32_1 = arith.constant 0 : i32
    return %arg1, %c0_i32, %c0_i32_0 : i32, i32, i32
  }
  func.func @transform_15(%arg0: i32, %arg1: i32) -> (i32, i32, i32) {
    %c0_i32 = arith.constant 0 : i32
    %c0_i32_0 = arith.constant 0 : i32
    %c0_i32_1 = arith.constant 0 : i32
    return %arg1, %c0_i32, %c0_i32_0 : i32, i32, i32
  }
  func.func @transform_16(%arg0: i32, %arg1: i32) -> (i32, i32, i32) {
    %c0_i32 = arith.constant 0 : i32
    %c0_i32_0 = arith.constant 0 : i32
    %c0_i32_1 = arith.constant 0 : i32
    return %arg0, %c0_i32, %c0_i32_0 : i32, i32, i32
  }
}

module attributes {stable_mosaic.version = 11 : i64} {
  func.func @_ln_proj_kernel(%arg0: memref<8x128xf32, #tpu.memory_space<vmem>>, %arg1: memref<1x128xf32, #tpu.memory_space<vmem>>, %arg2: memref<1x128xf32, #tpu.memory_space<vmem>>, %arg3: memref<128x128xf32, #tpu.memory_space<vmem>>, %arg4: memref<8x128xf32, #tpu.memory_space<vmem>>) attributes {dimension_semantics = [], scalar_prefetch = 0 : i64, scratch_operands = 0 : i64, tpu.core_type = #tpu.core_type<tc>} {
    %c0 = arith.constant 0 : index
    %c0_0 = arith.constant 0 : index
    %0 = vector.load %arg0[%c0, %c0_0] : memref<8x128xf32, #tpu.memory_space<vmem>>, vector<8x128xf32>
    %c0_1 = arith.constant 0 : index
    %c0_2 = arith.constant 0 : index
    %1 = vector.load %arg1[%c0_1, %c0_2] : memref<1x128xf32, #tpu.memory_space<vmem>>, vector<1x128xf32>
    %c0_3 = arith.constant 0 : index
    %c0_4 = arith.constant 0 : index
    %2 = vector.load %arg2[%c0_3, %c0_4] : memref<1x128xf32, #tpu.memory_space<vmem>>, vector<1x128xf32>
    %cst = arith.constant dense<0.000000e+00> : vector<8xf32>
    %3 = vector.multi_reduction <add>, %0, %cst [1] : vector<8x128xf32> to vector<8xf32>
    %4 = vector.shape_cast %3 : vector<8xf32> to vector<8x1xf32>
    %cst_5 = arith.constant 1.280000e+02 : f32
    %5 = vector.broadcast %cst_5 : f32 to vector<8x1xf32>
    %6 = arith.divf %4, %5 : vector<8x1xf32>
    %7 = vector.broadcast %6 : vector<8x1xf32> to vector<8x128xf32>
    %8 = arith.subf %0, %7 : vector<8x128xf32>
    %9 = arith.mulf %8, %8 : vector<8x128xf32>
    %cst_6 = arith.constant dense<0.000000e+00> : vector<8xf32>
    %10 = vector.multi_reduction <add>, %9, %cst_6 [1] : vector<8x128xf32> to vector<8xf32>
    %11 = vector.shape_cast %10 : vector<8xf32> to vector<8x1xf32>
    %cst_7 = arith.constant 1.280000e+02 : f32
    %12 = vector.broadcast %cst_7 : f32 to vector<8x1xf32>
    %13 = arith.divf %11, %12 : vector<8x1xf32>
    %cst_8 = arith.constant 9.99999974E-6 : f32
    %14 = vector.broadcast %cst_8 : f32 to vector<8x1xf32>
    %15 = arith.addf %13, %14 : vector<8x1xf32>
    %16 = math.rsqrt %15 : vector<8x1xf32>
    %17 = vector.broadcast %16 : vector<8x1xf32> to vector<8x128xf32>
    %18 = arith.mulf %8, %17 : vector<8x128xf32>
    %19 = vector.broadcast %1 : vector<1x128xf32> to vector<8x128xf32>
    %20 = arith.mulf %18, %19 : vector<8x128xf32>
    %21 = vector.broadcast %2 : vector<1x128xf32> to vector<8x128xf32>
    %22 = arith.addf %20, %21 : vector<8x128xf32>
    %c0_9 = arith.constant 0 : index
    %c0_10 = arith.constant 0 : index
    %23 = vector.load %arg3[%c0_9, %c0_10] : memref<128x128xf32, #tpu.memory_space<vmem>>, vector<128x128xf32>
    %cst_11 = arith.constant dense<0.000000e+00> : vector<8x128xf32>
    %24 = tpu.matmul %22, %23, %cst_11 {dimension_numbers = #tpu.dot_dimension_numbers<[1], [0], [0], [1], [0, 0, 1, 1], [], []>} : vector<8x128xf32>, vector<128x128xf32>, vector<8x128xf32> -> vector<8x128xf32>
    %c0_12 = arith.constant 0 : index
    %c0_13 = arith.constant 0 : index
    %25 = vector.load %arg4[%c0_12, %c0_13] : memref<8x128xf32, #tpu.memory_space<vmem>>, vector<8x128xf32>
    tpu.vector_store %arg4[%c0_12, %c0_13], %24 {strides = array<i32>} : memref<8x128xf32, #tpu.memory_space<vmem>>, vector<8x128xf32>,
    return
  }
}

module attributes {stable_mosaic.version = 11 : i64} {
  func.func @_encoder_layer_kernel(%arg0: i32, %arg1: i32, %arg2: memref<2x8x128xf32, #tpu.memory_space<vmem>>, %arg3: memref<8x8xf32, #tpu.memory_space<vmem>>, %arg4: memref<1x1x128xf32, #tpu.memory_space<vmem>>, %arg5: memref<1x1x128xf32, #tpu.memory_space<vmem>>, %arg6: memref<1x128x384xbf16, #tpu.memory_space<vmem>>, %arg7: memref<1x1x384xf32, #tpu.memory_space<vmem>>, %arg8: memref<1x128x128xbf16, #tpu.memory_space<vmem>>, %arg9: memref<1x1x128xf32, #tpu.memory_space<vmem>>, %arg10: memref<1x1x128xf32, #tpu.memory_space<vmem>>, %arg11: memref<1x1x128xf32, #tpu.memory_space<vmem>>, %arg12: memref<1x128x512xbf16, #tpu.memory_space<vmem>>, %arg13: memref<1x1x512xf32, #tpu.memory_space<vmem>>, %arg14: memref<1x512x128xbf16, #tpu.memory_space<vmem>>, %arg15: memref<1x1x128xf32, #tpu.memory_space<vmem>>, %arg16: memref<2x8x128xf32, #tpu.memory_space<vmem>>, %arg17: memref<2x8x128xf32, #tpu.memory_space<vmem>>) attributes {dimension_semantics = [#tpu.dimension_semantics<parallel>, #tpu.dimension_semantics<arbitrary>], iteration_bounds = array<i64: 1, 2>, scalar_prefetch = 0 : i64, scratch_operands = 1 : i64, tpu.core_type = #tpu.core_type<tc>, window_params = [{transform_indices = @transform_0, window_bounds = array<i64: 2, 8, 128>}, {pipeline_mode = #tpu.pipeline_mode<synchronous>, transform_indices = @transform_1, window_bounds = array<i64: 8, 8>}, {transform_indices = @transform_2, window_bounds = array<i64: 1, 1, 128>}, {transform_indices = @transform_3, window_bounds = array<i64: 1, 1, 128>}, {transform_indices = @transform_4, window_bounds = array<i64: 1, 128, 384>}, {transform_indices = @transform_5, window_bounds = array<i64: 1, 1, 384>}, {transform_indices = @transform_6, window_bounds = array<i64: 1, 128, 128>}, {transform_indices = @transform_7, window_bounds = array<i64: 1, 1, 128>}, {transform_indices = @transform_8, window_bounds = array<i64: 1, 1, 128>}, {transform_indices = @transform_9, window_bounds = array<i64: 1, 1, 128>}, {transform_indices = @transform_10, window_bounds = array<i64: 1, 128, 512>}, {transform_indices = @transform_11, window_bounds = array<i64: 1, 1, 512>}, {transform_indices = @transform_12, window_bounds = array<i64: 1, 512, 128>}, {transform_indices = @transform_13, window_bounds = array<i64: 1, 1, 128>}, {transform_indices = @transform_14, window_bounds = array<i64: 2, 8, 128>}]} {
    %c0_i32 = arith.constant 0 : i32
    %0 = arith.cmpi eq, %arg1, %c0_i32 : i32
    %1 = arith.extui %0 : i1 to i32
    %c0_i32_0 = arith.constant 0 : i32
    %2 = arith.cmpi ne, %1, %c0_i32_0 : i32
    scf.if %2 {
      %c0_70 = arith.constant 0 : index
      %c0_71 = arith.constant 0 : index
      %c0_72 = arith.constant 0 : index
      %151 = vector.load %arg2[%c0_70, %c0_71, %c0_72] : memref<2x8x128xf32, #tpu.memory_space<vmem>>, vector<2x8x128xf32>
      %c0_73 = arith.constant 0 : index
      %c0_74 = arith.constant 0 : index
      %c0_75 = arith.constant 0 : index
      %152 = vector.load %arg17[%c0_73, %c0_74, %c0_75] : memref<2x8x128xf32, #tpu.memory_space<vmem>>, vector<2x8x128xf32>
      tpu.vector_store %arg17[%c0_73, %c0_74, %c0_75], %151 {strides = array<i32>} : memref<2x8x128xf32, #tpu.memory_space<vmem>>, vector<2x8x128xf32>,
    } else {
    }
    %c0 = arith.constant 0 : index
    %c0_1 = arith.constant 0 : index
    %c0_2 = arith.constant 0 : index
    %3 = vector.load %arg17[%c0, %c0_1, %c0_2] : memref<2x8x128xf32, #tpu.memory_space<vmem>>, vector<2x8x128xf32>
    %4 = vector.shape_cast %3 : vector<2x8x128xf32> to vector<16x128xf32>
    %c0_3 = arith.constant 0 : index
    %c0_4 = arith.constant 0 : index
    %c0_5 = arith.constant 0 : index
    %5 = vector.load %arg4[%c0_3, %c0_4, %c0_5] : memref<1x1x128xf32, #tpu.memory_space<vmem>>, vector<1x1x128xf32>
    %6 = vector.shape_cast %5 : vector<1x1x128xf32> to vector<1x128xf32>
    %c0_6 = arith.constant 0 : index
    %c0_7 = arith.constant 0 : index
    %c0_8 = arith.constant 0 : index
    %7 = vector.load %arg5[%c0_6, %c0_7, %c0_8] : memref<1x1x128xf32, #tpu.memory_space<vmem>>, vector<1x1x128xf32>
    %8 = vector.shape_cast %7 : vector<1x1x128xf32> to vector<1x128xf32>
    %cst = arith.constant dense<0.000000e+00> : vector<16xf32>
    %9 = vector.multi_reduction <add>, %4, %cst [1] : vector<16x128xf32> to vector<16xf32>
    %10 = vector.shape_cast %9 : vector<16xf32> to vector<16x1xf32>
    %cst_9 = arith.constant 1.280000e+02 : f32
    %11 = vector.broadcast %cst_9 : f32 to vector<16x1xf32>
    %12 = arith.divf %10, %11 : vector<16x1xf32>
    %13 = vector.broadcast %12 : vector<16x1xf32> to vector<16x128xf32>
    %14 = arith.subf %4, %13 : vector<16x128xf32>
    %15 = arith.mulf %14, %14 : vector<16x128xf32>
    %cst_10 = arith.constant dense<0.000000e+00> : vector<16xf32>
    %16 = vector.multi_reduction <add>, %15, %cst_10 [1] : vector<16x128xf32> to vector<16xf32>
    %17 = vector.shape_cast %16 : vector<16xf32> to vector<16x1xf32>
    %cst_11 = arith.constant 1.280000e+02 : f32
    %18 = vector.broadcast %cst_11 : f32 to vector<16x1xf32>
    %19 = arith.divf %17, %18 : vector<16x1xf32>
    %cst_12 = arith.constant 9.99999974E-6 : f32
    %20 = vector.broadcast %cst_12 : f32 to vector<16x1xf32>
    %21 = arith.addf %19, %20 : vector<16x1xf32>
    %22 = math.rsqrt %21 : vector<16x1xf32>
    %23 = vector.broadcast %22 : vector<16x1xf32> to vector<16x128xf32>
    %24 = arith.mulf %14, %23 : vector<16x128xf32>
    %25 = vector.broadcast %6 : vector<1x128xf32> to vector<16x128xf32>
    %26 = arith.mulf %24, %25 : vector<16x128xf32>
    %27 = vector.broadcast %8 : vector<1x128xf32> to vector<16x128xf32>
    %28 = arith.addf %26, %27 : vector<16x128xf32>
    %29 = arith.truncf %28 : vector<16x128xf32> to vector<16x128xbf16>
    %c0_13 = arith.constant 0 : index
    %c0_14 = arith.constant 0 : index
    %c0_15 = arith.constant 0 : index
    %30 = vector.load %arg6[%c0_13, %c0_14, %c0_15] : memref<1x128x384xbf16, #tpu.memory_space<vmem>>, vector<1x128x384xbf16>
    %31 = vector.shape_cast %30 : vector<1x128x384xbf16> to vector<128x384xbf16>
    %cst_16 = arith.constant dense<0.000000e+00> : vector<16x384xf32>
    %32 = tpu.matmul %29, %31, %cst_16 {dimension_numbers = #tpu.dot_dimension_numbers<[1], [0], [0], [1], [0, 0, 1, 1], [], []>} : vector<16x128xbf16>, vector<128x384xbf16>, vector<16x384xf32> -> vector<16x384xf32>
    %c0_17 = arith.constant 0 : index
    %c0_18 = arith.constant 0 : index
    %c0_19 = arith.constant 0 : index
    %33 = vector.load %arg7[%c0_17, %c0_18, %c0_19] : memref<1x1x384xf32, #tpu.memory_space<vmem>>, vector<1x1x384xf32>
    %34 = vector.shape_cast %33 : vector<1x1x384xf32> to vector<1x384xf32>
    %35 = vector.broadcast %34 : vector<1x384xf32> to vector<16x384xf32>
    %36 = arith.addf %32, %35 : vector<16x384xf32>
    %37 = vector.shape_cast %36 : vector<16x384xf32> to vector<2x8x384xf32>
    %c0_20 = arith.constant 0 : index
    %c0_21 = arith.constant 0 : index
    %38 = vector.load %arg3[%c0_20, %c0_21] : memref<8x8xf32, #tpu.memory_space<vmem>>, vector<8x8xf32>
    %39 = vector.shape_cast %38 : vector<8x8xf32> to vector<1x8x8xf32>
    %40 = vector.extract_strided_slice %37 {offsets = [0, 0, 0], sizes = [2, 8, 64], strides = [1, 1, 1]} : vector<2x8x384xf32> to vector<2x8x64xf32>
    %41 = vector.extract_strided_slice %37 {offsets = [0, 0, 128], sizes = [2, 8, 64], strides = [1, 1, 1]} : vector<2x8x384xf32> to vector<2x8x64xf32>
    %42 = vector.extract_strided_slice %37 {offsets = [0, 0, 256], sizes = [2, 8, 64], strides = [1, 1, 1]} : vector<2x8x384xf32> to vector<2x8x64xf32>
    %43 = arith.truncf %40 : vector<2x8x64xf32> to vector<2x8x64xbf16>
    %44 = arith.truncf %41 : vector<2x8x64xf32> to vector<2x8x64xbf16>
    "tpu.trace_start"() <{level = 10 : i32, message = "bqd,bkd->bqk"}> : () -> ()
    %cst_22 = arith.constant dense<0.000000e+00> : vector<2x8x8xf32>
    %45 = tpu.matmul %43, %44, %cst_22 {dimension_numbers = #tpu.dot_dimension_numbers<[2], [2], [1], [1], [0, 0, 0, 1, 1, 1], [0], [0]>} : vector<2x8x64xbf16>, vector<2x8x64xbf16>, vector<2x8x8xf32> -> vector<2x8x8xf32>
    "tpu.trace_stop"() : () -> ()
    %cst_23 = arith.constant 1.250000e-01 : f32
    %46 = vector.broadcast %cst_23 : f32 to vector<2x8x8xf32>
    %47 = arith.mulf %45, %46 : vector<2x8x8xf32>
    %48 = vector.broadcast %39 : vector<1x8x8xf32> to vector<2x8x8xf32>
    %49 = arith.addf %47, %48 : vector<2x8x8xf32>
    %cst_24 = arith.constant dense<0xFF800000> : vector<2x8xf32>
    %50 = vector.multi_reduction <maximumf>, %49, %cst_24 [2] : vector<2x8x8xf32> to vector<2x8xf32>
    %51 = vector.shape_cast %50 : vector<2x8xf32> to vector<2x8x1xf32>
    %52 = vector.broadcast %51 : vector<2x8x1xf32> to vector<2x8x8xf32>
    %53 = arith.subf %49, %52 : vector<2x8x8xf32>
    %54 = math.exp %53 : vector<2x8x8xf32>
    %cst_25 = arith.constant dense<0.000000e+00> : vector<2x8xf32>
    %55 = vector.multi_reduction <add>, %54, %cst_25 [2] : vector<2x8x8xf32> to vector<2x8xf32>
    %56 = vector.shape_cast %55 : vector<2x8xf32> to vector<2x8x1xf32>
    %57 = tpu.reciprocal %56 {approx = true} : vector<2x8x1xf32> -> vector<2x8x1xf32>
    %58 = vector.broadcast %57 : vector<2x8x1xf32> to vector<2x8x8xf32>
    %59 = arith.mulf %54, %58 : vector<2x8x8xf32>
    %60 = arith.truncf %59 : vector<2x8x8xf32> to vector<2x8x8xbf16>
    %61 = arith.truncf %42 : vector<2x8x64xf32> to vector<2x8x64xbf16>
    "tpu.trace_start"() <{level = 10 : i32, message = "bqk,bkd->bqd"}> : () -> ()
    %cst_26 = arith.constant dense<0.000000e+00> : vector<2x8x64xf32>
    %62 = tpu.matmul %60, %61, %cst_26 {dimension_numbers = #tpu.dot_dimension_numbers<[2], [1], [1], [2], [0, 0, 0, 1, 1, 2], [0], [0]>} : vector<2x8x8xbf16>, vector<2x8x64xbf16>, vector<2x8x64xf32> -> vector<2x8x64xf32>
    "tpu.trace_stop"() : () -> ()
    %63 = vector.extract_strided_slice %37 {offsets = [0, 0, 64], sizes = [2, 8, 64], strides = [1, 1, 1]} : vector<2x8x384xf32> to vector<2x8x64xf32>
    %64 = vector.extract_strided_slice %37 {offsets = [0, 0, 192], sizes = [2, 8, 64], strides = [1, 1, 1]} : vector<2x8x384xf32> to vector<2x8x64xf32>
    %65 = vector.extract_strided_slice %37 {offsets = [0, 0, 320], sizes = [2, 8, 64], strides = [1, 1, 1]} : vector<2x8x384xf32> to vector<2x8x64xf32>
    %66 = arith.truncf %63 : vector<2x8x64xf32> to vector<2x8x64xbf16>
    %67 = arith.truncf %64 : vector<2x8x64xf32> to vector<2x8x64xbf16>
    "tpu.trace_start"() <{level = 10 : i32, message = "bqd,bkd->bqk"}> : () -> ()
    %cst_27 = arith.constant dense<0.000000e+00> : vector<2x8x8xf32>
    %68 = tpu.matmul %66, %67, %cst_27 {dimension_numbers = #tpu.dot_dimension_numbers<[2], [2], [1], [1], [0, 0, 0, 1, 1, 1], [0], [0]>} : vector<2x8x64xbf16>, vector<2x8x64xbf16>, vector<2x8x8xf32> -> vector<2x8x8xf32>
    "tpu.trace_stop"() : () -> ()
    %cst_28 = arith.constant 1.250000e-01 : f32
    %69 = vector.broadcast %cst_28 : f32 to vector<2x8x8xf32>
    %70 = arith.mulf %68, %69 : vector<2x8x8xf32>
    %71 = vector.broadcast %39 : vector<1x8x8xf32> to vector<2x8x8xf32>
    %72 = arith.addf %70, %71 : vector<2x8x8xf32>
    %cst_29 = arith.constant dense<0xFF800000> : vector<2x8xf32>
    %73 = vector.multi_reduction <maximumf>, %72, %cst_29 [2] : vector<2x8x8xf32> to vector<2x8xf32>
    %74 = vector.shape_cast %73 : vector<2x8xf32> to vector<2x8x1xf32>
    %75 = vector.broadcast %74 : vector<2x8x1xf32> to vector<2x8x8xf32>
    %76 = arith.subf %72, %75 : vector<2x8x8xf32>
    %77 = math.exp %76 : vector<2x8x8xf32>
    %cst_30 = arith.constant dense<0.000000e+00> : vector<2x8xf32>
    %78 = vector.multi_reduction <add>, %77, %cst_30 [2] : vector<2x8x8xf32> to vector<2x8xf32>
    %79 = vector.shape_cast %78 : vector<2x8xf32> to vector<2x8x1xf32>
    %80 = tpu.reciprocal %79 {approx = true} : vector<2x8x1xf32> -> vector<2x8x1xf32>
    %81 = vector.broadcast %80 : vector<2x8x1xf32> to vector<2x8x8xf32>
    %82 = arith.mulf %77, %81 : vector<2x8x8xf32>
    %83 = arith.truncf %82 : vector<2x8x8xf32> to vector<2x8x8xbf16>
    %84 = arith.truncf %65 : vector<2x8x64xf32> to vector<2x8x64xbf16>
    "tpu.trace_start"() <{level = 10 : i32, message = "bqk,bkd->bqd"}> : () -> ()
    %cst_31 = arith.constant dense<0.000000e+00> : vector<2x8x64xf32>
    %85 = tpu.matmul %83, %84, %cst_31 {dimension_numbers = #tpu.dot_dimension_numbers<[2], [1], [1], [2], [0, 0, 0, 1, 1, 2], [0], [0]>} : vector<2x8x8xbf16>, vector<2x8x64xbf16>, vector<2x8x64xf32> -> vector<2x8x64xf32>
    "tpu.trace_stop"() : () -> ()
    %86 = tpu.concatenate %62, %85 in 2 : vector<2x8x64xf32>, vector<2x8x64xf32> -> vector<2x8x128xf32>
    %87 = vector.shape_cast %86 : vector<2x8x128xf32> to vector<16x128xf32>
    %88 = arith.truncf %87 : vector<16x128xf32> to vector<16x128xbf16>
    %c0_32 = arith.constant 0 : index
    %c0_33 = arith.constant 0 : index
    %c0_34 = arith.constant 0 : index
    %89 = vector.load %arg8[%c0_32, %c0_33, %c0_34] : memref<1x128x128xbf16, #tpu.memory_space<vmem>>, vector<1x128x128xbf16>
    %90 = vector.shape_cast %89 : vector<1x128x128xbf16> to vector<128x128xbf16>
    %cst_35 = arith.constant dense<0.000000e+00> : vector<16x128xf32>
    %91 = tpu.matmul %88, %90, %cst_35 {dimension_numbers = #tpu.dot_dimension_numbers<[1], [0], [0], [1], [0, 0, 1, 1], [], []>} : vector<16x128xbf16>, vector<128x128xbf16>, vector<16x128xf32> -> vector<16x128xf32>
    %c0_36 = arith.constant 0 : index
    %c0_37 = arith.constant 0 : index
    %c0_38 = arith.constant 0 : index
    %92 = vector.load %arg9[%c0_36, %c0_37, %c0_38] : memref<1x1x128xf32, #tpu.memory_space<vmem>>, vector<1x1x128xf32>
    %93 = vector.shape_cast %92 : vector<1x1x128xf32> to vector<1x128xf32>
    %94 = vector.broadcast %93 : vector<1x128xf32> to vector<16x128xf32>
    %95 = arith.addf %91, %94 : vector<16x128xf32>
    %96 = arith.addf %4, %95 : vector<16x128xf32>
    %c0_39 = arith.constant 0 : index
    %c0_40 = arith.constant 0 : index
    %c0_41 = arith.constant 0 : index
    %97 = vector.load %arg10[%c0_39, %c0_40, %c0_41] : memref<1x1x128xf32, #tpu.memory_space<vmem>>, vector<1x1x128xf32>
    %98 = vector.shape_cast %97 : vector<1x1x128xf32> to vector<1x128xf32>
    %c0_42 = arith.constant 0 : index
    %c0_43 = arith.constant 0 : index
    %c0_44 = arith.constant 0 : index
    %99 = vector.load %arg11[%c0_42, %c0_43, %c0_44] : memref<1x1x128xf32, #tpu.memory_space<vmem>>, vector<1x1x128xf32>
    %100 = vector.shape_cast %99 : vector<1x1x128xf32> to vector<1x128xf32>
    %cst_45 = arith.constant dense<0.000000e+00> : vector<16xf32>
    %101 = vector.multi_reduction <add>, %96, %cst_45 [1] : vector<16x128xf32> to vector<16xf32>
    %102 = vector.shape_cast %101 : vector<16xf32> to vector<16x1xf32>
    %cst_46 = arith.constant 1.280000e+02 : f32
    %103 = vector.broadcast %cst_46 : f32 to vector<16x1xf32>
    %104 = arith.divf %102, %103 : vector<16x1xf32>
    %105 = vector.broadcast %104 : vector<16x1xf32> to vector<16x128xf32>
    %106 = arith.subf %96, %105 : vector<16x128xf32>
    %107 = arith.mulf %106, %106 : vector<16x128xf32>
    %cst_47 = arith.constant dense<0.000000e+00> : vector<16xf32>
    %108 = vector.multi_reduction <add>, %107, %cst_47 [1] : vector<16x128xf32> to vector<16xf32>
    %109 = vector.shape_cast %108 : vector<16xf32> to vector<16x1xf32>
    %cst_48 = arith.constant 1.280000e+02 : f32
    %110 = vector.broadcast %cst_48 : f32 to vector<16x1xf32>
    %111 = arith.divf %109, %110 : vector<16x1xf32>
    %cst_49 = arith.constant 9.99999974E-6 : f32
    %112 = vector.broadcast %cst_49 : f32 to vector<16x1xf32>
    %113 = arith.addf %111, %112 : vector<16x1xf32>
    %114 = math.rsqrt %113 : vector<16x1xf32>
    %115 = vector.broadcast %114 : vector<16x1xf32> to vector<16x128xf32>
    %116 = arith.mulf %106, %115 : vector<16x128xf32>
    %117 = vector.broadcast %98 : vector<1x128xf32> to vector<16x128xf32>
    %118 = arith.mulf %116, %117 : vector<16x128xf32>
    %119 = vector.broadcast %100 : vector<1x128xf32> to vector<16x128xf32>
    %120 = arith.addf %118, %119 : vector<16x128xf32>
    %121 = arith.truncf %120 : vector<16x128xf32> to vector<16x128xbf16>
    %c0_50 = arith.constant 0 : index
    %c0_51 = arith.constant 0 : index
    %c0_52 = arith.constant 0 : index
    %122 = vector.load %arg12[%c0_50, %c0_51, %c0_52] : memref<1x128x512xbf16, #tpu.memory_space<vmem>>, vector<1x128x512xbf16>
    %123 = vector.shape_cast %122 : vector<1x128x512xbf16> to vector<128x512xbf16>
    %cst_53 = arith.constant dense<0.000000e+00> : vector<16x512xf32>
    %124 = tpu.matmul %121, %123, %cst_53 {dimension_numbers = #tpu.dot_dimension_numbers<[1], [0], [0], [1], [0, 0, 1, 1], [], []>} : vector<16x128xbf16>, vector<128x512xbf16>, vector<16x512xf32> -> vector<16x512xf32>
    %c0_54 = arith.constant 0 : index
    %c0_55 = arith.constant 0 : index
    %c0_56 = arith.constant 0 : index
    %125 = vector.load %arg13[%c0_54, %c0_55, %c0_56] : memref<1x1x512xf32, #tpu.memory_space<vmem>>, vector<1x1x512xf32>
    %126 = vector.shape_cast %125 : vector<1x1x512xf32> to vector<1x512xf32>
    %127 = vector.broadcast %126 : vector<1x512xf32> to vector<16x512xf32>
    %128 = arith.addf %124, %127 : vector<16x512xf32>
    %cst_57 = arith.constant 1.702000e+00 : f32
    %129 = vector.broadcast %cst_57 : f32 to vector<16x512xf32>
    %130 = arith.mulf %129, %128 : vector<16x512xf32>
    %131 = arith.negf %130 : vector<16x512xf32>
    %132 = math.exp %131 : vector<16x512xf32>
    %cst_58 = arith.constant 1.000000e+00 : f32
    %133 = vector.broadcast %cst_58 : f32 to vector<16x512xf32>
    %134 = arith.addf %133, %132 : vector<16x512xf32>
    %135 = arith.divf %133, %134 : vector<16x512xf32>
    %136 = arith.mulf %128, %135 : vector<16x512xf32>
    %137 = arith.truncf %136 : vector<16x512xf32> to vector<16x512xbf16>
    %c0_59 = arith.constant 0 : index
    %c0_60 = arith.constant 0 : index
    %c0_61 = arith.constant 0 : index
    %138 = vector.load %arg14[%c0_59, %c0_60, %c0_61] : memref<1x512x128xbf16, #tpu.memory_space<vmem>>, vector<1x512x128xbf16>
    %139 = vector.shape_cast %138 : vector<1x512x128xbf16> to vector<512x128xbf16>
    %cst_62 = arith.constant dense<0.000000e+00> : vector<16x128xf32>
    %140 = tpu.matmul %137, %139, %cst_62 {dimension_numbers = #tpu.dot_dimension_numbers<[1], [0], [0], [1], [0, 0, 1, 1], [], []>} : vector<16x512xbf16>, vector<512x128xbf16>, vector<16x128xf32> -> vector<16x128xf32>
    %c0_63 = arith.constant 0 : index
    %c0_64 = arith.constant 0 : index
    %c0_65 = arith.constant 0 : index
    %141 = vector.load %arg15[%c0_63, %c0_64, %c0_65] : memref<1x1x128xf32, #tpu.memory_space<vmem>>, vector<1x1x128xf32>
    %142 = vector.shape_cast %141 : vector<1x1x128xf32> to vector<1x128xf32>
    %143 = vector.broadcast %142 : vector<1x128xf32> to vector<16x128xf32>
    %144 = arith.addf %140, %143 : vector<16x128xf32>
    %145 = arith.addf %96, %144 : vector<16x128xf32>
    %146 = vector.shape_cast %145 : vector<16x128xf32> to vector<2x8x128xf32>
    %c0_66 = arith.constant 0 : index
    %c0_67 = arith.constant 0 : index
    %c0_68 = arith.constant 0 : index
    %147 = vector.load %arg17[%c0_66, %c0_67, %c0_68] : memref<2x8x128xf32, #tpu.memory_space<vmem>>, vector<2x8x128xf32>
    tpu.vector_store %arg17[%c0_66, %c0_67, %c0_68], %146 {strides = array<i32>} : memref<2x8x128xf32, #tpu.memory_space<vmem>>, vector<2x8x128xf32>,
    %c1_i32 = arith.constant 1 : i32
    %148 = arith.cmpi eq, %arg1, %c1_i32 : i32
    %149 = arith.extui %148 : i1 to i32
    %c0_i32_69 = arith.constant 0 : i32
    %150 = arith.cmpi ne, %149, %c0_i32_69 : i32
    scf.if %150 {
      %c0_70 = arith.constant 0 : index
      %c0_71 = arith.constant 0 : index
      %c0_72 = arith.constant 0 : index
      %151 = vector.load %arg16[%c0_70, %c0_71, %c0_72] : memref<2x8x128xf32, #tpu.memory_space<vmem>>, vector<2x8x128xf32>
      tpu.vector_store %arg16[%c0_70, %c0_71, %c0_72], %146 {strides = array<i32>} : memref<2x8x128xf32, #tpu.memory_space<vmem>>, vector<2x8x128xf32>,
    } else {
    }
    return
  }
  func.func @transform_0(%arg0: i32, %arg1: i32) -> (i32, i32, i32) {
    %c0_i32 = arith.constant 0 : i32
    %c0_i32_0 = arith.constant 0 : i32
    %c0_i32_1 = arith.constant 0 : i32
    return %arg0, %c0_i32, %c0_i32_0 : i32, i32, i32
  }
  func.func @transform_1(%arg0: i32, %arg1: i32) -> (i32, i32) {
    %c0_i32 = arith.constant 0 : i32
    %c0_i32_0 = arith.constant 0 : i32
    %c0_i32_1 = arith.constant 0 : i32
    return %c0_i32, %c0_i32_0 : i32, i32
  }
  func.func @transform_2(%arg0: i32, %arg1: i32) -> (i32, i32, i32) {
    %c0_i32 = arith.constant 0 : i32
    %c0_i32_0 = arith.constant 0 : i32
    %c0_i32_1 = arith.constant 0 : i32
    return %arg1, %c0_i32, %c0_i32_0 : i32, i32, i32
  }
  func.func @transform_3(%arg0: i32, %arg1: i32) -> (i32, i32, i32) {
    %c0_i32 = arith.constant 0 : i32
    %c0_i32_0 = arith.constant 0 : i32
    %c0_i32_1 = arith.constant 0 : i32
    return %arg1, %c0_i32, %c0_i32_0 : i32, i32, i32
  }
  func.func @transform_4(%arg0: i32, %arg1: i32) -> (i32, i32, i32) {
    %c0_i32 = arith.constant 0 : i32
    %c0_i32_0 = arith.constant 0 : i32
    %c0_i32_1 = arith.constant 0 : i32
    return %arg1, %c0_i32, %c0_i32_0 : i32, i32, i32
  }
  func.func @transform_5(%arg0: i32, %arg1: i32) -> (i32, i32, i32) {
    %c0_i32 = arith.constant 0 : i32
    %c0_i32_0 = arith.constant 0 : i32
    %c0_i32_1 = arith.constant 0 : i32
    return %arg1, %c0_i32, %c0_i32_0 : i32, i32, i32
  }
  func.func @transform_6(%arg0: i32, %arg1: i32) -> (i32, i32, i32) {
    %c0_i32 = arith.constant 0 : i32
    %c0_i32_0 = arith.constant 0 : i32
    %c0_i32_1 = arith.constant 0 : i32
    return %arg1, %c0_i32, %c0_i32_0 : i32, i32, i32
  }
  func.func @transform_7(%arg0: i32, %arg1: i32) -> (i32, i32, i32) {
    %c0_i32 = arith.constant 0 : i32
    %c0_i32_0 = arith.constant 0 : i32
    %c0_i32_1 = arith.constant 0 : i32
    return %arg1, %c0_i32, %c0_i32_0 : i32, i32, i32
  }
  func.func @transform_8(%arg0: i32, %arg1: i32) -> (i32, i32, i32) {
    %c0_i32 = arith.constant 0 : i32
    %c0_i32_0 = arith.constant 0 : i32
    %c0_i32_1 = arith.constant 0 : i32
    return %arg1, %c0_i32, %c0_i32_0 : i32, i32, i32
  }
  func.func @transform_9(%arg0: i32, %arg1: i32) -> (i32, i32, i32) {
    %c0_i32 = arith.constant 0 : i32
    %c0_i32_0 = arith.constant 0 : i32
    %c0_i32_1 = arith.constant 0 : i32
    return %arg1, %c0_i32, %c0_i32_0 : i32, i32, i32
  }
  func.func @transform_10(%arg0: i32, %arg1: i32) -> (i32, i32, i32) {
    %c0_i32 = arith.constant 0 : i32
    %c0_i32_0 = arith.constant 0 : i32
    %c0_i32_1 = arith.constant 0 : i32
    return %arg1, %c0_i32, %c0_i32_0 : i32, i32, i32
  }
  func.func @transform_11(%arg0: i32, %arg1: i32) -> (i32, i32, i32) {
    %c0_i32 = arith.constant 0 : i32
    %c0_i32_0 = arith.constant 0 : i32
    %c0_i32_1 = arith.constant 0 : i32
    return %arg1, %c0_i32, %c0_i32_0 : i32, i32, i32
  }
  func.func @transform_12(%arg0: i32, %arg1: i32) -> (i32, i32, i32) {
    %c0_i32 = arith.constant 0 : i32
    %c0_i32_0 = arith.constant 0 : i32
    %c0_i32_1 = arith.constant 0 : i32
    return %arg1, %c0_i32, %c0_i32_0 : i32, i32, i32
  }
  func.func @transform_13(%arg0: i32, %arg1: i32) -> (i32, i32, i32) {
    %c0_i32 = arith.constant 0 : i32
    %c0_i32_0 = arith.constant 0 : i32
    %c0_i32_1 = arith.constant 0 : i32
    return %arg1, %c0_i32, %c0_i32_0 : i32, i32, i32
  }
  func.func @transform_14(%arg0: i32, %arg1: i32) -> (i32, i32, i32) {
    %c0_i32 = arith.constant 0 : i32
    %c0_i32_0 = arith.constant 0 : i32
    %c0_i32_1 = arith.constant 0 : i32
    return %arg0, %c0_i32, %c0_i32_0 : i32, i32, i32
  }
}

module attributes {stable_mosaic.version = 11 : i64} {
  func.func @_ln_proj_kernel(%arg0: memref<2x128xf32, #tpu.memory_space<vmem>>, %arg1: memref<1x128xf32, #tpu.memory_space<vmem>>, %arg2: memref<1x128xf32, #tpu.memory_space<vmem>>, %arg3: memref<128x128xf32, #tpu.memory_space<vmem>>, %arg4: memref<2x128xf32, #tpu.memory_space<vmem>>) attributes {dimension_semantics = [], scalar_prefetch = 0 : i64, scratch_operands = 0 : i64, tpu.core_type = #tpu.core_type<tc>} {
    %c0 = arith.constant 0 : index
    %c0_0 = arith.constant 0 : index
    %0 = vector.load %arg0[%c0, %c0_0] : memref<2x128xf32, #tpu.memory_space<vmem>>, vector<2x128xf32>
    %c0_1 = arith.constant 0 : index
    %c0_2 = arith.constant 0 : index
    %1 = vector.load %arg1[%c0_1, %c0_2] : memref<1x128xf32, #tpu.memory_space<vmem>>, vector<1x128xf32>
    %c0_3 = arith.constant 0 : index
    %c0_4 = arith.constant 0 : index
    %2 = vector.load %arg2[%c0_3, %c0_4] : memref<1x128xf32, #tpu.memory_space<vmem>>, vector<1x128xf32>
    %cst = arith.constant dense<0.000000e+00> : vector<2xf32>
    %3 = vector.multi_reduction <add>, %0, %cst [1] : vector<2x128xf32> to vector<2xf32>
    %4 = vector.shape_cast %3 : vector<2xf32> to vector<2x1xf32>
    %cst_5 = arith.constant 1.280000e+02 : f32
    %5 = vector.broadcast %cst_5 : f32 to vector<2x1xf32>
    %6 = arith.divf %4, %5 : vector<2x1xf32>
    %7 = vector.broadcast %6 : vector<2x1xf32> to vector<2x128xf32>
    %8 = arith.subf %0, %7 : vector<2x128xf32>
    %9 = arith.mulf %8, %8 : vector<2x128xf32>
    %cst_6 = arith.constant dense<0.000000e+00> : vector<2xf32>
    %10 = vector.multi_reduction <add>, %9, %cst_6 [1] : vector<2x128xf32> to vector<2xf32>
    %11 = vector.shape_cast %10 : vector<2xf32> to vector<2x1xf32>
    %cst_7 = arith.constant 1.280000e+02 : f32
    %12 = vector.broadcast %cst_7 : f32 to vector<2x1xf32>
    %13 = arith.divf %11, %12 : vector<2x1xf32>
    %cst_8 = arith.constant 9.99999974E-6 : f32
    %14 = vector.broadcast %cst_8 : f32 to vector<2x1xf32>
    %15 = arith.addf %13, %14 : vector<2x1xf32>
    %16 = math.rsqrt %15 : vector<2x1xf32>
    %17 = vector.broadcast %16 : vector<2x1xf32> to vector<2x128xf32>
    %18 = arith.mulf %8, %17 : vector<2x128xf32>
    %19 = vector.broadcast %1 : vector<1x128xf32> to vector<2x128xf32>
    %20 = arith.mulf %18, %19 : vector<2x128xf32>
    %21 = vector.broadcast %2 : vector<1x128xf32> to vector<2x128xf32>
    %22 = arith.addf %20, %21 : vector<2x128xf32>
    %c0_9 = arith.constant 0 : index
    %c0_10 = arith.constant 0 : index
    %23 = vector.load %arg3[%c0_9, %c0_10] : memref<128x128xf32, #tpu.memory_space<vmem>>, vector<128x128xf32>
    %cst_11 = arith.constant dense<0.000000e+00> : vector<2x128xf32>
    %24 = tpu.matmul %22, %23, %cst_11 {dimension_numbers = #tpu.dot_dimension_numbers<[1], [0], [0], [1], [0, 0, 1, 1], [], []>} : vector<2x128xf32>, vector<128x128xf32>, vector<2x128xf32> -> vector<2x128xf32>
    %c0_12 = arith.constant 0 : index
    %c0_13 = arith.constant 0 : index
    %25 = vector.load %arg4[%c0_12, %c0_13] : memref<2x128xf32, #tpu.memory_space<vmem>>, vector<2x128xf32>
    tpu.vector_store %arg4[%c0_12, %c0_13], %24 {strides = array<i32>} : memref<2x128xf32, #tpu.memory_space<vmem>>, vector<2x128xf32>,
    return
  }
}

module attributes {stable_mosaic.version = 11 : i64} {
  func.func @_sim_itc_kernel(%arg0: memref<2x128xf32, #tpu.memory_space<vmem>>, %arg1: memref<2x4x128xf32, #tpu.memory_space<vmem>>, %arg2: memref<2x4x1xf32, #tpu.memory_space<vmem>>, %arg3: memref<1x1xf32, #tpu.memory_space<vmem>>, %arg4: memref<1x1xf32, #tpu.memory_space<vmem>>) attributes {dimension_semantics = [], scalar_prefetch = 0 : i64, scratch_operands = 0 : i64, tpu.core_type = #tpu.core_type<tc>} {
    %c0 = arith.constant 0 : index
    %c0_0 = arith.constant 0 : index
    %0 = vector.load %arg0[%c0, %c0_0] : memref<2x128xf32, #tpu.memory_space<vmem>>, vector<2x128xf32>
    %c0_1 = arith.constant 0 : index
    %c0_2 = arith.constant 0 : index
    %c0_3 = arith.constant 0 : index
    %1 = vector.load %arg1[%c0_1, %c0_2, %c0_3] : memref<2x4x128xf32, #tpu.memory_space<vmem>>, vector<2x4x128xf32>
    %c0_4 = arith.constant 0 : index
    %c0_5 = arith.constant 0 : index
    %c0_6 = arith.constant 0 : index
    %2 = vector.load %arg2[%c0_4, %c0_5, %c0_6] : memref<2x4x1xf32, #tpu.memory_space<vmem>>, vector<2x4x1xf32>
    %3 = arith.mulf %0, %0 : vector<2x128xf32>
    %cst = arith.constant dense<0.000000e+00> : vector<2xf32>
    %4 = vector.multi_reduction <add>, %3, %cst [1] : vector<2x128xf32> to vector<2xf32>
    %5 = vector.shape_cast %4 : vector<2xf32> to vector<2x1xf32>
    %6 = math.rsqrt %5 : vector<2x1xf32>
    %7 = vector.broadcast %6 : vector<2x1xf32> to vector<2x128xf32>
    %8 = arith.mulf %0, %7 : vector<2x128xf32>
    %9 = arith.mulf %1, %1 : vector<2x4x128xf32>
    %cst_7 = arith.constant dense<0.000000e+00> : vector<2x4xf32>
    %10 = vector.multi_reduction <add>, %9, %cst_7 [2] : vector<2x4x128xf32> to vector<2x4xf32>
    %11 = vector.shape_cast %10 : vector<2x4xf32> to vector<2x4x1xf32>
    %12 = math.rsqrt %11 : vector<2x4x1xf32>
    %13 = vector.broadcast %12 : vector<2x4x1xf32> to vector<2x4x128xf32>
    %14 = arith.mulf %1, %13 : vector<2x4x128xf32>
    %15 = vector.shape_cast %8 : vector<2x128xf32> to vector<1x2x128xf32>
    %16 = vector.shape_cast %15 : vector<1x2x128xf32> to vector<1x2x128xf32>
    %17 = vector.broadcast %16 : vector<1x2x128xf32> to vector<2x2x128xf32>
    "tpu.trace_start"() <{level = 10 : i32, message = "mtd,mnd->mtn"}> : () -> ()
    %cst_8 = arith.constant dense<0.000000e+00> : vector<2x4x2xf32>
    %18 = tpu.matmul %14, %17, %cst_8 {dimension_numbers = #tpu.dot_dimension_numbers<[2], [2], [1], [1], [0, 0, 0, 1, 1, 1], [0], [0]>} : vector<2x4x128xf32>, vector<2x2x128xf32>, vector<2x4x2xf32> -> vector<2x4x2xf32>
    "tpu.trace_stop"() : () -> ()
    %19 = vector.broadcast %2 : vector<2x4x1xf32> to vector<2x4x2xf32>
    %20 = arith.mulf %18, %19 : vector<2x4x2xf32>
    %21 = arith.mulf %20, %20 : vector<2x4x2xf32>
    %cst_9 = arith.constant dense<0.000000e+00> : vector<2x2xf32>
    %22 = vector.multi_reduction <add>, %21, %cst_9 [1] : vector<2x4x2xf32> to vector<2x2xf32>
    %23 = vector.shape_cast %22 : vector<2x2xf32> to vector<2x1x2xf32>
    %cst_10 = arith.constant 9.99999996E-13 : f32
    %24 = vector.broadcast %cst_10 : f32 to vector<2x1x2xf32>
    %25 = arith.addf %23, %24 : vector<2x1x2xf32>
    %26 = math.rsqrt %25 : vector<2x1x2xf32>
    %27 = vector.broadcast %26 : vector<2x1x2xf32> to vector<2x4x2xf32>
    %28 = arith.mulf %20, %27 : vector<2x4x2xf32>
    %cst_11 = arith.constant 5.000000e-01 : f32
    %29 = vector.broadcast %cst_11 : f32 to vector<2x4x1xf32>
    %30 = arith.cmpf ogt, %2, %29 : vector<2x4x1xf32>
    %cst_12 = arith.constant 6.000000e+00 : f32
    %31 = vector.broadcast %cst_12 : f32 to vector<2x4x2xf32>
    %32 = arith.mulf %31, %28 : vector<2x4x2xf32>
    %cst_13 = arith.constant -1.000000e+20 : f32
    %33 = vector.shape_cast %30 : vector<2x4x1xi1> to vector<2x4x1xi1>
    %34 = vector.broadcast %33 : vector<2x4x1xi1> to vector<2x4x2xi1>
    %35 = vector.broadcast %cst_13 : f32 to vector<2x4x2xf32>
    %36 = arith.select %34, %32, %35 : vector<2x4x2xi1>, vector<2x4x2xf32>
    %cst_14 = arith.constant dense<0xFF800000> : vector<2x2xf32>
    %37 = vector.multi_reduction <maximumf>, %36, %cst_14 [1] : vector<2x4x2xf32> to vector<2x2xf32>
    %38 = vector.shape_cast %37 : vector<2x2xf32> to vector<2x1x2xf32>
    %39 = vector.broadcast %38 : vector<2x1x2xf32> to vector<2x4x2xf32>
    %40 = arith.subf %36, %39 : vector<2x4x2xf32>
    %41 = math.exp %40 : vector<2x4x2xf32>
    %cst_15 = arith.constant dense<0.000000e+00> : vector<2x2xf32>
    %42 = vector.multi_reduction <add>, %41, %cst_15 [1] : vector<2x4x2xf32> to vector<2x2xf32>
    %43 = vector.shape_cast %42 : vector<2x2xf32> to vector<2x1x2xf32>
    %44 = tpu.reciprocal %43 {approx = true} : vector<2x1x2xf32> -> vector<2x1x2xf32>
    %45 = vector.broadcast %44 : vector<2x1x2xf32> to vector<2x4x2xf32>
    %46 = arith.mulf %41, %45 : vector<2x4x2xf32>
    %c0_16 = arith.constant 0 : index
    %c0_17 = arith.constant 0 : index
    %47 = vector.load %arg3[%c0_16, %c0_17] : memref<1x1xf32, #tpu.memory_space<vmem>>, vector<1x1xf32>
    %48 = math.exp %47 : vector<1x1xf32>
    %49 = arith.mulf %46, %18 : vector<2x4x2xf32>
    %cst_18 = arith.constant dense<0.000000e+00> : vector<2x2xf32>
    %50 = vector.multi_reduction <add>, %49, %cst_18 [1] : vector<2x4x2xf32> to vector<2x2xf32>
    %51 = vector.shape_cast %50 : vector<2x2xf32> to vector<2x1x2xf32>
    %52 = vector.shape_cast %48 : vector<1x1xf32> to vector<1x1x1xf32>
    %53 = vector.broadcast %52 : vector<1x1x1xf32> to vector<2x1x2xf32>
    %54 = arith.mulf %53, %51 : vector<2x1x2xf32>
    %55 = tpu.iota {dimensions = array<i32: 0>} : vector<2x1x2xi32>
    %56 = tpu.iota {dimensions = array<i32: 2>} : vector<2x1x2xi32>
    %57 = arith.cmpi eq, %55, %56 : vector<2x1x2xi32>
    %cst_19 = arith.constant dense<0xFF800000> : vector<1x2xf32>
    %58 = vector.multi_reduction <maximumf>, %54, %cst_19 [0] : vector<2x1x2xf32> to vector<1x2xf32>
    %59 = vector.shape_cast %58 : vector<1x2xf32> to vector<1x1x2xf32>
    %60 = vector.broadcast %59 : vector<1x1x2xf32> to vector<2x1x2xf32>
    %61 = arith.subf %54, %60 : vector<2x1x2xf32>
    %62 = math.exp %61 : vector<2x1x2xf32>
    %cst_20 = arith.constant dense<0.000000e+00> : vector<1x2xf32>
    %63 = vector.multi_reduction <add>, %62, %cst_20 [0] : vector<2x1x2xf32> to vector<1x2xf32>
    %64 = vector.shape_cast %63 : vector<1x2xf32> to vector<1x1x2xf32>
    %65 = math.log %64 : vector<1x1x2xf32>
    %66 = arith.addf %65, %59 : vector<1x1x2xf32>
    %67 = vector.broadcast %66 : vector<1x1x2xf32> to vector<2x1x2xf32>
    %68 = arith.subf %54, %67 : vector<2x1x2xf32>
    %cst_21 = arith.constant 0.000000e+00 : f32
    %69 = vector.broadcast %cst_21 : f32 to vector<2x1x2xf32>
    %70 = arith.select %57, %68, %69 : vector<2x1x2xi1>, vector<2x1x2xf32>
    %71 = vector.shape_cast %70 : vector<2x1x2xf32> to vector<1x2x1x2xf32>
    %cst_22 = arith.constant dense<0.000000e+00> : vector<1xf32>
    %72 = vector.multi_reduction <add>, %71, %cst_22 [1, 2, 3] : vector<1x2x1x2xf32> to vector<1xf32>
    %73 = vector.shape_cast %72 : vector<1xf32> to vector<1x1x1x1xf32>
    %74 = vector.extract %73[0, 0, 0, 0] : f32 from vector<1x1x1x1xf32>
    %cst_23 = arith.constant 0.000000e+00 : f32
    %75 = arith.subf %cst_23, %74 : f32
    %cst_24 = arith.constant 2.000000e+00 : f32
    %76 = arith.divf %75, %cst_24 : f32
    %cst_25 = arith.constant dense<0xFF800000> : vector<2x1xf32>
    %77 = vector.multi_reduction <maximumf>, %54, %cst_25 [2] : vector<2x1x2xf32> to vector<2x1xf32>
    %78 = vector.shape_cast %77 : vector<2x1xf32> to vector<2x1x1xf32>
    %79 = vector.broadcast %78 : vector<2x1x1xf32> to vector<2x1x2xf32>
    %80 = arith.subf %54, %79 : vector<2x1x2xf32>
    %81 = math.exp %80 : vector<2x1x2xf32>
    %cst_26 = arith.constant dense<0.000000e+00> : vector<2x1xf32>
    %82 = vector.multi_reduction <add>, %81, %cst_26 [2] : vector<2x1x2xf32> to vector<2x1xf32>
    %83 = vector.shape_cast %82 : vector<2x1xf32> to vector<2x1x1xf32>
    %84 = math.log %83 : vector<2x1x1xf32>
    %85 = arith.addf %84, %78 : vector<2x1x1xf32>
    %86 = vector.broadcast %85 : vector<2x1x1xf32> to vector<2x1x2xf32>
    %87 = arith.subf %54, %86 : vector<2x1x2xf32>
    %cst_27 = arith.constant 0.000000e+00 : f32
    %88 = vector.broadcast %cst_27 : f32 to vector<2x1x2xf32>
    %89 = arith.select %57, %87, %88 : vector<2x1x2xi1>, vector<2x1x2xf32>
    %90 = vector.shape_cast %89 : vector<2x1x2xf32> to vector<1x2x1x2xf32>
    %cst_28 = arith.constant dense<0.000000e+00> : vector<1xf32>
    %91 = vector.multi_reduction <add>, %90, %cst_28 [1, 2, 3] : vector<1x2x1x2xf32> to vector<1xf32>
    %92 = vector.shape_cast %91 : vector<1xf32> to vector<1x1x1x1xf32>
    %93 = vector.extract %92[0, 0, 0, 0] : f32 from vector<1x1x1x1xf32>
    %cst_29 = arith.constant 0.000000e+00 : f32
    %94 = arith.subf %cst_29, %93 : f32
    %cst_30 = arith.constant 2.000000e+00 : f32
    %95 = arith.divf %94, %cst_30 : f32
    %96 = arith.addf %76, %95 : f32
    %cst_31 = arith.constant 5.000000e-01 : f32
    %97 = arith.mulf %cst_31, %96 : f32
    %cst_32 = arith.constant 1.000000e+00 : f32
    %98 = vector.broadcast %cst_32 : f32 to vector<1x1xf32>
    %99 = vector.broadcast %97 : f32 to vector<1x1xf32>
    %100 = arith.mulf %99, %98 : vector<1x1xf32>
    %c0_33 = arith.constant 0 : index
    %c0_34 = arith.constant 0 : index
    %101 = vector.load %arg4[%c0_33, %c0_34] : memref<1x1xf32, #tpu.memory_space<vmem>>, vector<1x1xf32>
    tpu.vector_store %arg4[%c0_33, %c0_34], %100 {strides = array<i32>} : memref<1x1xf32, #tpu.memory_space<vmem>>, vector<1x1xf32>,
    return
  }
}

</mosaic_0001>

<bundles_post_ra>
// kernel: clip4clip_forward.8
= control target key start
LH: loop header
LB: loop body
LE: loop exit
PB: predicated region body
PF: predicated region fallthrough
CT: control target
= control target key end

     0   :  { %s586_s9 = smov 0   ;;  %s668_s0 = inlined_call_operand.vmem [shape: bf16[128,192], index: 0, kind: input, shape index: {}]   ;;  %s669_s1 = inlined_call_operand.vmem [shape: bf16[192,128], index: 1, kind: input, shape index: {}]   ;;  %s670_s2 = inlined_call_operand.vmem [shape: f32[128,128], index: 2, kind: output, shape index: {}]  }
   0x1 LB: > { %s426_s10 = sadd.s32 4294967295, %s569_s9   ;;  %p430_p0 = scmp.ge.s32.totalorder %s569_s9, 1  ;;  %s569_s9 = sphi %s586_s9, %s12_s9  }
   0x2   : > { %p114_p1 = scmp.lt.s32.totalorder %s569_s9, 3 }
   0x4   : > { %p115_p2 = pnand %p430_p0, %p114_p1 }
   0x5   : > { %s431_s15 = sshll.u32 (!%p115_p2), %s426_s10, 3 }
   0x6   : > { %118 = sbr.rel (%p115_p2) target bundleno = 203 (0xcb), region = 28  ;;  %p138_p3 = scmp.lt.s32.totalorder (!%p115_p2), %s431_s15, 15 }
   0xb   : > { %v538_v0 = vld [vmem:[%s669_s1 + $0x38] sm:$0xff]  ;;  %v537_v2 = vld [vmem:[%s669_s1 + $0x30] sm:$0xff]  ;;  %s672_s15 = smov (!%p138_p3, %s431_s15), 15  ;;  %v536_v4 = vld [vmem:[%s669_s1 + $0x28] sm:$0xff]  ;;  %vm291_vm0 = vcmask 523264  }
   0xc   : > { %v542_v1 = vld [vmem:[%s669_s1 + $0x58] sm:$0xff]  ;;  %304 = vmatpush.bf16.msra.mxu0 %v538_v0  ;;  %543 = vmatpush.bf16.msra.mxu2 %v538_v0  ;;  %v541_v3 = vld [vmem:[%s669_s1 + $0x50] sm:$0xff]  ;;  %s522_s20 = sshll.u32 %s672_s15, 3  ;;  %v540_v5 = vld [vmem:[%s669_s1 + $0x48] sm:$0xff] }
   0xd   : > { %551 = vmatpush.bf16.msra.mxu3 %v542_v1  ;;  %337 = vmatpush.bf16.msra.mxu1 %v542_v1  ;;  %s620_s27 = scalar_lea.vmem %s668_s0, %s522_s20  ;;  %v535_v6 = vld [vmem:[%s669_s1 + $0x20] sm:$0xff]  ;;  %v534_v13 = vld [vmem:[%s669_s1 + $0x18] sm:$0xff]  ;;  %v533_v15 = vld [vmem:[%s669_s1 + $0x10] sm:$0xff]  ;;  %s148_s16 = scalar_lea.vmem %s670_s2, %s522_s20 }
   0xe   : > { %v539_v7 = vld [vmem:[%s669_s1 + $0x40] sm:$0xff]  ;;  %v525_v8 = vld [vmem:[%s620_s27 + $0x14] sm:$0xf]  ;;  %v448_v9 = vld [vmem:[%s620_s27 + $0x18] sm:$0xf0] }
   0xf   : > { %v523_v10 = vld [vmem:[%s620_s27 + $0x4] sm:$0xf]  ;;  %v440_v11 = vld [vmem:[%s620_s27 + $0x8] sm:$0xf0]  ;;  %v451_v12 = vor.u32 %v525_v8, %v448_v9  ;;  %v438_v18 = vld [vmem:[%s620_s27] sm:$0xf] }
  0x10   : > { %305 = vmatpush.bf16.msra.mxu0 %v537_v2  ;;  %544 = vmatpush.bf16.msra.mxu2 %v537_v2  ;;  %v443_v14 = vor.u32 %v523_v10, %v440_v11  ;;  %v532_v16 = vld [vmem:[%s669_s1 + $0x8] sm:$0xff]  ;;  %v531_v17 = vld [vmem:[%s669_s1] sm:$0xff]  ;;  %v446_v27 = vld [vmem:[%s620_s27 + $0x10] sm:$0xf] }
  0x11   : > { %552 = vmatpush.bf16.msra.mxu3 %v541_v3  ;;  %338 = vmatpush.bf16.msra.mxu1 %v541_v3  ;;  %v524_v19 = vld [vmem:[%s620_s27 + $0x4] sm:$0xf0]  ;;  %v454_v20 = vld [vmem:[%s620_s27 + $0x20] sm:$0xf]  ;;  %v527_v22 = vld [vmem:[%s620_s27 + $0x24] sm:$0xf] }
  0x12   : > { %v528_v21 = vld [vmem:[%s620_s27 + $0x24] sm:$0xf0]  ;;  %v456_v23 = vld [vmem:[%s620_s27 + $0x28] sm:$0xf0]  ;;  %v439_v24 = vor.u32 %v524_v19, %v438_v18  ;;  %v526_v28 = vld [vmem:[%s620_s27 + $0x14] sm:$0xf0] }
  0x13   : > { %v455_v25 = vor.u32 %v528_v21, %v454_v20  ;;  %v459_v26 = vor.u32 %v527_v22, %v456_v23  ;;  %v462_v29 = vld [vmem:[%s620_s27 + $0x30] sm:$0xf]  ;;  %v530_v30 = vld [vmem:[%s620_s27 + $0x34] sm:$0xf0]  ;;  %v529_v31 = vld [vmem:[%s620_s27 + $0x34] sm:$0xf]  ;;  %v447_v33 = vor.u32 %v526_v28, %v446_v27 }
  0x14   : > { %306 = vmatpush.bf16.msra.mxu0 %v536_v4  ;;  %545 = vmatpush.bf16.msra.mxu2 %v536_v4  ;;  %v464_v32 = vld [vmem:[%s620_s27 + $0x38] sm:$0xf0]  ;;  %v463_v34 = vor.u32 %v530_v30, %v462_v29 }
  0x15   : > { %553 = vmatpush.bf16.msra.mxu3 %v540_v5  ;;  %339 = vmatpush.bf16.msra.mxu1 %v540_v5  ;;  %v467_v35 = vor.u32 %v529_v31, %v464_v32 }
  0x18   : > { %307 = vmatpush.bf16.msra.mxu0 %v535_v6  ;;  %546 = vmatpush.bf16.msra.mxu2 %v535_v6 }
  0x19   : > { %554 = vmatpush.bf16.msra.mxu3 %v539_v7  ;;  %340 = vmatpush.bf16.msra.mxu1 %v539_v7 }
  0x1c   : > { %517 = vmatmul.msk.bf16.vlgmr.msra.gmra.mxu3 %vm291_vm0, %v451_v12  ;;  %308 = vmatpush.bf16.msra.mxu0 %v534_v13 }
  0x1d   : > { %547 = vmatpush.bf16.msra.mxu2 %v534_v13  ;;  %516 = vmatmul.msk.bf16.vlgmr.msra.gmra.mxu1 %vm291_vm0, %v443_v14 }
  0x20   : > { %309 = vmatpush.bf16.msra.mxu0 %v533_v15 }
  0x21   : > { %548 = vmatpush.bf16.msra.mxu2 %v533_v15 }
  0x24   : > { %310 = vmatpush.bf16.msra.mxu0 %v532_v16 }
  0x25   : > { %549 = vmatpush.bf16.msra.mxu2 %v532_v16 }
  0x28   : > { %311 = vmatpush.bf16.msra.mxu0 %v531_v17 }
  0x29   : > { %550 = vmatpush.bf16.msra.mxu2 %v531_v17 }
  0x2b   : > { %312 = vmatmul.bf16.vlgmr.msra.gmra.mxu0 %v439_v24 }
  0x2c   : > { %322 = vmatmul.bf16.vlgmr.msra.gmra.mxu2 %v455_v25  ;;  %518 = vmatmul.msk.bf16.gmra.mxu3 %vm291_vm0, %v459_v26 }
  0x3b   : > { %317 = vmatmul.bf16.gmra.mxu0 %v447_v33 }
  0x3c   : > { %327 = vmatmul.bf16.gmra.mxu2 %v463_v34  ;;  %519 = vmatmul.msk.bf16.gmra.mxu3 %vm291_vm0, %v467_v35 }
  0x9a   : > { %v342_v37 = vpop.f32.mrf.mxu1 }
  0x9f   : > { %v347_v36 = vpop.f32.mrf.mxu3 }
  0xa2   : > { %v344_v41 = vpop.f32.mrf.mxu1 }
  0xa7   : > { %v349_v38 = vpop.f32.mrf.mxu3 }
  0xa8   : > { %v313_v39 = vpop.f32.mrf.mxu0 }
  0xa9   : > { %v343_v40 = vadd.f32 %v342_v37, %v313_v39 }
  0xab   : > { %362 = vst [vmem:[%s148_s16] sm:$0xff] %v343_v40 }
  0xaf   : > { %v323_v42 = vpop.f32.mrf.mxu2  ;;  %v352_v43 = vpop.f32.mrf.mxu3 }
  0xb0   : > { %v353_v44 = vadd.f32 %v352_v43, %v323_v42  ;;  %v315_v45 = vpop.f32.mrf.mxu0 }
  0xb1   : > { %v345_v46 = vadd.f32 %v344_v41, %v315_v45 }
  0xb2   : > { %366 = vst [vmem:[%s148_s16 + $0x20] sm:$0xff] %v353_v44 }
  0xb3   : > { %363 = vst [vmem:[%s148_s16 + $0x8] sm:$0xff] %v345_v46 }
  0xb7   : > { %v325_v47 = vpop.f32.mrf.mxu2  ;;  %v354_v48 = vpop.f32.mrf.mxu3 }
  0xb8   : > { %v355_v49 = vadd.f32 %v354_v48, %v325_v47  ;;  %v318_v50 = vpop.f32.mrf.mxu0 }
  0xb9   : > { %v348_v51 = vadd.f32 %v347_v36, %v318_v50 }
  0xba   : > { %367 = vst [vmem:[%s148_s16 + $0x28] sm:$0xff] %v355_v49 }
  0xbb   : > { %364 = vst [vmem:[%s148_s16 + $0x10] sm:$0xff] %v348_v51 }
  0xbf   : > { %v328_v52 = vpop.f32.mrf.mxu2  ;;  %v357_v53 = vpop.f32.mrf.mxu3 }
  0xc0   : > { %v358_v54 = vadd.f32 %v357_v53, %v328_v52  ;;  %v320_v55 = vpop.f32.mrf.mxu0 }
  0xc1   : > { %v350_v56 = vadd.f32 %v349_v38, %v320_v55 }
  0xc2   : > { %368 = vst [vmem:[%s148_s16 + $0x30] sm:$0xff] %v358_v54 }
  0xc3   : > { %365 = vst [vmem:[%s148_s16 + $0x18] sm:$0xff] %v350_v56 }
  0xc7   : > { %v330_v57 = vpop.f32.mrf.mxu2  ;;  %v359_v58 = vpop.f32.mrf.mxu3 }
  0xc8   : > { %v360_v59 = vadd.f32 %v359_v58, %v330_v57 }
  0xca   : > { %369 = vst [vmem:[%s148_s16 + $0x38] sm:$0xff] %v360_v59 }
  0xcb PF: > { %s12_s9 = sadd.s32 1, %s569_s9  }
  0xcc   : > { %p9_p4 = scmp.ge.s32.totalorder %s12_s9, 4  }
  0xce   :  { %11 = sbr.rel (!%p9_p4) target bundleno = 1 (0x1), region = 58 }

// kernel: clip4clip_forward.10
= control target key start
LH: loop header
LB: loop body
LE: loop exit
PB: predicated region body
PF: predicated region fallthrough
CT: control target
= control target key end

     0   :  { %v103_v1 = vmov 128.0   ;;  %s189_s0 = inlined_call_operand.vmem [shape: f32[8,128], index: 0, kind: input, shape index: {}]   ;;  %s190_s3 = inlined_call_operand.vmem [shape: f32[128,128], index: 3, kind: input, shape index: {}]   ;;  %s191_s1 = inlined_call_operand.vmem [shape: f32[1,128], index: 1, kind: input, shape index: {}]   ;;  %s192_s2 = inlined_call_operand.vmem [shape: f32[1,128], index: 2, kind: input, shape index: {}]   ;;  %s193_s4 = inlined_call_operand.vmem [shape: f32[8,128], index: 4, kind: output, shape index: {}]  }
   0x1   :  { %v17_v0 = vld [vmem:[%s189_s0] sm:$0xff]  ;;  %99 = vrcp.f32 %v103_v1  ;;  %v70_v2 = vld [vmem:[%s190_s3 + $0x78] sm:$0xff]  ;;  %v69_v3 = vld [vmem:[%s190_s3 + $0x70] sm:$0xff] }
   0x2   :  { %20 = vadd.xlane.f32.xlu0 %v17_v0  ;;  %71 = vmatpush.msra.mxu0 %v70_v2  ;;  %v68_v14 = vld [vmem:[%s190_s3 + $0x68] sm:$0xff]  ;;  %v67_v15 = vld [vmem:[%s190_s3 + $0x60] sm:$0xff]  ;;  %v66_v16 = vld [vmem:[%s190_s3 + $0x58] sm:$0xff] }
   0x3   :  { %v65_v17 = vld [vmem:[%s190_s3 + $0x50] sm:$0xff]  ;;  %v64_v18 = vld [vmem:[%s190_s3 + $0x48] sm:$0xff]  ;;  %v63_v19 = vld [vmem:[%s190_s3 + $0x40] sm:$0xff] }
   0x4   :  { %72 = vmatpush.msra.mxu0 %v69_v3  ;;  %v62_v20 = vld [vmem:[%s190_s3 + $0x38] sm:$0xff]  ;;  %v61_v21 = vld [vmem:[%s190_s3 + $0x30] sm:$0xff]  ;;  %v60_v22 = vld [vmem:[%s190_s3 + $0x28] sm:$0xff] }
   0x5   :  { %v59_v23 = vld [vmem:[%s190_s3 + $0x20] sm:$0xff]  ;;  %v58_v24 = vld [vmem:[%s190_s3 + $0x18] sm:$0xff]  ;;  %v57_v25 = vld [vmem:[%s190_s3 + $0x10] sm:$0xff] }
   0x6   :  { %73 = vmatpush.msra.mxu0 %v68_v14  ;;  %v56_v26 = vld [vmem:[%s190_s3 + $0x8] sm:$0xff]  ;;  %v55_v27 = vld [vmem:[%s190_s3] sm:$0xff] }
   0x7   :  { %v100_v4 = vpop.eup %99  ;;  %v97_v37 = vld [vmem:[%s191_s1] ss:$0 sm:$0xff] }
   0x8   :  { %v23_v5 = vmul.f32 128.0, %v100_v4  ;;  %vm27_vm0 = vweird.f32 %v100_v4  ;;  %74 = vmatpush.msra.mxu0 %v67_v15  ;;  %v98_v40 = vld [vmem:[%s192_s2] ss:$0 sm:$0xff] }
   0xa   :  { %v24_v6 = vsub.f32 1.0, %v23_v5  ;;  %75 = vmatpush.msra.mxu0 %v66_v16 }
   0xc   :  { %v25_v7 = vmul.f32 %v100_v4, %v24_v6  ;;  %76 = vmatpush.msra.mxu0 %v65_v17 }
   0xe   :  { %v26_v8 = vadd.f32 %v100_v4, %v25_v7  ;;  %77 = vmatpush.msra.mxu0 %v64_v18 }
  0x10   :  { %v28_v9 = vsel %vm27_vm0, %v100_v4, %v26_v8  ;;  %78 = vmatpush.msra.mxu0 %v63_v19 }
  0x12   :  { %79 = vmatpush.msra.mxu0 %v62_v20 }
  0x14   :  { %80 = vmatpush.msra.mxu0 %v61_v21 }
  0x16   :  { %81 = vmatpush.msra.mxu0 %v60_v22 }
  0x18   :  { %82 = vmatpush.msra.mxu0 %v59_v23 }
  0x1a   :  { %83 = vmatpush.msra.mxu0 %v58_v24 }
  0x1c   :  { %84 = vmatpush.msra.mxu0 %v57_v25 }
  0x1e   :  { %85 = vmatpush.msra.mxu0 %v56_v26 }
  0x20   :  { %86 = vmatpush.msra.mxu0 %v55_v27 }
  0x75   :  { %v21_v10 = vpop.xlane.xlu0 %20 }
  0x76   :  { %v29_v11 = vmul.f32 %v28_v9, %v21_v10 }
  0x78   :  { %v30_v12 = vsub.f32 %v17_v0, %v29_v11 }
  0x7a   :  { %v31_v13 = vmul.f32 %v30_v12, %v30_v12 }
  0x7c   :  { %32 = vadd.xlane.f32.xlu0 %v31_v13 }
  0xef   :  { %v33_v28 = vpop.xlane.xlu0 %32 }
  0xf0   :  { %v34_v29 = vmul.f32 %v33_v28, %v28_v9 }
  0xf2   :  { %v35_v30 = vadd.f32 1e-05, %v34_v29 }
  0xf4   :  { %101 = vrsqrt.f32 %v35_v30  ;;  %vm42_vm2 = vweird.f32 %v35_v30 }
  0xfa   :  { %v102_v31 = vpop.eup %101 }
  0xfb   :  { %v37_v32 = vmul.f32 %v102_v31, %v35_v30  ;;  %vm43_vm1 = vweird.f32 %v102_v31 }
  0xfc   :  { %vm44_vm3 = vmor %vm42_vm2, %vm43_vm1 }
  0xfd   :  { %v38_v33 = vmul.f32 %v102_v31, %v37_v32 }
  0xff   :  { %v39_v34 = vmul.f32 0.5, %v38_v33 }
 0x101   :  { %v40_v35 = vsub.f32 1.5, %v39_v34 }
 0x103   :  { %v41_v36 = vmul.f32 %v102_v31, %v40_v35 }
 0x105   :  { %v45_v38 = vsel %vm44_vm3, %v102_v31, %v41_v36 }
 0x106   :  { %v46_v39 = vmul.f32 %v45_v38, %v30_v12 }
 0x108   :  { %v50_v41 = vmul.f32 %v97_v37, %v46_v39 }
 0x10a   :  { %v54_v42 = vadd.f32 %v98_v40, %v50_v41 }
 0x10c   :  { %87 = vmatmul.f32.vlgmr.msra.gmra.mxu0 %v54_v42 }
 0x189   :  { %v88_v43 = vpop.f32.mrf.mxu0 }
 0x18a   :  { %91 = vst [vmem:[%s193_s4] sm:$0xff] %v88_v43 }

// kernel: clip4clip_forward.9
= control target key start
LH: loop header
LB: loop body
LE: loop exit
PB: predicated region body
PF: predicated region fallthrough
CT: control target
= control target key end

     0   :  { %s7458_s21 = smov 0   ;;  %s7460_s22 = smov 0   ;;  %s11907_s0 = inlined_call_operand.vmem [shape: f32[8,32,128], index: 0, kind: input, shape index: {}]   ;;  %s11908_s1 = inlined_call_operand.vmem [shape: f32[32,32], index: 1, kind: input, shape index: {}]   ;;  %s11909_s2 = inlined_call_operand.vmem [shape: f32[1,128], index: 2, kind: input, shape index: {}]   ;;  %s11910_s3 = inlined_call_operand.vmem [shape: f32[1,128], index: 3, kind: input, shape index: {}]   ;;  %s11911_s4 = inlined_call_operand.vmem [shape: f32[2,1,128], index: 4, kind: input, shape index: {}]   ;;  %s11912_s5 = inlined_call_operand.vmem [shape: f32[2,1,128], index: 5, kind: input, shape index: {}]   ;;  %s11913_s6 = inlined_call_operand.vmem [shape: bf16[2,128,384], index: 6, kind: input, shape index: {}]   ;;  %s11914_s7 = inlined_call_operand.vmem [shape: f32[2,1,384], index: 7, kind: input, shape index: {}]   ;;  %s11915_s8 = inlined_call_operand.vmem [shape: bf16[2,128,128], index: 8, kind: input, shape index: {}]   ;;  %s11916_s9 = inlined_call_operand.vmem [shape: f32[2,1,128], index: 9, kind: input, shape index: {}]   ;;  %s11917_s10 = inlined_call_operand.vmem [shape: f32[2,1,128], index: 10, kind: input, shape index: {}]   ;;  %s11918_s11 = inlined_call_operand.vmem [shape: f32[2,1,128], index: 11, kind: input, shape index: {}]   ;;  %s11919_s12 = inlined_call_operand.vmem [shape: bf16[2,128,512], index: 12, kind: input, shape index: {}]   ;;  %s11920_s13 = inlined_call_operand.vmem [shape: f32[2,1,512], index: 13, kind: input, shape index: {}]   ;;  %s11921_s14 = inlined_call_operand.vmem [shape: bf16[2,512,128], index: 14, kind: input, shape index: {}]   ;;  %s11922_s15 = inlined_call_operand.vmem [shape: f32[2,1,128], index: 15, kind: input, shape index: {}]   ;;  %s11923_s16 = inlined_call_operand.vmem [shape: f32[8,32,128], index: 16, kind: output, shape index: {}]  }
   0x1   :  { %11978 = sst [smem:[#allocation46_spill]] %s11907_s0  ;;  %s7462_s23 = smov 0  }
   0x2   :  { %11979 = sst [smem:[#allocation47_spill]] %s11908_s1  ;;  %s7464_s24 = smov 0  }
   0x3   :  { %11980 = sst [smem:[#allocation48_spill]] %s11909_s2  ;;  %s7466_s25 = smov 0  }
   0x4   :  { %11981 = sst [smem:[#allocation49_spill]] %s11910_s3 }
   0x5   :  { %11982 = sst [smem:[#allocation50_spill]] %s11911_s4 }
   0x6   :  { %11983 = sst [smem:[#allocation51_spill]] %s11912_s5 }
   0x7   :  { %11984 = sst [smem:[#allocation52_spill]] %s11913_s6 }
   0x8   :  { %11985 = sst [smem:[#allocation53_spill]] %s11914_s7 }
   0x9   :  { %11986 = sst [smem:[#allocation54_spill]] %s11915_s8 }
   0xa   :  { %11987 = sst [smem:[#allocation55_spill]] %s11917_s10 }
   0xb LB: > { %11988 = sst [smem:[#allocation3_spill]] %s7352_s21  ;;  %s35_s26 = sadd.s32 1, %s7360_s23  ;;  %s7368_s25 = sphi %s7466_s25, %s26_s25   ;;  %s7364_s24 = sphi %s7464_s24, %s12385_s24   ;;  %s7360_s23 = sphi %s7462_s23, %s12384_s23   ;;  %s7356_s22 = sphi %s7460_s22, %s12383_s22   ;;  %s7352_s21 = sphi %s7458_s21, %s12382_s21  }
   0xc   : > { %11989 = sst [smem:[#allocation4_spill]] %s7360_s23  ;;  %s38_s27 = sadd.s32 1, %s7364_s24 }
   0xd   : > { %11990 = sst [smem:[#allocation5_spill]] %s7364_s24  ;;  %p36_p0 = scmp.ge.s32.totalorder %s35_s26, 2 }
   0xe   : > { %11991 = sst [smem:[#allocation6_spill]] %s7368_s25  ;;  %p6135_p1 = scmp.ge.s32.totalorder %s7368_s25, 1 }
   0xf   : > { %p582_p2 = scmp.lt.s32.totalorder %s7368_s25, 5  ;;  %s12387_s26 = smov (%p36_p0, %s35_s26), 0 }
  0x10   : > { %11992 = sst [smem:[#allocation7_spill]] %s12387_s26  ;;  %s12389_s27 = smov (!%p36_p0, %s38_s27), %s7364_s24 }
  0x11   : > { %p583_p3 = pnand %p6135_p1, %p582_p2  ;;  %p40_p4 = scmp.ge.s32.totalorder %s12389_s27, 2 }
  0x13   : > { %s12391_s27 = smov (%p40_p4, %s12389_s27), 0  ;;  %586 = sbr.rel (%p583_p3) target bundleno = 3155 (0xc53), region = 84 }
  0x14   : > { %11993 = sst [smem:[#allocation8_spill]] %s12391_s27 }
  0x18   : > { %s6136_s28 = sshll.u32 %s7356_s22, 2  ;;  %p687_p5 = scmp.lt.s32.totalorder %s7352_s21, 1 }
  0x19   : > { %p681_p6 = scmp.lt.s32.totalorder %s6136_s28, 7  ;;  %s11996_s23 = sld [smem:[#allocation46_spill]] }
  0x1a   : > { %s7492_s29 = scalar_select %p687_p5, %s7352_s21, 1 }
  0x1b   : > { %s12393_s28 = smov (!%p681_p6, %s6136_s28), 7  ;;  %s11997_s6 = sld [smem:[#allocation52_spill]] }
  0x1c   : > { %s6634_s22 = sshll.u32 %s12393_s28, 5  ;;  %s6735_s27 = smul.u32 192, %s7492_s29 }
  0x1d   : > { %s6736_s1 = smul.u32 3, %s7492_s29  ;;  %s6635_s30 = sshll.u32 %s7492_s29, 6 }
  0x1e   : > { %s11998_s7 = sld [smem:[#allocation53_spill]]  ;;  %s7539_s17 = scalar_lea.vmem %s11918_s11, %s7492_s29 }
  0x1f   : > { %s7506_s25 = scalar_lea.vmem %s11996_s23, %s6634_s22  ;;  %s11999_s8 = sld [smem:[#allocation54_spill]] }
  0x20   : > { %s12000_s10 = sld [smem:[#allocation55_spill]]  ;;  %s6144_s28 = sshll.u32 %s7492_s29, 2 }
  0x21   : > { %s7512_s21 = scalar_lea.vmem %s11997_s6, %s6735_s27  ;;  %s7551_s23 = scalar_lea.vmem %s11920_s13, %s6144_s28 }
  0x22   : > { %s7565_s6 = scalar_lea.vmem %s11923_s16, %s6634_s22  ;;  %s12001_s0 = sld [smem:[#allocation3_spill]] }
  0x24   : > { %s7518_s18 = scalar_lea.vmem %s11998_s7, %s6736_s1  ;;  %s6636_s1 = sshll.u32 %s7492_s29, 8 }
  0x25   : > { %s7523_s20 = scalar_lea.vmem %s11999_s8, %s6635_s30  ;;  %s7545_s30 = scalar_lea.vmem %s11919_s12, %s6636_s1 }
  0x26   : > { %s7533_s2 = scalar_lea.vmem %s12000_s10, %s7492_s29  ;;  %s7556_s26 = scalar_lea.vmem %s11921_s14, %s6636_s1 }
  0x27   : > { %s732_s7 = scalar_lea.vmem %s11922_s15, %s7492_s29 }
  0x28   : > { %p6150_p7 = scmp.ne.s32.totalorder %s12001_s0, 0 }
  0x29   : > { %s12003_s28 = sld [smem:[#allocation49_spill]] (!%p6150_p7) }
  0x2a   : > { %744 = sbr.rel (%p6150_p7) target bundleno = 364 (0x16c), region = 88 }
  0x2f   : > { %v7569_v0 = vld [vmem:[%s7506_s25 + $0x20] sm:$0xff]  ;;  %v747_v1 = vld [vmem:[%s7506_s25 + $0x10] sm:$0xff]  ;;  %v750_v3 = vld [vmem:[%s7506_s25 + $0x28] sm:$0xff]  ;;  %v7370_v16 = vmov 128.0  }
  0x30   : > { %v745_v2 = vld [vmem:[%s7506_s25] sm:$0xff]  ;;  %771 = vadd.xlane.f32.xlu2 %v7569_v0  ;;  %767 = vadd.xlane.f32.xlu1 %v747_v1  ;;  %v748_v4 = vld [vmem:[%s7506_s25 + $0x18] sm:$0xff]  ;;  %v746_v5 = vld [vmem:[%s7506_s25 + $0x8] sm:$0xff]  ;;  %6782 = vrcp.f32 %v7370_v16 }
  0x31   : > { %763 = vadd.xlane.f32.xlu0 %v745_v2  ;;  %v753_v6 = vld [vmem:[%s7506_s25 + $0x40] sm:$0xff]  ;;  %v7579_v7 = vld [vmem:[%s7506_s25 + $0x38] sm:$0xff]  ;;  %v751_v8 = vld [vmem:[%s7506_s25 + $0x30] sm:$0xff] }
  0x32   : > { %v7584_v9 = vld [vmem:[%s7506_s25 + $0x58] sm:$0xff]  ;;  %v7587_v10 = vld [vmem:[%s7506_s25 + $0x50] sm:$0xff]  ;;  %v7590_v11 = vld [vmem:[%s7506_s25 + $0x48] sm:$0xff] }
  0x33   : > { %v7596_v12 = vld [vmem:[%s7506_s25 + $0x70] sm:$0xff]  ;;  %v7599_v13 = vld [vmem:[%s7506_s25 + $0x68] sm:$0xff]  ;;  %v7602_v14 = vld [vmem:[%s7506_s25 + $0x60] sm:$0xff] }
  0x34   : > { %v7608_v15 = vld [vmem:[%s7506_s25 + $0x78] sm:$0xff]  ;;  %s12002_s25 = sld [smem:[#allocation48_spill]] }
  0x36   : > { %v6783_v17 = vpop.eup %6782 }
  0x37   : > { %v796_v18 = vmul.f32 128.0, %v6783_v17  ;;  %vm800_vm0 = vweird.f32 %v6783_v17 }
  0x38   : > { %773 = vadd.xlane.f32.xlu2 %v750_v3  ;;  %769 = vadd.xlane.f32.xlu1 %v748_v4 }
  0x39   : > { %765 = vadd.xlane.f32.xlu0 %v746_v5  ;;  %v797_v19 = vsub.f32 1.0, %v796_v18 }
  0x3b   : > { %v798_v20 = vmul.f32 %v6783_v17, %v797_v19 }
  0x3d   : > { %v799_v21 = vadd.f32 %v6783_v17, %v798_v20 }
  0x3f   : > { %v7611_v22 = vsel %vm800_vm0, %v6783_v17, %v799_v21 }
  0x40   : > { %779 = vadd.xlane.f32.xlu2 %v753_v6  ;;  %777 = vadd.xlane.f32.xlu1 %v7579_v7 }
  0x41   : > { %775 = vadd.xlane.f32.xlu0 %v751_v8 }
  0x48   : > { %785 = vadd.xlane.f32.xlu2 %v7584_v9  ;;  %783 = vadd.xlane.f32.xlu1 %v7587_v10 }
  0x49   : > { %781 = vadd.xlane.f32.xlu0 %v7590_v11 }
  0x50   : > { %791 = vadd.xlane.f32.xlu2 %v7596_v12  ;;  %789 = vadd.xlane.f32.xlu1 %v7599_v13 }
  0x51   : > { %787 = vadd.xlane.f32.xlu0 %v7602_v14 }
  0x59   : > { %793 = vadd.xlane.f32.xlu0 %v7608_v15 }
  0xa3   : > { %v772_v23 = vpop.xlane.xlu2 %771  ;;  %v768_v24 = vpop.xlane.xlu1 %767 }
  0xa4   : > { %v804_v25 = vmul.f32 %v7611_v22, %v768_v24  ;;  %v764_v26 = vpop.xlane.xlu0 %763  ;;  %v806_v43 = vmul.f32 %v7611_v22, %v772_v23 }
  0xa5   : > { %v802_v27 = vmul.f32 %v7611_v22, %v764_v26 }
  0xa6   : > { %v7615_v28 = vsub.f32 %v747_v1, %v804_v25  ;;  %v7641_v49 = vsub.f32 %v7569_v0, %v806_v43 }
  0xa7   : > { %v7617_v29 = vsub.f32 %v745_v2, %v802_v27 }
  0xa8   : > { %v836_v30 = vmul.f32 %v7615_v28, %v7615_v28  ;;  %v838_v55 = vmul.f32 %v7641_v49, %v7641_v49 }
  0xa9   : > { %v834_v31 = vmul.f32 %v7617_v29, %v7617_v29 }
  0xaa   : > { %854 = vadd.xlane.f32.xlu0 %v836_v30 }
  0xab   : > { %850 = vadd.xlane.f32.xlu1 %v834_v31  ;;  %v774_v32 = vpop.xlane.xlu2 %773  ;;  %v770_v33 = vpop.xlane.xlu1 %769 }
  0xac   : > { %v807_v34 = vmul.f32 %v7611_v22, %v774_v32  ;;  %v805_v35 = vmul.f32 %v7611_v22, %v770_v33  ;;  %v766_v36 = vpop.xlane.xlu0 %765 }
  0xad   : > { %v803_v37 = vmul.f32 %v7611_v22, %v766_v36 }
  0xae   : > { %v7626_v38 = vsub.f32 %v750_v3, %v807_v34  ;;  %v7628_v39 = vsub.f32 %v748_v4, %v805_v35 }
  0xaf   : > { %v7630_v40 = vsub.f32 %v746_v5, %v803_v37 }
  0xb0   : > { %v839_v41 = vmul.f32 %v7626_v38, %v7626_v38  ;;  %v837_v42 = vmul.f32 %v7628_v39, %v7628_v39 }
  0xb1   : > { %v835_v44 = vmul.f32 %v7630_v40, %v7630_v40 }
  0xb2   : > { %860 = vadd.xlane.f32.xlu0 %v839_v41 }
  0xb3   : > { %856 = vadd.xlane.f32.xlu1 %v837_v42  ;;  %852 = vadd.xlane.f32.xlu2 %v835_v44  ;;  %v780_v45 = vpop.xlane.xlu2 %779  ;;  %v778_v46 = vpop.xlane.xlu1 %777 }
  0xb4   : > { %v810_v47 = vmul.f32 %v7611_v22, %v780_v45  ;;  %v776_v48 = vpop.xlane.xlu0 %775  ;;  %v809_v53 = vmul.f32 %v7611_v22, %v778_v46 }
  0xb5   : > { %v808_v50 = vmul.f32 %v7611_v22, %v776_v48 }
  0xb6   : > { %v7644_v51 = vsub.f32 %v753_v6, %v810_v47  ;;  %v7656_v58 = vsub.f32 %v7579_v7, %v809_v53 }
  0xb7   : > { %v7646_v52 = vsub.f32 %v751_v8, %v808_v50 }
  0xb8   : > { %v842_v54 = vmul.f32 %v7644_v51, %v7644_v51  ;;  %v841_v1 = vmul.f32 %v7656_v58, %v7656_v58 }
  0xb9   : > { %v840_v56 = vmul.f32 %v7646_v52, %v7646_v52 }
  0xba   : > { %866 = vadd.xlane.f32.xlu0 %v842_v54 }
  0xbb   : > { %858 = vadd.xlane.f32.xlu2 %v838_v55  ;;  %862 = vadd.xlane.f32.xlu1 %v840_v56  ;;  %v786_v57 = vpop.xlane.xlu2 %785  ;;  %v784_v59 = vpop.xlane.xlu1 %783 }
  0xbc   : > { %v813_v60 = vmul.f32 %v7611_v22, %v786_v57  ;;  %v782_v61 = vpop.xlane.xlu0 %781  ;;  %v812_v2 = vmul.f32 %v7611_v22, %v784_v59 }
  0xbd   : > { %v811_v62 = vmul.f32 %v7611_v22, %v782_v61 }
  0xbe   : > { %v7661_v63 = vsub.f32 %v7584_v9, %v813_v60  ;;  %v7674_v6 = vsub.f32 %v7587_v10, %v812_v2 }
  0xbf   : > { %v7664_v0 = vsub.f32 %v7590_v11, %v811_v62 }
  0xc0   : > { %v845_v3 = vmul.f32 %v7661_v63, %v7661_v63  ;;  %v844_v18 = vmul.f32 %v7674_v6, %v7674_v6 }
  0xc1   : > { %v843_v4 = vmul.f32 %v7664_v0, %v7664_v0 }
  0xc2   : > { %872 = vadd.xlane.f32.xlu0 %v845_v3 }
  0xc3   : > { %864 = vadd.xlane.f32.xlu2 %v841_v1  ;;  %868 = vadd.xlane.f32.xlu1 %v843_v4  ;;  %v792_v5 = vpop.xlane.xlu2 %791  ;;  %v790_v9 = vpop.xlane.xlu1 %789 }
  0xc4   : > { %v816_v7 = vmul.f32 %v7611_v22, %v792_v5  ;;  %v788_v8 = vpop.xlane.xlu0 %787  ;;  %v815_v19 = vmul.f32 %v7611_v22, %v790_v9  ;;  %v7732_v9 = vld [vmem:[%s12002_s25] ss:$0 sm:$0xff] }
  0xc5   : > { %v814_v11 = vmul.f32 %v7611_v22, %v788_v8 }
  0xc6   : > { %v7679_v16 = vsub.f32 %v7596_v12, %v816_v7  ;;  %v7692_v12 = vsub.f32 %v7599_v13, %v815_v19 }
  0xc7   : > { %v7682_v17 = vsub.f32 %v7602_v14, %v814_v11 }
  0xc8   : > { %v848_v10 = vmul.f32 %v7679_v16, %v7679_v16  ;;  %v847_v24 = vmul.f32 %v7692_v12, %v7692_v12 }
  0xc9   : > { %v846_v20 = vmul.f32 %v7682_v17, %v7682_v17 }
  0xca   : > { %878 = vadd.xlane.f32.xlu0 %v848_v10 }
  0xcb   : > { %870 = vadd.xlane.f32.xlu2 %v844_v18  ;;  %874 = vadd.xlane.f32.xlu1 %v846_v20 }
  0xcc   : > { %v794_v21 = vpop.xlane.xlu0 %793 }
  0xcd   : > { %v817_v14 = vmul.f32 %v7611_v22, %v794_v21 }
  0xcf   : > { %v7696_v23 = vsub.f32 %v7608_v15, %v817_v14 }
  0xd1   : > { %v849_v25 = vmul.f32 %v7696_v23, %v7696_v23 }
  0xd3   : > { %876 = vadd.xlane.f32.xlu2 %v847_v24  ;;  %880 = vadd.xlane.f32.xlu1 %v849_v25  ;;  %v7747_v24 = vld [vmem:[%s12003_s28] ss:$0 sm:$0xff] }
 0x11d   : > { %v855_v26 = vpop.xlane.xlu0 %854 }
 0x11e   : > { %v851_v27 = vpop.xlane.xlu1 %850  ;;  %v884_v30 = vmul.f32 %v855_v26, %v7611_v22 }
 0x11f   : > { %v882_v13 = vmul.f32 %v851_v27, %v7611_v22 }
 0x120   : > { %v900_v31 = vadd.f32 1e-05, %v884_v30 }
 0x121   : > { %v898_v32 = vadd.f32 1e-05, %v882_v13 }
 0x122   : > { %6784 = vrsqrt.f32 %v900_v31  ;;  %vm940_vm3 = vweird.f32 %v900_v31 }
 0x123   : > { %6786 = vrsqrt.f32 %v898_v32  ;;  %vm920_vm4 = vweird.f32 %v898_v32 }
 0x125   : > { %v861_v15 = vpop.xlane.xlu0 %860 }
 0x126   : > { %v857_v33 = vpop.xlane.xlu1 %856  ;;  %v853_v34 = vpop.xlane.xlu2 %852  ;;  %v887_v35 = vmul.f32 %v861_v15, %v7611_v22 }
 0x127   : > { %v885_v36 = vmul.f32 %v857_v33, %v7611_v22  ;;  %v883_v37 = vmul.f32 %v853_v34, %v7611_v22 }
 0x128   : > { %v6785_v41 = vpop.eup %6784  ;;  %v7707_v42 = vadd.f32 1e-05, %v887_v35 }
 0x129   : > { %v6787_v43 = vpop.eup %6786  ;;  %v935_v44 = vmul.f32 %v6785_v41, %v900_v31  ;;  %v7709_v45 = vadd.f32 1e-05, %v885_v36  ;;  %v7711_v46 = vadd.f32 1e-05, %v883_v37  ;;  %vm941_vm1 = vweird.f32 %v6785_v41 }
 0x12a   : > { %v915_v47 = vmul.f32 %v6787_v43, %v898_v32  ;;  %6788 = vrsqrt.f32 %v7707_v42  ;;  %vm921_vm2 = vweird.f32 %v6787_v43  ;;  %vm942_vm5 = vmor %vm940_vm3, %vm941_vm1  ;;  %vm970_vm7 = vweird.f32 %v7707_v42 }
 0x12b   : > { %v936_v48 = vmul.f32 %v6785_v41, %v935_v44  ;;  %6790 = vrsqrt.f32 %v7709_v45  ;;  %vm922_vm6 = vmor %vm920_vm4, %vm921_vm2  ;;  %vm950_vm11 = vweird.f32 %v7709_v45  ;;  %vm930_vm12 = vweird.f32 %v7711_v46 }
 0x12c   : > { %v916_v50 = vmul.f32 %v6787_v43, %v915_v47  ;;  %6792 = vrsqrt.f32 %v7711_v46 }
 0x12d   : > { %v937_v53 = vmul.f32 0.5, %v936_v48  ;;  %v867_v54 = vpop.xlane.xlu0 %866 }
 0x12e   : > { %v917_v55 = vmul.f32 0.5, %v916_v50  ;;  %v859_v56 = vpop.xlane.xlu2 %858  ;;  %v863_v57 = vpop.xlane.xlu1 %862  ;;  %v890_v62 = vmul.f32 %v867_v54, %v7611_v22 }
 0x12f   : > { %v938_v59 = vsub.f32 1.5, %v937_v53  ;;  %v886_v60 = vmul.f32 %v859_v56, %v7611_v22  ;;  %v888_v61 = vmul.f32 %v863_v57, %v7611_v22 }
 0x130   : > { %v7719_v1 = vpop.eup %6788  ;;  %v918_v2 = vsub.f32 1.5, %v917_v55  ;;  %v7742_v14 = vadd.f32 1e-05, %v890_v62 }
 0x131   : > { %v7721_v3 = vpop.eup %6790  ;;  %v939_v4 = vmul.f32 %v6785_v41, %v938_v59  ;;  %v965_v5 = vmul.f32 %v7719_v1, %v7707_v42  ;;  %v7725_v7 = vadd.f32 1e-05, %v886_v60  ;;  %v7737_v19 = vadd.f32 1e-05, %v888_v61 }
 0x132   : > { %v7727_v8 = vpop.eup %6792  ;;  %v919_v11 = vmul.f32 %v6787_v43, %v918_v2  ;;  %v945_v18 = vmul.f32 %v7721_v3, %v7709_v45  ;;  %vm971_vm8 = vweird.f32 %v7719_v1  ;;  %vm951_vm9 = vweird.f32 %v7721_v3 }
 0x133   : > { %v943_v10 = vsel %vm942_vm5, %v6785_v41, %v939_v4  ;;  %v925_v20 = vmul.f32 %v7727_v8, %v7711_v46  ;;  %v966_v21 = vmul.f32 %v7719_v1, %v965_v5  ;;  %6794 = vrsqrt.f32 %v7725_v7  ;;  %vm972_vm13 = vmor %vm970_vm7, %vm971_vm8 }
 0x134   : > { %v923_v25 = vsel %vm922_vm6, %v6787_v43, %v919_v11  ;;  %v1076_v26 = vmul.f32 %v943_v10, %v7615_v28  ;;  %v946_v27 = vmul.f32 %v7721_v3, %v945_v18  ;;  %6796 = vrsqrt.f32 %v7737_v19  ;;  %vm952_vm14 = vmor %vm950_vm11, %vm951_vm9 }
 0x135   : > { %v1074_v30 = vmul.f32 %v923_v25, %v7617_v29  ;;  %v926_v13 = vmul.f32 %v7727_v8, %v925_v20  ;;  %v967_v31 = vmul.f32 0.5, %v966_v21  ;;  %6798 = vrsqrt.f32 %v7742_v14  ;;  %v873_v48 = vpop.xlane.xlu0 %872 }
 0x136   : > { %v1095_v32 = vmul.f32 %v7732_v9, %v1076_v26  ;;  %v947_v15 = vmul.f32 0.5, %v946_v27  ;;  %v865_v33 = vpop.xlane.xlu2 %864  ;;  %v869_v41 = vpop.xlane.xlu1 %868  ;;  %vm931_vm10 = vweird.f32 %v7727_v8  ;;  %vm960_vm15 = vweird.f32 %v7725_v7 }
 0x137   : > { %v1093_v28 = vmul.f32 %v7732_v9, %v1074_v30  ;;  %v927_v34 = vmul.f32 0.5, %v926_v13  ;;  %v968_v35 = vsub.f32 1.5, %v967_v31  ;;  %v889_v37 = vmul.f32 %v865_v33, %v7611_v22  ;;  %vm932_vm0 = vmor %vm930_vm12, %vm931_vm10 }
 0x138   : > { %v1114_v29 = vadd.f32 %v7747_v24, %v1095_v32  ;;  %v948_v36 = vsub.f32 1.5, %v947_v15  ;;  %v891_v46 = vmul.f32 %v869_v41, %v7611_v22  ;;  %v893_v60 = vmul.f32 %v873_v48, %v7611_v22 }
 0x139   : > { %v1112_v43 = vadd.f32 %v7747_v24, %v1093_v28  ;;  %v928_v44 = vsub.f32 1.5, %v927_v34  ;;  %v969_v47 = vmul.f32 %v7719_v1, %v968_v35  ;;  %v7766_v50 = vpop.eup %6794  ;;  %v7775_v54 = vadd.f32 1e-05, %v889_v37 }
 0x13a   : > { %1130 = vst [vmem:[#allocation2 + $0x58] sm:$0xff] %v1114_v29  ;;  %v949_v53 = vmul.f32 %v7721_v3, %v948_v36  ;;  %v955_v45 = vmul.f32 %v7766_v50, %v7725_v7  ;;  %v7785_v57 = vpop.eup %6796  ;;  %vm980_vm1 = vweird.f32 %v7737_v19  ;;  %vm961_vm2 = vweird.f32 %v7766_v50 }
 0x13b   : > { %1128 = vst [vmem:[#allocation2 + $0x30] sm:$0xff] %v1112_v43  ;;  %v929_v55 = vmul.f32 %v7727_v8, %v928_v44  ;;  %v973_v56 = vsel %vm972_vm13, %v7719_v1, %v969_v47  ;;  %6800 = vrsqrt.f32 %v7775_v54  ;;  %v6799_v61 = vpop.eup %6798  ;;  %v975_v4 = vmul.f32 %v7785_v57, %v7737_v19  ;;  %vm962_vm5 = vmor %vm960_vm15, %vm961_vm2 }
 0x13c   : > { %v953_v42 = vsel %vm952_vm14, %v7721_v3, %v949_v53  ;;  %v1079_v59 = vmul.f32 %v973_v56, %v7626_v38  ;;  %v956_v2 = vmul.f32 %v7766_v50, %v955_v45  ;;  %v995_v38 = vmul.f32 %v6799_v61, %v7742_v14 }
 0x13d   : > { %v1077_v62 = vmul.f32 %v953_v42, %v7628_v39  ;;  %v933_v1 = vsel %vm932_vm0, %v7727_v8, %v929_v55  ;;  %v976_v39 = vmul.f32 %v7785_v57, %v975_v4  ;;  %v7810_v30 = vadd.f32 1e-05, %v893_v60  ;;  %v879_v36 = vpop.xlane.xlu0 %878 }
 0x13e   : > { %v1075_v3 = vmul.f32 %v933_v1, %v7630_v40  ;;  %v1098_v5 = vmul.f32 %v7732_v9, %v1079_v59  ;;  %v871_v11 = vpop.xlane.xlu2 %870  ;;  %v957_v10 = vmul.f32 0.5, %v956_v2  ;;  %v996_v21 = vmul.f32 %v6799_v61, %v995_v38  ;;  %v875_v15 = vpop.xlane.xlu1 %874 }
 0x13f   : > { %v1096_v18 = vmul.f32 %v7732_v9, %v1077_v62  ;;  %v7807_v40 = vadd.f32 1e-05, %v891_v46  ;;  %v977_v27 = vmul.f32 0.5, %v976_v39  ;;  %vm1000_vm3 = vweird.f32 %v7742_v14 }
 0x140   : > { %v1094_v8 = vmul.f32 %v7732_v9, %v1075_v3  ;;  %v1117_v20 = vadd.f32 %v7747_v24, %v1098_v5  ;;  %v958_v26 = vsub.f32 1.5, %v957_v10  ;;  %v997_v32 = vmul.f32 0.5, %v996_v21 }
 0x141   : > { %v1115_v25 = vadd.f32 %v7747_v24, %v1096_v18  ;;  %v7812_v13 = vpop.eup %6800  ;;  %6802 = vrsqrt.f32 %v7807_v40  ;;  %v978_v28 = vsub.f32 1.5, %v977_v27  ;;  %vm981_vm4 = vweird.f32 %v7785_v57 }
 0x142   : > { %v1113_v31 = vadd.f32 %v7747_v24, %v1094_v8  ;;  %1133 = vst [vmem:[#allocation2 + $0x68] sm:$0xff] %v1117_v20  ;;  %v959_v33 = vmul.f32 %v7766_v50, %v958_v26  ;;  %v985_v34 = vmul.f32 %v7812_v13, %v7775_v54  ;;  %v998_v35 = vsub.f32 1.5, %v997_v32  ;;  %vm982_vm7 = vmor %vm980_vm1, %vm981_vm4 }
 0x143   : > { %1131 = vst [vmem:[#allocation2 + $0x18] sm:$0xff] %v1115_v25  ;;  %vm1001_vm6 = vweird.f32 %v6799_v61  ;;  %6804 = vrsqrt.f32 %v7810_v30  ;;  %v892_v29 = vmul.f32 %v871_v11, %v7611_v22  ;;  %v979_v41 = vmul.f32 %v7785_v57, %v978_v28 }
 0x144   : > { %1129 = vst [vmem:[#allocation2] sm:$0xff] %v1113_v31  ;;  %v963_v37 = vsel %vm962_vm5, %v7766_v50, %v959_v33  ;;  %v986_v43 = vmul.f32 %v7812_v13, %v985_v34  ;;  %v894_v44 = vmul.f32 %v875_v15, %v7611_v22  ;;  %v999_v7 = vmul.f32 %v6799_v61, %v998_v35  ;;  %vm1002_vm9 = vmor %vm1000_vm3, %vm1001_vm6 }
 0x145   : > { %v1078_v47 = vmul.f32 %v963_v37, %v7641_v49  ;;  %vm990_vm8 = vweird.f32 %v7775_v54  ;;  %v7835_v48 = vadd.f32 1e-05, %v892_v29  ;;  %v983_v53 = vsel %vm982_vm7, %v7785_v57, %v979_v41 }
 0x146   : > { %v987_v50 = vmul.f32 0.5, %v986_v43  ;;  %v7840_v55 = vadd.f32 1e-05, %v894_v44  ;;  %v896_v56 = vmul.f32 %v879_v36, %v7611_v22  ;;  %v877_v45 = vpop.xlane.xlu2 %876  ;;  %v1080_v46 = vmul.f32 %v983_v53, %v7646_v52  ;;  %v881_v39 = vpop.xlane.xlu1 %880 }
 0x147   : > { %v6803_v49 = vpop.eup %6802  ;;  %v1097_v19 = vmul.f32 %v7732_v9, %v1078_v47  ;;  %v1003_v42 = vsel %vm1002_vm9, %v6799_v61, %v999_v7  ;;  %6806 = vrsqrt.f32 %v7835_v48  ;;  %vm991_vm10 = vweird.f32 %v7812_v13 }
 0x148   : > { %v1082_v59 = vmul.f32 %v1003_v42, %v7644_v51  ;;  %v988_v57 = vsub.f32 1.5, %v987_v50  ;;  %v1005_v14 = vmul.f32 %v6803_v49, %v7807_v40  ;;  %v1099_v1 = vmul.f32 %v7732_v9, %v1080_v46  ;;  %vm992_vm11 = vmor %vm990_vm8, %vm991_vm10 }
 0x149   : > { %v6805_v60 = vpop.eup %6804  ;;  %v1116_v62 = vadd.f32 %v7747_v24, %v1097_v19  ;;  %6808 = vrsqrt.f32 %v7840_v55  ;;  %v895_v2 = vmul.f32 %v877_v45, %v7611_v22  ;;  %vm1010_vm12 = vweird.f32 %v7807_v40 }
 0x14a   : > { %v1101_v52 = vmul.f32 %v7732_v9, %v1082_v59  ;;  %v989_v61 = vmul.f32 %v7812_v13, %v988_v57  ;;  %v1006_v4 = vmul.f32 %v6803_v49, %v1005_v14  ;;  %v1025_v51 = vmul.f32 %v6805_v60, %v7810_v30 }
 0x14b   : > { %1132 = vst [vmem:[#allocation2 + $0x50] sm:$0xff] %v1116_v62  ;;  %v1118_v3 = vadd.f32 %v7747_v24, %v1099_v1  ;;  %v7860_v5 = vadd.f32 1e-05, %v896_v56  ;;  %vm1030_vm13 = vweird.f32 %v7810_v30  ;;  %v7867_v54 = vadd.f32 1e-05, %v895_v2 }
 0x14c   : > { %v1120_v38 = vadd.f32 %v7747_v24, %v1101_v52  ;;  %v993_v11 = vsel %vm992_vm11, %v7812_v13, %v989_v61  ;;  %v1007_v18 = vmul.f32 0.5, %v1006_v4  ;;  %v1026_v10 = vmul.f32 %v6805_v60, %v1025_v51 }
 0x14d   : > { %v6807_v8 = vpop.eup %6806  ;;  %1134 = vst [vmem:[#allocation2 + $0x8] sm:$0xff] %v1118_v3  ;;  %v1081_v20 = vmul.f32 %v993_v11, %v7656_v58  ;;  %6810 = vrsqrt.f32 %v7860_v5  ;;  %vm1011_vm14 = vweird.f32 %v6803_v49  ;;  %vm1031_vm15 = vweird.f32 %v6805_v60 }
 0x14e   : > { %1136 = vst [vmem:[#allocation2 + $0x40] sm:$0xff] %v1120_v38  ;;  %v1008_v21 = vsub.f32 1.5, %v1007_v18  ;;  %v1027_v25 = vmul.f32 0.5, %v1026_v10  ;;  %v1015_v26 = vmul.f32 %v6807_v8, %v7835_v48  ;;  %6812 = vrsqrt.f32 %v7867_v54  ;;  %vm1012_vm0 = vmor %vm1010_vm12, %vm1011_vm14 }
 0x14f   : > { %v6809_v27 = vpop.eup %6808  ;;  %v1100_v13 = vmul.f32 %v7732_v9, %v1081_v20  ;;  %v897_v58 = vmul.f32 %v881_v39, %v7611_v22  ;;  %vm1032_vm1 = vmor %vm1030_vm13, %vm1031_vm15  ;;  %vm1021_vm2 = vweird.f32 %v6807_v8  ;;  %vm1020_vm3 = vweird.f32 %v7835_v48 }
 0x150   : > { %v1009_v31 = vmul.f32 %v6803_v49, %v1008_v21  ;;  %v1028_v32 = vsub.f32 1.5, %v1027_v25  ;;  %v1016_v15 = vmul.f32 %v6807_v8, %v1015_v26  ;;  %v1035_v33 = vmul.f32 %v6809_v27, %v7840_v55  ;;  %vm1022_vm5 = vmor %vm1020_vm3, %vm1021_vm2 }
 0x151   : > { %v1119_v28 = vadd.f32 %v7747_v24, %v1100_v13  ;;  %v7877_v34 = vadd.f32 1e-05, %v897_v58  ;;  %vm1041_vm4 = vweird.f32 %v6809_v27  ;;  %vm1040_vm6 = vweird.f32 %v7840_v55 }
 0x152   : > { %v1013_v35 = vsel %vm1012_vm0, %v6803_v49, %v1009_v31  ;;  %v1029_v29 = vmul.f32 %v6805_v60, %v1028_v32  ;;  %v1017_v36 = vmul.f32 0.5, %v1016_v15  ;;  %v1036_v37 = vmul.f32 %v6809_v27, %v1035_v33  ;;  %vm1042_vm7 = vmor %vm1040_vm6, %vm1041_vm4 }
 0x153   : > { %v6811_v41 = vpop.eup %6810  ;;  %1135 = vst [vmem:[#allocation2 + $0x48] sm:$0xff] %v1119_v28  ;;  %v1083_v22 = vmul.f32 %v1013_v35, %v7664_v0  ;;  %6814 = vrsqrt.f32 %v7877_v34  ;;  %vm1060_vm8 = vweird.f32 %v7860_v5  ;;  %vm1050_vm12 = vweird.f32 %v7867_v54 }
 0x154   : > { %v1033_v43 = vsel %vm1032_vm1, %v6805_v60, %v1029_v29  ;;  %v1018_v40 = vsub.f32 1.5, %v1017_v36  ;;  %v1037_v44 = vmul.f32 0.5, %v1036_v37  ;;  %v1055_v47 = vmul.f32 %v6811_v41, %v7860_v5  ;;  %v6813_v7 = vpop.eup %6812 }
 0x155   : > { %v1102_v53 = vmul.f32 %v7732_v9, %v1083_v22  ;;  %v1085_v50 = vmul.f32 %v1033_v43, %v7661_v63  ;;  %v1045_v45 = vmul.f32 %v6813_v7, %v7867_v54  ;;  %vm1061_vm9 = vweird.f32 %v6811_v41 }
 0x156   : > { %v1019_v0 = vmul.f32 %v6807_v8, %v1018_v40  ;;  %v1038_v56 = vsub.f32 1.5, %v1037_v44  ;;  %v1056_v30 = vmul.f32 %v6811_v41, %v1055_v47  ;;  %vm1051_vm10 = vweird.f32 %v6813_v7  ;;  %vm1062_vm11 = vmor %vm1060_vm8, %vm1061_vm9 }
 0x157   : > { %v1121_v49 = vadd.f32 %v7747_v24, %v1102_v53  ;;  %v1104_v19 = vmul.f32 %v7732_v9, %v1085_v50  ;;  %v1046_v63 = vmul.f32 %v6813_v7, %v1045_v45  ;;  %vm1052_vm13 = vmor %vm1050_vm12, %vm1051_vm10  ;;  %vm1070_vm15 = vweird.f32 %v7877_v34 }
 0x158   : > { %v1023_v46 = vsel %vm1022_vm5, %v6807_v8, %v1019_v0  ;;  %v1039_v42 = vmul.f32 %v6809_v27, %v1038_v56  ;;  %v1057_v59 = vmul.f32 0.5, %v1056_v30 }
 0x159   : > { %v6815_v57 = vpop.eup %6814  ;;  %1137 = vst [vmem:[#allocation2 + $0x20] sm:$0xff] %v1121_v49  ;;  %v1123_v48 = vadd.f32 %v7747_v24, %v1104_v19  ;;  %v1084_v14 = vmul.f32 %v1023_v46, %v7674_v6  ;;  %v1047_v1 = vmul.f32 0.5, %v1046_v63 }
 0x15a   : > { %v1043_v60 = vsel %vm1042_vm7, %v6809_v27, %v1039_v42  ;;  %v1058_v62 = vsub.f32 1.5, %v1057_v59  ;;  %v1065_v55 = vmul.f32 %v6815_v57, %v7877_v34  ;;  %vm1071_vm14 = vweird.f32 %v6815_v57 }
 0x15b   : > { %1139 = vst [vmem:[#allocation2 + $0x38] sm:$0xff] %v1123_v48  ;;  %v1103_v2 = vmul.f32 %v7732_v9, %v1084_v14  ;;  %v1086_v52 = vmul.f32 %v1043_v60, %v7682_v17  ;;  %v1048_v4 = vsub.f32 1.5, %v1047_v1  ;;  %vm1072_vm0 = vmor %vm1070_vm15, %vm1071_vm14 }
 0x15c   : > { %v1059_v61 = vmul.f32 %v6811_v41, %v1058_v62  ;;  %v1066_v51 = vmul.f32 %v6815_v57, %v1065_v55 }
 0x15d   : > { %v1122_v6 = vadd.f32 %v7747_v24, %v1103_v2  ;;  %v1105_v3 = vmul.f32 %v7732_v9, %v1086_v52  ;;  %v1049_v11 = vmul.f32 %v6813_v7, %v1048_v4 }
 0x15e   : > { %v1063_v38 = vsel %vm1062_vm11, %v6811_v41, %v1059_v61  ;;  %v1067_v18 = vmul.f32 0.5, %v1066_v51 }
 0x15f   : > { %1138 = vst [vmem:[#allocation2 + $0x10] sm:$0xff] %v1122_v6  ;;  %v1124_v10 = vadd.f32 %v7747_v24, %v1105_v3  ;;  %v1088_v17 = vmul.f32 %v1063_v38, %v7679_v16  ;;  %v1053_v39 = vsel %vm1052_vm13, %v6813_v7, %v1049_v11 }
 0x160   : > { %v1068_v8 = vsub.f32 1.5, %v1067_v18  ;;  %v1087_v5 = vmul.f32 %v1053_v39, %v7692_v12 }
 0x161   : > { %1140 = vst [vmem:[#allocation2 + $0x60] sm:$0xff] %v1124_v10  ;;  %v1107_v20 = vmul.f32 %v7732_v9, %v1088_v17 }
 0x162   : > { %v1069_v21 = vmul.f32 %v6815_v57, %v1068_v8  ;;  %v1106_v25 = vmul.f32 %v7732_v9, %v1087_v5 }
 0x163   : > { %v1126_v54 = vadd.f32 %v7747_v24, %v1107_v20 }
 0x164   : > { %v1073_v26 = vsel %vm1072_vm0, %v6815_v57, %v1069_v21  ;;  %v1125_v16 = vadd.f32 %v7747_v24, %v1106_v25 }
 0x165   : > { %1142 = vst [vmem:[#allocation2 + $0x78] sm:$0xff] %v1126_v54  ;;  %v1089_v27 = vmul.f32 %v1073_v26, %v7696_v23 }
 0x166   : > { %1141 = vst [vmem:[#allocation2 + $0x70] sm:$0xff] %v1125_v16 }
 0x167   : > { %v1108_v13 = vmul.f32 %v7732_v9, %v1089_v27 }
 0x169   : > { %v1127_v58 = vadd.f32 %v7747_v24, %v1108_v13 }
 0x16b   : > { %1143 = vst [vmem:[#allocation2 + $0x28] sm:$0xff] %v1127_v58 }
 0x16c PF: > { %v1146_v12 = vld [vmem:[#allocation2 + $0x58] sm:$0xff]  ;;  %v1144_v31 = vld [vmem:[#allocation2 + $0x30] sm:$0xff]  ;;  %v1145_v33 = vld [vmem:[#allocation2] sm:$0xff]  ;;  %v7371_v34 = vmov 128.0   ;;  %s12008_s24 = sld [smem:[#allocation50_spill]]  ;;  %s12022_s3 = scalar_lea.vmem %s11916_s9, %s7492_s29 }
 0x16d   : > { %1166 = vadd.xlane.f32.xlu1 %v1146_v12  ;;  %1162 = vadd.xlane.f32.xlu0 %v1144_v31  ;;  %v1148_v32 = vld [vmem:[#allocation2 + $0x50] sm:$0xff]  ;;  %v1147_v15 = vld [vmem:[#allocation2 + $0x18] sm:$0xff]  ;;  %v1149_v28 = vld [vmem:[#allocation2 + $0x68] sm:$0xff]  ;;  %6862 = vrcp.f32 %v7371_v34  ;;  %s12010_s27 = sld [smem:[#allocation51_spill]] }
 0x16e   : > { %1170 = vadd.xlane.f32.xlu2 %v1148_v32  ;;  %v1150_v23 = vld [vmem:[#allocation2 + $0x8] sm:$0xff]  ;;  %v7945_v60 = vld [vmem:[#allocation2 + $0x40] sm:$0xff]  ;;  %v7955_v61 = vld [vmem:[#allocation2 + $0x38] sm:$0xff]  ;;  %s12020_s25 = sld [smem:[#allocation47_spill]] }
 0x16f   : > { %v7931_v19 = vld [vmem:[#allocation2 + $0x48] sm:$0xff]  ;;  %v7957_v4 = vld [vmem:[#allocation2 + $0x20] sm:$0xff]  ;;  %v7967_v38 = vld [vmem:[#allocation2 + $0x10] sm:$0xff] }
 0x170   : > { %v7965_v3 = vld [vmem:[#allocation2 + $0x60] sm:$0xff]  ;;  %v7971_v11 = vld [vmem:[#allocation2 + $0x70] sm:$0xff]  ;;  %v7974_v18 = vld [vmem:[#allocation2 + $0x78] sm:$0xff] }
 0x171   : > { %v6237_v10 = vld [vmem:[%s7512_s21 + $0xa8] sm:$0xf]  ;;  %v6661_v17 = vld [vmem:[%s7512_s21 + $0xb0] sm:$0xf0]  ;;  %v6660_v39 = vld [vmem:[%s7512_s21 + $0xac] sm:$0xf] }
 0x172   : > { %v6238_v8 = vor.u32 %v6661_v17, %v6237_v10  ;;  %v6239_v20 = vld [vmem:[%s7512_s21 + $0xb4] sm:$0xf0]  ;;  %v6245_v5 = vld [vmem:[%s7512_s21 + $0xb0] sm:$0xf]  ;;  %v6662_v21 = vld [vmem:[%s7512_s21 + $0xb8] sm:$0xf0]  ;;  %s12009_s4 = scalar_lea.vmem %s12008_s24, %s7492_s29 }
 0x173   : > { %v6863_v9 = vpop.eup %6862  ;;  %v6242_v54 = vor.u32 %v6660_v39, %v6239_v20  ;;  %v6246_v25 = vor.u32 %v6662_v21, %v6245_v5  ;;  %v6225_v26 = vld [vmem:[%s7512_s21 + $0x90] sm:$0xf]  ;;  %v6658_v16 = vld [vmem:[%s7512_s21 + $0x98] sm:$0xf0]  ;;  %v6657_v27 = vld [vmem:[%s7512_s21 + $0x94] sm:$0xf]  ;;  %s12011_s0 = scalar_lea.vmem %s12010_s27, %s7492_s29 }
 0x174   : > { %v1195_v24 = vmul.f32 128.0, %v6863_v9  ;;  %vm1199_vm1 = vweird.f32 %v6863_v9  ;;  %1703 = vmatpush.bf16.msra.mxu0 %v6238_v8  ;;  %v6226_v13 = vor.u32 %v6658_v16, %v6225_v26  ;;  %v6227_v58 = vld [vmem:[%s7512_s21 + $0x9c] sm:$0xf0]  ;;  %v6185_v39 = vld [vmem:[%s7512_s21 + $0x38] sm:$0xf]  ;;  %s12021_s1 = smov %s12020_s25 }
 0x175   : > { %1168 = vadd.xlane.f32.xlu1 %v1147_v15  ;;  %1164 = vadd.xlane.f32.xlu0 %v1145_v33  ;;  %v6179_v17 = vld [vmem:[%s7512_s21 + $0x3c] sm:$0xf0]  ;;  %v6647_v8 = vld [vmem:[%s7512_s21 + $0x40] sm:$0xf0]  ;;  %v6165_v21 = vld [vmem:[%s7512_s21 + $0x18] sm:$0xf] }
 0x176   : > { %1172 = vadd.xlane.f32.xlu2 %v1149_v28  ;;  %v1196_v35 = vsub.f32 1.0, %v1195_v24  ;;  %1752 = vmatpush.bf16.msra.mxu1 %v6242_v54  ;;  %v6221_v24 = vld [vmem:[%s7512_s21 + $0x80] sm:$0xf]  ;;  %v6186_v5 = vor.u32 %v6647_v8, %v6185_v39  ;;  %v6643_v54 = vld [vmem:[%s7512_s21 + $0x20] sm:$0xf0] }
 0x177   : > { %1801 = vmatpush.bf16.msra.mxu2 %v6246_v25  ;;  %v6642_v25 = vld [vmem:[%s7512_s21 + $0x1c] sm:$0xf]  ;;  %v6166_v16 = vor.u32 %v6643_v54, %v6165_v21 }
 0x178   : > { %v1197_v29 = vmul.f32 %v6863_v9, %v1196_v35  ;;  %1704 = vmatpush.bf16.msra.mxu0 %v6226_v13  ;;  %v6656_v35 = vld [vmem:[%s7512_s21 + $0x88] sm:$0xf0]  ;;  %v6173_v13 = vld [vmem:[%s7512_s21 + $0x20] sm:$0xf] }
 0x17a   : > { %v1198_v36 = vadd.f32 %v6863_v9, %v1197_v29 }
 0x17c   : > { %v7916_v37 = vsel %vm1199_vm1, %v6863_v9, %v1198_v36  ;;  %v6215_v9 = vld [vmem:[%s7512_s21 + $0x84] sm:$0xf0]  ;;  %v6222_v36 = vor.u32 %v6656_v35, %v6221_v24 }
 0x17d   : > { %v6161_v24 = vld [vmem:[%s7512_s21 + $0x8] sm:$0xf] }
 0x17e   : > { %1174 = vadd.xlane.f32.xlu2 %v1150_v23 }
 0x1e0   : > { %v1167_v41 = vpop.xlane.xlu1 %1166  ;;  %v1163_v22 = vpop.xlane.xlu0 %1162 }
 0x1e1   : > { %v1201_v43 = vmul.f32 %v7916_v37, %v1163_v22  ;;  %v1171_v44 = vpop.xlane.xlu2 %1170  ;;  %v1203_v49 = vmul.f32 %v7916_v37, %v1167_v41  ;;  %v6201_v41 = vld [vmem:[%s7512_s21 + $0x60] sm:$0xf]  ;;  %v6652_v22 = vld [vmem:[%s7512_s21 + $0x68] sm:$0xf0] }
 0x1e2   : > { %v1205_v45 = vmul.f32 %v7916_v37, %v1171_v44  ;;  %v6202_v44 = vor.u32 %v6652_v22, %v6201_v41 }
 0x1e3   : > { %v7919_v40 = vsub.f32 %v1144_v31, %v1201_v43  ;;  %v7940_v57 = vsub.f32 %v1146_v12, %v1203_v49  ;;  %v6233_v12 = vld [vmem:[%s7512_s21 + $0x98] sm:$0xf]  ;;  %v6659_v31 = vld [vmem:[%s7512_s21 + $0xa0] sm:$0xf0]  ;;  %v6649_v49 = vld [vmem:[%s7512_s21 + $0x50] sm:$0xf0] }
 0x1e4   : > { %v7938_v63 = vsub.f32 %v1148_v32, %v1205_v45  ;;  %v6230_v32 = vor.u32 %v6657_v27, %v6227_v58  ;;  %v6651_v43 = vld [vmem:[%s7512_s21 + $0x64] sm:$0xf]  ;;  %v6189_v45 = vld [vmem:[%s7512_s21 + $0x48] sm:$0xf] }
 0x1e5   : > { %v1233_v47 = vmul.f32 %v7919_v40, %v7919_v40  ;;  %v1235_v62 = vmul.f32 %v7940_v57, %v7940_v57  ;;  %v6167_v27 = vld [vmem:[%s7512_s21 + $0x24] sm:$0xf0] }
 0x1e6   : > { %v1237_v48 = vmul.f32 %v7938_v63, %v7938_v63  ;;  %1753 = vmatpush.bf16.msra.mxu1 %v6230_v32 }
 0x1e7   : > { %1249 = vadd.xlane.f32.xlu0 %v1233_v47  ;;  %v6203_v47 = vld [vmem:[%s7512_s21 + $0x6c] sm:$0xf0] }
 0x1e8   : > { %v1169_v7 = vpop.xlane.xlu1 %1168  ;;  %v1165_v53 = vpop.xlane.xlu0 %1164 }
 0x1e9   : > { %v1204_v50 = vmul.f32 %v7916_v37, %v1169_v7  ;;  %v1202_v0 = vmul.f32 %v7916_v37, %v1165_v53  ;;  %v1173_v59 = vpop.xlane.xlu2 %1172  ;;  %v6209_v7 = vld [vmem:[%s7512_s21 + $0x68] sm:$0xf]  ;;  %v6653_v53 = vld [vmem:[%s7512_s21 + $0x70] sm:$0xf0] }
 0x1ea   : > { %v1206_v14 = vmul.f32 %v7916_v37, %v1173_v59  ;;  %v6191_v59 = vld [vmem:[%s7512_s21 + $0x54] sm:$0xf0] }
 0x1eb   : > { %v7925_v56 = vsub.f32 %v1147_v15, %v1204_v50  ;;  %v7927_v30 = vsub.f32 %v1145_v33, %v1202_v0  ;;  %v6234_v15 = vor.u32 %v6659_v31, %v6233_v12  ;;  %v6213_v33 = vld [vmem:[%s7512_s21 + $0x78] sm:$0xf]  ;;  %v6206_v50 = vor.u32 %v6651_v43, %v6203_v47  ;;  %v6644_v31 = vld [vmem:[%s7512_s21 + $0x28] sm:$0xf0] }
 0x1ec   : > { %v7950_v1 = vsub.f32 %v1149_v28, %v1206_v14  ;;  %v6655_v28 = vld [vmem:[%s7512_s21 + $0x80] sm:$0xf0]  ;;  %v6210_v0 = vor.u32 %v6653_v53, %v6209_v7  ;;  %v6650_v14 = vld [vmem:[%s7512_s21 + $0x58] sm:$0xf0]  ;;  %v6170_v12 = vor.u32 %v6642_v25, %v6167_v27  ;;  %v6174_v32 = vor.u32 %v6644_v31, %v6173_v13 }
 0x1ed   : > { %v1236_v46 = vmul.f32 %v7925_v56, %v7925_v56  ;;  %v1234_v42 = vmul.f32 %v7927_v30, %v7927_v30  ;;  %1802 = vmatpush.bf16.msra.mxu2 %v6234_v15  ;;  %v6214_v34 = vor.u32 %v6655_v28, %v6213_v33  ;;  %v6153_v33 = vld [vmem:[%s7512_s21] sm:$0xf]  ;;  %v6640_v28 = vld [vmem:[%s7512_s21 + $0x8] sm:$0xf0] }
 0x1ee   : > { %v1238_v2 = vmul.f32 %v7950_v1, %v7950_v1 }
 0x1ef   : > { %1255 = vadd.xlane.f32.xlu2 %v1236_v46  ;;  %1176 = vadd.xlane.f32.xlu0 %v7931_v19  ;;  %v6648_v46 = vld [vmem:[%s7512_s21 + $0x4c] sm:$0xf] }
 0x1f0   : > { %1251 = vadd.xlane.f32.xlu1 %v1234_v42  ;;  %1705 = vmatpush.bf16.msra.mxu0 %v6214_v34  ;;  %v6190_v42 = vor.u32 %v6649_v49, %v6189_v45  ;;  %v6639_v34 = vld [vmem:[%s7512_s21 + $0x4] sm:$0xf] }
 0x1f1   : > { %v1175_v55 = vpop.xlane.xlu2 %1174  ;;  %1803 = vmatpush.bf16.msra.mxu2 %v6222_v36 }
 0x1f2   : > { %v1207_v52 = vmul.f32 %v7916_v37, %v1175_v55 }
 0x1f4   : > { %v7960_v51 = vsub.f32 %v1150_v23, %v1207_v52  ;;  %v6654_v23 = vld [vmem:[%s7512_s21 + $0x7c] sm:$0xf]  ;;  %1706 = vmatpush.bf16.msra.mxu0 %v6202_v44 }
 0x1f5   : > { %v6218_v29 = vor.u32 %v6654_v23, %v6215_v9  ;;  %1804 = vmatpush.bf16.msra.mxu2 %v6210_v0  ;;  %v6646_v52 = vld [vmem:[%s7512_s21 + $0x38] sm:$0xf0]  ;;  %v6154_v23 = vor.u32 %v6640_v28, %v6153_v33  ;;  %v6155_v9 = vld [vmem:[%s7512_s21 + $0xc] sm:$0xf0] }
 0x1f6   : > { %v1239_v6 = vmul.f32 %v7960_v51, %v7960_v51  ;;  %v6158_v35 = vor.u32 %v6639_v34, %v6155_v9 }
 0x1f7   : > { %1257 = vadd.xlane.f32.xlu2 %v1237_v48  ;;  %1178 = vadd.xlane.f32.xlu0 %v7945_v60  ;;  %v6197_v48 = vld [vmem:[%s7512_s21 + $0x50] sm:$0xf] }
 0x1f8   : > { %1253 = vadd.xlane.f32.xlu1 %v1235_v62  ;;  %1754 = vmatpush.bf16.msra.mxu1 %v6218_v29  ;;  %v6194_v62 = vor.u32 %v6648_v46, %v6191_v59  ;;  %v6198_v55 = vor.u32 %v6650_v14, %v6197_v48  ;;  %v6641_v29 = vld [vmem:[%s7512_s21 + $0x10] sm:$0xf0] }
 0x1f9   : > { %1707 = vmatpush.bf16.msra.mxu0 %v6190_v42  ;;  %v6162_v36 = vor.u32 %v6641_v29, %v6161_v24 }
 0x1fa   : > { %1805 = vmatpush.bf16.msra.mxu2 %v6198_v55 }
 0x1fc   : > { %1755 = vmatpush.bf16.msra.mxu1 %v6206_v50 }
 0x1fe   : > { %1806 = vmatpush.bf16.msra.mxu2 %v6186_v5 }
 0x1ff   : > { %1184 = vadd.xlane.f32.xlu2 %v7955_v61  ;;  %1259 = vadd.xlane.f32.xlu0 %v1238_v2  ;;  %v6177_v2 = vld [vmem:[%s7512_s21 + $0x30] sm:$0xf] }
 0x200   : > { %1180 = vadd.xlane.f32.xlu1 %v7957_v4  ;;  %1756 = vmatpush.bf16.msra.mxu1 %v6194_v62  ;;  %v6178_v10 = vor.u32 %v6646_v52, %v6177_v2 }
 0x202   : > { %1708 = vmatpush.bf16.msra.mxu0 %v6178_v10  ;;  %1807 = vmatpush.bf16.msra.mxu2 %v6174_v32 }
 0x206   : > { %1709 = vmatpush.bf16.msra.mxu0 %v6166_v16  ;;  %1808 = vmatpush.bf16.msra.mxu2 %v6162_v36 }
 0x207   : > { %1186 = vadd.xlane.f32.xlu2 %v7965_v3  ;;  %1261 = vadd.xlane.f32.xlu0 %v1239_v6  ;;  %v6645_v6 = vld [vmem:[%s7512_s21 + $0x34] sm:$0xf] }
 0x208   : > { %1182 = vadd.xlane.f32.xlu1 %v7967_v38  ;;  %v6182_v20 = vor.u32 %v6645_v6, %v6179_v17 }
 0x20a   : > { %1757 = vmatpush.bf16.msra.mxu1 %v6182_v20  ;;  %1710 = vmatpush.bf16.msra.mxu0 %v6154_v23 }
 0x20e   : > { %1758 = vmatpush.bf16.msra.mxu1 %v6170_v12 }
 0x20f   : > { %1188 = vadd.xlane.f32.xlu0 %v7971_v11 }
 0x212   : > { %1759 = vmatpush.bf16.msra.mxu1 %v6158_v35 }
 0x217   : > { %1190 = vadd.xlane.f32.xlu0 %v7974_v18 }
 0x25a   : > { %v1250_v26 = vpop.xlane.xlu0 %1249 }
 0x25b   : > { %v1281_v58 = vmul.f32 %v1250_v26, %v7916_v37 }
 0x25d   : > { %v1297_v15 = vadd.f32 1e-05, %v1281_v58 }
 0x25f   : > { %6864 = vrsqrt.f32 %v1297_v15  ;;  %vm1319_vm3 = vweird.f32 %v1297_v15 }
 0x262   : > { %v1256_v41 = vpop.xlane.xlu2 %1255  ;;  %v1177_v22 = vpop.xlane.xlu0 %1176 }
 0x263   : > { %v1284_v43 = vmul.f32 %v1256_v41, %v7916_v37  ;;  %v1252_v44 = vpop.xlane.xlu1 %1251  ;;  %v1208_v47 = vmul.f32 %v7916_v37, %v1177_v22 }
 0x264   : > { %v1282_v7 = vmul.f32 %v1252_v44, %v7916_v37 }
 0x265   : > { %v6865_v53 = vpop.eup %6864  ;;  %v8029_v50 = vadd.f32 1e-05, %v1284_v43  ;;  %v8032_v0 = vsub.f32 %v7931_v19, %v1208_v47 }
 0x266   : > { %v1314_v45 = vmul.f32 %v6865_v53, %v1297_v15  ;;  %v1298_v49 = vadd.f32 1e-05, %v1282_v7  ;;  %vm1320_vm2 = vweird.f32 %v6865_v53 }
 0x267   : > { %6866 = vrsqrt.f32 %v8029_v50  ;;  %v1240_v46 = vmul.f32 %v8032_v0, %v8032_v0  ;;  %vm8054_vm5 = vmor %vm1319_vm3, %vm1320_vm2  ;;  %vm1349_vm10 = vweird.f32 %v8029_v50 }
 0x268   : > { %v1315_v42 = vmul.f32 %v6865_v53, %v1314_v45  ;;  %6868 = vrsqrt.f32 %v1298_v49  ;;  %vm1329_vm4 = vweird.f32 %v1298_v49 }
 0x269   : > { %1263 = vadd.xlane.f32.xlu1 %v1240_v46 }
 0x26a   : > { %v1316_v59 = vmul.f32 0.5, %v1315_v42  ;;  %v1258_v48 = vpop.xlane.xlu2 %1257  ;;  %v1179_v14 = vpop.xlane.xlu0 %1178 }
 0x26b   : > { %v1254_v62 = vpop.xlane.xlu1 %1253  ;;  %v1209_v55 = vmul.f32 %v7916_v37, %v1179_v14  ;;  %v1285_v17 = vmul.f32 %v1258_v48, %v7916_v37 }
 0x26c   : > { %v1317_v2 = vsub.f32 1.5, %v1316_v59  ;;  %v1283_v19 = vmul.f32 %v1254_v62, %v7916_v37  ;;  %v8108_v59 = vld [vmem:[%s12011_s0] ss:$0 sm:$0xff] }
 0x26d   : > { %v8039_v52 = vpop.eup %6866  ;;  %v8042_v6 = vsub.f32 %v7945_v60, %v1209_v55  ;;  %v8052_v60 = vadd.f32 1e-05, %v1285_v17 }
 0x26e   : > { %v6869_v10 = vpop.eup %6868  ;;  %v8045_v39 = vadd.f32 1e-05, %v1283_v19  ;;  %v1318_v20 = vmul.f32 %v6865_v53, %v1317_v2  ;;  %v1344_v5 = vmul.f32 %v8039_v52, %v8029_v50  ;;  %vm1350_vm11 = vweird.f32 %v8039_v52 }
 0x26f   : > { %v1324_v8 = vmul.f32 %v6869_v10, %v1298_v49  ;;  %v1241_v54 = vmul.f32 %v8042_v6, %v8042_v6  ;;  %vm1330_vm6 = vweird.f32 %v6869_v10  ;;  %vm8136_vm13 = vmor %vm1349_vm10, %vm1350_vm11  ;;  %vm1359_vm0 = vweird.f32 %v8052_v60 }
 0x270   : > { %6870 = vrsqrt.f32 %v8045_v39  ;;  %v1322_v31 = vsel %vm8054_vm5, %v6865_v53, %v1318_v20  ;;  %v1345_v32 = vmul.f32 %v8039_v52, %v1344_v5  ;;  %vm8070_vm7 = vmor %vm1329_vm4, %vm1330_vm6  ;;  %vm1339_vm8 = vweird.f32 %v8045_v39 }
 0x271   : > { %v1325_v21 = vmul.f32 %v6869_v10, %v1324_v8  ;;  %1265 = vadd.xlane.f32.xlu1 %v1241_v54  ;;  %6872 = vrsqrt.f32 %v8052_v60  ;;  %v1473_v36 = vmul.f32 %v1322_v31, %v7919_v40 }
 0x272   : > { %v1185_v25 = vpop.xlane.xlu2 %1184  ;;  %v1260_v26 = vpop.xlane.xlu0 %1259  ;;  %v1346_v41 = vmul.f32 0.5, %v1345_v32 }
 0x273   : > { %v1326_v27 = vmul.f32 0.5, %v1325_v21  ;;  %v1212_v13 = vmul.f32 %v7916_v37, %v1185_v25  ;;  %v1181_v58 = vpop.xlane.xlu1 %1180  ;;  %v1286_v12 = vmul.f32 %v1260_v26, %v7916_v37 }
 0x274   : > { %v1210_v15 = vmul.f32 %v7916_v37, %v1181_v58 }
 0x275   : > { %v1327_v33 = vsub.f32 1.5, %v1326_v27  ;;  %v8064_v28 = vadd.f32 1e-05, %v1286_v12  ;;  %v8067_v23 = vsub.f32 %v7955_v61, %v1212_v13  ;;  %v8086_v61 = vld [vmem:[%s12009_s4] ss:$0 sm:$0xff] }
 0x276   : > { %v6871_v34 = vpop.eup %6870  ;;  %v8076_v24 = vsub.f32 %v7957_v4, %v1210_v15  ;;  %v8090_v4 = vld [vmem:[#allocation2 + $0x28] sm:$0xff]  ;;  %v1492_v42 = vmul.f32 %v8086_v61, %v1473_v36 }
 0x277   : > { %v1328_v35 = vmul.f32 %v6869_v10, %v1327_v33  ;;  %v1334_v29 = vmul.f32 %v6871_v34, %v8045_v39  ;;  %6874 = vrsqrt.f32 %v8064_v28  ;;  %v1244_v22 = vmul.f32 %v8067_v23, %v8067_v23  ;;  %v8110_v48 = vpop.eup %6872 }
 0x278   : > { %v1242_v40 = vmul.f32 %v8076_v24, %v8076_v24  ;;  %vm1340_vm9 = vweird.f32 %v6871_v34  ;;  %v1511_v5 = vadd.f32 %v8108_v59, %v1492_v42  ;;  %v1354_v21 = vmul.f32 %v8110_v48, %v8052_v60 }
 0x279   : > { %v1332_v43 = vsel %vm8070_vm7, %v6869_v10, %v1328_v35  ;;  %v1335_v44 = vmul.f32 %v6871_v34, %v1334_v29  ;;  %1271 = vadd.xlane.f32.xlu0 %v1244_v22  ;;  %1192 = vadd.xlane.f32.xlu1 %v8090_v4  ;;  %vm8125_vm12 = vmor %vm1339_vm8, %vm1340_vm9  ;;  %vm1369_vm14 = vweird.f32 %v8064_v28  ;;  %vm1360_vm1 = vweird.f32 %v8110_v48 }
 0x27a   : > { %v1187_v47 = vpop.xlane.xlu2 %1186  ;;  %v8096_v7 = vpop.xlane.xlu0 %1261  ;;  %v1474_v53 = vmul.f32 %v1332_v43, %v7927_v30  ;;  %1267 = vadd.xlane.f32.xlu2 %v1242_v40  ;;  %v1347_v30 = vsub.f32 1.5, %v1346_v41  ;;  %v1355_v12 = vmul.f32 %v8110_v48, %v1354_v21  ;;  %vm1361_vm3 = vmor %vm1359_vm0, %vm1360_vm1 }
 0x27b   : > { %v1336_v45 = vmul.f32 0.5, %v1335_v44  ;;  %v1213_v49 = vmul.f32 %v7916_v37, %v1187_v47  ;;  %v1183_v46 = vpop.xlane.xlu1 %1182 }
 0x27c   : > { %v1211_v14 = vmul.f32 %v7916_v37, %v1183_v46  ;;  %v1493_v62 = vmul.f32 %v8086_v61, %v1474_v53  ;;  %v1348_v50 = vmul.f32 %v8039_v52, %v1347_v30  ;;  %v1356_v9 = vmul.f32 0.5, %v1355_v12 }
 0x27d   : > { %v6875_v55 = vpop.eup %6874  ;;  %v1337_v2 = vsub.f32 1.5, %v1336_v45  ;;  %v8115_v19 = vsub.f32 %v7965_v3, %v1213_v49 }
 0x27e   : > { %v1364_v10 = vmul.f32 %v6875_v55, %v8064_v28  ;;  %v8121_v17 = vsub.f32 %v7967_v38, %v1211_v14  ;;  %v1512_v3 = vadd.f32 %v8108_v59, %v1493_v62  ;;  %v1352_v58 = vsel %vm8136_vm13, %v8039_v52, %v1348_v50 }
 0x27f   : > { %v1338_v8 = vmul.f32 %v6871_v34, %v1337_v2  ;;  %v1245_v25 = vmul.f32 %v8115_v19, %v8115_v19  ;;  %vm1370_vm15 = vweird.f32 %v6875_v55 }
 0x280   : > { %v1243_v38 = vmul.f32 %v8121_v17, %v8121_v17  ;;  %v1527_v39 = vpack.c.bf16 %v1512_v3, %v1511_v5  ;;  %v1365_v16 = vmul.f32 %v6875_v55, %v1364_v10  ;;  %vm1371_vm2 = vmor %vm1369_vm14, %vm1370_vm15 }
 0x281   : > { %v1342_v26 = vsel %vm8125_vm12, %v6871_v34, %v1338_v8  ;;  %1273 = vadd.xlane.f32.xlu1 %v1245_v25  ;;  %v1476_v34 = vmul.f32 %v1352_v58, %v7925_v56 }
 0x282   : > { %v1189_v27 = vpop.xlane.xlu0 %1188  ;;  %1269 = vadd.xlane.f32.xlu2 %v1243_v38  ;;  %1711 = vmatmul.bf16.vlgmr.msra.gmra.mxu0 %v1527_v39  ;;  %v1475_v32 = vmul.f32 %v1342_v26, %v7940_v57  ;;  %v1366_v15 = vmul.f32 0.5, %v1365_v16 }
 0x283   : > { %v1214_v13 = vmul.f32 %v7916_v37, %v1189_v27  ;;  %1760 = vmatmul.bf16.vlgmr.msra.gmra.mxu1 %v1527_v39  ;;  %1809 = vmatmul.bf16.vlgmr.msra.gmra.mxu2 %v1527_v39  ;;  %v1495_v41 = vmul.f32 %v8086_v61, %v1476_v34 }
 0x284   : > { %v1494_v35 = vmul.f32 %v8086_v61, %v1475_v32  ;;  %v1367_v52 = vsub.f32 1.5, %v1366_v15 }
 0x285   : > { %v8150_v31 = vsub.f32 %v7971_v11, %v1214_v13  ;;  %v1357_v11 = vsub.f32 1.5, %v1356_v9  ;;  %v1514_v43 = vadd.f32 %v8108_v59, %v1495_v41 }
 0x286   : > { %v1513_v22 = vadd.f32 %v8108_v59, %v1494_v35  ;;  %v1368_v56 = vmul.f32 %v6875_v55, %v1367_v52 }
 0x287   : > { %v1246_v33 = vmul.f32 %v8150_v31, %v8150_v31  ;;  %v1358_v40 = vmul.f32 %v8110_v48, %v1357_v11 }
 0x288   : > { %v1528_v28 = vpack.c.bf16 %v1514_v43, %v1513_v22 }
 0x289   : > { %v1362_v47 = vsel %vm1361_vm3, %v8110_v48, %v1358_v40  ;;  %v1287_v48 = vmul.f32 %v8096_v7, %v7916_v37 }
 0x28a   : > { %v1191_v29 = vpop.xlane.xlu0 %1190  ;;  %1275 = vadd.xlane.f32.xlu2 %v1246_v33  ;;  %v1477_v53 = vmul.f32 %v1362_v47, %v7938_v63 }
 0x28b   : > { %v1215_v36 = vmul.f32 %v7916_v37, %v1191_v29  ;;  %v1303_v14 = vadd.f32 1e-05, %v1287_v48 }
 0x28c   : > { %v1496_v49 = vmul.f32 %v8086_v61, %v1477_v53 }
 0x28d   : > { %v8161_v57 = vsub.f32 %v7974_v18, %v1215_v36  ;;  %v1372_v18 = vsel %vm1371_vm2, %v6875_v55, %v1368_v56  ;;  %6876 = vrsqrt.f32 %v1303_v14  ;;  %vm1379_vm4 = vweird.f32 %v1303_v14 }
 0x28e   : > { %v1478_v60 = vmul.f32 %v1372_v18, %v7950_v1  ;;  %v1515_v42 = vadd.f32 %v8108_v59, %v1496_v49 }
 0x28f   : > { %v1247_v44 = vmul.f32 %v8161_v57, %v8161_v57 }
 0x290   : > { %v1497_v45 = vmul.f32 %v8086_v61, %v1478_v60 }
 0x291   : > { %1277 = vadd.xlane.f32.xlu0 %v1247_v44 }
 0x292   : > { %1716 = vmatmul.bf16.gmra.mxu0 %v1528_v28  ;;  %v1516_v46 = vadd.f32 %v8108_v59, %v1497_v45 }
 0x293   : > { %1765 = vmatmul.bf16.gmra.mxu1 %v1528_v28  ;;  %1814 = vmatmul.bf16.gmra.mxu2 %v1528_v28  ;;  %v6877_v1 = vpop.eup %6876 }
 0x294   : > { %v1529_v30 = vpack.c.bf16 %v1516_v46, %v1515_v42  ;;  %v1374_v62 = vmul.f32 %v6877_v1, %v1303_v14  ;;  %vm1380_vm5 = vweird.f32 %v6877_v1 }
 0x295   : > { %vm1381_vm6 = vmor %vm1379_vm4, %vm1380_vm5 }
 0x296   : > { %v1375_v55 = vmul.f32 %v6877_v1, %v1374_v62 }
 0x298   : > { %v1376_v8 = vmul.f32 0.5, %v1375_v55 }
 0x29a   : > { %v1377_v20 = vsub.f32 1.5, %v1376_v8 }
 0x29c   : > { %v1378_v7 = vmul.f32 %v6877_v1, %v1377_v20 }
 0x29e   : > { %v1382_v25 = vsel %vm1381_vm6, %v6877_v1, %v1378_v7 }
 0x29f   : > { %v1479_v15 = vmul.f32 %v1382_v25, %v7960_v51 }
 0x2a1   : > { %v1498_v22 = vmul.f32 %v8086_v61, %v1479_v15 }
 0x2a2   : > { %1721 = vmatmul.bf16.gmra.mxu0 %v1529_v30 }
 0x2a3   : > { %1770 = vmatmul.bf16.gmra.mxu1 %v1529_v30  ;;  %1819 = vmatmul.bf16.gmra.mxu2 %v1529_v30  ;;  %v1517_v47 = vadd.f32 %v8108_v59, %v1498_v22 }
 0x2dc   : > { %v1264_v63 = vpop.xlane.xlu1 %1263 }
 0x2dd   : > { %v1288_v2 = vmul.f32 %v1264_v63, %v7916_v37 }
 0x2df   : > { %v1304_v10 = vadd.f32 1e-05, %v1288_v2 }
 0x2e1   : > { %6878 = vrsqrt.f32 %v1304_v10  ;;  %vm1389_vm8 = vweird.f32 %v1304_v10 }
 0x2e4   : > { %v1266_v5 = vpop.xlane.xlu1 %1265 }
 0x2e5   : > { %v1289_v50 = vmul.f32 %v1266_v5, %v7916_v37 }
 0x2e7   : > { %v6879_v3 = vpop.eup %6878  ;;  %v1305_v38 = vadd.f32 1e-05, %v1289_v50 }
 0x2e8   : > { %v1384_v21 = vmul.f32 %v6879_v3, %v1304_v10  ;;  %vm1390_vm7 = vweird.f32 %v6879_v3 }
 0x2e9   : > { %6880 = vrsqrt.f32 %v1305_v38  ;;  %vm1391_vm9 = vmor %vm1389_vm8, %vm1390_vm7  ;;  %vm1399_vm11 = vweird.f32 %v1305_v38 }
 0x2ea   : > { %v1385_v54 = vmul.f32 %v6879_v3, %v1384_v21  ;;  %v8212_v21 = vld [vmem:[%s7518_s18] sm:$0x7]  ;;  %s7372_s18 = smov 64  }
 0x2ec   : > { %v1386_v39 = vmul.f32 0.5, %v1385_v54  ;;  %v1272_v26 = vpop.xlane.xlu0 %1271  ;;  %v1193_v13 = vpop.xlane.xlu1 %1192 }
 0x2ed   : > { %v1268_v27 = vpop.xlane.xlu2 %1267  ;;  %v1292_v58 = vmul.f32 %v1272_v26, %v7916_v37  ;;  %v1216_v32 = vmul.f32 %v7916_v37, %v1193_v13  ;;  %v8218_v26 = vperm.slane %v8212_v21, 1 }
 0x2ee   : > { %v1387_v16 = vsub.f32 1.5, %v1386_v39  ;;  %v1290_v12 = vmul.f32 %v1268_v27, %v7916_v37 }
 0x2ef   : > { %v8185_v34 = vadd.f32 1e-05, %v1292_v58  ;;  %v6881_v9 = vpop.eup %6880  ;;  %v8188_v52 = vsub.f32 %v8090_v4, %v1216_v32 }
 0x2f0   : > { %v1388_v33 = vmul.f32 %v6879_v3, %v1387_v16  ;;  %v1306_v35 = vadd.f32 1e-05, %v1290_v12  ;;  %v1394_v36 = vmul.f32 %v6881_v9, %v1305_v38  ;;  %vm1400_vm10 = vweird.f32 %v6881_v9 }
 0x2f1   : > { %6882 = vrsqrt.f32 %v8185_v34  ;;  %v1248_v51 = vmul.f32 %v8188_v52, %v8188_v52  ;;  %vm1401_vm14 = vmor %vm1399_vm11, %vm1400_vm10  ;;  %vm1429_vm2 = vweird.f32 %v8185_v34 }
 0x2f2   : > { %v1392_v29 = vsel %vm1391_vm9, %v6879_v3, %v1388_v33  ;;  %6884 = vrsqrt.f32 %v1306_v35  ;;  %v1395_v11 = vmul.f32 %v6881_v9, %v1394_v36  ;;  %vm1409_vm12 = vweird.f32 %v1306_v35 }
 0x2f3   : > { %v1480_v41 = vmul.f32 %v1392_v29, %v8032_v0  ;;  %1279 = vadd.xlane.f32.xlu1 %v1248_v51 }
 0x2f4   : > { %v1396_v43 = vmul.f32 0.5, %v1395_v11  ;;  %v1274_v0 = vpop.xlane.xlu1 %1273 }
 0x2f5   : > { %v1499_v56 = vmul.f32 %v8086_v61, %v1480_v41  ;;  %v1270_v44 = vpop.xlane.xlu2 %1269  ;;  %v1293_v49 = vmul.f32 %v1274_v0, %v7916_v37 }
 0x2f6   : > { %v1291_v4 = vmul.f32 %v1270_v44, %v7916_v37  ;;  %v1397_v18 = vsub.f32 1.5, %v1396_v43 }
 0x2f7   : > { %v1518_v40 = vadd.f32 %v8108_v59, %v1499_v56  ;;  %v8198_v28 = vpop.eup %6882  ;;  %v8204_v1 = vadd.f32 1e-05, %v1293_v49 }
 0x2f8   : > { %v6885_v60 = vpop.eup %6884  ;;  %v1307_v53 = vadd.f32 1e-05, %v1291_v4  ;;  %v1398_v42 = vmul.f32 %v6881_v9, %v1397_v18  ;;  %v1424_v48 = vmul.f32 %v8198_v28, %v8185_v34  ;;  %vm1430_vm3 = vweird.f32 %v8198_v28 }
 0x2f9   : > { %v1404_v45 = vmul.f32 %v6885_v60, %v1306_v35  ;;  %v1530_v46 = vpack.c.bf16 %v1518_v40, %v1517_v47  ;;  %vm1410_vm13 = vweird.f32 %v6885_v60  ;;  %vm8241_vm5 = vmor %vm1429_vm2, %vm1430_vm3  ;;  %vm1439_vm8 = vweird.f32 %v8204_v1 }
 0x2fa   : > { %6886 = vrsqrt.f32 %v1307_v53  ;;  %v1402_v55 = vsel %vm1401_vm14, %v6881_v9, %v1398_v42  ;;  %v1425_v10 = vmul.f32 %v8198_v28, %v1424_v48  ;;  %vm1411_vm15 = vmor %vm1409_vm12, %vm1410_vm13  ;;  %vm1419_vm0 = vweird.f32 %v1307_v53 }
 0x2fb   : > { %v1405_v30 = vmul.f32 %v6885_v60, %v1404_v45  ;;  %1726 = vmatmul.bf16.gmra.mxu0 %v1530_v46  ;;  %1775 = vmatmul.bf16.gmra.mxu1 %v1530_v46  ;;  %6888 = vrsqrt.f32 %v8204_v1  ;;  %v1481_v7 = vmul.f32 %v1402_v55, %v8042_v6  ;;  %vm1906_vm12 = vcmask 523264  }
 0x2fc   : > { %1824 = vmatmul.bf16.gmra.mxu2 %v1530_v46  ;;  %v1426_v54 = vmul.f32 0.5, %v1425_v10  ;;  %vm2123_vm3 = vcmask 261120  }
 0x2fd   : > { %v1406_v14 = vmul.f32 0.5, %v1405_v30  ;;  %v1276_v62 = vpop.xlane.xlu2 %1275  ;;  %v1500_v27 = vmul.f32 %v8086_v61, %v1481_v7 }
 0x2fe   : > { %v1294_v63 = vmul.f32 %v1276_v62, %v7916_v37  ;;  %v1427_v12 = vsub.f32 1.5, %v1426_v54 }
 0x2ff   : > { %v1407_v2 = vsub.f32 1.5, %v1406_v14  ;;  %v1519_v36 = vadd.f32 %v8108_v59, %v1500_v27 }
 0x300   : > { %v6887_v8 = vpop.eup %6886  ;;  %v8208_v20 = vadd.f32 1e-05, %v1294_v63  ;;  %v1761_v5 = vpop.f32.mrf.mxu1  ;;  %v1428_v41 = vmul.f32 %v8198_v28, %v1427_v12 }
 0x301   : > { %v1408_v3 = vmul.f32 %v6885_v60, %v1407_v2  ;;  %v1414_v50 = vmul.f32 %v6887_v8, %v1307_v53  ;;  %v8222_v58 = vpop.eup %6888  ;;  %vm1420_vm1 = vweird.f32 %v6887_v8  ;;  %v1762_v15 = vadd.f32 %v1761_v5, %v8218_v26 }
 0x302   : > { %6890 = vrsqrt.f32 %v8208_v20  ;;  %vm8232_vm4 = vmor %vm1419_vm0, %vm1420_vm1  ;;  %v1434_v11 = vmul.f32 %v8222_v58, %v8204_v1  ;;  %v1432_v40 = vsel %vm8241_vm5, %v8198_v28, %v1428_v41  ;;  %vm1449_vm6 = vweird.f32 %v8208_v20 }
 0x303   : > { %v1412_v38 = vsel %vm1411_vm15, %v6885_v60, %v1408_v3  ;;  %v1415_v39 = vmul.f32 %v6887_v8, %v1414_v50  ;;  %v1870_v22 = vpack.c.bf16 %v1762_v15, %v1762_v15  ;;  %v1484_v49 = vmul.f32 %v1432_v40, %v8067_v23 }
 0x304   : > { %v1482_v25 = vmul.f32 %v1412_v38, %v8076_v24  ;;  %v1435_v18 = vmul.f32 %v8222_v58, %v1434_v11  ;;  %vm1440_vm9 = vweird.f32 %v8222_v58  ;;  %v1278_v15 = vpop.xlane.xlu0 %1277 }
 0x305   : > { %v1416_v16 = vmul.f32 0.5, %v1415_v39  ;;  %v1900_v60 = vunpack.c.l.b16 %v1870_v22  ;;  %v1503_v14 = vmul.f32 %v8086_v61, %v1484_v49  ;;  %vm1441_vm11 = vmor %vm1439_vm8, %vm1440_vm9 }
 0x306   : > { %v1501_v13 = vmul.f32 %v8086_v61, %v1482_v25  ;;  %v1436_v42 = vmul.f32 0.5, %v1435_v18 }
 0x307   : > { %v1417_v32 = vsub.f32 1.5, %v1416_v16  ;;  %v1522_v10 = vadd.f32 %v8108_v59, %v1503_v14 }
 0x308   : > { %v8224_v6 = vpop.eup %6890  ;;  %v1763_v33 = vpop.f32.mrf.mxu1  ;;  %v1520_v24 = vadd.f32 %v8108_v59, %v1501_v13  ;;  %v1437_v62 = vsub.f32 1.5, %v1436_v42 }
 0x309   : > { %v1418_v9 = vmul.f32 %v6887_v8, %v1417_v32  ;;  %v1444_v35 = vmul.f32 %v8224_v6, %v8208_v20  ;;  %v1764_v51 = vadd.f32 %v1763_v33, %v8218_v26  ;;  %vm1450_vm7 = vweird.f32 %v8224_v6  ;;  %v8278_v32 = vpop.f32.mrf.mxu2 }
 0x30a   : > { %v1531_v56 = vpack.c.bf16 %v1520_v24, %v1519_v36  ;;  %vm1451_vm10 = vmor %vm1449_vm6, %vm1450_vm7  ;;  %v1295_v33 = vmul.f32 %v1278_v15, %v7916_v37 }
 0x30b   : > { %v1422_v43 = vsel %vm8232_vm4, %v6887_v8, %v1418_v9  ;;  %v1445_v44 = vmul.f32 %v8224_v6, %v1444_v35  ;;  %v1871_v4 = vpack.c.bf16 %v1764_v51, %v1764_v51  ;;  %v1438_v8 = vmul.f32 %v8222_v58, %v1437_v62 }
 0x30c   : > { %1731 = vmatmul.bf16.gmra.mxu0 %v1531_v56  ;;  %1780 = vmatmul.bf16.gmra.mxu1 %v1531_v56  ;;  %v1483_v47 = vmul.f32 %v1422_v43, %v8121_v17  ;;  %v1311_v24 = vadd.f32 1e-05, %v1295_v33 }
 0x30d   : > { %v1901_v0 = vunpack.c.l.b16 %v1871_v4  ;;  %1829 = vmatmul.bf16.gmra.mxu2 %v1531_v56  ;;  %v1446_v45 = vmul.f32 0.5, %v1445_v44  ;;  %v1442_v7 = vsel %vm1441_vm11, %v8222_v58, %v1438_v8 }
 0x30e   : > { %v1502_v30 = vmul.f32 %v8086_v61, %v1483_v47  ;;  %v1485_v25 = vmul.f32 %v1442_v7, %v8115_v19  ;;  %6892 = vrsqrt.f32 %v1311_v24  ;;  %vm1459_vm13 = vweird.f32 %v1311_v24 }
 0x30f   : > { %v1904_v46 = vpack.c.b16 %v1901_v0, %v1900_v60  ;;  %v1447_v48 = vsub.f32 1.5, %v1446_v45 }
 0x310   : > { %v1766_v53 = vpop.f32.mrf.mxu1  ;;  %v1521_v17 = vadd.f32 %v8108_v59, %v1502_v30  ;;  %v1504_v27 = vmul.f32 %v8086_v61, %v1485_v25 }
 0x311   : > { %2524 = vrot.lane.b32.xlu2 %v1904_v46, %s7372_s18  ;;  %v1767_v28 = vadd.f32 %v1766_v53, %v8218_v26  ;;  %v1448_v63 = vmul.f32 %v8224_v6, %v1447_v48  ;;  %v1914_v58 = vsel %vm1906_vm12, %v1904_v46, 0  ;;  %v8282_v19 = vpop.f32.mrf.mxu2 }
 0x312   : > { %v1532_v5 = vpack.c.bf16 %v1522_v10, %v1521_v17  ;;  %v1523_v12 = vadd.f32 %v8108_v59, %v1504_v27 }
 0x313   : > { %v1872_v55 = vpack.c.bf16 %v1767_v28, %v1767_v28  ;;  %v1452_v1 = vsel %vm1451_vm10, %v8224_v6, %v1448_v63  ;;  %v8280_v6 = vpop.f32.mrf.mxu0 }
 0x314   : > { %v1486_v54 = vmul.f32 %v1452_v1, %v8150_v31  ;;  %v6893_v29 = vpop.eup %6892 }
 0x315   : > { %v1902_v3 = vunpack.c.l.b16 %v1872_v55  ;;  %v1454_v11 = vmul.f32 %v6893_v29, %v1311_v24  ;;  %vm1460_vm14 = vweird.f32 %v6893_v29 }
 0x316   : > { %v1505_v16 = vmul.f32 %v8086_v61, %v1486_v54  ;;  %vm1461_vm15 = vmor %vm1459_vm13, %vm1460_vm14 }
 0x317   : > { %v1455_v34 = vmul.f32 %v6893_v29, %v1454_v11 }
 0x318   : > { %v1768_v23 = vpop.f32.mrf.mxu1  ;;  %v1524_v13 = vadd.f32 %v8108_v59, %v1505_v16 }
 0x319   : > { %v1769_v2 = vadd.f32 %v1768_v23, %v8218_v26  ;;  %v8287_v35 = vpop.f32.mrf.mxu2  ;;  %v1456_v44 = vmul.f32 0.5, %v1455_v34 }
 0x31a   : > { %v1533_v31 = vpack.c.bf16 %v1524_v13, %v1523_v12 }
 0x31b   : > { %v1873_v20 = vpack.c.bf16 %v1769_v2, %v1769_v2  ;;  %v8285_v9 = vpop.f32.mrf.mxu0  ;;  %v1457_v18 = vsub.f32 1.5, %v1456_v44 }
 0x31c   : > { %1736 = vmatmul.bf16.gmra.mxu0 %v1532_v5  ;;  %1785 = vmatmul.bf16.gmra.mxu1 %v1532_v5 }
 0x31d   : > { %v1903_v50 = vunpack.c.l.b16 %v1873_v20  ;;  %1834 = vmatmul.bf16.gmra.mxu2 %v1532_v5  ;;  %v1458_v60 = vmul.f32 %v6893_v29, %v1457_v18 }
 0x31f   : > { %v1905_v38 = vpack.c.b16 %v1903_v50, %v1902_v3  ;;  %v1462_v42 = vsel %vm1461_vm15, %v6893_v29, %v1458_v60  ;;  %v8304_v3 = vperm.slane %v8212_v21, 2 }
 0x320   : > { %v1771_v51 = vpop.f32.mrf.mxu1  ;;  %v1487_v14 = vmul.f32 %v1462_v42, %v8161_v57 }
 0x321   : > { %2526 = vrot.lane.b32.xlu1 %v1905_v38, %s7372_s18  ;;  %v1917_v39 = vsel %vm1906_vm12, %v1905_v38, 0  ;;  %v8291_v41 = vpop.f32.mrf.mxu2  ;;  %v1772_v50 = vadd.f32 %v1771_v51, %v8218_v26 }
 0x322   : > { %1925 = vmatpush.bf16.xpose.msrb.mxu0 %v1917_v39  ;;  %v1506_v2 = vmul.f32 %v8086_v61, %v1487_v14 }
 0x323   : > { %v8289_v36 = vpop.f32.mrf.mxu0 }
 0x328   : > { %v1773_v0 = vpop.f32.mrf.mxu1 }
 0x329   : > { %v1820_v40 = vpop.f32.mrf.mxu2  ;;  %v1774_v20 = vadd.f32 %v1773_v0, %v8218_v26 }
 0x32a   : > { %1926 = vmatpush.bf16.xpose.msrb.mxu0 %v1914_v58  ;;  %v1874_v58 = vpack.c.bf16 %v1772_v50, %v1772_v50  ;;  %v1821_v15 = vadd.f32 %v1820_v40, %v8304_v3 }
 0x32b   : > { %v8294_v4 = vpop.f32.mrf.mxu0  ;;  %v1875_v39 = vpack.c.bf16 %v1774_v20, %v1774_v20 }
 0x32c   : > { %1741 = vmatmul.bf16.gmra.mxu0 %v1533_v31  ;;  %1790 = vmatmul.bf16.gmra.mxu1 %v1533_v31  ;;  %v2320_v40 = vpack.c.bf16 %v1821_v15, %v1821_v15 }
 0x32d   : > { %1839 = vmatmul.bf16.gmra.mxu2 %v1533_v31  ;;  %v1953_v29 = vunpack.c.l.b16 %v1875_v39 }
 0x331   : > { %v1822_v46 = vpop.f32.mrf.mxu2 }
 0x332   : > { %v1823_v13 = vadd.f32 %v1822_v46, %v8304_v3 }
 0x333   : > { %v1722_v49 = vpop.f32.mrf.mxu0 }
 0x334   : > { %v2321_v51 = vpack.c.bf16 %v1823_v13, %v1823_v13 }
 0x33b   : > { %v1724_v8 = vpop.f32.mrf.mxu0 }
 0x366   : > { %v1280_v22 = vpop.xlane.xlu1 %1279 }
 0x367   : > { %v1296_v56 = vmul.f32 %v1280_v22, %v7916_v37 }
 0x369   : > { %v1312_v43 = vadd.f32 1e-05, %v1296_v56  ;;  %v1952_v56 = vunpack.c.l.b16 %v1874_v58 }
 0x36b   : > { %6894 = vrsqrt.f32 %v1312_v43  ;;  %vm1469_vm1 = vweird.f32 %v1312_v43  ;;  %v8326_v60 = vpack.c.b16 %v1953_v29, %v1952_v56 }
 0x371   : > { %v6895_v47 = vpop.eup %6894 }
 0x372   : > { %v1464_v53 = vmul.f32 %v6895_v47, %v1312_v43  ;;  %vm1470_vm0 = vweird.f32 %v6895_v47 }
 0x373   : > { %vm1471_vm2 = vmor %vm1469_vm1, %vm1470_vm0 }
 0x374   : > { %v1465_v45 = vmul.f32 %v6895_v47, %v1464_v53  ;;  %v2394_v53 = vunpack.c.l.b16 %v2321_v51 }
 0x376   : > { %v1466_v30 = vmul.f32 0.5, %v1465_v45 }
 0x378   : > { %v1776_v48 = vpop.f32.mrf.mxu1  ;;  %v1467_v28 = vsub.f32 1.5, %v1466_v30  ;;  %v1727_v11 = vpop.f32.mrf.mxu0  ;;  %v2393_v30 = vunpack.c.l.b16 %v2320_v40 }
 0x379   : > { %v1777_v23 = vadd.f32 %v1776_v48, %v8218_v26 }
 0x37a   : > { %v1468_v62 = vmul.f32 %v6895_v47, %v1467_v28  ;;  %v1965_v28 = vsel %vm1906_vm12, %v8326_v60, 0 }
 0x37b   : > { %v1876_v5 = vpack.c.bf16 %v1777_v23, %v1777_v23 }
 0x37c   : > { %v1472_v17 = vsel %vm1471_vm2, %v6895_v47, %v1468_v62  ;;  %v8333_v62 = vpack.c.b16 %v2394_v53, %v2393_v30 }
 0x37d   : > { %v1488_v63 = vmul.f32 %v1472_v17, %v8188_v52  ;;  %v1525_v52 = vadd.f32 %v8108_v59, %v1506_v2  ;;  %v1954_v25 = vunpack.c.l.b16 %v1876_v5 }
 0x37f   : > { %v1825_v55 = vpop.f32.mrf.mxu2  ;;  %v1507_v57 = vmul.f32 %v8086_v61, %v1488_v63  ;;  %v8312_v61 = vperm.slane %v8212_v21, 0 }
 0x380   : > { %v1778_v10 = vpop.f32.mrf.mxu1  ;;  %v1826_v54 = vadd.f32 %v1825_v55, %v8304_v3  ;;  %v1729_v17 = vpop.f32.mrf.mxu0 }
 0x381   : > { %v1779_v1 = vadd.f32 %v1778_v10, %v8218_v26  ;;  %v1526_v38 = vadd.f32 %v8108_v59, %v1507_v57  ;;  %v1715_v24 = vadd.f32 %v8285_v9, %v8312_v61  ;;  %v1713_v22 = vadd.f32 %v8280_v6, %v8312_v61 }
 0x382   : > { %v2322_v59 = vpack.c.bf16 %v1826_v54, %v1826_v54  ;;  %v1725_v43 = vadd.f32 %v1724_v8, %v8312_v61  ;;  %v1723_v9 = vadd.f32 %v1722_v49, %v8312_v61  ;;  %v1720_v8 = vadd.f32 %v8294_v4, %v8312_v61 }
 0x383   : > { %v1877_v7 = vpack.c.bf16 %v1779_v1, %v1779_v1  ;;  %v1534_v27 = vpack.c.bf16 %v1526_v38, %v1525_v52  ;;  %v1855_v47 = vpack.c.bf16 %v1715_v24, %v1715_v24  ;;  %v1854_v46 = vpack.c.bf16 %v1713_v22, %v1713_v22 }
 0x384   : > { %v2395_v18 = vunpack.c.l.b16 %v2322_v59  ;;  %v1859_v42 = vpack.c.bf16 %v1725_v43, %v1725_v43  ;;  %v1858_v48 = vpack.c.bf16 %v1723_v9, %v1723_v9  ;;  %v1718_v5 = vadd.f32 %v8289_v36, %v8312_v61 }
 0x385   : > { %v1955_v16 = vunpack.c.l.b16 %v1877_v7  ;;  %1746 = vmatmul.bf16.gmra.mxu0 %v1534_v27  ;;  %1795 = vmatmul.bf16.gmra.mxu1 %v1534_v27  ;;  %v1891_v6 = vunpack.c.l.b16 %v1855_v47  ;;  %v1890_v49 = vunpack.c.l.b16 %v1854_v46  ;;  %v1730_v1 = vadd.f32 %v1729_v17, %v8312_v61 }
 0x386   : > { %1844 = vmatmul.bf16.gmra.mxu2 %v1534_v27  ;;  %v1943_v23 = vunpack.c.l.b16 %v1859_v42  ;;  %v1942_v2 = vunpack.c.l.b16 %v1858_v48  ;;  %v1857_v50 = vpack.c.bf16 %v1720_v8, %v1720_v8  ;;  %v1728_v7 = vadd.f32 %v1727_v11, %v8312_v61 }
 0x387   : > { %v1827_v12 = vpop.f32.mrf.mxu2  ;;  %v8314_v31 = vpack.c.b16 %v1955_v16, %v1954_v25  ;;  %v8336_v55 = vpack.c.b16 %v1891_v6, %v1890_v49  ;;  %v1856_v38 = vpack.c.bf16 %v1718_v5, %v1718_v5  ;;  %v1861_v54 = vpack.c.bf16 %v1730_v1, %v1730_v1 }
 0x388   : > { %v1828_v33 = vadd.f32 %v1827_v12, %v8304_v3  ;;  %v8338_v10 = vpack.c.b16 %v1943_v23, %v1942_v2  ;;  %v1893_v25 = vunpack.c.l.b16 %v1857_v50  ;;  %v1860_v4 = vpack.c.bf16 %v1728_v7, %v1728_v7 }
 0x389   : > { %v1968_v21 = vsel %vm1906_vm12, %v8314_v31, 0  ;;  %v1781_v44 = vpop.f32.mrf.mxu1  ;;  %v1732_v52 = vpop.f32.mrf.mxu0  ;;  %v1892_v27 = vunpack.c.l.b16 %v1856_v38  ;;  %v1945_v13 = vunpack.c.l.b16 %v1861_v54 }
 0x38a   : > { %v2323_v34 = vpack.c.bf16 %v1828_v33, %v1828_v33  ;;  %1976 = vmatpush.bf16.xpose.msrb.mxu1 %v1968_v21  ;;  %v1944_v59 = vunpack.c.l.b16 %v1860_v4  ;;  %v1782_v24 = vadd.f32 %v1781_v44, %v8218_v26  ;;  %v1733_v17 = vadd.f32 %v1732_v52, %v8312_v61 }
 0x38b   : > { %v8353_v33 = vpack.c.b16 %v1893_v25, %v1892_v27 }
 0x38c   : > { %v2396_v0 = vunpack.c.l.b16 %v2323_v34  ;;  %v8359_v51 = vpack.c.b16 %v1945_v13, %v1944_v59  ;;  %v1878_v40 = vpack.c.bf16 %v1782_v24, %v1782_v24  ;;  %v1862_v1 = vpack.c.bf16 %v1733_v17, %v1733_v17 }
 0x38e   : > { %v8328_v45 = vpack.c.b16 %v2396_v0, %v2395_v18  ;;  %v2003_v6 = vunpack.c.l.b16 %v1878_v40  ;;  %v1993_v52 = vunpack.c.l.b16 %v1862_v1 }
 0x390   : > { %2413 = vmatpush.bf16.msra.mxu0 %v8328_v45  ;;  %v1830_v14 = vpop.f32.mrf.mxu2 }
 0x391   : > { %v1783_v63 = vpop.f32.mrf.mxu1  ;;  %v1734_v11 = vpop.f32.mrf.mxu0  ;;  %v1831_v0 = vadd.f32 %v1830_v14, %v8304_v3 }
 0x392   : > { %1977 = vmatpush.bf16.xpose.msrb.mxu1 %v1965_v28  ;;  %v1784_v12 = vadd.f32 %v1783_v63, %v8218_v26  ;;  %v1735_v48 = vadd.f32 %v1734_v11, %v8312_v61 }
 0x393   : > { %v2324_v28 = vpack.c.bf16 %v1831_v0, %v1831_v0 }
 0x394   : > { %2414 = vmatpush.bf16.msra.mxu0 %v8333_v62  ;;  %v1879_v34 = vpack.c.bf16 %v1784_v12, %v1784_v12 }
 0x395   : > { %6247 = vmatmul.msk.bf16.vlgmr.msrb.gmra.mxu0 %vm1906_vm12, %v8336_v55  ;;  %v2440_v5 = vunpack.c.l.b16 %v2324_v28  ;;  %v1816_v28 = vadd.f32 %v8287_v35, %v8304_v3 }
 0x396   : > { %v2004_v53 = vunpack.c.l.b16 %v1879_v34 }
 0x398   : > { %v1832_v20 = vpop.f32.mrf.mxu2  ;;  %v8372_v63 = vpack.c.b16 %v2004_v53, %v2003_v6 }
 0x399   : > { %6249 = vmatmul.msk.bf16.vlgmr.msrb.gmra.mxu1 %vm1906_vm12, %v8338_v10  ;;  %v1786_v57 = vpop.f32.mrf.mxu1  ;;  %v1833_v43 = vadd.f32 %v1832_v20, %v8304_v3  ;;  %v1737_v2 = vpop.f32.mrf.mxu0  ;;  %v1863_v20 = vpack.c.bf16 %v1735_v48, %v1735_v48 }
 0x39a   : > { %v1787_v39 = vadd.f32 %v1786_v57, %v8218_v26  ;;  %v2016_v57 = vsel %vm1906_vm12, %v8372_v63, 0  ;;  %v1738_v25 = vadd.f32 %v1737_v2, %v8312_v61 }
 0x39b   : > { %v2325_v42 = vpack.c.bf16 %v1833_v43, %v1833_v43  ;;  %v1994_v7 = vunpack.c.l.b16 %v1863_v20 }
 0x39c   : > { %v1880_v36 = vpack.c.bf16 %v1787_v39, %v1787_v39 }
 0x39d   : > { %v2441_v14 = vunpack.c.l.b16 %v2325_v42  ;;  %v8382_v38 = vpack.c.b16 %v1994_v7, %v1993_v52 }
 0x39e   : > { %v2005_v22 = vunpack.c.l.b16 %v1880_v36 }
 0x39f   : > { %v8379_v50 = vpack.c.b16 %v2441_v14, %v2440_v5  ;;  %v8415_v5 = vld [vmem:[%s12020_s25] sm:$0xff] }
 0x3a0   : > { %v1835_v16 = vpop.f32.mrf.mxu2 }
 0x3a1   : > { %v1788_v58 = vpop.f32.mrf.mxu1  ;;  %v1836_v21 = vadd.f32 %v1835_v16, %v8304_v3  ;;  %v1739_v54 = vpop.f32.mrf.mxu0  ;;  %v1864_v16 = vpack.c.bf16 %v1738_v25, %v1738_v25 }
 0x3a2   : > { %v1789_v15 = vadd.f32 %v1788_v58, %v8218_v26  ;;  %v1740_v39 = vadd.f32 %v1739_v54, %v8312_v61 }
 0x3a3   : > { %v2326_v47 = vpack.c.bf16 %v1836_v21, %v1836_v21  ;;  %v1995_v13 = vunpack.c.l.b16 %v1864_v16 }
 0x3a4   : > { %v1881_v29 = vpack.c.bf16 %v1789_v15, %v1789_v15  ;;  %v1865_v4 = vpack.c.bf16 %v1740_v39, %v1740_v39  ;;  %v2318_v39 = vpack.c.bf16 %v1816_v28, %v1816_v28 }
 0x3a5   : > { %6248 = vmatmul.msk.bf16.gmra.mxu0 %vm1906_vm12, %v8353_v33  ;;  %v2442_v49 = vunpack.c.l.b16 %v2326_v47 }
 0x3a6   : > { %v2006_v56 = vunpack.c.l.b16 %v1881_v29  ;;  %v1996_v27 = vunpack.c.l.b16 %v1865_v4 }
 0x3a8   : > { %v1837_v18 = vpop.f32.mrf.mxu2  ;;  %v8364_v44 = vpack.c.b16 %v2006_v56, %v2005_v22  ;;  %v8388_v58 = vpack.c.b16 %v1996_v27, %v1995_v13 }
 0x3a9   : > { %6250 = vmatmul.msk.bf16.gmra.mxu1 %vm1906_vm12, %v8359_v51  ;;  %v1838_v9 = vadd.f32 %v1837_v18, %v8304_v3  ;;  %v1742_v12 = vpop.f32.mrf.mxu0  ;;  %v1791_v36 = vpop.f32.mrf.mxu1 }
 0x3aa   : > { %v2019_v46 = vsel %vm1906_vm12, %v8364_v44, 0  ;;  %v1792_v47 = vadd.f32 %v1791_v36, %v8218_v26 }
 0x3ab   : > { %v2327_v30 = vpack.c.bf16 %v1838_v9, %v1838_v9  ;;  %2027 = vmatpush.bf16.xpose.msrb.mxu2 %v2019_v46  ;;  %v1818_v46 = vadd.f32 %v8291_v41, %v8304_v3 }
 0x3ad   : > { %v2443_v23 = vunpack.c.l.b16 %v2327_v30  ;;  %v2319_v1 = vpack.c.bf16 %v1818_v46, %v1818_v46 }
 0x3af   : > { %v8374_v8 = vpack.c.b16 %v2443_v23, %v2442_v49  ;;  %v1882_v49 = vpack.c.bf16 %v1792_v47, %v1792_v47 }
 0x3b0   : > { %v1840_v15 = vpop.f32.mrf.mxu2 }
 0x3b1   : > { %2460 = vmatpush.bf16.msra.mxu1 %v8374_v8  ;;  %v1744_v59 = vpop.f32.mrf.mxu0  ;;  %v1793_v24 = vpop.f32.mrf.mxu1  ;;  %v1841_v14 = vadd.f32 %v1840_v15, %v8304_v3  ;;  %v2054_v25 = vunpack.c.l.b16 %v1882_v49 }
 0x3b2   : > { %v1794_v40 = vadd.f32 %v1793_v24, %v8218_v26  ;;  %v1745_v4 = vadd.f32 %v1744_v59, %v8312_v61  ;;  %v2349_v24 = vunpack.c.l.b16 %v2319_v1 }
 0x3b3   : > { %2028 = vmatpush.bf16.xpose.msrb.mxu2 %v2016_v57  ;;  %v2328_v13 = vpack.c.bf16 %v1841_v14, %v1841_v14 }
 0x3b4   : > { %v1883_v42 = vpack.c.bf16 %v1794_v40, %v1794_v40  ;;  %v1867_v40 = vpack.c.bf16 %v1745_v4, %v1745_v4 }
 0x3b5   : > { %2461 = vmatpush.bf16.msra.mxu1 %v8379_v50 }
 0x3b6   : > { %v2055_v35 = vunpack.c.l.b16 %v1883_v42 }
 0x3b8   : > { %v1842_v29 = vpop.f32.mrf.mxu2 }
 0x3b9   : > { %v1843_v48 = vadd.f32 %v1842_v29, %v8304_v3  ;;  %v1743_v29 = vadd.f32 %v1742_v12, %v8312_v61  ;;  %v8436_v12 = vld [vmem:[%s12021_s1 + $0x8] sm:$0xff] }
 0x3ba   : > { %6251 = vmatmul.msk.bf16.vlgmr.msrb.gmra.mxu2 %vm1906_vm12, %v8382_v38 }
 0x3bb   : > { %v2329_v52 = vpack.c.bf16 %v1843_v48, %v1843_v48  ;;  %v2045_v48 = vunpack.c.l.b16 %v1867_v40 }
 0x3ca   : > { %6252 = vmatmul.msk.bf16.gmra.mxu2 %vm1906_vm12, %v8388_v58 }
 0x402   : > { %v8392_v11 = vpop.f32.mrf.mxu0  ;;  %v1796_v21 = vpop.f32.mrf.mxu1 }
 0x403   : > { %v1797_v34 = vadd.f32 %v1796_v21, %v8218_v26  ;;  %v2488_v21 = vunpack.c.l.b16 %v2329_v52 }
 0x405   : > { %v1884_v18 = vpack.c.bf16 %v1797_v34, %v1797_v34 }
 0x407   : > { %v2056_v30 = vunpack.c.l.b16 %v1884_v18 }
 0x409   : > { %v1845_v22 = vpop.f32.mrf.mxu2 }
 0x40a   : > { %v8395_v56 = vpop.f32.mrf.mxu0  ;;  %v1798_v43 = vpop.f32.mrf.mxu1  ;;  %v1846_v53 = vadd.f32 %v1845_v22, %v8304_v3 }
 0x40b   : > { %v1799_v0 = vadd.f32 %v1798_v43, %v8218_v26  ;;  %v1813_v26 = vadd.f32 %v8282_v19, %v8304_v3  ;;  %v1811_v19 = vadd.f32 %v8278_v32, %v8304_v3  ;;  %v2348_v43 = vunpack.c.l.b16 %v2318_v39 }
 0x40c   : > { %v2330_v2 = vpack.c.bf16 %v1846_v53, %v1846_v53  ;;  %v1750_v52 = vadd.f32 %v8395_v56, %v8312_v61  ;;  %v1748_v39 = vadd.f32 %v8392_v11, %v8312_v61 }
 0x40d   : > { %v1885_v9 = vpack.c.bf16 %v1799_v0, %v1799_v0  ;;  %v2317_v27 = vpack.c.bf16 %v1813_v26, %v1813_v26  ;;  %v2316_v59 = vpack.c.bf16 %v1811_v19, %v1811_v19  ;;  %v2487_v0 = vunpack.c.l.b16 %v2328_v13  ;;  %v2525_v13 = vpop.permute.xlu2 %2524 }
 0x40e   : > { %v2489_v36 = vunpack.c.l.b16 %v2330_v2  ;;  %v8440_v42 = vpack.c.b16 %v2349_v24, %v2348_v43  ;;  %v2527_v2 = vpop.permute.xlu1 %2526  ;;  %v1868_v56 = vpack.c.bf16 %v1748_v39, %v1748_v39 }
 0x40f   : > { %v2057_v6 = vunpack.c.l.b16 %v1885_v9  ;;  %v2347_v18 = vunpack.c.l.b16 %v2317_v27  ;;  %v1866_v9 = vpack.c.bf16 %v1743_v29, %v1743_v29 }
 0x410   : > { %v2046_v11 = vunpack.c.l.b16 %v1868_v56 }
 0x411   : > { %v1847_v23 = vpop.f32.mrf.mxu2  ;;  %v8406_v17 = vpack.c.b16 %v2057_v6, %v2056_v30  ;;  %v8442_v30 = vpack.c.b16 %v2488_v21, %v2487_v0  ;;  %v2346_v6 = vunpack.c.l.b16 %v2316_v59  ;;  %v2044_v49 = vunpack.c.l.b16 %v1866_v9 }
 0x412   : > { %v1848_v41 = vadd.f32 %v1847_v23, %v8304_v3  ;;  %v1928_v20 = vpop.f32.mrf.mxu0  ;;  %v8428_v3 = vpack.c.b16 %v2055_v35, %v2054_v25  ;;  %v8459_v35 = vld [vmem:[%s12021_s1 + $0x10] sm:$0xff] }
 0x413   : > { %v2091_v57 = vmul.f32 0.125, %v1928_v20  ;;  %v2070_v7 = vsel %vm1906_vm12, %v8406_v17, 0  ;;  %v8451_v14 = vpack.c.b16 %v2347_v18, %v2346_v6  ;;  %v8505_v6 = vld [vmem:[%s12021_s1 + $0x18] sm:$0xff] }
 0x414   : > { %v2331_v54 = vpack.c.bf16 %v1848_v41, %v1848_v41  ;;  %2078 = vmatpush.bf16.xpose.msra.mxu3 %v2070_v7  ;;  %v2067_v46 = vsel %vm1906_vm12, %v8428_v3, 0  ;;  %v8454_v41 = vpack.c.b16 %v2045_v48, %v2044_v49 }
 0x415   : > { %v8423_v16 = vadd.f32 %v2091_v57, %v8415_v5  ;;  %v2538_v57 = vsel %vm1906_vm12, %v2527_v2, 0 }
 0x416   : > { %v2490_v15 = vunpack.c.l.b16 %v2331_v54  ;;  %v1979_v22 = vpop.f32.mrf.mxu1 }
 0x417   : > { %v2124_v32 = vsel %vm2123_vm3, %v8423_v16, -inf  ;;  %v2095_v23 = vmul.f32 0.125, %v1979_v22 }
 0x418   : > { %v8430_v34 = vpack.c.b16 %v2490_v15, %v2489_v36  ;;  %2125 = vmax.xlane.f32.xlu2 %v2124_v32  ;;  %v1869_v36 = vpack.c.bf16 %v1750_v52, %v1750_v52  ;;  %v2535_v15 = vsel %vm1906_vm12, %v2525_v13, 0 }
 0x419   : > { %v8465_v19 = vadd.f32 %v2095_v23, %v8415_v5 }
 0x41a   : > { %2507 = vmatpush.bf16.msra.mxu2 %v8430_v34  ;;  %v1930_v47 = vpop.f32.mrf.mxu0  ;;  %v2047_v61 = vunpack.c.l.b16 %v1869_v36 }
 0x41b   : > { %v2092_v53 = vmul.f32 0.125, %v1930_v47  ;;  %v2136_v4 = vsel %vm2123_vm3, %v8465_v19, -inf }
 0x41c   : > { %2079 = vmatpush.bf16.xpose.msra.mxu3 %v2067_v46  ;;  %v8486_v22 = vpack.c.b16 %v2047_v61, %v2046_v11 }
 0x41d   : > { %v8446_v28 = vadd.f32 %v2092_v53, %v8436_v12 }
 0x41e   : > { %2508 = vmatpush.bf16.msra.mxu2 %v8442_v30  ;;  %v1981_v20 = vpop.f32.mrf.mxu1 }
 0x41f   : > { %v2127_v26 = vsel %vm2123_vm3, %v8446_v28, -inf  ;;  %v2096_v25 = vmul.f32 0.125, %v1981_v20 }
 0x420   : > { %2128 = vmax.xlane.f32.xlu0 %v2127_v26 }
 0x421   : > { %v8480_v24 = vadd.f32 %v2096_v25, %v8436_v12 }
 0x422   : > { %v1933_v1 = vpop.f32.mrf.mxu0 }
 0x423   : > { %v2093_v7 = vmul.f32 0.125, %v1933_v1  ;;  %6253 = vmatmul.msk.bf16.vlgmr.msra.gmra.mxu3 %vm1906_vm12, %v8454_v41  ;;  %v2139_v21 = vsel %vm2123_vm3, %v8480_v24, -inf }
 0x424   : > { %2366 = vmatpush.bf16.msrb.mxu3 %v8440_v42 }
 0x425   : > { %v8470_v54 = vadd.f32 %v2093_v7, %v8459_v35 }
 0x426   : > { %v1984_v29 = vpop.f32.mrf.mxu1 }
 0x427   : > { %v2130_v27 = vsel %vm2123_vm3, %v8470_v54, -inf  ;;  %v2097_v32 = vmul.f32 0.125, %v1984_v29 }
 0x428   : > { %2367 = vmatpush.bf16.msrb.mxu3 %v8451_v14  ;;  %2137 = vmax.xlane.f32.xlu0 %v2136_v4 }
 0x429   : > { %2131 = vmax.xlane.f32.xlu1 %v2130_v27  ;;  %v8491_v59 = vadd.f32 %v2097_v32, %v8459_v35 }
 0x42a   : > { %v1935_v9 = vpop.f32.mrf.mxu0 }
 0x42b   : > { %v2142_v43 = vsel %vm2123_vm3, %v8491_v59, -inf  ;;  %v2094_v46 = vmul.f32 0.125, %v1935_v9 }
 0x42c   : > { %2546 = vmatpush.bf16.xpose.msra.mxu3 %v2538_v57 }
 0x42d   : > { %v2110_v48 = vadd.f32 %v2094_v46, %v8505_v6 }
 0x42e   : > { %v1986_v49 = vpop.f32.mrf.mxu1 }
 0x42f   : > { %v2098_v2 = vmul.f32 0.125, %v1986_v49  ;;  %v2133_v20 = vsel %vm2123_vm3, %v2110_v48, -inf }
 0x430   : > { %2520 = vrot.lane.b32.xlu2 %v8336_v55, %s7372_s18 }
 0x431   : > { %2140 = vmax.xlane.f32.xlu1 %v2139_v21  ;;  %v8517_v57 = vadd.f32 %v2098_v2, %v8505_v6 }
 0x433   : > { %6254 = vmatmul.msk.bf16.gmra.mxu3 %vm1906_vm12, %v8486_v22  ;;  %v2145_v52 = vsel %vm2123_vm3, %v8517_v57, -inf }
 0x434   : > { %2547 = vmatpush.bf16.xpose.msra.mxu3 %v2535_v15 }
 0x439   : > { %2143 = vmax.xlane.f32.xlu1 %v2142_v43 }
 0x43d   : > { %v2030_v40 = vpop.f32.mrf.mxu2 }
 0x43e   : > { %v2099_v7 = vmul.f32 0.125, %v2030_v40 }
 0x440   : > { %v2115_v39 = vadd.f32 %v2099_v7, %v8415_v5 }
 0x442   : > { %v2148_v4 = vsel %vm2123_vm3, %v2115_v39, -inf }
 0x445   : > { %v2032_v18 = vpop.f32.mrf.mxu2 }
 0x446   : > { %v2100_v0 = vmul.f32 0.125, %v2032_v18 }
 0x448   : > { %v8496_v47 = vadd.f32 %v2100_v0, %v8436_v12 }
 0x44a   : > { %v2151_v55 = vsel %vm2123_vm3, %v8496_v47, -inf }
 0x44b   : > { %2152 = vmax.xlane.f32.xlu0 %v2151_v55 }
 0x44d   : > { %v2035_v53 = vpop.f32.mrf.mxu2 }
 0x44e   : > { %v2101_v25 = vmul.f32 0.125, %v2035_v53 }
 0x452   : > { %2563 = vrot.lane.b32.xlu1 %v8326_v60, %s7372_s18 }
 0x455   : > { %v2037_v23 = vpop.f32.mrf.mxu2 }
 0x456   : > { %v2102_v26 = vmul.f32 0.125, %v2037_v23 }
 0x458   : > { %v8510_v1 = vadd.f32 %v2102_v26, %v8505_v6 }
 0x459   : > { %2134 = vmax.xlane.f32.xlu2 %v2133_v20 }
 0x45a   : > { %2559 = vrot.lane.b32.xlu1 %v8338_v10, %s7372_s18  ;;  %v2157_v60 = vsel %vm2123_vm3, %v8510_v1, -inf  ;;  %v8524_v10 = vadd.f32 %v2101_v25, %v8459_v35 }
 0x45b   : > { %2158 = vmax.xlane.f32.xlu0 %v2157_v60 }
 0x45c   : > { %v2154_v27 = vsel %vm2123_vm3, %v8524_v10, -inf }
 0x461   : > { %2146 = vmax.xlane.f32.xlu2 %v2145_v52 }
 0x469   : > { %2149 = vmax.xlane.f32.xlu2 %v2148_v4 }
 0x471   : > { %2155 = vmax.xlane.f32.xlu2 %v2154_v27 }
 0x48b   : > { %v2126_v13 = vpop.xlane.xlu2 %2125 }
 0x48c   : > { %v2172_v36 = vsub.f32 %v8423_v16, %v2126_v13 }
 0x48e   : > { %v2188_v15 = vmul.f32 1.442695, %v2172_v36 }
 0x490   : > { %6896 = vpow2.f32 %v2188_v15 }
 0x493   : > { %v2129_v40 = vpop.xlane.xlu0 %2128  ;;  %v8558_v52 = vpop.permute.xlu2 %2520 }
 0x494   : > { %v2173_v0 = vsub.f32 %v8446_v28, %v2129_v40 }
 0x496   : > { %v8529_v56 = vpop.eup %6896  ;;  %v2190_v9 = vmul.f32 1.442695, %v2173_v0 }
 0x497   : > { %v2220_v29 = vsel %vm2123_vm3, %v8529_v56, 0.0 }
 0x498   : > { %2221 = vadd.xlane.f32.xlu2 %v2220_v29  ;;  %6898 = vpow2.f32 %v2190_v9 }
 0x49b   : > { %v2138_v25 = vpop.xlane.xlu0 %2137 }
 0x49c   : > { %v2176_v13 = vsub.f32 %v8465_v19, %v2138_v25 }
 0x49e   : > { %v8549_v20 = vpop.eup %6898  ;;  %v2196_v15 = vmul.f32 1.442695, %v2176_v13 }
 0x49f   : > { %v2223_v60 = vsel %vm2123_vm3, %v8549_v20, 0.0 }
 0x4a6   : > { %v2081_v61 = vpop.f32.mrf.mxu3 }
 0x4a7   : > { %v2103_v11 = vmul.f32 0.125, %v2081_v61 }
 0x4a9   : > { %v8534_v32 = vadd.f32 %v2103_v11, %v8415_v5 }
 0x4ab   : > { %v2160_v21 = vsel %vm2123_vm3, %v8534_v32, -inf }
 0x4ac   : > { %2161 = vmax.xlane.f32.xlu0 %v2160_v21 }
 0x4ae   : > { %v2083_v43 = vpop.f32.mrf.mxu3 }
 0x4af   : > { %v2104_v16 = vmul.f32 0.125, %v2083_v43 }
 0x4b1   : > { %v8539_v18 = vadd.f32 %v2104_v16, %v8436_v12 }
 0x4b3   : > { %v2163_v55 = vsel %vm2123_vm3, %v8539_v18, -inf }
 0x4b4   : > { %2164 = vmax.xlane.f32.xlu0 %v2163_v55 }
 0x4b6   : > { %v2086_v53 = vpop.f32.mrf.mxu3 }
 0x4b7   : > { %v2105_v46 = vmul.f32 0.125, %v2086_v53  ;;  %v2132_v53 = vpop.xlane.xlu1 %2131 }
 0x4b9   : > { %v8545_v49 = vadd.f32 %v2105_v46, %v8459_v35 }
 0x4bb   : > { %v2166_v23 = vsel %vm2123_vm3, %v8545_v49, -inf }
 0x4bc   : > { %2167 = vmax.xlane.f32.xlu0 %v2166_v23 }
 0x4be   : > { %v2088_v26 = vpop.f32.mrf.mxu3  ;;  %v2153_v21 = vpop.xlane.xlu0 %2152 }
 0x4bf   : > { %v2106_v2 = vmul.f32 0.125, %v2088_v26  ;;  %v2181_v40 = vsub.f32 %v8496_v47, %v2153_v21  ;;  %v2141_v23 = vpop.xlane.xlu1 %2140 }
 0x4c1   : > { %v8552_v28 = vadd.f32 %v2106_v2, %v8505_v6 }
 0x4c3   : > { %v2169_v7 = vsel %vm2123_vm3, %v8552_v28, -inf }
 0x4c4   : > { %2224 = vadd.xlane.f32.xlu0 %v2223_v60  ;;  %2170 = vmax.xlane.f32.xlu2 %v2169_v7  ;;  %v2177_v7 = vsub.f32 %v8480_v24, %v2141_v23 }
 0x4c6   : > { %v2198_v25 = vmul.f32 1.442695, %v2177_v7 }
 0x4cc   : > { %v2135_v4 = vpop.xlane.xlu2 %2134 }
 0x4cd   : > { %v2175_v27 = vsub.f32 %v2110_v48, %v2135_v4  ;;  %v2144_v4 = vpop.xlane.xlu1 %2143 }
 0x4ce   : > { %v2159_v47 = vpop.xlane.xlu0 %2158 }
 0x4cf   : > { %v2194_v36 = vmul.f32 1.442695, %v2175_v27  ;;  %v2183_v26 = vsub.f32 %v8510_v1, %v2159_v47 }
 0x4d1   : > { %6900 = vpow2.f32 %v2194_v36  ;;  %v2210_v60 = vmul.f32 1.442695, %v2183_v26 }
 0x4d2   : > { %6902 = vpow2.f32 %v2196_v15 }
 0x4d4   : > { %v2147_v29 = vpop.xlane.xlu2 %2146 }
 0x4d7   : > { %v8561_v61 = vpop.eup %6900 }
 0x4d8   : > { %2522 = vrot.lane.b32.xlu0 %v8353_v33, %s7372_s18  ;;  %v2229_v11 = vsel %vm2123_vm3, %v8561_v61, 0.0  ;;  %v8569_v19 = vpop.eup %6902  ;;  %v2206_v33 = vmul.f32 1.442695, %v2181_v40 }
 0x4d9   : > { %2230 = vadd.xlane.f32.xlu1 %v2229_v11  ;;  %v2232_v0 = vsel %vm2123_vm3, %v8569_v19, 0.0  ;;  %v2179_v11 = vsub.f32 %v8517_v57, %v2147_v29 }
 0x4dc   : > { %v2150_v43 = vpop.xlane.xlu2 %2149  ;;  %2565 = vrot.lane.b32.xlu2 %v8314_v31, %s7372_s18 }
 0x4dd   : > { %v2180_v48 = vsub.f32 %v2115_v39, %v2150_v43  ;;  %v2174_v39 = vsub.f32 %v8470_v54, %v2132_v53  ;;  %v2178_v54 = vsub.f32 %v8491_v59, %v2144_v4  ;;  %v2202_v59 = vmul.f32 1.442695, %v2179_v11  ;;  %v2564_v4 = vpop.permute.xlu1 %2563 }
 0x4df   : > { %v2204_v16 = vmul.f32 1.442695, %v2180_v48  ;;  %v2192_v2 = vmul.f32 1.442695, %v2174_v39  ;;  %v2200_v1 = vmul.f32 1.442695, %v2178_v54 }
 0x4e1   : > { %6904 = vpow2.f32 %v2204_v16  ;;  %2233 = vadd.xlane.f32.xlu1 %v2232_v0 }
 0x4e2   : > { %6906 = vpow2.f32 %v2206_v33 }
 0x4e3   : > { %6908 = vpow2.f32 %v2192_v2 }
 0x4e4   : > { %6910 = vpow2.f32 %v2210_v60  ;;  %v2156_v43 = vpop.xlane.xlu2 %2155 }
 0x4e5   : > { %6912 = vpow2.f32 %v2198_v25  ;;  %v2182_v40 = vsub.f32 %v8524_v10, %v2156_v43  ;;  %v8635_v43 = vpop.permute.xlu1 %2559 }
 0x4e6   : > { %6914 = vpow2.f32 %v2200_v1 }
 0x4e7   : > { %v8574_v55 = vpop.eup %6904  ;;  %6916 = vpow2.f32 %v2202_v59  ;;  %v2208_v0 = vmul.f32 1.442695, %v2182_v40 }
 0x4e8   : > { %v2244_v9 = vsel %vm2123_vm3, %v8574_v55, 0.0  ;;  %v8578_v31 = vpop.eup %6906 }
 0x4e9   : > { %2245 = vadd.xlane.f32.xlu1 %v2244_v9  ;;  %v2247_v46 = vsel %vm2123_vm3, %v8578_v31, 0.0  ;;  %v8585_v27 = vpop.eup %6908  ;;  %6918 = vpow2.f32 %v2208_v0 }
 0x4ea   : > { %v8588_v13 = vpop.eup %6910  ;;  %v2226_v36 = vsel %vm2123_vm3, %v8585_v27, 0.0 }
 0x4eb   : > { %v2253_v15 = vsel %vm2123_vm3, %v8588_v13, 0.0  ;;  %v8594_v24 = vpop.eup %6912 }
 0x4ec   : > { %v2235_v21 = vsel %vm2123_vm3, %v8594_v24, 0.0  ;;  %v8599_v48 = vpop.eup %6914 }
 0x4ed   : > { %v2238_v16 = vsel %vm2123_vm3, %v8599_v48, 0.0  ;;  %v8604_v33 = vpop.eup %6916 }
 0x4ee   : > { %v2241_v57 = vsel %vm2123_vm3, %v8604_v33, 0.0 }
 0x4ef   : > { %v8610_v29 = vpop.eup %6918 }
 0x4f0   : > { %v2250_v53 = vsel %vm2123_vm3, %v8610_v29, 0.0 }
 0x4f1   : > { %2248 = vadd.xlane.f32.xlu1 %v2247_v46 }
 0x502   : > { %2227 = vadd.xlane.f32.xlu0 %v2226_v36 }
 0x505   : > { %2254 = vadd.xlane.f32.xlu2 %v2253_v15 }
 0x50a   : > { %2236 = vadd.xlane.f32.xlu0 %v2235_v21 }
 0x512   : > { %2239 = vadd.xlane.f32.xlu0 %v2238_v16 }
 0x51a   : > { %2242 = vadd.xlane.f32.xlu0 %v2241_v57 }
 0x51d   : > { %2604 = vrot.lane.b32.xlu2 %v8364_v44, %s7372_s18 }
 0x51f   : > { %v2162_v9 = vpop.xlane.xlu0 %2161 }
 0x520   : > { %v2184_v10 = vsub.f32 %v8534_v32, %v2162_v9  ;;  %v2222_v32 = vpop.xlane.xlu2 %2221 }
 0x522   : > { %v2212_v39 = vmul.f32 1.442695, %v2184_v10  ;;  %2251 = vadd.xlane.f32.xlu0 %v2250_v53 }
 0x524   : > { %6920 = vpow2.f32 %v2212_v39 }
 0x525   : > { %2598 = vrot.lane.b32.xlu2 %v8382_v38, %s7372_s18 }
 0x527   : > { %v2165_v47 = vpop.xlane.xlu0 %2164 }
 0x528   : > { %v2185_v46 = vsub.f32 %v8539_v18, %v2165_v47 }
 0x52a   : > { %v8618_v23 = vpop.eup %6920  ;;  %v2214_v44 = vmul.f32 1.442695, %v2185_v46 }
 0x52b   : > { %v2256_v26 = vsel %vm2123_vm3, %v8618_v23, 0.0 }
 0x52c   : > { %6922 = vpow2.f32 %v2214_v44  ;;  %2257 = vadd.xlane.f32.xlu1 %v2256_v26 }
 0x52d   : > { %2643 = vrot.lane.b32.xlu2 %v8406_v17, %s7372_s18  ;;  %6924 = vrcp.f32 %v2222_v32 }
 0x52f   : > { %v2168_v2 = vpop.xlane.xlu0 %2167 }
 0x530   : > { %v2186_v57 = vsub.f32 %v8545_v49, %v2168_v2 }
 0x532   : > { %v8624_v60 = vpop.eup %6922  ;;  %v2216_v10 = vmul.f32 1.442695, %v2186_v57 }
 0x533   : > { %v2259_v38 = vsel %vm2123_vm3, %v8624_v60, 0.0  ;;  %v6925_v25 = vpop.eup %6924 }
 0x534   : > { %2260 = vadd.xlane.f32.xlu0 %v2259_v38  ;;  %v2284_v54 = vmul.f32 %v6925_v25, %v8529_v56 }
 0x535   : > { %2641 = vrot.lane.b32.xlu2 %v8428_v3, %s7372_s18 }
 0x536   : > { %v2300_v36 = vpack.c.bf16 %v2284_v54, %v2284_v54 }
 0x537   : > { %v2225_v18 = vpop.xlane.xlu0 %2224  ;;  %v2171_v7 = vpop.xlane.xlu2 %2170 }
 0x538   : > { %6926 = vrcp.f32 %v2225_v18  ;;  %v2336_v3 = vunpack.c.l.b16 %v2300_v36  ;;  %v2187_v16 = vsub.f32 %v8552_v28, %v2171_v7 }
 0x53a   : > { %v2218_v9 = vmul.f32 1.442695, %v2187_v16 }
 0x53d   : > { %2637 = vrot.lane.b32.xlu2 %v8454_v41, %s7372_s18  ;;  %v2574_v41 = vsel %vm1906_vm12, %v2564_v4, 0 }
 0x53e   : > { %v6927_v17 = vpop.eup %6926 }
 0x53f   : > { %v2285_v1 = vmul.f32 %v6927_v17, %v8549_v20  ;;  %v2566_v15 = vpop.permute.xlu2 %2565 }
 0x540   : > { %v2577_v11 = vsel %vm1906_vm12, %v2566_v15, 0 }
 0x541   : > { %v2301_v21 = vpack.c.bf16 %v2285_v1, %v2285_v1  ;;  %2585 = vmatpush.bf16.xpose.msrb.mxu0 %v2577_v11 }
 0x543   : > { %v2337_v59 = vunpack.c.l.b16 %v2301_v21 }
 0x545   : > { %2602 = vrot.lane.b32.xlu1 %v8372_v63, %s7372_s18  ;;  %v2340_v56 = vpack.c.b16 %v2337_v59, %v2336_v3 }
 0x547   : > { %6255 = vmatmul.msk.bf16.vlgmr.msrb.gmra.mxu3 %vm2123_vm3, %v2340_v56 }
 0x548   : > { %2561 = vrot.lane.b32.xlu0 %v8359_v51, %s7372_s18 }
 0x549   : > { %2586 = vmatpush.bf16.xpose.msrb.mxu0 %v2574_v41 }
 0x54a   : > { %v8649_v28 = vpop.permute.xlu0 %2522 }
 0x54c   : > { %v2231_v20 = vpop.xlane.xlu1 %2230 }
 0x554   : > { %v2234_v40 = vpop.xlane.xlu1 %2233 }
 0x55c   : > { %v2246_v0 = vpop.xlane.xlu1 %2245 }
 0x55d   : > { %6928 = vrcp.f32 %v2246_v0 }
 0x55e   : > { %6930 = vpow2.f32 %v2218_v9 }
 0x563   : > { %v6929_v53 = vpop.eup %6928 }
 0x564   : > { %v2249_v63 = vpop.xlane.xlu1 %2248  ;;  %v2292_v39 = vmul.f32 %v6929_v53, %v8574_v55  ;;  %v8646_v47 = vpop.eup %6930 }
 0x565   : > { %6932 = vrcp.f32 %v2249_v63  ;;  %v2265_v32 = vsel %vm2123_vm3, %v8646_v47, 0.0 }
 0x566   : > { %6934 = vpow2.f32 %v2216_v10  ;;  %v2308_v46 = vpack.c.bf16 %v2292_v39, %v2292_v39 }
 0x567   : > { %6936 = vrcp.f32 %v2231_v20 }
 0x568   : > { %v2430_v2 = vunpack.c.l.b16 %v2308_v46 }
 0x56b   : > { %v6933_v51 = vpop.eup %6932 }
 0x56c   : > { %v2293_v44 = vmul.f32 %v6933_v51, %v8578_v31  ;;  %v8651_v26 = vpop.eup %6934 }
 0x56d   : > { %v2262_v55 = vsel %vm2123_vm3, %v8651_v26, 0.0  ;;  %v6937_v7 = vpop.eup %6936 }
 0x56e   : > { %v2309_v49 = vpack.c.bf16 %v2293_v44, %v2293_v44  ;;  %v2287_v4 = vmul.f32 %v6937_v7, %v8561_v61 }
 0x56f   : > { %2266 = vadd.xlane.f32.xlu1 %v2265_v32 }
 0x570   : > { %v2431_v38 = vunpack.c.l.b16 %v2309_v49  ;;  %v2303_v1 = vpack.c.bf16 %v2287_v4, %v2287_v4 }
 0x572   : > { %v2434_v18 = vpack.c.b16 %v2431_v38, %v2430_v2  ;;  %2263 = vadd.xlane.f32.xlu0 %v2262_v55  ;;  %v2339_v41 = vunpack.c.l.b16 %v2303_v1 }
 0x574   : > { %6259 = vmatmul.msk.bf16.vlgmr.msra.gmra.mxu1 %vm2123_vm3, %v2434_v18 }
 0x575   : > { %v2228_v31 = vpop.xlane.xlu0 %2227 }
 0x576   : > { %6938 = vrcp.f32 %v2228_v31 }
 0x577   : > { %6940 = vrcp.f32 %v2234_v40 }
 0x578   : > { %v2255_v25 = vpop.xlane.xlu2 %2254 }
 0x57c   : > { %v6939_v54 = vpop.eup %6938 }
 0x57d   : > { %v2237_v17 = vpop.xlane.xlu0 %2236  ;;  %v2286_v36 = vmul.f32 %v6939_v54, %v8585_v27  ;;  %v6941_v15 = vpop.eup %6940 }
 0x57e   : > { %6942 = vrcp.f32 %v2237_v17  ;;  %v2288_v3 = vmul.f32 %v6941_v15, %v8569_v19 }
 0x57f   : > { %v2302_v11 = vpack.c.bf16 %v2286_v36, %v2286_v36 }
 0x580   : > { %v2605_v21 = vpop.permute.xlu2 %2604  ;;  %v2304_v16 = vpack.c.bf16 %v2288_v3, %v2288_v3 }
 0x581   : > { %v2616_v59 = vsel %vm1906_vm12, %v2605_v21, 0  ;;  %v2338_v56 = vunpack.c.l.b16 %v2302_v11 }
 0x582   : > { %2624 = vmatpush.bf16.xpose.msrb.mxu1 %v2616_v59  ;;  %v2383_v57 = vunpack.c.l.b16 %v2304_v16 }
 0x583   : > { %v2341_v20 = vpack.c.b16 %v2339_v41, %v2338_v56 }
 0x584   : > { %v6943_v40 = vpop.eup %6942 }
 0x585   : > { %v2289_v61 = vmul.f32 %v6943_v40, %v8594_v24  ;;  %6256 = vmatmul.msk.bf16.gmra.mxu3 %vm2123_vm3, %v2341_v20  ;;  %v2240_v27 = vpop.xlane.xlu0 %2239 }
 0x586   : > { %2639 = vrot.lane.b32.xlu0 %v8486_v22, %s7372_s18  ;;  %6944 = vrcp.f32 %v2240_v27 }
 0x587   : > { %v2305_v0 = vpack.c.bf16 %v2289_v61, %v2289_v61 }
 0x588   : > { %2600 = vrot.lane.b32.xlu1 %v8388_v58, %s7372_s18  ;;  %v2599_v19 = vpop.permute.xlu2 %2598 }
 0x589   : > { %v2384_v9 = vunpack.c.l.b16 %v2305_v0 }
 0x58b   : > { %v2387_v10 = vpack.c.b16 %v2384_v9, %v2383_v57 }
 0x58c   : > { %v6945_v53 = vpop.eup %6944 }
 0x58d   : > { %6257 = vmatmul.msk.bf16.vlgmr.msra.gmra.mxu0 %vm2123_vm3, %v2387_v10  ;;  %v2243_v63 = vpop.xlane.xlu0 %2242  ;;  %v2290_v58 = vmul.f32 %v6945_v53, %v8599_v48 }
 0x58e   : > { %6946 = vrcp.f32 %v2243_v63  ;;  %2910 = vrot.lane.b32.xlu0 %v8451_v14, %s7372_s18 }
 0x58f   : > { %6948 = vrcp.f32 %v2255_v25  ;;  %v2306_v44 = vpack.c.bf16 %v2290_v58, %v2290_v58 }
 0x590   : > { %2912 = vrot.lane.b32.xlu1 %v8440_v42, %s7372_s18  ;;  %v2644_v22 = vpop.permute.xlu2 %2643 }
 0x591   : > { %v2655_v24 = vsel %vm1906_vm12, %v2644_v22, 0  ;;  %v2385_v2 = vunpack.c.l.b16 %v2306_v44 }
 0x592   : > { %2663 = vmatpush.bf16.xpose.msrb.mxu2 %v2655_v24 }
 0x594   : > { %v6947_v39 = vpop.eup %6946 }
 0x595   : > { %6263 = vmatmul.msk.bf16.vlgmr.msra.gmra.mxu3 %vm1906_vm12, %v8558_v52  ;;  %v2252_v51 = vpop.xlane.xlu0 %2251  ;;  %v2291_v46 = vmul.f32 %v6947_v39, %v8604_v33  ;;  %v6949_v49 = vpop.eup %6948 }
 0x596   : > { %6950 = vrcp.f32 %v2252_v51  ;;  %v2295_v55 = vmul.f32 %v6949_v49, %v8588_v13 }
 0x597   : > { %v2307_v14 = vpack.c.bf16 %v2291_v46, %v2291_v46 }
 0x598   : > { %v2642_v32 = vpop.permute.xlu2 %2641  ;;  %v2311_v31 = vpack.c.bf16 %v2295_v55, %v2295_v55 }
 0x599   : > { %v2652_v42 = vsel %vm1906_vm12, %v2642_v32, 0  ;;  %v2386_v38 = vunpack.c.l.b16 %v2307_v14 }
 0x59a   : > { %2664 = vmatpush.bf16.xpose.msrb.mxu2 %v2652_v42  ;;  %v2433_v4 = vunpack.c.l.b16 %v2311_v31 }
 0x59b   : > { %v2388_v48 = vpack.c.b16 %v2386_v38, %v2385_v2 }
 0x59c   : > { %v6951_v18 = vpop.eup %6950 }
 0x59d   : > { %6258 = vmatmul.msk.bf16.gmra.mxu0 %vm2123_vm3, %v2388_v48  ;;  %v2294_v52 = vmul.f32 %v6951_v18, %v8610_v29 }
 0x59f   : > { %v2258_v33 = vpop.xlane.xlu1 %2257  ;;  %v2310_v7 = vpack.c.bf16 %v2294_v52, %v2294_v52 }
 0x5a0   : > { %6952 = vrcp.f32 %v2258_v33 }
 0x5a1   : > { %v2432_v25 = vunpack.c.l.b16 %v2310_v7 }
 0x5a3   : > { %v2435_v54 = vpack.c.b16 %v2433_v4, %v2432_v25 }
 0x5a5   : > { %6260 = vmatmul.msk.bf16.gmra.mxu1 %vm2123_vm3, %v2435_v54  ;;  %6264 = vmatmul.msk.bf16.gmra.mxu3 %vm1906_vm12, %v8649_v28 }
 0x5a6   : > { %v6953_v17 = vpop.eup %6952 }
 0x5a7   : > { %v2261_v13 = vpop.xlane.xlu0 %2260  ;;  %v2296_v36 = vmul.f32 %v6953_v17, %v8618_v23 }
 0x5a8   : > { %6954 = vrcp.f32 %v2261_v13 }
 0x5a9   : > { %v2312_v1 = vpack.c.bf16 %v2296_v36, %v2296_v36 }
 0x5ab   : > { %v2477_v21 = vunpack.c.l.b16 %v2312_v1 }
 0x5ad   : > { %6265 = vmatmul.msk.bf16.vlgmr.msrb.gmra.mxu0 %vm1906_vm12, %v8635_v43 }
 0x5ae   : > { %v6955_v29 = vpop.eup %6954 }
 0x5af   : > { %v2297_v15 = vmul.f32 %v6955_v29, %v8624_v60 }
 0x5b1   : > { %v2313_v11 = vpack.c.bf16 %v2297_v15, %v2297_v15 }
 0x5b3   : > { %v2478_v3 = vunpack.c.l.b16 %v2313_v11 }
 0x5b5   : > { %v2481_v59 = vpack.c.b16 %v2478_v3, %v2477_v21 }
 0x5b7   : > { %v2603_v56 = vpop.permute.xlu1 %2602  ;;  %6261 = vmatmul.msk.bf16.vlgmr.msra.gmra.mxu2 %vm2123_vm3, %v2481_v59 }
 0x5b8   : > { %v2613_v28 = vsel %vm1906_vm12, %v2603_v56, 0 }
 0x5b9   : > { %2625 = vmatpush.bf16.xpose.msrb.mxu1 %v2613_v28 }
 0x5ba   : > { %v2562_v41 = vpop.permute.xlu0 %2561 }
 0x5bd   : > { %6266 = vmatmul.msk.bf16.gmra.mxu0 %vm1906_vm12, %v2562_v41 }
 0x5c0   : > { %6267 = vmatmul.msk.bf16.vlgmr.msrb.gmra.mxu1 %vm1906_vm12, %v2599_v19 }
 0x5ca   : > { %v8696_v10 = vpop.f32.mrf.mxu3 }
 0x5d2   : > { %v8699_v53 = vpop.f32.mrf.mxu3 }
 0x5e2   : > { %v2267_v23 = vpop.xlane.xlu1 %2266 }
 0x5e3   : > { %6956 = vrcp.f32 %v2267_v23 }
 0x5e5   : > { %v2264_v43 = vpop.xlane.xlu0 %2263 }
 0x5e6   : > { %6958 = vrcp.f32 %v2264_v43 }
 0x5e9   : > { %v6957_v60 = vpop.eup %6956 }
 0x5ea   : > { %v2299_v20 = vmul.f32 %v6957_v60, %v8646_v47  ;;  %v2638_v47 = vpop.permute.xlu2 %2637 }
 0x5ec   : > { %v6959_v40 = vpop.eup %6958  ;;  %v2315_v61 = vpack.c.bf16 %v2299_v20, %v2299_v20 }
 0x5ed   : > { %v2298_v16 = vmul.f32 %v6959_v40, %v8651_v26 }
 0x5ee   : > { %v2480_v57 = vunpack.c.l.b16 %v2315_v61 }
 0x5ef   : > { %v2314_v27 = vpack.c.bf16 %v2298_v16, %v2298_v16 }
 0x5f1   : > { %v2479_v0 = vunpack.c.l.b16 %v2314_v27  ;;  %v8711_v44 = vpop.f32.mrf.mxu1 }
 0x5f3   : > { %v2482_v9 = vpack.c.b16 %v2480_v57, %v2479_v0 }
 0x5f5   : > { %6262 = vmatmul.msk.bf16.gmra.mxu2 %vm2123_vm3, %v2482_v9 }
 0x5f8   : > { %v2640_v63 = vpop.permute.xlu0 %2639 }
 0x5f9   : > { %v8722_v48 = vpop.f32.mrf.mxu1 }
 0x5fa   : > { %v2601_v19 = vpop.permute.xlu1 %2600 }
 0x5fb   : > { %6268 = vmatmul.msk.bf16.gmra.mxu1 %vm1906_vm12, %v2601_v19 }
 0x600   : > { %v2911_v26 = vpop.permute.xlu0 %2910 }
 0x602   : > { %v2913_v22 = vpop.permute.xlu1 %2912 }
 0x603   : > { %2928 = vmatpush.bf16.msrb.mxu3 %v2913_v22 }
 0x605   : > { %6269 = vmatmul.msk.bf16.vlgmr.msrb.gmra.mxu2 %vm1906_vm12, %v2638_v47 }
 0x607   : > { %2929 = vmatpush.bf16.msrb.mxu3 %v2911_v26 }
 0x608   : > { %v8702_v24 = vpop.f32.mrf.mxu3 }
 0x60a   : > { %v8704_v58 = vpop.f32.mrf.mxu0 }
 0x610   : > { %v8706_v39 = vpop.f32.mrf.mxu3 }
 0x612   : > { %v8708_v51 = vpop.f32.mrf.mxu0 }
 0x615   : > { %6270 = vmatmul.msk.bf16.gmra.mxu2 %vm1906_vm12, %v2640_v63 }
 0x618   : > { %v2549_v46 = vpop.f32.mrf.mxu3 }
 0x619   : > { %v2676_v49 = vmul.f32 0.125, %v2549_v46 }
 0x61a   : > { %v8713_v14 = vpop.f32.mrf.mxu0 }
 0x61b   : > { %v8716_v32 = vadd.f32 %v2676_v49, %v8415_v5 }
 0x61d   : > { %v2708_v42 = vsel %vm2123_vm3, %v8716_v32, -inf }
 0x61e   : > { %2709 = vmax.xlane.f32.xlu1 %v2708_v42 }
 0x620   : > { %v2551_v2 = vpop.f32.mrf.mxu3 }
 0x621   : > { %v2677_v38 = vmul.f32 0.125, %v2551_v2 }
 0x622   : > { %v8720_v55 = vpop.f32.mrf.mxu0  ;;  %v8729_v25 = vpop.f32.mrf.mxu1 }
 0x623   : > { %v8725_v18 = vadd.f32 %v2677_v38, %v8436_v12 }
 0x625   : > { %v2711_v52 = vsel %vm2123_vm3, %v8725_v18, -inf }
 0x626   : > { %2712 = vmax.xlane.f32.xlu2 %v2711_v52 }
 0x628   : > { %v2554_v31 = vpop.f32.mrf.mxu3 }
 0x629   : > { %v2678_v33 = vmul.f32 0.125, %v2554_v31 }
 0x62a   : > { %v2588_v7 = vpop.f32.mrf.mxu0  ;;  %v8744_v21 = vpop.f32.mrf.mxu1 }
 0x62b   : > { %v2680_v4 = vmul.f32 0.125, %v2588_v7  ;;  %v8732_v54 = vadd.f32 %v2678_v33, %v8459_v35 }
 0x62d   : > { %v2714_v13 = vsel %vm2123_vm3, %v8732_v54, -inf  ;;  %v8737_v17 = vadd.f32 %v2680_v4, %v8415_v5 }
 0x62e   : > { %2715 = vmax.xlane.f32.xlu0 %v2714_v13 }
 0x62f   : > { %v2720_v36 = vsel %vm2123_vm3, %v8737_v17, -inf }
 0x630   : > { %v2556_v29 = vpop.f32.mrf.mxu3  ;;  %2721 = vmax.xlane.f32.xlu2 %v2720_v36 }
 0x631   : > { %v2679_v1 = vmul.f32 0.125, %v2556_v29 }
 0x632   : > { %v2590_v15 = vpop.f32.mrf.mxu0 }
 0x633   : > { %v8742_v11 = vadd.f32 %v2679_v1, %v8505_v6  ;;  %v2681_v3 = vmul.f32 0.125, %v2590_v15 }
 0x635   : > { %v2717_v59 = vsel %vm2123_vm3, %v8742_v11, -inf  ;;  %v8749_v56 = vadd.f32 %v2681_v3, %v8436_v12 }
 0x636   : > { %2718 = vmax.xlane.f32.xlu1 %v2717_v59 }
 0x637   : > { %v2723_v43 = vsel %vm2123_vm3, %v8749_v56, -inf }
 0x63a   : > { %v2593_v28 = vpop.f32.mrf.mxu0  ;;  %v8775_v26 = vpop.f32.mrf.mxu2 }
 0x63b   : > { %v2682_v41 = vmul.f32 0.125, %v2593_v28 }
 0x63d   : > { %v2627_v23 = vpop.f32.mrf.mxu1  ;;  %v8754_v60 = vadd.f32 %v2682_v41, %v8459_v35 }
 0x63e   : > { %2724 = vmax.xlane.f32.xlu1 %v2723_v43  ;;  %v2684_v57 = vmul.f32 0.125, %v2627_v23 }
 0x63f   : > { %v2726_v20 = vsel %vm2123_vm3, %v8754_v60, -inf }
 0x640   : > { %2727 = vmax.xlane.f32.xlu0 %v2726_v20  ;;  %v8769_v22 = vadd.f32 %v2684_v57, %v8415_v5 }
 0x642   : > { %v2595_v40 = vpop.f32.mrf.mxu0  ;;  %v2732_v47 = vsel %vm2123_vm3, %v8769_v22, -inf  ;;  %v8779_v46 = vpop.f32.mrf.mxu2 }
 0x643   : > { %v2683_v16 = vmul.f32 0.125, %v2595_v40 }
 0x645   : > { %v2629_v61 = vpop.f32.mrf.mxu1  ;;  %v8759_v27 = vadd.f32 %v2683_v16, %v8505_v6 }
 0x646   : > { %v2685_v0 = vmul.f32 0.125, %v2629_v61 }
 0x647   : > { %v2729_v9 = vsel %vm2123_vm3, %v8759_v27, -inf }
 0x648   : > { %2730 = vmax.xlane.f32.xlu2 %v2729_v9  ;;  %v8764_v19 = vadd.f32 %v2685_v0, %v8436_v12 }
 0x64a   : > { %v2735_v63 = vsel %vm2123_vm3, %v8764_v19, -inf }
 0x64b   : > { %2736 = vmax.xlane.f32.xlu0 %v2735_v63 }
 0x650   : > { %2733 = vmax.xlane.f32.xlu2 %v2732_v47 }
 0x65f   : > { %2953 = vrot.lane.b32.xlu0 %v8328_v45, %s7372_s18 }
 0x668   : > { %2951 = vrot.lane.b32.xlu2 %v8333_v62, %s7372_s18 }
 0x678   : > { %v8781_v49 = vpop.f32.mrf.mxu2  ;;  %v2632_v42 = vpop.f32.mrf.mxu1 }
 0x679   : > { %v2686_v2 = vmul.f32 0.125, %v2632_v42 }
 0x67b   : > { %v8784_v38 = vadd.f32 %v2686_v2, %v8459_v35 }
 0x67d   : > { %v2738_v52 = vsel %vm2123_vm3, %v8784_v38, -inf }
 0x67e   : > { %2739 = vmax.xlane.f32.xlu1 %v2738_v52 }
 0x680   : > { %v8788_v31 = vpop.f32.mrf.mxu2  ;;  %v2634_v45 = vpop.f32.mrf.mxu1 }
 0x681   : > { %v2687_v33 = vmul.f32 0.125, %v2634_v45 }
 0x683   : > { %v8791_v62 = vadd.f32 %v2687_v33, %v8505_v6 }
 0x685   : > { %v2741_v36 = vsel %vm2123_vm3, %v8791_v62, -inf }
 0x688   : > { %v2666_v7 = vpop.f32.mrf.mxu2 }
 0x689   : > { %v2688_v4 = vmul.f32 0.125, %v2666_v7 }
 0x68b   : > { %v8796_v1 = vadd.f32 %v2688_v4, %v8415_v5 }
 0x68d   : > { %v2744_v28 = vsel %vm2123_vm3, %v8796_v1, -inf }
 0x690   : > { %v2668_v13 = vpop.f32.mrf.mxu2 }
 0x691   : > { %2742 = vmax.xlane.f32.xlu2 %v2741_v36  ;;  %v2710_v29 = vpop.xlane.xlu1 %2709  ;;  %v2689_v3 = vmul.f32 0.125, %v2668_v13 }
 0x692   : > { %v2756_v15 = vsub.f32 %v8716_v32, %v2710_v29 }
 0x693   : > { %v8806_v16 = vadd.f32 %v2689_v3, %v8436_v12 }
 0x694   : > { %v2772_v43 = vmul.f32 1.442695, %v2756_v15 }
 0x695   : > { %v2747_v0 = vsel %vm2123_vm3, %v8806_v16, -inf }
 0x696   : > { %6960 = vpow2.f32 %v2772_v43 }
 0x698   : > { %v2671_v59 = vpop.f32.mrf.mxu2 }
 0x699   : > { %v2690_v41 = vmul.f32 0.125, %v2671_v59  ;;  %2745 = vmax.xlane.f32.xlu2 %v2744_v28  ;;  %v2713_v23 = vpop.xlane.xlu2 %2712 }
 0x69a   : > { %v2757_v40 = vsub.f32 %v8725_v18, %v2713_v23 }
 0x69b   : > { %v8802_v20 = vadd.f32 %v2690_v41, %v8459_v35 }
 0x69c   : > { %v2774_v32 = vmul.f32 1.442695, %v2757_v40  ;;  %v8816_v63 = vpop.eup %6960 }
 0x69d   : > { %v2750_v5 = vsel %vm2123_vm3, %v8802_v20, -inf  ;;  %v2804_v42 = vsel %vm2123_vm3, %v8816_v63, 0.0 }
 0x69e   : > { %2751 = vmax.xlane.f32.xlu0 %v2750_v5  ;;  %6962 = vpow2.f32 %v2774_v32 }
 0x6a0   : > { %v2673_v61 = vpop.f32.mrf.mxu2 }
 0x6a1   : > { %v2691_v57 = vmul.f32 0.125, %v2673_v61  ;;  %v2716_v9 = vpop.xlane.xlu0 %2715  ;;  %2748 = vmax.xlane.f32.xlu2 %v2747_v0 }
 0x6a2   : > { %v2758_v35 = vsub.f32 %v8732_v54, %v2716_v9 }
 0x6a3   : > { %v8814_v18 = vadd.f32 %v2691_v57, %v8505_v6  ;;  %v2722_v6 = vpop.xlane.xlu2 %2721 }
 0x6a4   : > { %v2776_v12 = vmul.f32 1.442695, %v2758_v35  ;;  %v8822_v52 = vpop.eup %6962  ;;  %v2760_v4 = vsub.f32 %v8737_v17, %v2722_v6 }
 0x6a5   : > { %v2753_v47 = vsel %vm2123_vm3, %v8814_v18, -inf  ;;  %v2807_v7 = vsel %vm2123_vm3, %v8822_v52, 0.0 }
 0x6a6   : > { %2754 = vmax.xlane.f32.xlu1 %v2753_v47  ;;  %6964 = vpow2.f32 %v2776_v12  ;;  %v2780_v36 = vmul.f32 1.442695, %v2760_v4 }
 0x6a9   : > { %v2719_v2 = vpop.xlane.xlu1 %2718  ;;  %2805 = vadd.xlane.f32.xlu2 %v2804_v42 }
 0x6aa   : > { %v2759_v54 = vsub.f32 %v8742_v11, %v2719_v2 }
 0x6ac   : > { %v2778_v45 = vmul.f32 1.442695, %v2759_v54  ;;  %v8825_v33 = vpop.eup %6964 }
 0x6ad   : > { %v2810_v13 = vsel %vm2123_vm3, %v8825_v33, 0.0 }
 0x6ae   : > { %2808 = vadd.xlane.f32.xlu1 %v2807_v7  ;;  %6966 = vpow2.f32 %v2778_v45 }
 0x6af   : > { %6968 = vpow2.f32 %v2780_v36 }
 0x6b1   : > { %2811 = vadd.xlane.f32.xlu2 %v2810_v13  ;;  %v2725_v29 = vpop.xlane.xlu1 %2724 }
 0x6b2   : > { %v2761_v11 = vsub.f32 %v8749_v56, %v2725_v29 }
 0x6b3   : > { %v2728_v23 = vpop.xlane.xlu0 %2727 }
 0x6b4   : > { %v8832_v15 = vpop.eup %6966  ;;  %v2782_v59 = vmul.f32 1.442695, %v2761_v11  ;;  %v2762_v35 = vsub.f32 %v8754_v60, %v2728_v23 }
 0x6b5   : > { %v2813_v3 = vsel %vm2123_vm3, %v8832_v15, 0.0  ;;  %v8837_v41 = vpop.eup %6968 }
 0x6b6   : > { %6970 = vpow2.f32 %v2782_v59  ;;  %v2816_v17 = vsel %vm2123_vm3, %v8837_v41, 0.0  ;;  %v2784_v12 = vmul.f32 1.442695, %v2762_v35 }
 0x6b9   : > { %2814 = vadd.xlane.f32.xlu2 %v2813_v3 }
 0x6bb   : > { %v2731_v28 = vpop.xlane.xlu2 %2730 }
 0x6bc   : > { %v8842_v5 = vpop.eup %6970 }
 0x6bd   : > { %v2819_v32 = vsel %vm2123_vm3, %v8842_v5, 0.0 }
 0x6be   : > { %v2737_v61 = vpop.xlane.xlu0 %2736 }
 0x6bf   : > { %v2765_v2 = vsub.f32 %v8764_v19, %v2737_v61 }
 0x6c1   : > { %2817 = vadd.xlane.f32.xlu2 %v2816_v17  ;;  %v2790_v7 = vmul.f32 1.442695, %v2765_v2 }
 0x6c3   : > { %v2734_v43 = vpop.xlane.xlu2 %2733 }
 0x6c4   : > { %v2764_v40 = vsub.f32 %v8769_v22, %v2734_v43 }
 0x6c6   : > { %v2788_v56 = vmul.f32 1.442695, %v2764_v40 }
 0x6c7   : > { %2994 = vrot.lane.b32.xlu1 %v8374_v8, %s7372_s18  ;;  %v2763_v8 = vsub.f32 %v8759_v27, %v2731_v28 }
 0x6c8   : > { %6972 = vpow2.f32 %v2788_v56 }
 0x6c9   : > { %2820 = vadd.xlane.f32.xlu2 %v2819_v32  ;;  %6974 = vpow2.f32 %v2784_v12  ;;  %v2786_v47 = vmul.f32 1.442695, %v2763_v8 }
 0x6cb   : > { %v2952_v22 = vpop.permute.xlu2 %2951  ;;  %6976 = vpow2.f32 %v2786_v47 }
 0x6ce   : > { %v8848_v0 = vpop.eup %6972 }
 0x6cf   : > { %v2828_v57 = vsel %vm2123_vm3, %v8848_v0, 0.0  ;;  %v8854_v42 = vpop.eup %6974 }
 0x6d0   : > { %v2822_v54 = vsel %vm2123_vm3, %v8854_v42, 0.0 }
 0x6d1   : > { %v2954_v9 = vpop.permute.xlu0 %2953  ;;  %2829 = vadd.xlane.f32.xlu2 %v2828_v57  ;;  %v8860_v60 = vpop.eup %6976 }
 0x6d2   : > { %2969 = vmatpush.bf16.msra.mxu0 %v2954_v9  ;;  %v2825_v27 = vsel %vm2123_vm3, %v8860_v60, 0.0 }
 0x6d6   : > { %2970 = vmatpush.bf16.msra.mxu0 %v2952_v22 }
 0x6f1   : > { %v2740_v6 = vpop.xlane.xlu1 %2739  ;;  %2823 = vadd.xlane.f32.xlu1 %v2822_v54 }
 0x6f2   : > { %v2766_v45 = vsub.f32 %v8784_v38, %v2740_v6 }
 0x6f4   : > { %v2792_v4 = vmul.f32 1.442695, %v2766_v45 }
 0x6f6   : > { %6978 = vpow2.f32 %v2792_v4 }
 0x6f7   : > { %6980 = vpow2.f32 %v2790_v7 }
 0x6f9   : > { %2826 = vadd.xlane.f32.xlu1 %v2825_v27 }
 0x6fc   : > { %v8864_v13 = vpop.eup %6978 }
 0x6fd   : > { %v8866_v19 = vpop.eup %6980  ;;  %v2834_v36 = vsel %vm2123_vm3, %v8864_v13, 0.0 }
 0x6fe   : > { %2835 = vadd.xlane.f32.xlu0 %v2834_v36  ;;  %v2831_v38 = vsel %vm2123_vm3, %v8866_v19, 0.0 }
 0x701   : > { %2832 = vadd.xlane.f32.xlu1 %v2831_v38 }
 0x704   : > { %v2743_v29 = vpop.xlane.xlu2 %2742 }
 0x705   : > { %v2767_v11 = vsub.f32 %v8791_v62, %v2743_v29 }
 0x707   : > { %v2794_v3 = vmul.f32 1.442695, %v2767_v11 }
 0x709   : > { %6982 = vpow2.f32 %v2794_v3 }
 0x70c   : > { %v2746_v59 = vpop.xlane.xlu2 %2745 }
 0x70d   : > { %v2768_v7 = vsub.f32 %v8796_v1, %v2746_v59 }
 0x70f   : > { %v8873_v28 = vpop.eup %6982 }
 0x710   : > { %v2837_v17 = vsel %vm2123_vm3, %v8873_v28, 0.0 }
 0x711   : > { %2838 = vadd.xlane.f32.xlu2 %v2837_v17 }
 0x714   : > { %v2749_v23 = vpop.xlane.xlu2 %2748 }
 0x715   : > { %v2769_v43 = vsub.f32 %v8806_v16, %v2749_v23 }
 0x717   : > { %v2798_v40 = vmul.f32 1.442695, %v2769_v43 }
 0x719   : > { %6984 = vpow2.f32 %v2798_v40  ;;  %v2755_v56 = vpop.xlane.xlu1 %2754 }
 0x71a   : > { %2992 = vrot.lane.b32.xlu1 %v8379_v50, %s7372_s18 }
 0x71c   : > { %v2806_v32 = vpop.xlane.xlu2 %2805 }
 0x71d   : > { %6986 = vrcp.f32 %v2806_v32 }
 0x71f   : > { %v8880_v62 = vpop.eup %6984 }
 0x720   : > { %v2843_v61 = vsel %vm2123_vm3, %v8880_v62, 0.0 }
 0x721   : > { %v2809_v57 = vpop.xlane.xlu1 %2808  ;;  %2844 = vadd.xlane.f32.xlu0 %v2843_v61 }
 0x722   : > { %6988 = vrcp.f32 %v2809_v57 }
 0x723   : > { %v6987_v9 = vpop.eup %6986 }
 0x724   : > { %v2812_v22 = vpop.xlane.xlu2 %2811  ;;  %v2868_v16 = vmul.f32 %v6987_v9, %v8816_v63 }
 0x725   : > { %6990 = vrcp.f32 %v2812_v22 }
 0x726   : > { %v2884_v12 = vpack.c.bf16 %v2868_v16, %v2868_v16  ;;  %v2752_v16 = vpop.xlane.xlu0 %2751 }
 0x728   : > { %v6989_v35 = vpop.eup %6988  ;;  %v2904_v2 = vunpack.c.l.b16 %v2884_v12 }
 0x729   : > { %v2869_v8 = vmul.f32 %v6989_v35, %v8822_v52  ;;  %3035 = vrot.lane.b32.xlu2 %v8430_v34, %s7372_s18  ;;  %v2796_v52 = vmul.f32 1.442695, %v2768_v7 }
 0x72b   : > { %v2885_v50 = vpack.c.bf16 %v2869_v8, %v2869_v8  ;;  %v6991_v45 = vpop.eup %6990 }
 0x72c   : > { %v2815_v47 = vpop.xlane.xlu2 %2814  ;;  %v2870_v34 = vmul.f32 %v6991_v45, %v8825_v33 }
 0x72d   : > { %v2905_v54 = vunpack.c.l.b16 %v2885_v50  ;;  %6992 = vrcp.f32 %v2815_v47 }
 0x72e   : > { %v2886_v29 = vpack.c.bf16 %v2870_v34, %v2870_v34 }
 0x72f   : > { %v2908_v6 = vpack.c.b16 %v2905_v54, %v2904_v2 }
 0x730   : > { %v2906_v1 = vunpack.c.l.b16 %v2886_v29 }
 0x731   : > { %6271 = vmatmul.msk.bf16.vlgmr.msrb.gmra.mxu3 %vm2123_vm3, %v2908_v6 }
 0x733   : > { %v6993_v63 = vpop.eup %6992 }
 0x734   : > { %v2818_v4 = vpop.xlane.xlu2 %2817  ;;  %v2871_v27 = vmul.f32 %v6993_v63, %v8832_v15  ;;  %v2771_v15 = vsub.f32 %v8814_v18, %v2755_v56  ;;  %v2770_v18 = vsub.f32 %v8802_v20, %v2752_v16 }
 0x735   : > { %3033 = vrot.lane.b32.xlu0 %v8442_v30, %s7372_s18  ;;  %6994 = vrcp.f32 %v2818_v4 }
 0x736   : > { %v2887_v36 = vpack.c.bf16 %v2871_v27, %v2871_v27  ;;  %6996 = vpow2.f32 %v2796_v52  ;;  %v2802_v40 = vmul.f32 1.442695, %v2771_v15  ;;  %v2800_v56 = vmul.f32 1.442695, %v2770_v18 }
 0x738   : > { %v2907_v11 = vunpack.c.l.b16 %v2887_v36 }
 0x739   : > { %v2995_v38 = vpop.permute.xlu1 %2994 }
 0x73a   : > { %3010 = vmatpush.bf16.msra.mxu1 %v2995_v38  ;;  %v2909_v59 = vpack.c.b16 %v2907_v11, %v2906_v1 }
 0x73b   : > { %v6995_v17 = vpop.eup %6994 }
 0x73c   : > { %v2821_v3 = vpop.xlane.xlu2 %2820  ;;  %v8894_v23 = vpop.eup %6996  ;;  %v2872_v30 = vmul.f32 %v6995_v17, %v8837_v41 }
 0x73d   : > { %6998 = vrcp.f32 %v2821_v3  ;;  %v2840_v43 = vsel %vm2123_vm3, %v8894_v23, 0.0 }
 0x73e   : > { %v2888_v32 = vpack.c.bf16 %v2872_v30, %v2872_v30  ;;  %7000 = vpow2.f32 %v2802_v40 }
 0x73f   : > { %7002 = vpow2.f32 %v2800_v56 }
 0x740   : > { %v2945_v9 = vunpack.c.l.b16 %v2888_v32 }
 0x741   : > { %6272 = vmatmul.msk.bf16.gmra.mxu3 %vm2123_vm3, %v2909_v59 }
 0x743   : > { %v6999_v33 = vpop.eup %6998 }
 0x744   : > { %v2873_v61 = vmul.f32 %v6999_v33, %v8842_v5  ;;  %2841 = vadd.xlane.f32.xlu1 %v2840_v43  ;;  %v8904_v41 = vpop.eup %7000  ;;  %v2830_v4 = vpop.xlane.xlu2 %2829 }
 0x745   : > { %v2849_v12 = vsel %vm2123_vm3, %v8904_v41, 0.0  ;;  %v8908_v5 = vpop.eup %7002 }
 0x746   : > { %v2889_v57 = vpack.c.bf16 %v2873_v61, %v2873_v61  ;;  %v2846_v8 = vsel %vm2123_vm3, %v8908_v5, 0.0 }
 0x748   : > { %v2946_v22 = vunpack.c.l.b16 %v2889_v57 }
 0x74a   : > { %v2949_v35 = vpack.c.b16 %v2946_v22, %v2945_v9 }
 0x74c   : > { %6273 = vmatmul.msk.bf16.vlgmr.msra.gmra.mxu0 %vm2123_vm3, %v2949_v35 }
 0x752   : > { %2850 = vadd.xlane.f32.xlu2 %v2849_v12 }
 0x75f   : > { %2847 = vadd.xlane.f32.xlu0 %v2846_v8 }
 0x764   : > { %v2824_v50 = vpop.xlane.xlu1 %2823 }
 0x765   : > { %7004 = vrcp.f32 %v2824_v50 }
 0x76b   : > { %v7005_v2 = vpop.eup %7004 }
 0x76c   : > { %v2827_v47 = vpop.xlane.xlu1 %2826  ;;  %v2874_v20 = vmul.f32 %v7005_v2, %v8854_v42 }
 0x76d   : > { %7006 = vrcp.f32 %v2827_v47 }
 0x76e   : > { %v2890_v6 = vpack.c.bf16 %v2874_v20, %v2874_v20 }
 0x770   : > { %v2947_v27 = vunpack.c.l.b16 %v2890_v6 }
 0x773   : > { %v7007_v54 = vpop.eup %7006 }
 0x774   : > { %v2875_v45 = vmul.f32 %v7007_v54, %v8860_v60  ;;  %v2833_v63 = vpop.xlane.xlu1 %2832  ;;  %v2836_v60 = vpop.xlane.xlu0 %2835 }
 0x775   : > { %7008 = vrcp.f32 %v2833_v63 }
 0x776   : > { %v2891_v7 = vpack.c.bf16 %v2875_v45, %v2875_v45  ;;  %7010 = vrcp.f32 %v2830_v4 }
 0x778   : > { %v2948_v34 = vunpack.c.l.b16 %v2891_v7 }
 0x77a   : > { %v2950_v52 = vpack.c.b16 %v2948_v34, %v2947_v27 }
 0x77b   : > { %v7009_v36 = vpop.eup %7008 }
 0x77c   : > { %6274 = vmatmul.msk.bf16.gmra.mxu0 %vm2123_vm3, %v2950_v52  ;;  %v7011_v38 = vpop.eup %7010  ;;  %v2877_v29 = vmul.f32 %v7009_v36, %v8866_v19 }
 0x77d   : > { %v2876_v42 = vmul.f32 %v7011_v38, %v8848_v0 }
 0x77e   : > { %v2893_v3 = vpack.c.bf16 %v2877_v29, %v2877_v29 }
 0x77f   : > { %v2892_v17 = vpack.c.bf16 %v2876_v42, %v2876_v42 }
 0x780   : > { %v2987_v1 = vunpack.c.l.b16 %v2893_v3 }
 0x781   : > { %v2986_v59 = vunpack.c.l.b16 %v2892_v17 }
 0x783   : > { %v2990_v33 = vpack.c.b16 %v2987_v1, %v2986_v59  ;;  %v6670_v59 = vld [vmem:[%s7523_s20 + $0x38] sm:$0xff] }
 0x784   : > { %v2839_v11 = vpop.xlane.xlu2 %2838  ;;  %3220 = vmatpush.bf16.msra.mxu3 %v6670_v59 }
 0x785   : > { %7012 = vrcp.f32 %v2839_v11 }
 0x786   : > { %7014 = vrcp.f32 %v2836_v60 }
 0x78b   : > { %v7013_v43 = vpop.eup %7012 }
 0x78c   : > { %v2993_v15 = vpop.permute.xlu1 %2992  ;;  %v3036_v30 = vpop.permute.xlu2 %3035  ;;  %v2879_v19 = vmul.f32 %v7013_v43, %v8873_v28 }
 0x78d   : > { %3011 = vmatpush.bf16.msra.mxu1 %v2993_v15  ;;  %3051 = vmatpush.bf16.msra.mxu2 %v3036_v30  ;;  %v7015_v40 = vpop.eup %7014  ;;  %v6669_v15 = vld [vmem:[%s7523_s20 + $0x30] sm:$0xff] }
 0x78e   : > { %v2878_v0 = vmul.f32 %v7015_v40, %v8864_v13  ;;  %v2895_v32 = vpack.c.bf16 %v2879_v19, %v2879_v19  ;;  %3221 = vmatpush.bf16.msra.mxu3 %v6669_v15  ;;  %v6666_v40 = vld [vmem:[%s7523_s20 + $0x18] sm:$0xff]  ;;  %v6665_v19 = vld [vmem:[%s7523_s20 + $0x10] sm:$0xff] }
 0x790   : > { %6275 = vmatmul.msk.bf16.vlgmr.msra.gmra.mxu1 %vm2123_vm3, %v2990_v33  ;;  %v2894_v61 = vpack.c.bf16 %v2878_v0, %v2878_v0  ;;  %v2989_v57 = vunpack.c.l.b16 %v2895_v32  ;;  %v6667_v33 = vld [vmem:[%s7523_s20 + $0x20] sm:$0xff]  ;;  %v6664_v0 = vld [vmem:[%s7523_s20 + $0x8] sm:$0xff] }
 0x792   : > { %v2988_v9 = vunpack.c.l.b16 %v2894_v61 }
 0x794   : > { %v2991_v22 = vpack.c.b16 %v2989_v57, %v2988_v9  ;;  %v2845_v16 = vpop.xlane.xlu0 %2844  ;;  %v6663_v57 = vld [vmem:[%s7523_s20] sm:$0xff] }
 0x795   : > { %7016 = vrcp.f32 %v2845_v16 }
 0x79b   : > { %v7017_v12 = vpop.eup %7016 }
 0x79c   : > { %v2881_v8 = vmul.f32 %v7017_v12, %v8880_v62 }
 0x79e   : > { %v2897_v47 = vpack.c.bf16 %v2881_v8, %v2881_v8 }
 0x7a0   : > { %6276 = vmatmul.msk.bf16.gmra.mxu1 %vm2123_vm3, %v2991_v22  ;;  %v3028_v54 = vunpack.c.l.b16 %v2897_v47 }
 0x7a7   : > { %v3034_v35 = vpop.permute.xlu0 %3033 }
 0x7a8   : > { %3052 = vmatpush.bf16.msra.mxu2 %v3034_v35 }
 0x7b4   : > { %v2931_v18 = vpop.f32.mrf.mxu3 }
 0x7b7   : > { %v2842_v56 = vpop.xlane.xlu1 %2841 }
 0x7b8   : > { %7018 = vrcp.f32 %v2842_v56 }
 0x7bc   : > { %v2933_v28 = vpop.f32.mrf.mxu3 }
 0x7bd   : > { %v6816_v50 = vpack.i.bf16 %v2933_v28, %v2931_v18 }
 0x7be   : > { %v7019_v13 = vpop.eup %7018 }
 0x7bf   : > { %v2880_v2 = vmul.f32 %v7019_v13, %v8894_v23  ;;  %6817 = vrot.lane.b32.xlu1 %v6816_v50, %s7372_s18 }
 0x7c1   : > { %v2896_v20 = vpack.c.bf16 %v2880_v2, %v2880_v2 }
 0x7c3   : > { %v3027_v6 = vunpack.c.l.b16 %v2896_v20 }
 0x7c4   : > { %v2936_v45 = vpop.f32.mrf.mxu3 }
 0x7c5   : > { %v3031_v7 = vpack.c.b16 %v3028_v54, %v3027_v6  ;;  %v2851_v4 = vpop.xlane.xlu2 %2850 }
 0x7c6   : > { %7020 = vrcp.f32 %v2851_v4 }
 0x7c7   : > { %6277 = vmatmul.msk.bf16.vlgmr.msra.gmra.mxu2 %vm2123_vm3, %v3031_v7 }
 0x7c9   : > { %v2972_v63 = vpop.f32.mrf.mxu0 }
 0x7cc   : > { %v2938_v27 = vpop.f32.mrf.mxu3  ;;  %v7021_v36 = vpop.eup %7020 }
 0x7cd   : > { %v6821_v62 = vpack.i.bf16 %v2938_v27, %v2936_v45  ;;  %v2883_v38 = vmul.f32 %v7021_v36, %v8904_v41  ;;  %v6668_v41 = vld [vmem:[%s7523_s20 + $0x28] sm:$0xff] }
 0x7ce   : > { %3222 = vmatpush.bf16.msra.mxu3 %v6668_v41 }
 0x7cf   : > { %6822 = vrot.lane.b32.xlu1 %v6821_v62, %s7372_s18  ;;  %v2899_v42 = vpack.c.bf16 %v2883_v38, %v2883_v38 }
 0x7d1   : > { %v2974_v34 = vpop.f32.mrf.mxu0  ;;  %v3030_v17 = vunpack.c.l.b16 %v2899_v42 }
 0x7d2   : > { %v6826_v52 = vpack.i.bf16 %v2974_v34, %v2972_v63  ;;  %v2848_v23 = vpop.xlane.xlu0 %2847  ;;  %3223 = vmatpush.bf16.msra.mxu3 %v6667_v33 }
 0x7d3   : > { %7022 = vrcp.f32 %v2848_v23 }
 0x7d4   : > { %6827 = vrot.lane.b32.xlu0 %v6826_v52, %s7372_s18 }
 0x7d6   : > { %3224 = vmatpush.bf16.msra.mxu3 %v6666_v40 }
 0x7d9   : > { %v7023_v29 = vpop.eup %7022 }
 0x7da   : > { %v2882_v11 = vmul.f32 %v7023_v29, %v8908_v5  ;;  %3225 = vmatpush.bf16.msra.mxu3 %v6665_v19 }
 0x7dc   : > { %v2898_v3 = vpack.c.bf16 %v2882_v11, %v2882_v11 }
 0x7de   : > { %v3029_v60 = vunpack.c.l.b16 %v2898_v3  ;;  %3226 = vmatpush.bf16.msra.mxu3 %v6664_v0 }
 0x7e0   : > { %v3032_v1 = vpack.c.b16 %v3030_v17, %v3029_v60 }
 0x7e2   : > { %6278 = vmatmul.msk.bf16.gmra.mxu2 %vm2123_vm3, %v3032_v1  ;;  %3227 = vmatpush.bf16.msra.mxu3 %v6663_v57 }
 0x7f9   : > { %v2977_v30 = vpop.f32.mrf.mxu0 }
 0x801   : > { %v2979_v43 = vpop.f32.mrf.mxu0 }
 0x802   : > { %v6831_v5 = vpack.i.bf16 %v2979_v43, %v2977_v30  ;;  %v7312_v43 = vld [vmem:[#allocation2 + $0x30] sm:$0xff] }
 0x804   : > { %6832 = vrot.lane.b32.xlu2 %v6831_v5, %s7372_s18 }
 0x80d   : > { %v3013_v32 = vpop.f32.mrf.mxu1 }
 0x815   : > { %v3015_v61 = vpop.f32.mrf.mxu1 }
 0x816   : > { %v6836_v9 = vpack.i.bf16 %v3015_v61, %v3013_v32 }
 0x818   : > { %6837 = vrot.lane.b32.xlu1 %v6836_v9, %s7372_s18 }
 0x81d   : > { %v3018_v22 = vpop.f32.mrf.mxu1 }
 0x825   : > { %v3020_v16 = vpop.f32.mrf.mxu1 }
 0x826   : > { %v6841_v35 = vpack.i.bf16 %v3020_v16, %v3018_v22 }
 0x828   : > { %6842 = vrot.lane.b32.xlu1 %v6841_v35, %s7372_s18 }
 0x831   : > { %v6818_v18 = vpop.permute.xlu1 %6817 }
 0x832   : > { %v6820_v56 = vunpack.i.h.bf16 %v6818_v18  ;;  %v6819_v12 = vunpack.i.l.bf16 %v6818_v18  ;;  %v7314_v18 = vld [vmem:[#allocation2 + $0x58] sm:$0xff] }
 0x834   : > { %v3129_v8 = vsel %vm1906_vm12, %v8699_v53, %v6820_v56  ;;  %v3128_v28 = vsel %vm1906_vm12, %v8696_v10, %v6819_v12 }
 0x835   : > { %v3144_v50 = vpack.c.bf16 %v3129_v8, %v3128_v28  ;;  %v7315_v28 = vld [vmem:[#allocation2 + $0x18] sm:$0xff] }
 0x837   : > { %3228 = vmatmul.bf16.vlgmr.msra.gmra.mxu3 %v3144_v50 }
 0x841   : > { %v6823_v13 = vpop.permute.xlu1 %6822 }
 0x842   : > { %v6825_v47 = vunpack.i.h.bf16 %v6823_v13  ;;  %v6824_v2 = vunpack.i.l.bf16 %v6823_v13  ;;  %v7316_v13 = vld [vmem:[#allocation2 + $0x50] sm:$0xff] }
 0x844   : > { %v3130_v20 = vsel %vm1906_vm12, %v8702_v24, %v6824_v2  ;;  %v3131_v54 = vsel %vm1906_vm12, %v8706_v39, %v6825_v47 }
 0x845   : > { %v3145_v6 = vpack.c.bf16 %v3131_v54, %v3130_v20 }
 0x846   : > { %v6828_v7 = vpop.permute.xlu0 %6827 }
 0x847   : > { %3233 = vmatmul.bf16.gmra.mxu3 %v3145_v6  ;;  %v6830_v63 = vunpack.i.h.bf16 %v6828_v7  ;;  %v6829_v53 = vunpack.i.l.bf16 %v6828_v7  ;;  %v7317_v7 = vld [vmem:[#allocation2 + $0x68] sm:$0xff] }
 0x849   : > { %v3132_v10 = vsel %vm1906_vm12, %v8704_v58, %v6829_v53  ;;  %v3133_v27 = vsel %vm1906_vm12, %v8708_v51, %v6830_v63 }
 0x84a   : > { %v3054_v45 = vpop.f32.mrf.mxu2  ;;  %v3146_v24 = vpack.c.bf16 %v3133_v27, %v3132_v10 }
 0x852   : > { %v3056_v4 = vpop.f32.mrf.mxu2 }
 0x853   : > { %v6846_v62 = vpack.i.bf16 %v3056_v4, %v3054_v45 }
 0x855   : > { %6847 = vrot.lane.b32.xlu0 %v6846_v62, %s7372_s18 }
 0x857   : > { %3238 = vmatmul.bf16.gmra.mxu3 %v3146_v24  ;;  %v7318_v24 = vld [vmem:[#allocation2 + $0x8] sm:$0xff] }
 0x85e   : > { %v6833_v34 = vpop.permute.xlu2 %6832 }
 0x85f   : > { %v6835_v39 = vunpack.i.h.bf16 %v6833_v34  ;;  %v6834_v52 = vunpack.i.l.bf16 %v6833_v34 }
 0x861   : > { %v3134_v23 = vsel %vm1906_vm12, %v8713_v14, %v6834_v52  ;;  %v3135_v36 = vsel %vm1906_vm12, %v8720_v55, %v6835_v39 }
 0x862   : > { %v3147_v29 = vpack.c.bf16 %v3135_v36, %v3134_v23 }
 0x865   : > { %v3059_v38 = vpop.f32.mrf.mxu2 }
 0x867   : > { %3243 = vmatmul.bf16.gmra.mxu3 %v3147_v29 }
 0x86d   : > { %v3061_v58 = vpop.f32.mrf.mxu2 }
 0x86e   : > { %v6851_v42 = vpack.i.bf16 %v3061_v58, %v3059_v38 }
 0x870   : > { %6852 = vrot.lane.b32.xlu1 %v6851_v42, %s7372_s18 }
 0x88a   : > { %v6838_v51 = vpop.permute.xlu1 %6837 }
 0x88b   : > { %v6840_v11 = vunpack.i.h.bf16 %v6838_v51  ;;  %v6839_v3 = vunpack.i.l.bf16 %v6838_v51  ;;  %v7319_v51 = vld [vmem:[#allocation2 + $0x48] sm:$0xff] }
 0x88d   : > { %v3136_v17 = vsel %vm1906_vm12, %v8711_v44, %v6839_v3  ;;  %v3137_v14 = vsel %vm1906_vm12, %v8722_v48, %v6840_v11  ;;  %v8972_v44 = vld [vmem:[%s12022_s3] ss:$0 sm:$0xff] }
 0x88e   : > { %v3148_v60 = vpack.c.bf16 %v3137_v14, %v3136_v17 }
 0x890   : > { %3248 = vmatmul.bf16.gmra.mxu3 %v3148_v60 }
 0x89a   : > { %v6843_v55 = vpop.permute.xlu1 %6842 }
 0x89b   : > { %v6845_v1 = vunpack.i.h.bf16 %v6843_v55  ;;  %v6844_v59 = vunpack.i.l.bf16 %v6843_v55 }
 0x89d   : > { %v3138_v15 = vsel %vm1906_vm12, %v8729_v25, %v6844_v59  ;;  %v3139_v30 = vsel %vm1906_vm12, %v8744_v21, %v6845_v1  ;;  %v7313_v21 = vld [vmem:[#allocation2] sm:$0xff] }
 0x89e   : > { %v3149_v41 = vpack.c.bf16 %v3139_v30, %v3138_v15  ;;  %v7320_v59 = vld [vmem:[#allocation2 + $0x40] sm:$0xff] }
 0x8a0   : > { %3253 = vmatmul.bf16.gmra.mxu3 %v3149_v41 }
 0x8ba   : > { %v3229_v48 = vpop.f32.mrf.mxu3 }
 0x8bb   : > { %v3230_v33 = vadd.f32 %v8972_v44, %v3229_v48 }
 0x8bd   : > { %v8975_v5 = vadd.f32 %v7312_v43, %v3230_v33 }
 0x8bf   : > { %12023 = vst [vmem:[#allocation9_spill] sm:$0xff] %v8975_v5  ;;  %3287 = vadd.xlane.f32.xlu2 %v8975_v5 }
 0x8c2   : > { %v3231_v25 = vpop.f32.mrf.mxu3 }
 0x8c3   : > { %v3232_v40 = vadd.f32 %v8972_v44, %v3231_v25 }
 0x8c5   : > { %v8979_v19 = vadd.f32 %v7313_v21, %v3232_v40  ;;  %v7321_v40 = vld [vmem:[#allocation2 + $0x20] sm:$0xff] }
 0x8c7   : > { %12024 = vst [vmem:[#allocation10_spill] sm:$0xff] %v8979_v19  ;;  %3289 = vadd.xlane.f32.xlu0 %v8979_v19  ;;  %v6848_v0 = vpop.permute.xlu0 %6847 }
 0x8c8   : > { %v6850_v32 = vunpack.i.h.bf16 %v6848_v0  ;;  %v6849_v61 = vunpack.i.l.bf16 %v6848_v0 }
 0x8ca   : > { %v3234_v57 = vpop.f32.mrf.mxu3  ;;  %v3140_v9 = vsel %vm1906_vm12, %v8775_v26, %v6849_v61  ;;  %v3141_v22 = vsel %vm1906_vm12, %v8779_v46, %v6850_v32 }
 0x8cb   : > { %v3235_v16 = vadd.f32 %v8972_v44, %v3234_v57  ;;  %v3150_v35 = vpack.c.bf16 %v3141_v22, %v3140_v9 }
 0x8cd   : > { %v8987_v56 = vadd.f32 %v7314_v18, %v3235_v16  ;;  %3258 = vmatmul.bf16.gmra.mxu3 %v3150_v35  ;;  %v7322_v16 = vld [vmem:[#allocation2 + $0x10] sm:$0xff] }
 0x8cf   : > { %12025 = vst [vmem:[#allocation11_spill] sm:$0xff] %v8987_v56  ;;  %3291 = vadd.xlane.f32.xlu1 %v8987_v56 }
 0x8d2   : > { %v3236_v12 = vpop.f32.mrf.mxu3 }
 0x8d3   : > { %v3237_v8 = vadd.f32 %v8972_v44, %v3236_v12 }
 0x8d5   : > { %v8991_v50 = vadd.f32 %v7315_v28, %v3237_v8 }
 0x8d7   : > { %12026 = vst [vmem:[#allocation12_spill] sm:$0xff] %v8991_v50  ;;  %3293 = vadd.xlane.f32.xlu2 %v8991_v50 }
 0x8da   : > { %v3239_v26 = vpop.f32.mrf.mxu3 }
 0x8db   : > { %v3240_v46 = vadd.f32 %v8972_v44, %v3239_v26 }
 0x8dd   : > { %v8995_v47 = vadd.f32 %v7316_v13, %v3240_v46  ;;  %v7323_v13 = vld [vmem:[#allocation2 + $0x38] sm:$0xff] }
 0x8df   : > { %12027 = vst [vmem:[#allocation13_spill] sm:$0xff] %v8995_v47  ;;  %3295 = vadd.xlane.f32.xlu0 %v8995_v47 }
 0x8e2   : > { %v3241_v2 = vpop.f32.mrf.mxu3  ;;  %v6853_v20 = vpop.permute.xlu1 %6852 }
 0x8e3   : > { %v3242_v54 = vadd.f32 %v8972_v44, %v3241_v2  ;;  %v6855_v6 = vunpack.i.h.bf16 %v6853_v20  ;;  %v6854_v45 = vunpack.i.l.bf16 %v6853_v20 }
 0x8e5   : > { %v8999_v63 = vadd.f32 %v7317_v7, %v3242_v54  ;;  %v3142_v53 = vsel %vm1906_vm12, %v8781_v49, %v6854_v45  ;;  %v3143_v4 = vsel %vm1906_vm12, %v8788_v31, %v6855_v6 }
 0x8e6   : > { %v3151_v10 = vpack.c.bf16 %v3143_v4, %v3142_v53  ;;  %v7324_v53 = vld [vmem:[#allocation2 + $0x60] sm:$0xff] }
 0x8e7   : > { %12028 = vst [vmem:[#allocation14_spill] sm:$0xff] %v8999_v63  ;;  %3297 = vadd.xlane.f32.xlu1 %v8999_v63 }
 0x8e8   : > { %3263 = vmatmul.bf16.gmra.mxu3 %v3151_v10 }
 0x8ea   : > { %v3244_v27 = vpop.f32.mrf.mxu3 }
 0x8eb   : > { %v3245_v62 = vadd.f32 %v8972_v44, %v3244_v27 }
 0x8ed   : > { %v9007_v34 = vadd.f32 %v7318_v24, %v3245_v62  ;;  %v7325_v24 = vld [vmem:[#allocation2 + $0x70] sm:$0xff] }
 0x8ef   : > { %12029 = vst [vmem:[#allocation15_spill] sm:$0xff] %v9007_v34  ;;  %3299 = vadd.xlane.f32.xlu1 %v9007_v34 }
 0x8f2   : > { %v3246_v39 = vpop.f32.mrf.mxu3 }
 0x8f3   : > { %v3247_v29 = vadd.f32 %v8972_v44, %v3246_v39 }
 0x8f5   : > { %v9021_v11 = vadd.f32 %v7319_v51, %v3247_v29  ;;  %v6701_v29 = vld [vmem:[%s7545_s30 + $0xec] sm:$0xf0] }
 0x8f7   : > { %12030 = vst [vmem:[#allocation16_spill] sm:$0xff] %v9021_v11 }
 0x913   : > { %v3249_v36 = vpop.f32.mrf.mxu3 }
 0x914   : > { %v3250_v60 = vadd.f32 %v8972_v44, %v3249_v36 }
 0x916   : > { %v9031_v15 = vadd.f32 %v7320_v59, %v3250_v60  ;;  %v6700_v59 = vld [vmem:[%s7545_s30 + $0xec] sm:$0xf] }
 0x918   : > { %12031 = vst [vmem:[#allocation17_spill] sm:$0xff] %v9031_v15 }
 0x91b   : > { %v3251_v17 = vpop.f32.mrf.mxu3 }
 0x91c   : > { %v3252_v48 = vadd.f32 %v8972_v44, %v3251_v17  ;;  %v6433_v17 = vld [vmem:[%s7545_s30 + $0xe8] sm:$0xf] }
 0x91e   : > { %v9041_v21 = vadd.f32 %v7321_v40, %v3252_v48  ;;  %v6409_v48 = vld [vmem:[%s7545_s30 + $0xc0] sm:$0xf] }
 0x920   : > { %12032 = vst [vmem:[#allocation18_spill] sm:$0xff] %v9041_v21 }
 0x923   : > { %v3254_v43 = vpop.f32.mrf.mxu3 }
 0x924   : > { %v3255_v61 = vadd.f32 %v8972_v44, %v3254_v43  ;;  %v6695_v43 = vld [vmem:[%s7545_s30 + $0xc4] sm:$0xf] }
 0x926   : > { %v9051_v35 = vadd.f32 %v7322_v16, %v3255_v61  ;;  %v6698_v61 = vld [vmem:[%s7545_s30 + $0xd4] sm:$0xf0]  ;;  %v6696_v16 = vld [vmem:[%s7545_s30 + $0xcc] sm:$0xf] }
 0x928   : > { %12033 = vst [vmem:[#allocation19_spill] sm:$0xff] %v9051_v35 }
 0x92b   : > { %v3256_v22 = vpop.f32.mrf.mxu3 }
 0x92c   : > { %v3257_v8 = vadd.f32 %v8972_v44, %v3256_v22 }
 0x92e   : > { %v9061_v2 = vadd.f32 %v7323_v13, %v3257_v8  ;;  %v6393_v8 = vld [vmem:[%s7545_s30 + $0xa0] sm:$0xf] }
 0x930   : > { %12034 = vst [vmem:[#allocation20_spill] sm:$0xff] %v9061_v2 }
 0x932   : > { %v3288_v52 = vpop.xlane.xlu2 %3287 }
 0x933   : > { %v3319_v23 = vmul.f32 %v3288_v52, %v7916_v37 }
 0x935   : > { %v9012_v49 = vsub.f32 %v8975_v5, %v3319_v23 }
 0x937   : > { %v3351_v31 = vmul.f32 %v9012_v49, %v9012_v49 }
 0x939   : > { %3367 = vadd.xlane.f32.xlu2 %v3351_v31  ;;  %v7326_v31 = vld [vmem:[#allocation2 + $0x78] sm:$0xff] }
 0x93a   : > { %v3290_v38 = vpop.xlane.xlu0 %3289 }
 0x93b   : > { %v3320_v58 = vmul.f32 %v3290_v38, %v7916_v37  ;;  %v6425_v38 = vld [vmem:[%s7545_s30 + $0xe0] sm:$0xf] }
 0x93c   : > { %v6426_v51 = vor.u32 %v6701_v29, %v6425_v38  ;;  %v6379_v38 = vld [vmem:[%s7545_s30 + $0x90] sm:$0xf0]  ;;  %v6385_v29 = vld [vmem:[%s7545_s30 + $0x88] sm:$0xf] }
 0x93d   : > { %v9019_v42 = vsub.f32 %v8979_v19, %v3320_v58  ;;  %v6699_v58 = vld [vmem:[%s7545_s30 + $0xe4] sm:$0xf] }
 0x93e   : > { %3855 = vmatpush.bf16.msrb.mxu0 %v6426_v51 }
 0x93f   : > { %v3352_v3 = vmul.f32 %v9019_v42, %v9019_v42 }
 0x941   : > { %3369 = vadd.xlane.f32.xlu0 %v3352_v3  ;;  %3301 = vadd.xlane.f32.xlu2 %v9021_v11  ;;  %v6427_v3 = vld [vmem:[%s7545_s30 + $0xf0] sm:$0xf0] }
 0x942   : > { %v3292_v14 = vpop.xlane.xlu1 %3291  ;;  %v6430_v60 = vor.u32 %v6699_v58, %v6427_v3  ;;  %v6690_v58 = vld [vmem:[%s7545_s30 + $0x94] sm:$0xf0] }
 0x943   : > { %v3321_v55 = vmul.f32 %v3292_v14, %v7916_v37  ;;  %v6702_v14 = vld [vmem:[%s7545_s30 + $0xf4] sm:$0xf0]  ;;  %v6386_v3 = vor.u32 %v6690_v58, %v6385_v29 }
 0x944   : > { %3904 = vmatpush.bf16.msrb.mxu1 %v6430_v60 }
 0x945   : > { %v9029_v1 = vsub.f32 %v8987_v56, %v3321_v55  ;;  %v6434_v55 = vor.u32 %v6702_v14, %v6433_v17  ;;  %v6688_v17 = vld [vmem:[%s7545_s30 + $0x8c] sm:$0xf]  ;;  %v6387_v14 = vld [vmem:[%s7545_s30 + $0x98] sm:$0xf0] }
 0x946   : > { %v6390_v60 = vor.u32 %v6688_v17, %v6387_v14 }
 0x947   : > { %v3353_v30 = vmul.f32 %v9029_v1, %v9029_v1  ;;  %3953 = vmatpush.bf16.msrb.mxu2 %v6434_v55  ;;  %v6361_v55 = vld [vmem:[%s7545_s30 + $0x60] sm:$0xf] }
 0x949   : > { %3371 = vadd.xlane.f32.xlu0 %v3353_v30  ;;  %3303 = vadd.xlane.f32.xlu2 %v9031_v15  ;;  %v6435_v30 = vld [vmem:[%s7545_s30 + $0xf8] sm:$0xf0] }
 0x94a   : > { %v3294_v41 = vpop.xlane.xlu2 %3293 }
 0x94b   : > { %v3322_v33 = vmul.f32 %v3294_v41, %v7916_v37  ;;  %v6438_v41 = vor.u32 %v6700_v59, %v6435_v30  ;;  %v6685_v59 = vld [vmem:[%s7545_s30 + $0x6c] sm:$0xf0]  ;;  %v6683_v30 = vld [vmem:[%s7545_s30 + $0x64] sm:$0xf] }
 0x94d   : > { %v9039_v25 = vsub.f32 %v8991_v50, %v3322_v33  ;;  %v6697_v33 = vld [vmem:[%s7545_s30 + $0xcc] sm:$0xf0]  ;;  %4002 = vmatpush.bf16.msrb.mxu3 %v6438_v41  ;;  %v6362_v41 = vor.u32 %v6685_v59, %v6361_v55  ;;  %v6671_v59 = vld [vmem:[%s7545_s30 + $0x4] sm:$0xf] }
 0x94e   : > { %v6410_v40 = vor.u32 %v6697_v33, %v6409_v48  ;;  %v6363_v48 = vld [vmem:[%s7545_s30 + $0x70] sm:$0xf0]  ;;  %v6369_v33 = vld [vmem:[%s7545_s30 + $0x68] sm:$0xf]  ;;  %v6673_v55 = vld [vmem:[%s7545_s30 + $0xc] sm:$0xf0] }
 0x94f   : > { %v3354_v0 = vmul.f32 %v9039_v25, %v9039_v25 }
 0x950   : > { %v3259_v46 = vpop.f32.mrf.mxu3  ;;  %3856 = vmatpush.bf16.msrb.mxu0 %v6410_v40  ;;  %v6366_v40 = vor.u32 %v6683_v30, %v6363_v48  ;;  %v6321_v48 = vld [vmem:[%s7545_s30 + $0x8] sm:$0xf] }
 0x951   : > { %3305 = vadd.xlane.f32.xlu0 %v9041_v21  ;;  %3373 = vadd.xlane.f32.xlu1 %v3354_v0  ;;  %v3260_v6 = vadd.f32 %v8972_v44, %v3259_v46  ;;  %v6411_v0 = vld [vmem:[%s7545_s30 + $0xd0] sm:$0xf0]  ;;  %v6691_v46 = vld [vmem:[%s7545_s30 + $0xa4] sm:$0xf] }
 0x952   : > { %v3296_v32 = vpop.xlane.xlu0 %3295 }
 0x953   : > { %v3323_v57 = vmul.f32 %v3296_v32, %v7916_v37  ;;  %v9071_v4 = vadd.f32 %v7324_v53, %v3260_v6  ;;  %v6417_v32 = vld [vmem:[%s7545_s30 + $0xc8] sm:$0xf]  ;;  %v6694_v6 = vld [vmem:[%s7545_s30 + $0xb4] sm:$0xf0] }
 0x954   : > { %v6418_v22 = vor.u32 %v6698_v61, %v6417_v32  ;;  %v6684_v32 = vld [vmem:[%s7545_s30 + $0x6c] sm:$0xf]  ;;  %v6371_v61 = vld [vmem:[%s7545_s30 + $0x78] sm:$0xf0] }
 0x955   : > { %v9049_v9 = vsub.f32 %v8995_v47, %v3323_v57  ;;  %12035 = vst [vmem:[#allocation21_spill] sm:$0xff] %v9071_v4  ;;  %v6414_v57 = vor.u32 %v6695_v43, %v6411_v0  ;;  %v6686_v43 = vld [vmem:[%s7545_s30 + $0x74] sm:$0xf0] }
 0x956   : > { %3954 = vmatpush.bf16.msrb.mxu2 %v6418_v22  ;;  %v6370_v0 = vor.u32 %v6686_v43, %v6369_v33  ;;  %v6345_v22 = vld [vmem:[%s7545_s30 + $0x40] sm:$0xf]  ;;  %v6674_v33 = vld [vmem:[%s7545_s30 + $0x14] sm:$0xf0] }
 0x957   : > { %v3355_v18 = vmul.f32 %v9049_v9, %v9049_v9  ;;  %3905 = vmatpush.bf16.msrb.mxu1 %v6414_v57  ;;  %v6374_v57 = vor.u32 %v6684_v32, %v6371_v61  ;;  %v6323_v32 = vld [vmem:[%s7545_s30 + $0x18] sm:$0xf0] }
 0x958   : > { %v3261_v27 = vpop.f32.mrf.mxu3 }
 0x959   : > { %3307 = vadd.xlane.f32.xlu0 %v9051_v35  ;;  %3375 = vadd.xlane.f32.xlu1 %v3355_v18  ;;  %v3262_v62 = vadd.f32 %v8972_v44, %v3261_v27  ;;  %v6419_v18 = vld [vmem:[%s7545_s30 + $0xd8] sm:$0xf0] }
 0x95a   : > { %v3298_v12 = vpop.xlane.xlu1 %3297  ;;  %v6403_v27 = vld [vmem:[%s7545_s30 + $0xb8] sm:$0xf0] }
 0x95b   : > { %v3324_v28 = vmul.f32 %v3298_v12, %v7916_v37  ;;  %v9077_v39 = vadd.f32 %v7325_v24, %v3262_v62  ;;  %v6422_v12 = vor.u32 %v6696_v16, %v6419_v18  ;;  %v6377_v24 = vld [vmem:[%s7545_s30 + $0x80] sm:$0xf]  ;;  %v6681_v16 = vld [vmem:[%s7545_s30 + $0x4c] sm:$0xf0]  ;;  %v6679_v18 = vld [vmem:[%s7545_s30 + $0x44] sm:$0xf] }
 0x95d   : > { %v9059_v26 = vsub.f32 %v8999_v63, %v3324_v28  ;;  %12036 = vst [vmem:[#allocation22_spill] sm:$0xff] %v9077_v39  ;;  %v6693_v28 = vld [vmem:[%s7545_s30 + $0xac] sm:$0xf0]  ;;  %4003 = vmatpush.bf16.msrb.mxu3 %v6422_v12  ;;  %v6346_v12 = vor.u32 %v6681_v16, %v6345_v22 }
 0x95e   : > { %v6394_v13 = vor.u32 %v6693_v28, %v6393_v8  ;;  %v6347_v8 = vld [vmem:[%s7545_s30 + $0x50] sm:$0xf0]  ;;  %v6353_v28 = vld [vmem:[%s7545_s30 + $0x48] sm:$0xf] }
 0x95f   : > { %v3356_v20 = vmul.f32 %v9059_v26, %v9059_v26 }
 0x960   : > { %3857 = vmatpush.bf16.msrb.mxu0 %v6394_v13  ;;  %v6350_v13 = vor.u32 %v6679_v18, %v6347_v8 }
 0x961   : > { %3377 = vadd.xlane.f32.xlu2 %v3356_v20  ;;  %3309 = vadd.xlane.f32.xlu1 %v9061_v2  ;;  %v6395_v20 = vld [vmem:[%s7545_s30 + $0xb0] sm:$0xf0] }
 0x962   : > { %v3300_v54 = vpop.xlane.xlu1 %3299 }
 0x963   : > { %v3325_v45 = vmul.f32 %v3300_v54, %v7916_v37  ;;  %v6401_v54 = vld [vmem:[%s7545_s30 + $0xa8] sm:$0xf] }
 0x964   : > { %v6402_v53 = vor.u32 %v6694_v6, %v6401_v54  ;;  %v6680_v54 = vld [vmem:[%s7545_s30 + $0x4c] sm:$0xf]  ;;  %v6355_v6 = vld [vmem:[%s7545_s30 + $0x58] sm:$0xf0] }
 0x965   : > { %v9069_v7 = vsub.f32 %v9007_v34, %v3325_v45  ;;  %v6398_v45 = vor.u32 %v6691_v46, %v6395_v20  ;;  %v6682_v46 = vld [vmem:[%s7545_s30 + $0x54] sm:$0xf0] }
 0x966   : > { %3955 = vmatpush.bf16.msrb.mxu2 %v6402_v53  ;;  %v6354_v20 = vor.u32 %v6682_v46, %v6353_v28 }
 0x967   : > { %v3357_v10 = vmul.f32 %v9069_v7, %v9069_v7  ;;  %3906 = vmatpush.bf16.msrb.mxu1 %v6398_v45  ;;  %v6358_v45 = vor.u32 %v6680_v54, %v6355_v6 }
 0x969   : > { %3311 = vadd.xlane.f32.xlu1 %v9071_v4  ;;  %3379 = vadd.xlane.f32.xlu2 %v3357_v10  ;;  %v6692_v10 = vld [vmem:[%s7545_s30 + $0xac] sm:$0xf] }
 0x96a   : > { %v6406_v62 = vor.u32 %v6692_v10, %v6403_v27  ;;  %3956 = vmatpush.bf16.msrb.mxu2 %v6386_v3  ;;  %v6329_v10 = vld [vmem:[%s7545_s30 + $0x20] sm:$0xf]  ;;  %v6677_v27 = vld [vmem:[%s7545_s30 + $0x2c] sm:$0xf0]  ;;  %v6339_v3 = vld [vmem:[%s7545_s30 + $0x38] sm:$0xf0] }
 0x96b   : > { %v3264_v52 = vpop.f32.mrf.mxu3 }
 0x96c   : > { %v3265_v23 = vadd.f32 %v8972_v44, %v3264_v52  ;;  %v6689_v52 = vld [vmem:[%s7545_s30 + $0x8c] sm:$0xf0]  ;;  %4004 = vmatpush.bf16.msrb.mxu3 %v6406_v62  ;;  %v6675_v62 = vld [vmem:[%s7545_s30 + $0x24] sm:$0xf] }
 0x96e   : > { %v9081_v36 = vadd.f32 %v7326_v31, %v3265_v23  ;;  %v6687_v23 = vld [vmem:[%s7545_s30 + $0x84] sm:$0xf]  ;;  %v6378_v31 = vor.u32 %v6689_v52, %v6377_v24  ;;  %3957 = vmatpush.bf16.msrb.mxu2 %v6370_v0  ;;  %v6330_v52 = vor.u32 %v6677_v27, %v6329_v10  ;;  %v6672_v0 = vld [vmem:[%s7545_s30 + $0xc] sm:$0xf] }
 0x96f   : > { %v6382_v51 = vor.u32 %v6687_v23, %v6379_v38  ;;  %v6331_v23 = vld [vmem:[%s7545_s30 + $0x30] sm:$0xf0]  ;;  %v6678_v38 = vld [vmem:[%s7545_s30 + $0x34] sm:$0xf0]  ;;  %v6326_v61 = vor.u32 %v6672_v0, %v6323_v32 }
 0x970   : > { %12037 = vst [vmem:[#allocation23_spill] sm:$0xff] %v9081_v36  ;;  %3858 = vmatpush.bf16.msrb.mxu0 %v6378_v31  ;;  %4005 = vmatpush.bf16.msrb.mxu3 %v6390_v60  ;;  %v6337_v31 = vld [vmem:[%s7545_s30 + $0x28] sm:$0xf]  ;;  %v6334_v29 = vor.u32 %v6675_v62, %v6331_v23  ;;  %v6313_v60 = vld [vmem:[%s7545_s30] sm:$0xf] }
 0x971   : > { %3313 = vadd.xlane.f32.xlu2 %v9077_v39  ;;  %3907 = vmatpush.bf16.msrb.mxu1 %v6382_v51  ;;  %v6338_v58 = vor.u32 %v6678_v38, %v6337_v31  ;;  %v6676_v51 = vld [vmem:[%s7545_s30 + $0x2c] sm:$0xf]  ;;  %v6314_v30 = vor.u32 %v6673_v55, %v6313_v60 }
 0x972   : > { %3958 = vmatpush.bf16.msrb.mxu2 %v6354_v20  ;;  %v6342_v14 = vor.u32 %v6676_v51, %v6339_v3 }
 0x974   : > { %3859 = vmatpush.bf16.msrb.mxu0 %v6362_v41  ;;  %4006 = vmatpush.bf16.msrb.mxu3 %v6374_v57  ;;  %v6315_v41 = vld [vmem:[%s7545_s30 + $0x10] sm:$0xf0] }
 0x975   : > { %3908 = vmatpush.bf16.msrb.mxu1 %v6366_v40  ;;  %v6318_v43 = vor.u32 %v6671_v59, %v6315_v41  ;;  %v6322_v40 = vor.u32 %v6674_v33, %v6321_v48  ;;  %v9167_v33 = vld [vmem:[%s7533_s2] ss:$0 sm:$0xff] }
 0x976   : > { %3959 = vmatpush.bf16.msrb.mxu2 %v6338_v58 }
 0x978   : > { %3860 = vmatpush.bf16.msrb.mxu0 %v6346_v12  ;;  %4007 = vmatpush.bf16.msrb.mxu3 %v6358_v45 }
 0x979   : > { %3315 = vadd.xlane.f32.xlu2 %v9081_v36  ;;  %3909 = vmatpush.bf16.msrb.mxu1 %v6350_v13 }
 0x97a   : > { %3960 = vmatpush.bf16.msrb.mxu2 %v6322_v40 }
 0x97c   : > { %3861 = vmatpush.bf16.msrb.mxu0 %v6330_v52  ;;  %4008 = vmatpush.bf16.msrb.mxu3 %v6342_v14 }
 0x97d   : > { %3910 = vmatpush.bf16.msrb.mxu1 %v6334_v29  ;;  %v3266_v29 = vpop.f32.mrf.mxu3 }
 0x97e   : > { %v3267_v55 = vadd.f32 %v8972_v44, %v3266_v29  ;;  %v7327_v44 = vld [vmem:[#allocation2 + $0x28] sm:$0xff] }
 0x980   : > { %3862 = vmatpush.bf16.msrb.mxu0 %v6314_v30  ;;  %4009 = vmatpush.bf16.msrb.mxu3 %v6326_v61  ;;  %v9173_v61 = vadd.f32 %v7327_v44, %v3267_v55 }
 0x981   : > { %3911 = vmatpush.bf16.msrb.mxu1 %v6318_v43 }
 0x982   : > { %12038 = vst [vmem:[#allocation24_spill] sm:$0xff] %v9173_v61 }
 0x9ac   : > { %v3368_v53 = vpop.xlane.xlu2 %3367 }
 0x9ad   : > { %v3399_v24 = vmul.f32 %v3368_v53, %v7916_v37 }
 0x9af   : > { %v3415_v17 = vadd.f32 1e-05, %v3399_v24 }
 0x9b1   : > { %7024 = vrsqrt.f32 %v3415_v17  ;;  %vm3437_vm5 = vweird.f32 %v3415_v17 }
 0x9b4   : > { %v3370_v57 = vpop.xlane.xlu0 %3369  ;;  %v3302_v22 = vpop.xlane.xlu2 %3301 }
 0x9b5   : > { %v3400_v16 = vmul.f32 %v3370_v57, %v7916_v37  ;;  %v3326_v18 = vmul.f32 %v3302_v22, %v7916_v37 }
 0x9b7   : > { %v7025_v12 = vpop.eup %7024  ;;  %v3416_v8 = vadd.f32 1e-05, %v3400_v16  ;;  %v9152_v28 = vsub.f32 %v9021_v11, %v3326_v18  ;;  %v9178_v18 = vld [vmem:[%s7539_s17] ss:$0 sm:$0xff] }
 0x9b8   : > { %v3432_v46 = vmul.f32 %v7025_v12, %v3415_v17  ;;  %vm3438_vm4 = vweird.f32 %v7025_v12 }
 0x9b9   : > { %7026 = vrsqrt.f32 %v3416_v8  ;;  %v3358_v13 = vmul.f32 %v9152_v28, %v9152_v28  ;;  %vm3439_vm6 = vmor %vm3437_vm5, %vm3438_vm4  ;;  %vm3447_vm8 = vweird.f32 %v3416_v8 }
 0x9ba   : > { %v3433_v20 = vmul.f32 %v7025_v12, %v3432_v46 }
 0x9bb   : > { %3381 = vadd.xlane.f32.xlu0 %v3358_v13 }
 0x9bc   : > { %v3434_v54 = vmul.f32 0.5, %v3433_v20  ;;  %v3372_v6 = vpop.xlane.xlu0 %3371  ;;  %v3304_v45 = vpop.xlane.xlu2 %3303 }
 0x9bd   : > { %v3401_v53 = vmul.f32 %v3372_v6, %v7916_v37  ;;  %v3327_v10 = vmul.f32 %v3304_v45, %v7916_v37 }
 0x9be   : > { %v3435_v27 = vsub.f32 1.5, %v3434_v54 }
 0x9bf   : > { %v7027_v62 = vpop.eup %7026  ;;  %v3417_v24 = vadd.f32 1e-05, %v3401_v53  ;;  %v9159_v52 = vsub.f32 %v9031_v15, %v3327_v10 }
 0x9c0   : > { %v3436_v23 = vmul.f32 %v7025_v12, %v3435_v27  ;;  %v3442_v31 = vmul.f32 %v7027_v62, %v3416_v8  ;;  %vm3448_vm7 = vweird.f32 %v7027_v62 }
 0x9c1   : > { %7028 = vrsqrt.f32 %v3417_v24  ;;  %v3359_v38 = vmul.f32 %v9159_v52, %v9159_v52  ;;  %vm3449_vm9 = vmor %vm3447_vm8, %vm3448_vm7  ;;  %vm3457_vm11 = vweird.f32 %v3417_v24 }
 0x9c2   : > { %v3443_v58 = vmul.f32 %v7027_v62, %v3442_v31  ;;  %v3440_v51 = vsel %vm3439_vm6, %v7025_v12, %v3436_v23 }
 0x9c3   : > { %3383 = vadd.xlane.f32.xlu0 %v3359_v38  ;;  %v3591_v17 = vmul.f32 %v3440_v51, %v9012_v49 }
 0x9c4   : > { %v3444_v3 = vmul.f32 0.5, %v3443_v58  ;;  %v3306_v14 = vpop.xlane.xlu0 %3305  ;;  %v3374_v60 = vpop.xlane.xlu1 %3373 }
 0x9c5   : > { %v3328_v59 = vmul.f32 %v3306_v14, %v7916_v37  ;;  %v3402_v30 = vmul.f32 %v3374_v60, %v7916_v37  ;;  %v3610_v49 = vmul.f32 %v9167_v33, %v3591_v17 }
 0x9c6   : > { %v3445_v41 = vsub.f32 1.5, %v3444_v3 }
 0x9c7   : > { %v7029_v48 = vpop.eup %7028  ;;  %v9171_v43 = vsub.f32 %v9041_v21, %v3328_v59  ;;  %v3418_v40 = vadd.f32 1e-05, %v3402_v30  ;;  %v3629_v10 = vadd.f32 %v9178_v18, %v3610_v49 }
 0x9c8   : > { %v3446_v0 = vmul.f32 %v7027_v62, %v3445_v41  ;;  %v3452_v32 = vmul.f32 %v7029_v48, %v3417_v24  ;;  %vm3458_vm10 = vweird.f32 %v7029_v48 }
 0x9c9   : > { %7030 = vrsqrt.f32 %v3418_v40  ;;  %v3360_v57 = vmul.f32 %v9171_v43, %v9171_v43  ;;  %vm3459_vm12 = vmor %vm3457_vm11, %vm3458_vm10  ;;  %vm3467_vm14 = vweird.f32 %v3418_v40 }
 0x9ca   : > { %v3450_v22 = vsel %vm3449_vm9, %v7027_v62, %v3446_v0  ;;  %v3453_v16 = vmul.f32 %v7029_v48, %v3452_v32 }
 0x9cb   : > { %v3592_v12 = vmul.f32 %v3450_v22, %v9019_v42  ;;  %3317 = vadd.xlane.f32.xlu0 %v9173_v61  ;;  %3385 = vadd.xlane.f32.xlu1 %v3360_v57 }
 0x9cc   : > { %v3454_v8 = vmul.f32 0.5, %v3453_v16  ;;  %v3308_v46 = vpop.xlane.xlu0 %3307  ;;  %v3376_v13 = vpop.xlane.xlu1 %3375 }
 0x9cd   : > { %v3611_v20 = vmul.f32 %v9167_v33, %v3592_v12  ;;  %v3329_v54 = vmul.f32 %v3308_v46, %v7916_v37  ;;  %v3403_v6 = vmul.f32 %v3376_v13, %v7916_v37 }
 0x9ce   : > { %v3455_v45 = vsub.f32 1.5, %v3454_v8 }
 0x9cf   : > { %v7031_v53 = vpop.eup %7030  ;;  %v3630_v27 = vadd.f32 %v9178_v18, %v3611_v20  ;;  %v9189_v42 = vsub.f32 %v9051_v35, %v3329_v54  ;;  %v3419_v62 = vadd.f32 1e-05, %v3403_v6 }
 0x9d0   : > { %v3456_v23 = vmul.f32 %v7029_v48, %v3455_v45  ;;  %v3462_v31 = vmul.f32 %v7031_v53, %v3418_v40  ;;  %vm3468_vm13 = vweird.f32 %v7031_v53 }
 0x9d1   : > { %7032 = vrsqrt.f32 %v3419_v62  ;;  %v3645_v38 = vpack.c.bf16 %v3630_v27, %v3629_v10  ;;  %v3361_v29 = vmul.f32 %v9189_v42, %v9189_v42  ;;  %vm3469_vm15 = vmor %vm3467_vm14, %vm3468_vm13  ;;  %vm3477_vm1 = vweird.f32 %v3419_v62 }
 0x9d2   : > { %v3463_v58 = vmul.f32 %v7031_v53, %v3462_v31  ;;  %v3460_v51 = vsel %vm3459_vm12, %v7029_v48, %v3456_v23 }
 0x9d3   : > { %3863 = vmatmul.bf16.vlgmr.msrb.gmra.mxu0 %v3645_v38  ;;  %3912 = vmatmul.bf16.vlgmr.msrb.gmra.mxu1 %v3645_v38  ;;  %v3593_v24 = vmul.f32 %v3460_v51, %v9029_v1 }
 0x9d4   : > { %v3464_v3 = vmul.f32 0.5, %v3463_v58  ;;  %3961 = vmatmul.bf16.vlgmr.msrb.gmra.mxu2 %v3645_v38  ;;  %4010 = vmatmul.bf16.vlgmr.msrb.gmra.mxu3 %v3645_v38  ;;  %v3378_v14 = vpop.xlane.xlu2 %3377  ;;  %v3310_v60 = vpop.xlane.xlu1 %3309 }
 0x9d5   : > { %3387 = vadd.xlane.f32.xlu1 %v3361_v29  ;;  %v3404_v55 = vmul.f32 %v3378_v14, %v7916_v37  ;;  %v3330_v59 = vmul.f32 %v3310_v60, %v7916_v37  ;;  %v3612_v49 = vmul.f32 %v9167_v33, %v3593_v24 }
 0x9d6   : > { %v3465_v30 = vsub.f32 1.5, %v3464_v3 }
 0x9d7   : > { %v7033_v41 = vpop.eup %7032  ;;  %v3420_v17 = vadd.f32 1e-05, %v3404_v55  ;;  %v9197_v0 = vsub.f32 %v9061_v2, %v3330_v59  ;;  %v3631_v6 = vadd.f32 %v9178_v18, %v3612_v49 }
 0x9d8   : > { %v3466_v48 = vmul.f32 %v7031_v53, %v3465_v30  ;;  %v3472_v32 = vmul.f32 %v7033_v41, %v3419_v62  ;;  %vm3478_vm0 = vweird.f32 %v7033_v41 }
 0x9d9   : > { %7034 = vrsqrt.f32 %v3420_v17  ;;  %v3362_v44 = vmul.f32 %v9197_v0, %v9197_v0  ;;  %vm3479_vm2 = vmor %vm3477_vm1, %vm3478_vm0  ;;  %vm3487_vm4 = vweird.f32 %v3420_v17 }
 0x9da   : > { %v3470_v57 = vsel %vm3469_vm15, %v7031_v53, %v3466_v48  ;;  %v3473_v22 = vmul.f32 %v7033_v41, %v3472_v32 }
 0x9db   : > { %v3594_v16 = vmul.f32 %v3470_v57, %v9039_v25  ;;  %3389 = vadd.xlane.f32.xlu2 %v3362_v44 }
 0x9dc   : > { %v3474_v1 = vmul.f32 0.5, %v3473_v22  ;;  %v3380_v12 = vpop.xlane.xlu2 %3379  ;;  %v3312_v8 = vpop.xlane.xlu1 %3311 }
 0x9dd   : > { %v3331_v46 = vmul.f32 %v3312_v8, %v7916_v37  ;;  %v3613_v40 = vmul.f32 %v9167_v33, %v3594_v16 }
 0x9de   : > { %v3475_v13 = vsub.f32 1.5, %v3474_v1 }
 0x9df   : > { %v7035_v20 = vpop.eup %7034  ;;  %v9206_v54 = vsub.f32 %v9071_v4, %v3331_v46  ;;  %v3632_v45 = vadd.f32 %v9178_v18, %v3613_v40 }
 0x9e0   : > { %v3476_v25 = vmul.f32 %v7033_v41, %v3475_v13  ;;  %v3482_v53 = vmul.f32 %v7035_v20, %v3420_v17  ;;  %vm3488_vm3 = vweird.f32 %v7035_v20 }
 0x9e1   : > { %v3646_v10 = vpack.c.bf16 %v3632_v45, %v3631_v6  ;;  %v3363_v27 = vmul.f32 %v9206_v54, %v9206_v54  ;;  %vm3489_vm5 = vmor %vm3487_vm4, %vm3488_vm3 }
 0x9e2   : > { %v3483_v23 = vmul.f32 %v7035_v20, %v3482_v53  ;;  %v3480_v31 = vsel %vm3479_vm2, %v7033_v41, %v3476_v25 }
 0x9e3   : > { %3868 = vmatmul.bf16.gmra.mxu0 %v3646_v10  ;;  %3917 = vmatmul.bf16.gmra.mxu1 %v3646_v10  ;;  %v3595_v3 = vmul.f32 %v3480_v31, %v9049_v9 }
 0x9e4   : > { %v3484_v38 = vmul.f32 0.5, %v3483_v23  ;;  %3966 = vmatmul.bf16.gmra.mxu2 %v3646_v10  ;;  %4015 = vmatmul.bf16.gmra.mxu3 %v3646_v10  ;;  %v3314_v29 = vpop.xlane.xlu2 %3313 }
 0x9e5   : > { %3391 = vadd.xlane.f32.xlu0 %v3363_v27  ;;  %v3332_v58 = vmul.f32 %v3314_v29, %v7916_v37  ;;  %v3614_v30 = vmul.f32 %v9167_v33, %v3595_v3 }
 0x9e6   : > { %v3485_v51 = vsub.f32 1.5, %v3484_v38 }
 0x9e7   : > { %v9215_v14 = vsub.f32 %v9077_v39, %v3332_v58  ;;  %v3633_v17 = vadd.f32 %v9178_v18, %v3614_v30 }
 0x9e8   : > { %v3486_v62 = vmul.f32 %v7035_v20, %v3485_v51 }
 0x9e9   : > { %v3364_v60 = vmul.f32 %v9215_v14, %v9215_v14 }
 0x9ea   : > { %v3490_v55 = vsel %vm3489_vm5, %v7035_v20, %v3486_v62 }
 0x9eb   : > { %v3596_v59 = vmul.f32 %v3490_v55, %v9059_v26  ;;  %3393 = vadd.xlane.f32.xlu1 %v3364_v60  ;;  %v3405_v26 = vmul.f32 %v3380_v12, %v7916_v37 }
 0x9ec   : > { %v3316_v41 = vpop.xlane.xlu2 %3315 }
 0x9ed   : > { %v3333_v24 = vmul.f32 %v3316_v41, %v7916_v37  ;;  %v3615_v9 = vmul.f32 %v9167_v33, %v3596_v59  ;;  %v3421_v22 = vadd.f32 1e-05, %v3405_v26 }
 0x9ef   : > { %v9224_v48 = vsub.f32 %v9081_v36, %v3333_v24  ;;  %v3634_v32 = vadd.f32 %v9178_v18, %v3615_v9  ;;  %7036 = vrsqrt.f32 %v3421_v22  ;;  %vm3497_vm7 = vweird.f32 %v3421_v22 }
 0x9f1   : > { %12039 = vst [vmem:[#allocation25_spill] sm:$0xff] %v9224_v48  ;;  %v3647_v44 = vpack.c.bf16 %v3634_v32, %v3633_v17  ;;  %v3365_v57 = vmul.f32 %v9224_v48, %v9224_v48 }
 0x9f3   : > { %3873 = vmatmul.bf16.gmra.mxu0 %v3647_v44  ;;  %3922 = vmatmul.bf16.gmra.mxu1 %v3647_v44 }
 0x9f4   : > { %3971 = vmatmul.bf16.gmra.mxu2 %v3647_v44  ;;  %4020 = vmatmul.bf16.gmra.mxu3 %v3647_v44 }
 0x9f5   : > { %3395 = vadd.xlane.f32.xlu2 %v3365_v57  ;;  %v7037_v16 = vpop.eup %7036 }
 0x9f6   : > { %v3492_v49 = vmul.f32 %v7037_v16, %v3421_v22  ;;  %vm3498_vm6 = vweird.f32 %v7037_v16 }
 0x9f7   : > { %vm3499_vm8 = vmor %vm3497_vm7, %vm3498_vm6 }
 0x9f8   : > { %v3493_v1 = vmul.f32 %v7037_v16, %v3492_v49 }
 0x9fa   : > { %v3494_v13 = vmul.f32 0.5, %v3493_v1 }
 0x9fc   : > { %v3495_v20 = vsub.f32 1.5, %v3494_v13 }
 0x9fe   : > { %v3496_v10 = vmul.f32 %v7037_v16, %v3495_v20 }
 0xa00   : > { %v3500_v23 = vsel %vm3499_vm8, %v7037_v16, %v3496_v10 }
 0xa01   : > { %v3597_v60 = vmul.f32 %v3500_v23, %v9069_v7  ;;  %v3685_v23 = vld [vmem:[%s7551_s23] sm:$0xf] }
 0xa03   : > { %v3616_v44 = vmul.f32 %v9167_v33, %v3597_v60 }
 0xa05   : > { %v3635_v16 = vadd.f32 %v9178_v18, %v3616_v44 }
 0xa2e   : > { %v3382_v8 = vpop.xlane.xlu0 %3381 }
 0xa2f   : > { %v3406_v46 = vmul.f32 %v3382_v8, %v7916_v37 }
 0xa31   : > { %v3422_v40 = vadd.f32 1e-05, %v3406_v46 }
 0xa33   : > { %7038 = vrsqrt.f32 %v3422_v40  ;;  %vm3507_vm10 = vweird.f32 %v3422_v40 }
 0xa36   : > { %v3384_v6 = vpop.xlane.xlu0 %3383 }
 0xa37   : > { %v3407_v45 = vmul.f32 %v3384_v6, %v7916_v37 }
 0xa39   : > { %v7039_v25 = vpop.eup %7038  ;;  %v3423_v53 = vadd.f32 1e-05, %v3407_v45 }
 0xa3a   : > { %v3502_v12 = vmul.f32 %v7039_v25, %v3422_v40  ;;  %vm3508_vm9 = vweird.f32 %v7039_v25 }
 0xa3b   : > { %7040 = vrsqrt.f32 %v3423_v53  ;;  %vm3509_vm11 = vmor %vm3507_vm10, %vm3508_vm9  ;;  %vm3517_vm13 = vweird.f32 %v3423_v53 }
 0xa3c   : > { %v3503_v27 = vmul.f32 %v7039_v25, %v3502_v12 }
 0xa3e   : > { %v3504_v31 = vmul.f32 0.5, %v3503_v27  ;;  %v3318_v38 = vpop.xlane.xlu0 %3317  ;;  %v3386_v29 = vpop.xlane.xlu1 %3385 }
 0xa3f   : > { %v3334_v58 = vmul.f32 %v3318_v38, %v7916_v37  ;;  %v3408_v51 = vmul.f32 %v3386_v29, %v7916_v37  ;;  %v9253_v29 = vperm.slane %v3685_v23, 0 }
 0xa40   : > { %v3505_v3 = vsub.f32 1.5, %v3504_v31 }
 0xa41   : > { %v7041_v62 = vpop.eup %7040  ;;  %v9237_v55 = vsub.f32 %v9173_v61, %v3334_v58  ;;  %v3424_v59 = vadd.f32 1e-05, %v3408_v51  ;;  %12041 = vst [vmem:[#allocation27_spill] sm:$0xff] %v9253_v29 }
 0xa42   : > { %v3506_v30 = vmul.f32 %v7039_v25, %v3505_v3  ;;  %v3512_v41 = vmul.f32 %v7041_v62, %v3423_v53  ;;  %vm3518_vm12 = vweird.f32 %v7041_v62 }
 0xa43   : > { %12040 = vst [vmem:[#allocation26_spill] sm:$0xff] %v9237_v55  ;;  %7042 = vrsqrt.f32 %v3424_v59  ;;  %v3366_v24 = vmul.f32 %v9237_v55, %v9237_v55  ;;  %vm3519_vm14 = vmor %vm3517_vm13, %vm3518_vm12  ;;  %vm3527_vm0 = vweird.f32 %v3424_v59 }
 0xa44   : > { %v3510_v9 = vsel %vm3509_vm11, %v7039_v25, %v3506_v30  ;;  %v3513_v17 = vmul.f32 %v7041_v62, %v3512_v41 }
 0xa45   : > { %v3598_v32 = vmul.f32 %v3510_v9, %v9152_v28  ;;  %3397 = vadd.xlane.f32.xlu0 %v3366_v24 }
 0xa46   : > { %v3514_v7 = vmul.f32 0.5, %v3513_v17 }
 0xa47   : > { %v3617_v57 = vmul.f32 %v9167_v33, %v3598_v32  ;;  %v9271_v32 = vperm.slane %v3685_v23, 2 }
 0xa48   : > { %v3515_v26 = vsub.f32 1.5, %v3514_v7  ;;  %v3388_v51 = vpop.xlane.xlu1 %3387  ;;  %v9273_v7 = vperm.slane %v3685_v23, 3 }
 0xa49   : > { %v7043_v22 = vpop.eup %7042  ;;  %v3636_v49 = vadd.f32 %v9178_v18, %v3617_v57  ;;  %v3409_v60 = vmul.f32 %v3388_v51, %v7916_v37 }
 0xa4a   : > { %v3522_v1 = vmul.f32 %v7043_v22, %v3424_v59  ;;  %v3516_v8 = vmul.f32 %v7041_v62, %v3515_v26  ;;  %vm3528_vm15 = vweird.f32 %v7043_v22 }
 0xa4b   : > { %v3648_v46 = vpack.c.bf16 %v3636_v49, %v3635_v16  ;;  %vm3529_vm1 = vmor %vm3527_vm0, %vm3528_vm15  ;;  %v9266_v24 = vadd.f32 1e-05, %v3409_v60 }
 0xa4c   : > { %v3523_v40 = vmul.f32 %v7043_v22, %v3522_v1  ;;  %v3520_v13 = vsel %vm3519_vm14, %v7041_v62, %v3516_v8 }
 0xa4d   : > { %3878 = vmatmul.bf16.gmra.mxu0 %v3648_v46  ;;  %3927 = vmatmul.bf16.gmra.mxu1 %v3648_v46  ;;  %v3599_v6 = vmul.f32 %v3520_v13, %v9159_v52  ;;  %v9255_v52 = vperm.slane %v3685_v23, 1  ;;  %7044 = vrsqrt.f32 %v9266_v24  ;;  %vm3537_vm2 = vweird.f32 %v9266_v24 }
 0xa4e   : > { %v3524_v28 = vmul.f32 0.5, %v3523_v40  ;;  %3976 = vmatmul.bf16.gmra.mxu2 %v3648_v46  ;;  %4025 = vmatmul.bf16.gmra.mxu3 %v3648_v46 }
 0xa4f   : > { %v3618_v53 = vmul.f32 %v9167_v33, %v3599_v6  ;;  %12042 = vst [vmem:[#allocation28_spill] sm:$0xff] %v9255_v52 }
 0xa50   : > { %v3525_v20 = vsub.f32 1.5, %v3524_v28  ;;  %v3864_v58 = vpop.f32.mrf.mxu0  ;;  %v3913_v3 = vpop.f32.mrf.mxu1 }
 0xa51   : > { %v3637_v31 = vadd.f32 %v9178_v18, %v3618_v53  ;;  %v9258_v62 = vadd.f32 %v3864_v58, %v9253_v29  ;;  %v9262_v59 = vadd.f32 %v3913_v3, %v9255_v52 }
 0xa52   : > { %v3526_v45 = vmul.f32 %v7043_v22, %v3525_v20 }
 0xa53   : > { %v6439_v41 = vmul.f32 -1.702, %v9258_v62  ;;  %v6440_v9 = vmul.f32 -1.702, %v9262_v59  ;;  %v9287_v28 = vpop.eup %7044 }
 0xa54   : > { %v3530_v25 = vsel %vm3529_vm1, %v7043_v22, %v3526_v45  ;;  %v3532_v53 = vmul.f32 %v9287_v28, %v9266_v24  ;;  %vm3538_vm3 = vweird.f32 %v9287_v28 }
 0xa55   : > { %v3600_v10 = vmul.f32 %v3530_v25, %v9171_v43  ;;  %v3390_v43 = vpop.xlane.xlu2 %3389  ;;  %v4179_v57 = vmul.f32 1.442695, %v6439_v41  ;;  %v4181_v22 = vmul.f32 1.442695, %v6440_v9  ;;  %vm9346_vm5 = vmor %vm3537_vm2, %vm3538_vm3 }
 0xa56   : > { %v3410_v30 = vmul.f32 %v3390_v43, %v7916_v37  ;;  %v3533_v43 = vmul.f32 %v9287_v28, %v3532_v53 }
 0xa57   : > { %v3619_v12 = vmul.f32 %v9167_v33, %v3600_v10  ;;  %v3962_v44 = vpop.f32.mrf.mxu2  ;;  %v4011_v26 = vpop.f32.mrf.mxu3 }
 0xa58   : > { %v9269_v17 = vadd.f32 1e-05, %v3410_v30  ;;  %v3866_v16 = vpop.f32.mrf.mxu0  ;;  %v9278_v49 = vadd.f32 %v3962_v44, %v9271_v32  ;;  %v9281_v1 = vadd.f32 %v4011_v26, %v9273_v7  ;;  %v3915_v46 = vpop.f32.mrf.mxu1  ;;  %v3534_v44 = vmul.f32 0.5, %v3533_v43 }
 0xa59   : > { %v3638_v27 = vadd.f32 %v9178_v18, %v3619_v12  ;;  %v9284_v8 = vadd.f32 %v3866_v16, %v9253_v29  ;;  %v9291_v20 = vadd.f32 %v3915_v46, %v9255_v52  ;;  %v3392_v25 = vpop.xlane.xlu0 %3391 }
 0xa5a   : > { %7046 = vrsqrt.f32 %v9269_v17  ;;  %v6441_v40 = vmul.f32 -1.702, %v9278_v49  ;;  %v6442_v13 = vmul.f32 -1.702, %v9281_v1  ;;  %v3411_v58 = vmul.f32 %v3392_v25, %v7916_v37 }
 0xa5b   : > { %v3649_v38 = vpack.c.bf16 %v3638_v27, %v3637_v31  ;;  %7048 = vpow2.f32 %v4179_v57  ;;  %v6443_v45 = vmul.f32 -1.702, %v9284_v8  ;;  %vm3547_vm6 = vweird.f32 %v9269_v17 }
 0xa5c   : > { %7050 = vpow2.f32 %v4181_v22  ;;  %v4183_v12 = vmul.f32 1.442695, %v6441_v40  ;;  %v4185_v31 = vmul.f32 1.442695, %v6442_v13  ;;  %v9308_v9 = vadd.f32 1e-05, %v3411_v58 }
 0xa5d   : > { %3883 = vmatmul.bf16.gmra.mxu0 %v3649_v38  ;;  %3932 = vmatmul.bf16.gmra.mxu1 %v3649_v38  ;;  %v4187_v51 = vmul.f32 1.442695, %v6443_v45  ;;  %v3535_v45 = vsub.f32 1.5, %v3534_v44 }
 0xa5e   : > { %3981 = vmatmul.bf16.gmra.mxu2 %v3649_v38  ;;  %4030 = vmatmul.bf16.gmra.mxu3 %v3649_v38  ;;  %v6444_v38 = vmul.f32 -1.702, %v9291_v20  ;;  %7052 = vpow2.f32 %v4183_v12  ;;  %v3394_v61 = vpop.xlane.xlu1 %3393  ;;  %vm3557_vm15 = vweird.f32 %v9308_v9 }
 0xa5f   : > { %7054 = vpow2.f32 %v4185_v31  ;;  %v3964_v57 = vpop.f32.mrf.mxu2  ;;  %v4013_v40 = vpop.f32.mrf.mxu3  ;;  %v3536_v43 = vmul.f32 %v9287_v28, %v3535_v45 }
 0xa60   : > { %v9293_v6 = vpop.eup %7046  ;;  %v4189_v41 = vmul.f32 1.442695, %v6444_v38  ;;  %7056 = vpow2.f32 %v4187_v51  ;;  %v9314_v46 = vadd.f32 %v3964_v57, %v9271_v32  ;;  %v3918_v35 = vpop.f32.mrf.mxu1 }
 0xa61   : > { %v7049_v10 = vpop.eup %7048  ;;  %v3542_v23 = vmul.f32 %v9293_v6, %v9269_v17  ;;  %vm3548_vm4 = vweird.f32 %v9293_v6 }
 0xa62   : > { %v7051_v27 = vpop.eup %7050  ;;  %v9302_v3 = vadd.f32 1.0, %v7049_v10  ;;  %v6445_v58 = vmul.f32 -1.702, %v9314_v46  ;;  %vm9357_vm7 = vmor %vm3547_vm6, %vm3548_vm4 }
 0xa63   : > { %v9305_v60 = vadd.f32 1.0, %v7051_v27  ;;  %v3543_v30 = vmul.f32 %v9293_v6, %v3542_v23  ;;  %v9325_v23 = vadd.f32 %v4013_v40, %v9273_v7  ;;  %v3540_v40 = vsel %vm9346_vm5, %v9287_v28, %v3536_v43 }
 0xa64   : > { %7058 = vrcp.f32 %v9302_v3  ;;  %v7053_v22 = vpop.eup %7052  ;;  %v9370_v17 = vmul.f32 %v3540_v40, %v9189_v42  ;;  %vm4376_vm8 = vweird.f32 %v9302_v3 }
 0xa65   : > { %7060 = vrcp.f32 %v9305_v60  ;;  %v3544_v26 = vmul.f32 0.5, %v3543_v30  ;;  %v7055_v16 = vpop.eup %7054  ;;  %v9318_v53 = vadd.f32 1.0, %v7053_v22  ;;  %v6446_v24 = vmul.f32 -1.702, %v9325_v23 }
 0xa66   : > { %7062 = vpow2.f32 %v4189_v41  ;;  %v7057_v13 = vpop.eup %7056  ;;  %v9322_v27 = vadd.f32 1.0, %v7055_v16  ;;  %v4191_v16 = vmul.f32 1.442695, %v6445_v58  ;;  %vm4391_vm9 = vweird.f32 %v9305_v60 }
 0xa67   : > { %7064 = vrsqrt.f32 %v9308_v9  ;;  %v3545_v10 = vsub.f32 1.5, %v3544_v26  ;;  %v9327_v38 = vadd.f32 1.0, %v7057_v13  ;;  %v4193_v28 = vmul.f32 1.442695, %v6446_v24  ;;  %v3869_v26 = vpop.f32.mrf.mxu0 }
 0xa68   : > { %7066 = vrcp.f32 %v9318_v53  ;;  %v4380_v13 = vand.u32 2147483647, %v9302_v3  ;;  %v9390_v2 = vadd.f32 %v3869_v26, %v9253_v29  ;;  %v4425_v11 = vand.u32 2147483647, %v9322_v27 }
 0xa69   : > { %v3546_v30 = vmul.f32 %v9293_v6, %v3545_v10  ;;  %7068 = vrcp.f32 %v9322_v27  ;;  %v4382_v10 = vand.u32 2147483648, %v9302_v3  ;;  %v4427_v34 = vand.u32 2147483648, %v9322_v27 }
 0xa6a   : > { %v9316_v25 = vpop.eup %7058  ;;  %7070 = vrcp.f32 %v9327_v38  ;;  %vm9398_vm11 = vcmp.eq.f32.partialorder %v4380_v13, 8.507059e+37  ;;  %v6447_v50 = vmul.f32 -1.702, %v9390_v2  ;;  %vm4406_vm1 = vweird.f32 %v9318_v53 }
 0xa6b   : > { %v9320_v12 = vpop.eup %7060  ;;  %v4372_v41 = vmul.f32 %v9316_v25, %v9302_v3  ;;  %v3550_v58 = vsel %vm9357_vm7, %v9293_v6, %v3546_v30  ;;  %v4395_v6 = vand.u32 2147483647, %v9305_v60  ;;  %v3412_v30 = vmul.f32 %v3394_v61, %v7916_v37 }
 0xa6c   : > { %v7063_v31 = vpop.eup %7062  ;;  %v4387_v44 = vmul.f32 %v9320_v12, %v9305_v60  ;;  %v9383_v42 = vmul.f32 %v3550_v58, %v9197_v0  ;;  %vm4377_vm10 = vweird.f32 %v9316_v25  ;;  %v4412_v61 = vand.u32 2147483648, %v9318_v53 }
 0xa6d   : > { %v9330_v51 = vpop.eup %7064  ;;  %v9343_v57 = vadd.f32 1.0, %v7063_v31  ;;  %v4373_v45 = vsub.f32 1.0, %v4372_v41  ;;  %v4397_v31 = vand.u32 2147483648, %v9305_v60  ;;  %vm4392_vm12 = vweird.f32 %v9320_v12  ;;  %vm9434_vm0 = vmor %vm4376_vm8, %vm4377_vm10 }
 0xa6e   : > { %v3552_v22 = vmul.f32 %v9330_v51, %v9308_v9  ;;  %v4388_v36 = vsub.f32 1.0, %v4387_v44  ;;  %v9367_v43 = vpop.eup %7066  ;;  %vm9403_vm13 = vcmp.eq.f32.partialorder %v4395_v6, 8.507059e+37  ;;  %v9410_v21 = vadd.f32 1e-05, %v3412_v30  ;;  %vm9451_vm2 = vmor %vm4391_vm9, %vm4392_vm12 }
 0xa6f   : > { %7072 = vrcp.f32 %v9343_v57  ;;  %v9374_v39 = vpop.eup %7068  ;;  %v4374_v24 = vmul.f32 %v9316_v25, %v4373_v45  ;;  %v4402_v4 = vmul.f32 %v9367_v43, %v9318_v53  ;;  %vm3558_vm14 = vweird.f32 %v9330_v51 }
 0xa70   : > { %v3553_v41 = vmul.f32 %v9330_v51, %v3552_v22  ;;  %7074 = vpow2.f32 %v4191_v16  ;;  %v9380_v44 = vpop.eup %7070  ;;  %v4383_v22 = vor.u32 1.1754944e-38, %v4382_v10  ;;  %v4398_v16 = vor.u32 1.1754944e-38, %v4397_v31  ;;  %v3967_v10 = vpop.f32.mrf.mxu2  ;;  %vm9500_vm10 = vmor %vm3557_vm15, %vm3558_vm14 }
 0xa71   : > { %v4389_v40 = vmul.f32 %v9320_v12, %v4388_v36  ;;  %7076 = vpow2.f32 %v4193_v28  ;;  %v4417_v0 = vmul.f32 %v9374_v39, %v9322_v27  ;;  %v4410_v28 = vand.u32 2147483647, %v9318_v53 }
 0xa72   : > { %v3554_v45 = vmul.f32 0.5, %v3553_v41  ;;  %v4432_v26 = vmul.f32 %v9380_v44, %v9327_v38  ;;  %v4016_v41 = vpop.f32.mrf.mxu3  ;;  %v4375_v13 = vadd.f32 %v9316_v25, %v4374_v24  ;;  %v9417_v6 = vadd.f32 %v3918_v35, %v9255_v52 }
 0xa73   : > { %v4390_v63 = vadd.f32 %v9320_v12, %v4389_v40  ;;  %v4403_v47 = vsub.f32 1.0, %v4402_v4  ;;  %v9422_v30 = vadd.f32 %v3967_v10, %v9271_v32  ;;  %v9424_v56 = vor.u32 1.1754944e-38, %v4412_v61 }
 0xa74   : > { %v4418_v24 = vsub.f32 1.0, %v4417_v0  ;;  %v3555_v19 = vsub.f32 1.5, %v3554_v45  ;;  %v9428_v5 = vadd.f32 %v4016_v41, %v9273_v7  ;;  %v4433_v4 = vsub.f32 1.0, %v4432_v26 }
 0xa75   : > { %v9396_v31 = vpop.eup %7072  ;;  %7078 = vrsqrt.f32 %v9410_v21  ;;  %v4379_v0 = vsel %vm9434_vm0, %v9316_v25, %v4375_v13  ;;  %vm4407_vm3 = vweird.f32 %v9367_v43  ;;  %vm4421_vm4 = vweird.f32 %v9322_v27 }
 0xa76   : > { %v7075_v15 = vpop.eup %7074  ;;  %v4447_v40 = vmul.f32 %v9396_v31, %v9343_v57  ;;  %v6448_v45 = vmul.f32 -1.702, %v9417_v6  ;;  %v4394_v25 = vsel %vm9451_vm2, %v9320_v12, %v4390_v63  ;;  %v4404_v10 = vmul.f32 %v9367_v43, %v4403_v47 }
 0xa77   : > { %v7077_v55 = vpop.eup %7076  ;;  %v9441_v61 = vadd.f32 1.0, %v7075_v15  ;;  %v9457_v15 = vor.u32 1.1754944e-38, %v4427_v34  ;;  %vm4436_vm5 = vweird.f32 %v9327_v38  ;;  %v4195_v60 = vmul.f32 1.442695, %v6447_v50 }
 0xa78   : > { %v6449_v26 = vmul.f32 -1.702, %v9422_v30  ;;  %v3556_v41 = vmul.f32 %v9330_v51, %v3555_v19  ;;  %v9468_v35 = vadd.f32 1.0, %v7077_v55  ;;  %v6450_v34 = vmul.f32 -1.702, %v9428_v5 }
 0xa79   : > { %v4419_v48 = vmul.f32 %v9374_v39, %v4418_v24  ;;  %v4434_v3 = vmul.f32 %v9380_v44, %v4433_v4  ;;  %v4448_v63 = vsub.f32 1.0, %v4447_v40  ;;  %7080 = vrcp.f32 %v9441_v61 }
 0xa7a   : > { %v4384_v50 = vsel %vm9398_vm11, %v4383_v22, %v4379_v0  ;;  %v4399_v47 = vsel %vm9403_vm13, %v4398_v16, %v4394_v25  ;;  %v4442_v19 = vand.u32 2147483648, %v9327_v38  ;;  %v4197_v12 = vmul.f32 1.442695, %v6448_v45  ;;  %vm9515_vm11 = vmor %vm4406_vm1, %vm4407_vm3 }
 0xa7b   : > { %v9479_v55 = vpop.eup %7078  ;;  %v4405_v13 = vadd.f32 %v9367_v43, %v4404_v10  ;;  %vm9482_vm6 = vcmp.eq.f32.partialorder %v4410_v28, 8.507059e+37  ;;  %vm4422_vm7 = vweird.f32 %v9374_v39  ;;  %vm9487_vm8 = vcmp.eq.f32.partialorder %v4425_v11, 8.507059e+37  ;;  %v3871_v10 = vpop.f32.mrf.mxu0 }
 0xa7c   : > { %7082 = vpow2.f32 %v4195_v60  ;;  %v4199_v22 = vmul.f32 1.442695, %v6449_v26  ;;  %vm4437_vm9 = vweird.f32 %v9380_v44  ;;  %v4201_v16 = vmul.f32 1.442695, %v6450_v34  ;;  %vm9536_vm12 = vmor %vm4421_vm4, %vm4422_vm7 }
 0xa7d   : > { %7084 = vrcp.f32 %v9468_v35  ;;  %v3620_v36 = vmul.f32 %v9167_v33, %v9370_v17  ;;  %v4420_v58 = vadd.f32 %v9374_v39, %v4419_v48  ;;  %v4435_v28 = vadd.f32 %v9380_v44, %v4434_v3  ;;  %vm9545_vm13 = vmor %vm4436_vm5, %vm4437_vm9 }
 0xa7e   : > { %v4449_v40 = vmul.f32 %v9396_v31, %v4448_v63  ;;  %v3621_v0 = vmul.f32 %v9167_v33, %v9383_v42  ;;  %v9509_v45 = vmul.f32 %v4384_v50, %v9258_v62  ;;  %v3560_v9 = vsel %vm9500_vm10, %v9330_v51, %v3556_v41  ;;  %v3396_v33 = vpop.xlane.xlu2 %3395 }
 0xa7f   : > { %v3562_v17 = vmul.f32 %v9479_v55, %v9410_v21  ;;  %7086 = vpow2.f32 %v4197_v12  ;;  %v9524_v42 = vpop.eup %7080  ;;  %v9527_v62 = vmul.f32 %v4399_v47, %v9262_v59  ;;  %v4409_v53 = vsel %vm9515_vm11, %v9367_v43, %v4405_v13 }
 0xa80   : > { %12061 = vst [vmem:[#allocation29_spill] sm:$0xff] %v9509_v45  ;;  %v4455_v25 = vand.u32 2147483647, %v9343_v57  ;;  %7088 = vpow2.f32 %v4199_v22  ;;  %vm4452_vm14 = vweird.f32 %v9396_v31  ;;  %v3639_v27 = vadd.f32 %v9178_v18, %v3620_v36  ;;  %v6733_v45 = vld [vmem:[%s7556_s26 + $0xf0] sm:$0xff] }
 0xa81   : > { %12064 = vst [vmem:[#allocation30_spill] sm:$0xff] %v9527_v62  ;;  %7090 = vpow2.f32 %v4201_v16  ;;  %v3640_v43 = vadd.f32 %v9178_v18, %v3621_v0  ;;  %v4424_v26 = vsel %vm9536_vm12, %v9374_v39, %v4420_v58  ;;  %v4439_v41 = vsel %vm9545_vm13, %v9380_v44, %v4435_v28 }
 0xa82   : > { %v7083_v60 = vpop.eup %7082  ;;  %v4450_v13 = vadd.f32 %v9396_v31, %v4449_v40  ;;  %v3413_v34 = vmul.f32 %v3396_v33, %v7916_v37  ;;  %v4462_v63 = vmul.f32 %v9524_v42, %v9441_v61  ;;  %v3563_v18 = vmul.f32 %v9479_v55, %v3562_v17 }
 0xa83   : > { %v9560_v3 = vpop.eup %7084  ;;  %v9566_v50 = vadd.f32 %v3871_v10, %v9253_v29  ;;  %v3650_v47 = vpack.c.bf16 %v3640_v43, %v3639_v27  ;;  %v9569_v39 = vmul.f32 %v3560_v9, %v9206_v54  ;;  %v4443_v12 = vor.u32 1.1754944e-38, %v4442_v19 }
 0xa84   : > { %vm4451_vm15 = vweird.f32 %v9343_v57  ;;  %v4457_v44 = vand.u32 2147483648, %v9343_v57  ;;  %v4414_v16 = vsel %vm9482_vm6, %v9424_v56, %v4409_v53  ;;  %v4429_v36 = vsel %vm9487_vm8, %v9457_v15, %v4424_v26  ;;  %v3920_v57 = vpop.f32.mrf.mxu1 }
 0xa85   : > { %v7087_v22 = vpop.eup %7086  ;;  %v12069_v58 = vand.u32 2147483647, %v9327_v38  ;;  %vm9583_vm1 = vmor %vm4451_vm15, %vm4452_vm14  ;;  %v9587_v19 = vadd.f32 1.0, %v7083_v60  ;;  %3888 = vmatmul.bf16.gmra.mxu0 %v3650_v47  ;;  %3937 = vmatmul.bf16.gmra.mxu1 %v3650_v47  ;;  %vm9592_vm2 = vcmp.eq.f32.partialorder %v4455_v25, 8.507059e+37  ;;  %v4477_v4 = vmul.f32 %v9560_v3, %v9468_v35 }
 0xa86   : > { %v7089_v24 = vpop.eup %7088  ;;  %v4454_v15 = vsel %vm9583_vm1, %v9396_v31, %v4450_v13  ;;  %3986 = vmatmul.bf16.gmra.mxu2 %v3650_v47  ;;  %4035 = vmatmul.bf16.gmra.mxu3 %v3650_v47  ;;  %v4463_v28 = vsub.f32 1.0, %v4462_v63  ;;  %v3564_v40 = vmul.f32 0.5, %v3563_v18  ;;  %v9598_v0 = vadd.f32 1e-05, %v3413_v34  ;;  %v4018_v18 = vpop.f32.mrf.mxu3 }
 0xa87   : > { %vm4441_vm0 = vcmp.eq.f32.partialorder %v12069_v58, 8.507059e+37  ;;  %v7091_v11 = vpop.eup %7090  ;;  %v6451_v48 = vmul.f32 -1.702, %v9566_v50  ;;  %v9602_v9 = vmul.f32 %v4414_v16, %v9278_v49  ;;  %v4458_v31 = vor.u32 1.1754944e-38, %v4457_v44 }
 0xa88   : > { %v4444_v56 = vsel %vm4441_vm0, %v4443_v12, %v4439_v41  ;;  %v9604_v17 = vadd.f32 1.0, %v7087_v22  ;;  %v9607_v33 = vadd.f32 %v3920_v57, %v9255_v52  ;;  %v9610_v53 = vmul.f32 %v4429_v36, %v9281_v1  ;;  %v3969_v41 = vpop.f32.mrf.mxu2 }
 0xa89   : > { %12074 = vst [vmem:[#allocation31_spill] sm:$0xff] %v9602_v9  ;;  %vm3567_vm3 = vweird.f32 %v9410_v21  ;;  %7092 = vrcp.f32 %v9587_v19  ;;  %v9614_v51 = vadd.f32 1.0, %v7089_v24  ;;  %v9617_v25 = vmul.f32 %v4444_v56, %v9284_v8 }
 0xa8a   : > { %12075 = vst [vmem:[#allocation32_spill] sm:$0xff] %v9610_v53  ;;  %v4459_v49 = vsel %vm9592_vm2, %v4458_v31, %v4454_v15  ;;  %v4478_v10 = vsub.f32 1.0, %v4477_v4  ;;  %v9621_v59 = vadd.f32 1.0, %v7091_v11  ;;  %v4464_v27 = vmul.f32 %v9524_v42, %v4463_v28  ;;  %v3874_v4 = vpop.f32.mrf.mxu0  ;;  %v6725_v53 = vld [vmem:[%s7556_s26 + $0xb0] sm:$0xff] }
 0xa8b   : > { %12076 = vst [vmem:[#allocation33_spill] sm:$0xff] %v9617_v25  ;;  %v3565_v43 = vsub.f32 1.5, %v3564_v40  ;;  %7094 = vrsqrt.f32 %v9598_v0  ;;  %v4203_v1 = vmul.f32 1.442695, %v6451_v48  ;;  %v4470_v60 = vand.u32 2147483647, %v9441_v61 }
 0xa8c   : > { %v4472_v26 = vand.u32 2147483648, %v9441_v61  ;;  %7096 = vrcp.f32 %v9604_v17  ;;  %v6452_v8 = vmul.f32 -1.702, %v9607_v33  ;;  %v9630_v13 = vmul.f32 %v4459_v49, %v9291_v20 }
 0xa8d   : > { %vm4466_vm4 = vweird.f32 %v9441_v61  ;;  %v4485_v34 = vand.u32 2147483647, %v9468_v35  ;;  %7098 = vrcp.f32 %v9614_v51  ;;  %vm4467_vm5 = vweird.f32 %v9524_v42 }
 0xa8e   : > { %12077 = vst [vmem:[#allocation34_spill] sm:$0xff] %v9630_v13  ;;  %v4479_v63 = vmul.f32 %v9560_v3, %v4478_v10  ;;  %vm3568_vm6 = vweird.f32 %v9479_v55  ;;  %7100 = vrcp.f32 %v9621_v59  ;;  %v4465_v20 = vadd.f32 %v9524_v42, %v4464_v27  ;;  %vm9675_vm9 = vmor %vm4466_vm4, %vm4467_vm5 }
 0xa8f   : > { %v9639_v47 = vpop.eup %7092  ;;  %v3566_v12 = vmul.f32 %v9479_v55, %v3565_v43  ;;  %7102 = vpow2.f32 %v4203_v1  ;;  %v9644_v44 = vadd.f32 %v3969_v41, %v9271_v32  ;;  %vm9648_vm7 = vcmp.eq.f32.partialorder %v4470_v60, 8.507059e+37  ;;  %vm9661_vm8 = vmor %vm3567_vm3, %vm3568_vm6 }
 0xa90   : > { %v4473_v36 = vor.u32 1.1754944e-38, %v4472_v26  ;;  %v4205_v58 = vmul.f32 1.442695, %v6452_v8  ;;  %v4487_v24 = vand.u32 2147483648, %v9468_v35  ;;  %v4502_v15 = vand.u32 2147483648, %v9587_v19 }
 0xa91   : > { %v9652_v54 = vpop.eup %7094  ;;  %v9667_v38 = vadd.f32 %v4018_v18, %v9273_v7  ;;  %v4480_v21 = vadd.f32 %v9560_v3, %v4479_v63  ;;  %vm4481_vm10 = vweird.f32 %v9468_v35  ;;  %vm4482_vm11 = vweird.f32 %v9560_v3 }
 0xa92   : > { %v9669_v11 = vpop.eup %7096  ;;  %v4492_v40 = vmul.f32 %v9639_v47, %v9587_v19  ;;  %v4469_v31 = vsel %vm9675_vm9, %v9524_v42, %v4465_v20  ;;  %vm9689_vm12 = vcmp.eq.f32.partialorder %v4485_v34, 8.507059e+37  ;;  %v3570_v49 = vsel %vm9661_vm8, %v9479_v55, %v3566_v12  ;;  %vm9704_vm13 = vmor %vm4481_vm10, %vm4482_vm11  ;;  %v3923_v12 = vpop.f32.mrf.mxu1 }
 0xa93   : > { %v9684_v48 = vpop.eup %7098  ;;  %v6453_v35 = vmul.f32 -1.702, %v9644_v44  ;;  %v4500_v27 = vand.u32 2147483647, %v9587_v19  ;;  %v4517_v43 = vand.u32 2147483648, %v9604_v17  ;;  %7104 = vpow2.f32 %v4205_v58 }
 0xa94   : > { %v9697_v10 = vpop.eup %7100  ;;  %v9702_v1 = vadd.f32 %v3874_v4, %v9253_v29  ;;  %v4488_v26 = vor.u32 1.1754944e-38, %v4487_v24  ;;  %v9708_v8 = vor.u32 1.1754944e-38, %v4502_v15  ;;  %v4515_v55 = vand.u32 2147483647, %v9604_v17 }
 0xa95   : > { %v7103_v42 = vpop.eup %7102  ;;  %v6454_v41 = vmul.f32 -1.702, %v9667_v38  ;;  %v4474_v34 = vsel %vm9648_vm7, %v4473_v36, %v4469_v31  ;;  %v4484_v63 = vsel %vm9704_vm13, %v9560_v3, %v4480_v21  ;;  %v3604_v18 = vmul.f32 %v3570_v49, %v9215_v14 }
 0xa96   : > { %v4493_v20 = vsub.f32 1.0, %v4492_v40  ;;  %v4507_v58 = vmul.f32 %v9669_v11, %v9604_v17  ;;  %v4522_v24 = vmul.f32 %v9684_v48, %v9614_v51  ;;  %v3572_v56 = vmul.f32 %v9652_v54, %v9598_v0  ;;  %v3972_v40 = vpop.f32.mrf.mxu2 }
 0xa97   : > { %v4207_v15 = vmul.f32 1.442695, %v6453_v35  ;;  %vm4496_vm14 = vweird.f32 %v9587_v19  ;;  %v9725_v16 = vor.u32 1.1754944e-38, %v4517_v43  ;;  %v4537_v3 = vmul.f32 %v9697_v10, %v9621_v59 }
 0xa98   : > { %v9729_v14 = vadd.f32 1.0, %v7103_v42  ;;  %v6455_v36 = vmul.f32 -1.702, %v9702_v1  ;;  %v9733_v4 = vmul.f32 %v4474_v34, %v9314_v46  ;;  %vm4497_vm15 = vweird.f32 %v9639_v47 }
 0xa99   : > { %v4209_v28 = vmul.f32 1.442695, %v6454_v41  ;;  %v9737_v21 = vadd.f32 %v3923_v12, %v9255_v52  ;;  %v7105_v31 = vpop.eup %7104  ;;  %v4489_v49 = vsel %vm9689_vm12, %v4488_v26, %v4484_v63  ;;  %v4494_v35 = vmul.f32 %v9639_v47, %v4493_v20  ;;  %v4021_v20 = vpop.f32.mrf.mxu3  ;;  %vm9782_vm4 = vmor %vm4496_vm14, %vm4497_vm15 }
 0xa9a   : > { %12088 = vst [vmem:[#allocation35_spill] sm:$0xff] %v9733_v4  ;;  %v4530_v43 = vand.u32 2147483647, %v9614_v51  ;;  %v4532_v42 = vand.u32 2147483648, %v9614_v51  ;;  %v4508_v60 = vsub.f32 1.0, %v4507_v58  ;;  %v4523_v46 = vsub.f32 1.0, %v4522_v24 }
 0xa9b   : > { %v3573_v34 = vmul.f32 %v9652_v54, %v3572_v56  ;;  %7106 = vpow2.f32 %v4207_v15  ;;  %v4538_v41 = vsub.f32 1.0, %v4537_v3  ;;  %v4211_v12 = vmul.f32 1.442695, %v6455_v36  ;;  %v3876_v3 = vpop.f32.mrf.mxu0 }
 0xa9c   : > { %7108 = vrcp.f32 %v9729_v14  ;;  %v9747_v57 = vadd.f32 %v3972_v40, %v9271_v32  ;;  %vm4511_vm0 = vweird.f32 %v9604_v17  ;;  %v9752_v26 = vadd.f32 1.0, %v7105_v31 }
 0xa9d   : > { %7110 = vpow2.f32 %v4209_v28  ;;  %v6456_v63 = vmul.f32 -1.702, %v9737_v21  ;;  %v9756_v58 = vmul.f32 %v4489_v49, %v9325_v23  ;;  %v4495_v24 = vadd.f32 %v9639_v47, %v4494_v35  ;;  %v9770_v23 = vld [vmem:[%s7533_s2] ss:$0 sm:$0xff] }
 0xa9e   : > { %vm9759_vm1 = vcmp.eq.f32.partialorder %v4500_v27, 8.507059e+37  ;;  %vm4512_vm2 = vweird.f32 %v9669_v11  ;;  %vm4526_vm3 = vweird.f32 %v9614_v51  ;;  %v9765_v15 = vor.u32 1.1754944e-38, %v4532_v42 }
 0xa9f   : > { %12089 = vst [vmem:[#allocation36_spill] sm:$0xff] %v9756_v58  ;;  %v4509_v36 = vmul.f32 %v9669_v11, %v4508_v60  ;;  %v4524_v28 = vmul.f32 %v9684_v48, %v4523_v46  ;;  %v3574_v40 = vmul.f32 0.5, %v3573_v34  ;;  %v3623_v31 = vmul.f32 %v9770_v23, %v3604_v18  ;;  %vm9827_vm10 = vmor %vm4511_vm0, %vm4512_vm2 }
 0xaa0   : > { %v4539_v27 = vmul.f32 %v9697_v10, %v4538_v41  ;;  %7112 = vpow2.f32 %v4211_v12  ;;  %v6457_v49 = vmul.f32 -1.702, %v9747_v57  ;;  %v9776_v35 = vadd.f32 %v4021_v20, %v9273_v7  ;;  %v3925_v12 = vpop.f32.mrf.mxu1 }
 0xaa1   : > { %v7107_v42 = vpop.eup %7106  ;;  %7114 = vrcp.f32 %v9752_v26  ;;  %v4213_v18 = vmul.f32 1.442695, %v6456_v63  ;;  %v9788_v46 = vadd.f32 %v3876_v3, %v9253_v29  ;;  %v3622_v34 = vmul.f32 %v9770_v23, %v9569_v39 }
 0xaa2   : > { %v9792_v41 = vpop.eup %7108  ;;  %v4499_v19 = vsel %vm9782_vm4, %v9639_v47, %v4495_v24  ;;  %vm9799_vm5 = vcmp.eq.f32.partialorder %v4515_v55, 8.507059e+37  ;;  %vm4527_vm6 = vweird.f32 %v9684_v48  ;;  %vm4541_vm7 = vweird.f32 %v9621_v59  ;;  %v9814_v47 = vld [vmem:[%s7539_s17] ss:$0 sm:$0xff] }
 0xaa3   : > { %v4547_v63 = vand.u32 2147483648, %v9621_v59  ;;  %v7111_v20 = vpop.eup %7110  ;;  %v4510_v39 = vadd.f32 %v9669_v11, %v4509_v36  ;;  %v4525_v3 = vadd.f32 %v9684_v48, %v4524_v28  ;;  %vm9808_vm8 = vcmp.eq.f32.partialorder %v4530_v43, 8.507059e+37  ;;  %vm9846_vm12 = vmor %vm4526_vm3, %vm4527_vm6 }
 0xaa4   : > { %vm4542_vm9 = vweird.f32 %v9697_v10  ;;  %v3642_v55 = vadd.f32 %v9814_v47, %v3623_v31  ;;  %v4540_v24 = vadd.f32 %v9697_v10, %v4539_v27  ;;  %v3575_v61 = vsub.f32 1.5, %v3574_v40 }
 0xaa5   : > { %v4215_v22 = vmul.f32 1.442695, %v6457_v49  ;;  %v6458_v9 = vmul.f32 -1.702, %v9776_v35  ;;  %v9819_v4 = vadd.f32 1.0, %v7107_v42  ;;  %7116 = vpow2.f32 %v4213_v18  ;;  %vm9858_vm14 = vmor %vm4541_vm7, %vm4542_vm9 }
 0xaa6   : > { %v6459_v43 = vmul.f32 -1.702, %v9788_v46  ;;  %v3641_v36 = vadd.f32 %v9814_v47, %v3622_v34  ;;  %v7113_v28 = vpop.eup %7112  ;;  %v4545_v40 = vand.u32 2147483647, %v9621_v59  ;;  %vm3577_vm11 = vweird.f32 %v9598_v0  ;;  %v6717_v0 = vld [vmem:[%s7556_s26 + $0x70] sm:$0xff] }
 0xaa7   : > { %v4552_v27 = vmul.f32 %v9792_v41, %v9729_v14  ;;  %v9835_v49 = vadd.f32 1.0, %v7111_v20  ;;  %v9837_v42 = vpop.eup %7114  ;;  %v4504_v18 = vsel %vm9759_vm1, %v9708_v8, %v4499_v19  ;;  %v4548_v34 = vor.u32 1.1754944e-38, %v4547_v63 }
 0xaa8   : > { %vm3578_vm13 = vweird.f32 %v9652_v54  ;;  %v3651_v62 = vpack.c.bf16 %v3642_v55, %v3641_v36  ;;  %v4514_v20 = vsel %vm9827_vm10, %v9669_v11, %v4510_v39  ;;  %v3576_v51 = vmul.f32 %v9652_v54, %v3575_v61  ;;  %v6726_v55 = vld [vmem:[%s7556_s26 + $0xb8] sm:$0xff] }
 0xaa9   : > { %7118 = vpow2.f32 %v4215_v22  ;;  %v4217_v56 = vmul.f32 1.442695, %v6458_v9  ;;  %v4529_v19 = vsel %vm9846_vm12, %v9684_v48, %v4525_v3  ;;  %v4544_v11 = vsel %vm9858_vm14, %v9697_v10, %v4540_v24  ;;  %vm9872_vm15 = vmor %vm3577_vm11, %vm3578_vm13  ;;  %v6710_v24 = vld [vmem:[%s7556_s26 + $0x38] sm:$0xff]  ;;  %5785 = vmatpush.bf16.msra.mxu2 %v6726_v55 }
 0xaaa   : > { %7120 = vrcp.f32 %v9819_v4  ;;  %v4219_v63 = vmul.f32 1.442695, %v6459_v43  ;;  %3893 = vmatmul.bf16.gmra.mxu0 %v3651_v62  ;;  %3942 = vmatmul.bf16.gmra.mxu1 %v3651_v62  ;;  %v4553_v59 = vsub.f32 1.0, %v4552_v27  ;;  %v4567_v22 = vmul.f32 %v9837_v42, %v9752_v26  ;;  %v6734_v43 = vld [vmem:[%s7556_s26 + $0xf8] sm:$0xff] }
 0xaab   : > { %7122 = vrcp.f32 %v9835_v49  ;;  %v9879_v48 = vadd.f32 1.0, %v7113_v28  ;;  %3991 = vmatmul.bf16.gmra.mxu2 %v3651_v62  ;;  %4040 = vmatmul.bf16.gmra.mxu3 %v3651_v62  ;;  %v7117_v10 = vpop.eup %7116  ;;  %v9884_v61 = vmul.f32 %v4504_v18, %v9390_v2  ;;  %v4519_v39 = vsel %vm9799_vm5, %v9725_v16, %v4514_v20  ;;  %v6718_v2 = vld [vmem:[%s7556_s26 + $0x78] sm:$0xff] }
 0xaac   : > { %vm4546_vm0 = vcmp.eq.f32.partialorder %v4545_v40, 8.507059e+37  ;;  %v4534_v62 = vsel %vm9808_vm8, %v9765_v15, %v4529_v19  ;;  %v3580_v28 = vsel %vm9872_vm15, %v9652_v54, %v3576_v51  ;;  %7124 = vpow2.f32 %v4217_v56  ;;  %5687 = vmatpush.bf16.msra.mxu0 %v6710_v24  ;;  %5834 = vmatpush.bf16.msra.mxu3 %v6734_v43 }
 0xaad   : > { %v4549_v36 = vsel %vm4546_vm0, %v4548_v34, %v4544_v11  ;;  %v4560_v31 = vand.u32 2147483647, %v9729_v14  ;;  %v4562_v16 = vand.u32 2147483648, %v9729_v14  ;;  %7126 = vpow2.f32 %v4219_v63  ;;  %5736 = vmatpush.bf16.msra.mxu1 %v6718_v2  ;;  %5786 = vmatpush.bf16.msra.mxu2 %v6725_v53 }
 0xaae   : > { %v4554_v15 = vmul.f32 %v9792_v41, %v4553_v59  ;;  %v4568_v60 = vsub.f32 1.0, %v4567_v22  ;;  %7128 = vrcp.f32 %v9879_v48  ;;  %v9904_v18 = vadd.f32 1.0, %v7117_v10 }
 0xaaf   : > { %v7119_v27 = vpop.eup %7118  ;;  %v9909_v17 = vmul.f32 %v4519_v39, %v9417_v6  ;;  %v9912_v34 = vmul.f32 %v4534_v62, %v9422_v30  ;;  %v9922_v56 = vmul.f32 %v4549_v36, %v9428_v5  ;;  %vm4556_vm1 = vweird.f32 %v9729_v14  ;;  %v3974_v39 = vpop.f32.mrf.mxu2 }
 0xab0   : > { %v9906_v54 = vpop.eup %7120  ;;  %v4577_v19 = vand.u32 2147483648, %v9752_v26  ;;  %v9927_v6 = vadd.f32 %v3925_v12, %v9255_v52  ;;  %vm4557_vm2 = vweird.f32 %v9792_v41  ;;  %vm9930_vm3 = vcmp.eq.f32.partialorder %v4560_v31, 8.507059e+37  ;;  %5835 = vmatpush.bf16.msra.mxu3 %v6733_v45 }
 0xab1   : > { %v9919_v51 = vpop.eup %7122  ;;  %v4563_v11 = vor.u32 1.1754944e-38, %v4562_v16  ;;  %v4575_v63 = vand.u32 2147483647, %v9752_v26  ;;  %v4592_v9 = vand.u32 2147483648, %v9819_v4  ;;  %v4555_v59 = vadd.f32 %v9792_v41, %v4554_v15  ;;  %vm9956_vm6 = vmor %vm4556_vm1, %vm4557_vm2  ;;  %v4023_v15 = vpop.f32.mrf.mxu3  ;;  %5737 = vmatpush.bf16.msra.mxu1 %v6717_v0 }
 0xab2   : > { %v7125_v5 = vpop.eup %7124  ;;  %v4569_v22 = vmul.f32 %v9837_v42, %v4568_v60  ;;  %v4582_v10 = vmul.f32 %v9906_v54, %v9819_v4  ;;  %7130 = vrcp.f32 %v9904_v18  ;;  %vm4571_vm4 = vweird.f32 %v9752_v26 }
 0xab3   : > { %v4597_v55 = vmul.f32 %v9919_v51, %v9835_v49  ;;  %v9944_v24 = vadd.f32 1.0, %v7119_v27  ;;  %vm4572_vm5 = vweird.f32 %v9837_v42  ;;  %v4578_v62 = vor.u32 1.1754944e-38, %v4577_v19 }
 0xab4   : > { %v4590_v36 = vand.u32 2147483647, %v9819_v4  ;;  %vm9960_vm7 = vcmp.eq.f32.partialorder %v4575_v63, 8.507059e+37  ;;  %v9964_v16 = vor.u32 1.1754944e-38, %v4592_v9  ;;  %v4605_v12 = vand.u32 2147483647, %v9835_v49  ;;  %vm10000_vm9 = vmor %vm4571_vm4, %vm4572_vm5 }
 0xab5   : > { %v9969_v27 = vadd.f32 %v3974_v39, %v9271_v32  ;;  %v4559_v14 = vsel %vm9956_vm6, %v9792_v41, %v4555_v59  ;;  %v4570_v60 = vadd.f32 %v9837_v42, %v4569_v22  ;;  %v9975_v19 = vadd.f32 1.0, %v7125_v5  ;;  %v6709_v9 = vld [vmem:[%s7556_s26 + $0x30] sm:$0xff] }
 0xab6   : > { %v4598_v58 = vsub.f32 1.0, %v4597_v55  ;;  %vm4586_vm8 = vweird.f32 %v9819_v4  ;;  %v4620_v41 = vand.u32 2147483647, %v9879_v48  ;;  %v4622_v5 = vand.u32 2147483648, %v9879_v48  ;;  %5688 = vmatpush.bf16.msra.mxu0 %v6709_v9 }
 0xab7   : > { %v9992_v22 = vadd.f32 %v4023_v15, %v9273_v7  ;;  %vm4587_vm10 = vweird.f32 %v9906_v54  ;;  %vm4601_vm11 = vweird.f32 %v9835_v49  ;;  %v4564_v26 = vsel %vm9930_vm3, %v4563_v11, %v4559_v14 }
 0xab8   : > { %v3398_v3 = vpop.xlane.xlu0 %3397  ;;  %v4574_v15 = vsel %vm10000_vm9, %v9837_v42, %v4570_v60  ;;  %v10031_v14 = vmul.f32 %v4564_v26, %v9566_v50  ;;  %vm10037_vm12 = vcmp.eq.f32.partialorder %v4590_v36, 8.507059e+37  ;;  %vm4602_vm13 = vweird.f32 %v9919_v51  ;;  %vm10065_vm0 = vmor %vm4586_vm8, %vm4587_vm10 }
 0xab9   : > { %v3414_v40 = vmul.f32 %v3398_v3, %v7916_v37  ;;  %v12106_v37 = vld [vmem:[#allocation25_spill] sm:$0xff]  ;;  %v7127_v3 = vpop.eup %7126  ;;  %v6462_v42 = vmul.f32 -1.702, %v9992_v22  ;;  %vm4616_vm14 = vweird.f32 %v9879_v48  ;;  %vm10049_vm15 = vcmp.eq.f32.partialorder %v4605_v12, 8.507059e+37  ;;  %vm10077_vm2 = vmor %vm4601_vm11, %vm4602_vm13 }
 0xaba   : > { %v9915_v20 = vmul.f32 %v3580_v28, %v12106_v37  ;;  %v9947_v43 = vpop.eup %7128  ;;  %v6460_v28 = vmul.f32 -1.702, %v9927_v6  ;;  %v4583_v37 = vsub.f32 1.0, %v4582_v10  ;;  %v9983_v39 = vadd.f32 1.0, %v7127_v3  ;;  %12113 = vst [vmem:[#allocation25_spill] sm:$0xff] %v9992_v22 }
 0xabb   : > { %v9917_v8 = vadd.f32 1e-05, %v3414_v40  ;;  %v4607_v40 = vand.u32 2147483648, %v9835_v49  ;;  %v4612_v13 = vmul.f32 %v9947_v43, %v9879_v48  ;;  %v9986_v2 = vpop.eup %7130  ;;  %vm4617_vm1 = vweird.f32 %v9947_v43 }
 0xabc   : > { %v4221_v59 = vmul.f32 1.442695, %v6460_v28  ;;  %v6461_v28 = vmul.f32 -1.702, %v9969_v27  ;;  %v4584_v9 = vmul.f32 %v9906_v54, %v4583_v37  ;;  %v4627_v30 = vmul.f32 %v9986_v2, %v9904_v18  ;;  %vm10122_vm9 = vmor %vm4616_vm14, %vm4617_vm1 }
 0xabd   : > { %7132 = vrsqrt.f32 %v9917_v8  ;;  %v10006_v55 = vor.u32 1.1754944e-38, %v4607_v40  ;;  %v4599_v40 = vmul.f32 %v9919_v51, %v4598_v58  ;;  %v4613_v25 = vsub.f32 1.0, %v4612_v13 }
 0xabe   : > { %7134 = vrcp.f32 %v9944_v24  ;;  %v4223_v13 = vmul.f32 1.442695, %v6461_v28  ;;  %v4579_v37 = vsel %vm9960_vm7, %v4578_v62, %v4574_v15  ;;  %v4585_v3 = vadd.f32 %v9906_v54, %v4584_v9 }
 0xabf   : > { %7136 = vrcp.f32 %v9975_v19  ;;  %v4600_v28 = vadd.f32 %v9919_v51, %v4599_v40  ;;  %v4614_v62 = vmul.f32 %v9947_v43, %v4613_v25  ;;  %v4628_v15 = vsub.f32 1.0, %v4627_v30 }
 0xac0   : > { %7138 = vrcp.f32 %v9983_v39  ;;  %v10071_v30 = vmul.f32 %v4579_v37, %v9607_v33  ;;  %vm10081_vm3 = vcmp.eq.f32.partialorder %v4620_v41, 8.507059e+37  ;;  %vm4631_vm4 = vweird.f32 %v9904_v18 }
 0xac1   : > { %7140 = vpow2.f32 %v4221_v59  ;;  %v4635_v59 = vand.u32 2147483647, %v9904_v18  ;;  %v4589_v49 = vsel %vm10065_vm0, %v9906_v54, %v4585_v3  ;;  %v4615_v41 = vadd.f32 %v9947_v43, %v4614_v62 }
 0xac2   : > { %7142 = vpow2.f32 %v4223_v13  ;;  %v4652_v13 = vand.u32 2147483648, %v9944_v24  ;;  %v4629_v37 = vmul.f32 %v9986_v2, %v4628_v15  ;;  %vm3587_vm6 = vweird.f32 %v9917_v8 }
 0xac3   : > { %v9994_v10 = vpop.eup %7132  ;;  %vm4646_vm8 = vweird.f32 %v9944_v24  ;;  %v4594_v15 = vsel %vm10037_vm12, %v9964_v16, %v4589_v49  ;;  %vm4632_vm10 = vweird.f32 %v9986_v2  ;;  %vm10127_vm11 = vcmp.eq.f32.partialorder %v4635_v59, 8.507059e+37  ;;  %v6708_v59 = vld [vmem:[%s7556_s26 + $0x28] sm:$0xff] }
 0xac4   : > { %v3582_v53 = vmul.f32 %v9994_v10, %v9917_v8  ;;  %v10028_v11 = vpop.eup %7134  ;;  %vm3588_vm5 = vweird.f32 %v9994_v10  ;;  %v4619_v16 = vsel %vm10122_vm9, %v9947_v43, %v4615_v41  ;;  %v4630_v12 = vadd.f32 %v9986_v2, %v4629_v37  ;;  %v6724_v49 = vld [vmem:[%s7556_s26 + $0xa8] sm:$0xff]  ;;  %5689 = vmatpush.bf16.msra.mxu0 %v6708_v59  ;;  %vm10164_vm13 = vmor %vm4631_vm4, %vm4632_vm10 }
 0xac5   : > { %v10054_v26 = vpop.eup %7136  ;;  %vm10105_vm7 = vmor %vm3587_vm6, %vm3588_vm5  ;;  %vm4661_vm12 = vweird.f32 %v9975_v19  ;;  %v4665_v37 = vand.u32 2147483647, %v9975_v19  ;;  %5787 = vmatpush.bf16.msra.mxu2 %v6724_v49  ;;  %vm4647_vm14 = vweird.f32 %v10028_v11  ;;  %v4682_v59 = vand.u32 2147483648, %v9983_v39 }
 0xac6   : > { %v3583_v58 = vmul.f32 %v9994_v10, %v3582_v53  ;;  %v4637_v53 = vand.u32 2147483648, %v9904_v18  ;;  %v10059_v22 = vpop.eup %7138  ;;  %vm10205_vm0 = vmor %vm4646_vm8, %vm4647_vm14  ;;  %vm4662_vm1 = vweird.f32 %v10054_v26  ;;  %vm4676_vm5 = vweird.f32 %v9983_v39 }
 0xac7   : > { %v7141_v40 = vpop.eup %7140  ;;  %v4672_v54 = vmul.f32 %v10059_v22, %v9983_v39  ;;  %vm10238_vm4 = vmor %vm4661_vm12, %vm4662_vm1 }
 0xac8   : > { %v3584_v36 = vmul.f32 0.5, %v3583_v58  ;;  %v4604_v58 = vsel %vm10077_vm2, %v9919_v51, %v4600_v28  ;;  %v10103_v3 = vadd.f32 1.0, %v7141_v40  ;;  %v10109_v28 = vor.u32 1.1754944e-38, %v4637_v53  ;;  %v7143_v62 = vpop.eup %7142  ;;  %v6707_v51 = vld [vmem:[%s7556_s26 + $0x20] sm:$0xff] }
 0xac9   : > { %v4609_v48 = vsel %vm10049_vm15, %v10006_v55, %v4604_v58  ;;  %v10149_v55 = vmul.f32 %v4594_v15, %v9644_v44  ;;  %v10152_v43 = vadd.f32 1.0, %v7143_v62  ;;  %5690 = vmatpush.bf16.msra.mxu0 %v6707_v51  ;;  %vm10222_vm2 = vcmp.eq.f32.partialorder %v4665_v37, 8.507059e+37  ;;  %v6706_v51 = vld [vmem:[%s7556_s26 + $0x18] sm:$0xff] }
 0xaca   : > { %v3879_v63 = vpop.f32.mrf.mxu0  ;;  %v3928_v45 = vpop.f32.mrf.mxu1  ;;  %v3585_v25 = vsub.f32 1.5, %v3584_v36  ;;  %v10155_v58 = vmul.f32 %v4609_v48, %v9667_v38  ;;  %v6731_v48 = vld [vmem:[%s7556_s26 + $0xe0] sm:$0xff]  ;;  %vm4691_vm8 = vweird.f32 %v10103_v3 }
 0xacb   : > { %v10010_v0 = vadd.f32 %v3879_v63, %v9253_v29  ;;  %v10023_v63 = vor.u32 1.1754944e-38, %v4622_v5  ;;  %v10045_v50 = vadd.f32 %v3928_v45, %v9255_v52  ;;  %v4642_v45 = vmul.f32 %v10028_v11, %v9944_v24 }
 0xacc   : > { %v10132_v5 = vor.u32 1.1754944e-38, %v4652_v13  ;;  %v12134_v13 = vld [vmem:[#allocation26_spill] sm:$0xff] }
 0xacd   : > { %12116 = vst [vmem:[#allocation37_spill] sm:$0xff] %v10010_v0  ;;  %v6463_v60 = vmul.f32 -1.702, %v10010_v0  ;;  %v4225_v0 = vmul.f32 1.442695, %v6462_v42  ;;  %v4643_v36 = vsub.f32 1.0, %v4642_v45  ;;  %v4624_v41 = vsel %vm10081_vm3, %v10023_v63, %v4619_v16  ;;  %5691 = vmatpush.bf16.msra.mxu0 %v6706_v51 }
 0xace   : > { %12119 = vst [vmem:[#allocation38_spill] sm:$0xff] %v10045_v50  ;;  %v6464_v33 = vmul.f32 -1.702, %v10045_v50  ;;  %v4657_v50 = vmul.f32 %v10054_v26, %v9975_v19  ;;  %v4650_v45 = vand.u32 2147483647, %v9944_v24  ;;  %v4673_v42 = vsub.f32 1.0, %v4672_v54 }
 0xacf   : > { %v4227_v9 = vmul.f32 1.442695, %v6463_v60  ;;  %v3586_v60 = vmul.f32 %v9994_v10, %v3585_v25  ;;  %7144 = vpow2.f32 %v4225_v0  ;;  %v4644_v25 = vmul.f32 %v10028_v11, %v4643_v36 }
 0xad0   : > { %v4229_v0 = vmul.f32 1.442695, %v6464_v33  ;;  %v4658_v40 = vsub.f32 1.0, %v4657_v50  ;;  %v4667_v36 = vand.u32 2147483648, %v9975_v19  ;;  %v4634_v63 = vsel %vm10164_vm13, %v9986_v2, %v4630_v12  ;;  %v6723_v2 = vld [vmem:[%s7556_s26 + $0xa0] sm:$0xff] }
 0xad1   : > { %7146 = vpow2.f32 %v4227_v9  ;;  %v3590_v8 = vsel %vm10105_vm7, %v9994_v10, %v3586_v60  ;;  %v6716_v9 = vld [vmem:[%s7556_s26 + $0x68] sm:$0xff]  ;;  %v3977_v38 = vpop.f32.mrf.mxu2  ;;  %v4645_v4 = vadd.f32 %v10028_v11, %v4644_v25  ;;  %vm10175_vm15 = vcmp.eq.f32.partialorder %v4650_v45, 8.507059e+37  ;;  %v4026_v54 = vpop.f32.mrf.mxu3  ;;  %5788 = vmatpush.bf16.msra.mxu2 %v6723_v2  ;;  %v6730_v2 = vld [vmem:[%s7556_s26 + $0xd8] sm:$0xff] }
 0xad2   : > { %7148 = vrcp.f32 %v10103_v3  ;;  %v3606_v33 = vmul.f32 %v3590_v8, %v12134_v13  ;;  %v6732_v60 = vld [vmem:[%s7556_s26 + $0xe8] sm:$0xff]  ;;  %5738 = vmatpush.bf16.msra.mxu1 %v6716_v9  ;;  %v6715_v8 = vld [vmem:[%s7556_s26 + $0x60] sm:$0xff]  ;;  %v4659_v62 = vmul.f32 %v10054_v26, %v4658_v40  ;;  %v4674_v15 = vmul.f32 %v10059_v22, %v4673_v42  ;;  %v3881_v40 = vpop.f32.mrf.mxu0 }
 0xad3   : > { %7150 = vpow2.f32 %v4229_v0  ;;  %5836 = vmatpush.bf16.msra.mxu3 %v6732_v60  ;;  %v3624_v0 = vmul.f32 %v9770_v23, %v9915_v20  ;;  %v10191_v45 = vmul.f32 %v4624_v41, %v9702_v1  ;;  %v10197_v25 = vadd.f32 %v3977_v38, %v9271_v32 }
 0xad4   : > { %v3625_v16 = vmul.f32 %v9770_v23, %v3606_v33  ;;  %7152 = vrcp.f32 %v10152_v43  ;;  %v4680_v1 = vand.u32 2147483647, %v9983_v39  ;;  %v10212_v9 = vadd.f32 %v4026_v54, %v9273_v7 }
 0xad5   : > { %v7145_v31 = vpop.eup %7144  ;;  %v4639_v24 = vsel %vm10127_vm11, %v10109_v28, %v4634_v63  ;;  %v4649_v33 = vsel %vm10205_vm0, %v10028_v11, %v4645_v4  ;;  %v3643_v60 = vadd.f32 %v9814_v47, %v3624_v0  ;;  %vm4677_vm3 = vweird.f32 %v10059_v22  ;;  %v3930_v28 = vpop.f32.mrf.mxu1  ;;  %v6722_v0 = vld [vmem:[%s7556_s26 + $0x98] sm:$0xff] }
 0xad6   : > { %v10185_v53 = vadd.f32 1.0, %v7145_v31  ;;  %5739 = vmatpush.bf16.msra.mxu1 %v6715_v8  ;;  %v3644_v42 = vadd.f32 %v9814_v47, %v3625_v16  ;;  %v4660_v31 = vadd.f32 %v10054_v26, %v4659_v62  ;;  %v6465_v11 = vmul.f32 -1.702, %v10197_v25  ;;  %v6714_v8 = vld [vmem:[%s7556_s26 + $0x58] sm:$0xff]  ;;  %vm10268_vm7 = vmor %vm4676_vm5, %vm4677_vm3  ;;  %5789 = vmatpush.bf16.msra.mxu2 %v6722_v0 }
 0xad7   : > { %v7147_v50 = vpop.eup %7146  ;;  %5837 = vmatpush.bf16.msra.mxu3 %v6731_v48  ;;  %v10234_v10 = vadd.f32 %v3881_v40, %v9253_v29  ;;  %v4668_v44 = vor.u32 1.1754944e-38, %v4667_v36  ;;  %v6466_v63 = vmul.f32 -1.702, %v10212_v9  ;;  %v10250_v54 = vmul.f32 %v4639_v24, %v9737_v21 }
 0xad8   : > { %v10194_v12 = vadd.f32 1.0, %v7147_v50  ;;  %v10199_v20 = vpop.eup %7148  ;;  %v4675_v50 = vadd.f32 %v10059_v22, %v4674_v15  ;;  %7154 = vrcp.f32 %v10185_v53  ;;  %v3652_v47 = vpack.c.bf16 %v3644_v42, %v3643_v60 }
 0xad9   : > { %v7151_v13 = vpop.eup %7150  ;;  %v4687_v37 = vmul.f32 %v10199_v20, %v10103_v3  ;;  %12145 = vst [vmem:[#allocation26_spill] sm:$0xff] %v10250_v54  ;;  %vm10253_vm6 = vcmp.eq.f32.partialorder %v4680_v1, 8.507059e+37  ;;  %v10258_v36 = vadd.f32 %v3930_v28, %v9255_v52  ;;  %v4654_v62 = vsel %vm10175_vm15, %v10132_v5, %v4649_v33  ;;  %v3979_v15 = vpop.f32.mrf.mxu2 }
 0xada   : > { %7156 = vrcp.f32 %v10194_v12  ;;  %v10244_v38 = vadd.f32 1.0, %v7151_v13  ;;  %v10247_v4 = vpop.eup %7152  ;;  %3898 = vmatmul.bf16.gmra.mxu0 %v3652_v47  ;;  %3947 = vmatmul.bf16.gmra.mxu1 %v3652_v47  ;;  %v4683_v39 = vor.u32 1.1754944e-38, %v4682_v59  ;;  %v4664_v5 = vsel %vm10238_vm4, %v10054_v26, %v4660_v31  ;;  %v4028_v59 = vpop.f32.mrf.mxu3  ;;  %v12184_v31 = vld [vmem:[#allocation34_spill] sm:$0xff] }
 0xadb   : > { %3996 = vmatmul.bf16.gmra.mxu2 %v3652_v47  ;;  %4045 = vmatmul.bf16.gmra.mxu3 %v3652_v47  ;;  %v4679_v18 = vsel %vm10268_vm7, %v10059_v22, %v4675_v50  ;;  %v4231_v23 = vmul.f32 1.442695, %v6465_v11  ;;  %v6467_v1 = vmul.f32 -1.702, %v10234_v10  ;;  %v4688_v42 = vsub.f32 1.0, %v4687_v37 }
 0xadc   : > { %5740 = vmatpush.bf16.msra.mxu1 %v6714_v8  ;;  %v4702_v13 = vmul.f32 %v10247_v4, %v10152_v43  ;;  %7158 = vrcp.f32 %v10244_v38  ;;  %v4233_v24 = vmul.f32 1.442695, %v6466_v63  ;;  %5838 = vmatpush.bf16.msra.mxu3 %v6730_v2  ;;  %v10292_v22 = vmul.f32 %v4654_v62, %v9747_v57  ;;  %v3884_v2 = vpop.f32.mrf.mxu0 }
 0xadd   : > { %v6468_v33 = vmul.f32 -1.702, %v10258_v36  ;;  %v10296_v60 = vadd.f32 %v3979_v15, %v9271_v32  ;;  %v4669_v50 = vsel %vm10222_vm2, %v4668_v44, %v4664_v5  ;;  %v4695_v28 = vand.u32 2147483647, %v10103_v3 }
 0xade   : > { %v10284_v40 = vpop.eup %7154  ;;  %12150 = vst [vmem:[#allocation39_spill] sm:$0xff] %v10292_v22  ;;  %v4697_v11 = vand.u32 2147483648, %v10103_v3  ;;  %v10305_v47 = vadd.f32 %v4028_v59, %v9273_v7  ;;  %v4684_v57 = vsel %vm10253_vm6, %v4683_v39, %v4679_v18  ;;  %7160 = vpow2.f32 %v4231_v23 }
 0xadf   : > { %v4717_v41 = vmul.f32 %v10284_v40, %v10185_v53  ;;  %v4235_v37 = vmul.f32 1.442695, %v6467_v1  ;;  %v4689_v63 = vmul.f32 %v10199_v20, %v4688_v42  ;;  %v4703_v51 = vsub.f32 1.0, %v4702_v13 }
 0xae0   : > { %v10289_v26 = vpop.eup %7156  ;;  %7162 = vpow2.f32 %v4233_v24  ;;  %v10315_v44 = vmul.f32 %v4669_v50, %v9776_v35  ;;  %v4237_v8 = vmul.f32 1.442695, %v6468_v33  ;;  %v6469_v0 = vmul.f32 -1.702, %v10296_v60 }
 0xae1   : > { %v4732_v49 = vmul.f32 %v10289_v26, %v10194_v12  ;;  %vm10323_vm9 = vcmp.eq.f32.partialorder %v4695_v28, 8.507059e+37  ;;  %v4698_v39 = vor.u32 1.1754944e-38, %v4697_v11  ;;  %v6470_v15 = vmul.f32 -1.702, %v10305_v47 }
 0xae2   : > { %12151 = vst [vmem:[#allocation40_spill] sm:$0xff] %v10315_v44  ;;  %v10320_v62 = vpop.eup %7158  ;;  %v10329_v35 = vmul.f32 %v4684_v57, %v9788_v46  ;;  %vm4692_vm10 = vweird.f32 %v10199_v20  ;;  %v4718_v5 = vsub.f32 1.0, %v4717_v41  ;;  %7164 = vpow2.f32 %v4235_v37 }
 0xae3   : > { %v4690_v18 = vadd.f32 %v10199_v20, %v4689_v63  ;;  %v4704_v23 = vmul.f32 %v10247_v4, %v4703_v51  ;;  %vm4706_vm11 = vweird.f32 %v10152_v43  ;;  %v4733_v1 = vsub.f32 1.0, %v4732_v49  ;;  %vm10347_vm13 = vmor %vm4691_vm8, %vm4692_vm10 }
 0xae4   : > { %v7161_v59 = vpop.eup %7160  ;;  %v4747_v42 = vmul.f32 %v10320_v62, %v10244_v38  ;;  %7166 = vpow2.f32 %v4237_v8  ;;  %v4239_v13 = vmul.f32 1.442695, %v6469_v0  ;;  %v10338_v46 = vadd.f32 %v3884_v2, %v9253_v29 }
 0xae5   : > { %v4710_v33 = vand.u32 2147483647, %v10152_v43  ;;  %v4712_v50 = vand.u32 2147483648, %v10152_v43  ;;  %vm4721_vm12 = vweird.f32 %v10185_v53  ;;  %v4241_v28 = vmul.f32 1.442695, %v6470_v15 }
 0xae6   : > { %12154 = vst [vmem:[#allocation41_spill] sm:$0xff] %v10338_v46  ;;  %v7163_v24 = vpop.eup %7162  ;;  %vm4707_vm14 = vweird.f32 %v10247_v4  ;;  %v4719_v57 = vmul.f32 %v10284_v40, %v4718_v5  ;;  %v4725_v41 = vand.u32 2147483647, %v10185_v53  ;;  %v4727_v37 = vand.u32 2147483648, %v10185_v53 }
 0xae7   : > { %v4694_v63 = vsel %vm10347_vm13, %v10199_v20, %v4690_v18  ;;  %v4705_v51 = vadd.f32 %v10247_v4, %v4704_v23  ;;  %v4734_v3 = vmul.f32 %v10289_v26, %v4733_v1  ;;  %v10360_v49 = vadd.f32 1.0, %v7161_v59  ;;  %v3933_v18 = vpop.f32.mrf.mxu1  ;;  %vm10376_vm1 = vmor %vm4706_vm11, %vm4707_vm14 }
 0xae8   : > { %v7165_v8 = vpop.eup %7164  ;;  %v4748_v0 = vsub.f32 1.0, %v4747_v42  ;;  %v10362_v15 = vadd.f32 1.0, %v7163_v24  ;;  %7168 = vpow2.f32 %v4239_v13  ;;  %v6471_v2 = vmul.f32 -1.702, %v10338_v46  ;;  %v6705_v24 = vld [vmem:[%s7556_s26 + $0x10] sm:$0xff] }
 0xae9   : > { %vm10365_vm15 = vcmp.eq.f32.partialorder %v4710_v33, 8.507059e+37  ;;  %v4713_v20 = vor.u32 1.1754944e-38, %v4712_v50  ;;  %vm4722_vm0 = vweird.f32 %v10284_v40  ;;  %7170 = vpow2.f32 %v4241_v28  ;;  %v6713_v33 = vld [vmem:[%s7556_s26 + $0x50] sm:$0xff]  ;;  %5692 = vmatpush.bf16.msra.mxu0 %v6705_v24 }
 0xaea   : > { %v7167_v23 = vpop.eup %7166  ;;  %v4699_v1 = vsel %vm10323_vm9, %v4698_v39, %v4694_v63  ;;  %v4720_v42 = vadd.f32 %v10284_v40, %v4719_v57  ;;  %vm4737_vm2 = vweird.f32 %v10289_v26  ;;  %v4740_v13 = vand.u32 2147483647, %v10194_v12  ;;  %v6721_v57 = vld [vmem:[%s7556_s26 + $0x90] sm:$0xff]  ;;  %5741 = vmatpush.bf16.msra.mxu1 %v6713_v33  ;;  %vm10413_vm4 = vmor %vm4721_vm12, %vm4722_vm0 }
 0xaeb   : > { %v4709_v21 = vsel %vm10376_vm1, %v10247_v4, %v4705_v51  ;;  %v4735_v39 = vadd.f32 %v10289_v26, %v4734_v3  ;;  %7172 = vrcp.f32 %v10360_v49  ;;  %v10388_v43 = vadd.f32 1.0, %v7165_v8  ;;  %v6729_v63 = vld [vmem:[%s7556_s26 + $0xd0] sm:$0xff]  ;;  %5790 = vmatpush.bf16.msra.mxu2 %v6721_v57 }
 0xaec   : > { %v4749_v50 = vmul.f32 %v10320_v62, %v4748_v0  ;;  %7174 = vrcp.f32 %v10362_v15  ;;  %v4243_v28 = vmul.f32 1.442695, %v6471_v2  ;;  %v10395_v11 = vadd.f32 %v3933_v18, %v9255_v52  ;;  %5839 = vmatpush.bf16.msra.mxu3 %v6729_v63  ;;  %v6728_v63 = vld [vmem:[%s7556_s26 + $0xc8] sm:$0xff] }
 0xaed   : > { %vm10399_vm3 = vcmp.eq.f32.partialorder %v4725_v41, 8.507059e+37  ;;  %v4728_v51 = vor.u32 1.1754944e-38, %v4727_v37  ;;  %v4742_v3 = vand.u32 2147483648, %v10194_v12  ;;  %v10404_v8 = vadd.f32 1.0, %v7167_v23  ;;  %v3982_v23 = vpop.f32.mrf.mxu2 }
 0xaee   : > { %12161 = vst [vmem:[#allocation42_spill] sm:$0xff] %v10395_v11  ;;  %v7169_v0 = vpop.eup %7168  ;;  %v10407_v59 = vmul.f32 %v4699_v1, %v9927_v6  ;;  %vm4736_vm5 = vweird.f32 %v10194_v12  ;;  %vm10418_vm6 = vcmp.eq.f32.partialorder %v4740_v13, 8.507059e+37  ;;  %v4755_v2 = vand.u32 2147483647, %v10244_v38  ;;  %v6704_v1 = vld [vmem:[%s7556_s26 + $0x8] sm:$0xff]  ;;  %v6711_v12 = vld [vmem:[%s7556_s26 + $0x40] sm:$0xff] }
 0xaef   : > { %v7171_v6 = vpop.eup %7170  ;;  %v4714_v53 = vsel %vm10365_vm15, %v4713_v20, %v4709_v21  ;;  %v4724_v18 = vsel %vm10413_vm4, %v10284_v40, %v4720_v42  ;;  %vm10430_vm7 = vmor %vm4736_vm5, %vm4737_vm2  ;;  %vm4752_vm8 = vweird.f32 %v10320_v62  ;;  %7176 = vrcp.f32 %v10388_v43  ;;  %v6712_v42 = vld [vmem:[%s7556_s26 + $0x48] sm:$0xff]  ;;  %5693 = vmatpush.bf16.msra.mxu0 %v6704_v1  ;;  %v12176_v1 = vld [vmem:[#allocation25_spill] sm:$0xff]  ;;  %v3935_v19 = vpop.f32.mrf.mxu1 }
 0xaf0   : > { %v4739_v5 = vsel %vm10430_vm7, %v10289_v26, %v4735_v39  ;;  %v4750_v20 = vadd.f32 %v10320_v62, %v4749_v50  ;;  %7178 = vpow2.f32 %v4243_v28  ;;  %v6472_v40 = vmul.f32 -1.702, %v10395_v11  ;;  %v6720_v13 = vld [vmem:[%s7556_s26 + $0x88] sm:$0xff]  ;;  %5742 = vmatpush.bf16.msra.mxu1 %v6712_v42  ;;  %5840 = vmatpush.bf16.msra.mxu3 %v6728_v63 }
 0xaf1   : > { %v10444_v21 = vpop.eup %7172  ;;  %v4743_v24 = vor.u32 1.1754944e-38, %v4742_v3  ;;  %v4757_v33 = vand.u32 2147483648, %v10244_v38  ;;  %7180 = vrcp.f32 %v10404_v8  ;;  %v10448_v57 = vadd.f32 1.0, %v7169_v0  ;;  %5791 = vmatpush.bf16.msra.mxu2 %v6720_v13 }
 0xaf2   : > { %v10451_v41 = vpop.eup %7174  ;;  %v4729_v26 = vsel %vm10399_vm3, %v4728_v51, %v4724_v18  ;;  %vm4751_vm9 = vweird.f32 %v10244_v38  ;;  %v10456_v39 = vadd.f32 1.0, %v7171_v6  ;;  %v10459_v50 = vadd.f32 %v3982_v23, %v9271_v32  ;;  %v6703_v18 = vld [vmem:[%s7556_s26] sm:$0xff] }
 0xaf3   : > { %v10462_v28 = vmul.f32 %v4714_v53, %v9969_v27  ;;  %v4744_v3 = vsel %vm10418_vm6, %v4743_v24, %v4739_v5  ;;  %vm10468_vm10 = vmor %vm4751_vm9, %vm4752_vm8  ;;  %v4772_v4 = vand.u32 2147483648, %v10360_v49  ;;  %vm10478_vm11 = vcmp.eq.f32.partialorder %v4755_v2, 8.507059e+37  ;;  %v4031_v53 = vpop.f32.mrf.mxu3  ;;  %v6719_v23 = vld [vmem:[%s7556_s26 + $0x80] sm:$0xff]  ;;  %5694 = vmatpush.bf16.msra.mxu0 %v6703_v18 }
 0xaf4   : > { %12170 = vst [vmem:[#allocation43_spill] sm:$0xff] %v10459_v50  ;;  %v4754_v27 = vsel %vm10468_vm10, %v10320_v62, %v4750_v20  ;;  %v4762_v37 = vmul.f32 %v10444_v21, %v10360_v49  ;;  %v4245_v6 = vmul.f32 1.442695, %v6472_v40  ;;  %v10490_v42 = vmul.f32 %v4729_v26, %v12176_v1  ;;  %v6727_v2 = vld [vmem:[%s7556_s26 + $0xc0] sm:$0xff]  ;;  %5743 = vmatpush.bf16.msra.mxu1 %v6711_v12 }
 0xaf5   : > { %12171 = vst [vmem:[#allocation44_spill] sm:$0xff] %v10462_v28  ;;  %v10487_v5 = vpop.eup %7176  ;;  %v4758_v13 = vor.u32 1.1754944e-38, %v4757_v33  ;;  %v4777_v62 = vmul.f32 %v10451_v41, %v10362_v15  ;;  %7182 = vrcp.f32 %v10448_v57  ;;  %v12178_v24 = vld [vmem:[#allocation37_spill] sm:$0xff]  ;;  %v6473_v40 = vmul.f32 -1.702, %v10459_v50  ;;  %5792 = vmatpush.bf16.msra.mxu2 %v6719_v23  ;;  %5841 = vmatpush.bf16.msra.mxu3 %v6727_v2 }
 0xaf6   : > { %12177 = vst [vmem:[#allocation25_spill] sm:$0xff] %v10490_v42  ;;  %v7179_v20 = vpop.eup %7178  ;;  %v10497_v63 = vmul.f32 %v4744_v3, %v12178_v24  ;;  %7184 = vrcp.f32 %v10456_v39  ;;  %v4770_v1 = vand.u32 2147483647, %v10360_v49  ;;  %v10508_v51 = vor.u32 1.1754944e-38, %v4772_v4  ;;  %v3886_v3 = vpop.f32.mrf.mxu0  ;;  %v12182_v23 = vld [vmem:[#allocation29_spill] sm:$0xff]  ;;  %v12185_v24 = vld [vmem:[#allocation30_spill] sm:$0xff] }
 0xaf7   : > { %v10503_v33 = vpop.eup %7180  ;;  %v4759_v38 = vsel %vm10478_vm11, %v4758_v13, %v4754_v27  ;;  %v4763_v18 = vsub.f32 1.0, %v4762_v37  ;;  %v4787_v12 = vand.u32 2147483648, %v10362_v15  ;;  %7186 = vpow2.f32 %v4245_v6  ;;  %v12181_v13 = vld [vmem:[#allocation33_spill] sm:$0xff]  ;;  %v3984_v6 = vpop.f32.mrf.mxu2 }
 0xaf8   : > { %12179 = vst [vmem:[#allocation37_spill] sm:$0xff] %v10497_v63  ;;  %v10514_v26 = vadd.f32 %v4031_v53, %v9273_v7  ;;  %v4778_v0 = vsub.f32 1.0, %v4777_v62  ;;  %v4792_v27 = vmul.f32 %v10487_v5, %v10388_v43  ;;  %v10518_v4 = vadd.f32 1.0, %v7179_v20  ;;  %v12187_v53 = vld [vmem:[#allocation38_spill] sm:$0xff] }
 0xaf9   : > { %v12183_v2 = vpack.c.bf16 %v12181_v13, %v12182_v23  ;;  %v12186_v37 = vpack.c.bf16 %v12184_v31, %v12185_v24  ;;  %v10529_v16 = vmul.f32 %v4759_v38, %v12187_v53  ;;  %vm4766_vm12 = vweird.f32 %v10360_v49  ;;  %v12190_v13 = vld [vmem:[#allocation35_spill] sm:$0xff]  ;;  %v12193_v31 = vld [vmem:[#allocation36_spill] sm:$0xff] }
 0xafa   : > { %12180 = vst [vmem:[#allocation45_spill] sm:$0xff] %v10514_v26  ;;  %v4807_v62 = vmul.f32 %v10503_v33, %v10404_v8  ;;  %v4247_v20 = vmul.f32 1.442695, %v6473_v40  ;;  %v10535_v48 = vadd.f32 %v3886_v3, %v9253_v29  ;;  %v12191_v23 = vld [vmem:[#allocation31_spill] sm:$0xff]  ;;  %v12194_v24 = vld [vmem:[#allocation32_spill] sm:$0xff]  ;;  %vm4767_vm13 = vweird.f32 %v10444_v21 }
 0xafb   : > { %5695 = vmatmul.bf16.vlgmr.msra.gmra.mxu0 %v12183_v2  ;;  %5744 = vmatmul.bf16.vlgmr.msra.gmra.mxu1 %v12186_v37  ;;  %12188 = vst [vmem:[#allocation33_spill] sm:$0xff] %v10529_v16  ;;  %v12192_v2 = vpack.c.bf16 %v12190_v13, %v12191_v23  ;;  %v12195_v37 = vpack.c.bf16 %v12193_v31, %v12194_v24  ;;  %v10543_v38 = vpop.eup %7182  ;;  %v4785_v53 = vand.u32 2147483647, %v10362_v15  ;;  %v4802_v40 = vand.u32 2147483648, %v10388_v43  ;;  %v4033_v11 = vpop.f32.mrf.mxu3  ;;  %vm10600_vm3 = vmor %vm4766_vm12, %vm4767_vm13 }
 0xafc   : > { %12189 = vst [vmem:[#allocation29_spill] sm:$0xff] %v10535_v48  ;;  %v10549_v3 = vadd.f32 %v3935_v19, %v9255_v52  ;;  %v10551_v16 = vpop.eup %7184  ;;  %v4764_v13 = vmul.f32 %v10444_v21, %v4763_v18  ;;  %vm4781_vm14 = vweird.f32 %v10362_v15  ;;  %v10555_v23 = vor.u32 1.1754944e-38, %v4787_v12 }
 0xafd   : > { %5793 = vmatmul.bf16.vlgmr.msra.gmra.mxu2 %v12192_v2  ;;  %5842 = vmatmul.bf16.vlgmr.msra.gmra.mxu3 %v12195_v37  ;;  %v4800_v2 = vand.u32 2147483647, %v10388_v43  ;;  %v6474_v31 = vmul.f32 -1.702, %v10514_v26  ;;  %v4779_v24 = vmul.f32 %v10451_v41, %v4778_v0  ;;  %v4793_v37 = vsub.f32 1.0, %v4792_v27  ;;  %v7187_v63 = vpop.eup %7186 }
 0xafe   : > { %12196 = vst [vmem:[#allocation34_spill] sm:$0xff] %v10549_v3  ;;  %7188 = vrcp.f32 %v10518_v4  ;;  %v10562_v19 = vadd.f32 %v3984_v6, %v9271_v32  ;;  %v4808_v50 = vsub.f32 1.0, %v4807_v62  ;;  %v4822_v18 = vmul.f32 %v10543_v38, %v10448_v57 }
 0xaff   : > { %7190 = vpow2.f32 %v4247_v20  ;;  %v6475_v12 = vmul.f32 -1.702, %v10535_v48  ;;  %vm10567_vm15 = vcmp.eq.f32.partialorder %v4770_v1, 8.507059e+37  ;;  %vm4796_vm0 = vweird.f32 %v10388_v43 }
 0xb00   : > { %v10572_v0 = vor.u32 1.1754944e-38, %v4802_v40  ;;  %v4817_v27 = vand.u32 2147483648, %v10404_v8  ;;  %v4837_v6 = vmul.f32 %v10551_v16, %v10456_v39  ;;  %v6476_v62 = vmul.f32 -1.702, %v10549_v3 }
 0xb01   : > { %v4765_v20 = vadd.f32 %v10444_v21, %v4764_v13  ;;  %vm4782_vm1 = vweird.f32 %v10451_v41  ;;  %v4815_v1 = vand.u32 2147483647, %v10404_v8  ;;  %v4249_v48 = vmul.f32 1.442695, %v6474_v31 }
 0xb02   : > { %vm10581_vm2 = vcmp.eq.f32.partialorder %v4785_v53, 8.507059e+37  ;;  %v4794_v40 = vmul.f32 %v10487_v5, %v4793_v37  ;;  %v10586_v44 = vadd.f32 1.0, %v7187_v63  ;;  %v6477_v42 = vmul.f32 -1.702, %v10562_v19  ;;  %vm10622_vm9 = vmor %vm4781_vm14, %vm4782_vm1 }
 0xb03   : > { %v10590_v22 = vadd.f32 %v4033_v11, %v9273_v7  ;;  %v4780_v13 = vadd.f32 %v10451_v41, %v4779_v24  ;;  %v4809_v3 = vmul.f32 %v10503_v33, %v4808_v50  ;;  %v4823_v28 = vsub.f32 1.0, %v4822_v18  ;;  %v3889_v18 = vpop.f32.mrf.mxu0 }
 0xb04   : > { %v4251_v54 = vmul.f32 1.442695, %v6475_v12  ;;  %v10594_v31 = vpop.eup %7188  ;;  %vm4811_vm4 = vweird.f32 %v10404_v8  ;;  %v4818_v11 = vor.u32 1.1754944e-38, %v4817_v27  ;;  %v4838_v53 = vsub.f32 1.0, %v4837_v6 }
 0xb05   : > { %v4253_v37 = vmul.f32 1.442695, %v6476_v62  ;;  %v7191_v24 = vpop.eup %7190  ;;  %v4769_v50 = vsel %vm10600_vm3, %v10444_v21, %v4765_v20  ;;  %vm4797_vm5 = vweird.f32 %v10487_v5  ;;  %vm10609_vm6 = vcmp.eq.f32.partialorder %v4800_v2, 8.507059e+37 }
 0xb06   : > { %vm4812_vm7 = vweird.f32 %v10503_v33  ;;  %vm10614_vm8 = vcmp.eq.f32.partialorder %v4815_v1, 8.507059e+37  ;;  %7192 = vpow2.f32 %v4249_v48  ;;  %v4795_v21 = vadd.f32 %v10487_v5, %v4794_v40  ;;  %vm10646_vm10 = vmor %vm4796_vm0, %vm4797_vm5 }
 0xb07   : > { %7194 = vrcp.f32 %v10586_v44  ;;  %v4255_v2 = vmul.f32 1.442695, %v6477_v42  ;;  %v6478_v27 = vmul.f32 -1.702, %v10590_v22  ;;  %v4784_v6 = vsel %vm10622_vm9, %v10451_v41, %v4780_v13  ;;  %vm10657_vm11 = vmor %vm4811_vm4, %vm4812_vm7 }
 0xb08   : > { %v4810_v48 = vadd.f32 %v10503_v33, %v4809_v3  ;;  %v4824_v62 = vmul.f32 %v10543_v38, %v4823_v28  ;;  %7196 = vpow2.f32 %v4251_v54  ;;  %v4839_v15 = vmul.f32 %v10551_v16, %v4838_v53 }
 0xb09   : > { %v4852_v20 = vmul.f32 %v10594_v31, %v10518_v4  ;;  %v10637_v1 = vadd.f32 1.0, %v7191_v24  ;;  %7198 = vpow2.f32 %v4253_v37  ;;  %v4774_v42 = vsel %vm10567_vm15, %v10508_v51, %v4769_v50 }
 0xb0a   : > { %v4830_v54 = vand.u32 2147483647, %v10448_v57  ;;  %v4832_v28 = vand.u32 2147483648, %v10448_v57  ;;  %v4845_v3 = vand.u32 2147483647, %v10456_v39  ;;  %vm4827_vm12 = vweird.f32 %v10543_v38 }
 0xb0b   : > { %v4847_v43 = vand.u32 2147483648, %v10456_v39  ;;  %7200 = vpow2.f32 %v4255_v2  ;;  %v4257_v51 = vmul.f32 1.442695, %v6478_v27  ;;  %v12213_v40 = vpack.c.bf16 %v10031_v14, %v9884_v61 }
 0xb0c   : > { %v12214_v13 = vpack.c.bf16 %v10071_v30, %v9909_v17  ;;  %v7193_v63 = vpop.eup %7192  ;;  %v4789_v8 = vsel %vm10581_vm2, %v10555_v23, %v4784_v6  ;;  %v4799_v53 = vsel %vm10646_vm10, %v10487_v5, %v4795_v21  ;;  %v4814_v37 = vsel %vm10657_vm11, %v10503_v33, %v4810_v48 }
 0xb0d   : > { %5700 = vmatmul.bf16.gmra.mxu0 %v12213_v40  ;;  %vm4842_vm13 = vweird.f32 %v10551_v16  ;;  %v12215_v61 = vpack.c.bf16 %v10149_v55, %v9912_v34  ;;  %v10682_v17 = vpop.eup %7194  ;;  %v4825_v14 = vadd.f32 %v10543_v38, %v4824_v62  ;;  %v4840_v30 = vadd.f32 %v10551_v16, %v4839_v15 }
 0xb0e   : > { %5749 = vmatmul.bf16.gmra.mxu1 %v12214_v13  ;;  %v4853_v26 = vsub.f32 1.0, %v4852_v20  ;;  %7202 = vrcp.f32 %v10637_v1  ;;  %v12216_v5 = vpack.c.bf16 %v10155_v58, %v9922_v56  ;;  %v7197_v33 = vpop.eup %7196  ;;  %v10691_v23 = vmul.f32 %v4774_v42, %v10197_v25  ;;  %v3987_v20 = vpop.f32.mrf.mxu2 }
 0xb0f   : > { %5798 = vmatmul.bf16.gmra.mxu2 %v12215_v61  ;;  %vm4826_vm14 = vweird.f32 %v10448_v57  ;;  %vm10694_vm15 = vcmp.eq.f32.partialorder %v4830_v54, 8.507059e+37  ;;  %vm4841_vm0 = vweird.f32 %v10456_v39  ;;  %v7199_v55 = vpop.eup %7198  ;;  %v4804_v24 = vsel %vm10609_vm6, %v10572_v0, %v4799_v53 }
 0xb10   : > { %5847 = vmatmul.bf16.gmra.mxu3 %v12216_v5  ;;  %v4819_v56 = vsel %vm10614_vm8, %v4818_v11, %v4814_v37  ;;  %vm10706_vm1 = vmor %vm4826_vm14, %vm4827_vm12  ;;  %v10710_v25 = vadd.f32 1.0, %v7193_v63  ;;  %7204 = vpow2.f32 %v4257_v51  ;;  %v10713_v57 = vmul.f32 %v4789_v8, %v10212_v9  ;;  %v4036_v37 = vpop.f32.mrf.mxu3 }
 0xb11   : > { %v4833_v39 = vor.u32 1.1754944e-38, %v4832_v28  ;;  %vm10717_vm2 = vmor %vm4841_vm0, %vm4842_vm13  ;;  %vm10721_vm3 = vcmp.eq.f32.partialorder %v4845_v3, 8.507059e+37  ;;  %v4848_v50 = vor.u32 1.1754944e-38, %v4847_v43  ;;  %v7201_v49 = vpop.eup %7200  ;;  %v4829_v12 = vsel %vm10706_vm1, %v10543_v38, %v4825_v14  ;;  %v3938_v38 = vpop.f32.mrf.mxu1 }
 0xb12   : > { %v4844_v9 = vsel %vm10717_vm2, %v10551_v16, %v4840_v30  ;;  %v4854_v21 = vmul.f32 %v10594_v31, %v4853_v26  ;;  %v10732_v2 = vadd.f32 1.0, %v7197_v33  ;;  %v10735_v27 = vmul.f32 %v4804_v24, %v10234_v10 }
 0xb13   : > { %v10738_v6 = vmul.f32 %v4819_v56, %v10258_v36  ;;  %v4867_v48 = vmul.f32 %v10682_v17, %v10586_v44  ;;  %v10742_v62 = vadd.f32 1.0, %v7199_v55  ;;  %vm4856_vm4 = vweird.f32 %v10518_v4 }
 0xb14   : > { %v10744_v15 = vpop.eup %7202  ;;  %v4860_v16 = vand.u32 2147483647, %v10518_v4  ;;  %7206 = vrcp.f32 %v10710_v25  ;;  %v10750_v10 = vadd.f32 %v3889_v18, %v9253_v29  ;;  %v4834_v36 = vsel %vm10694_vm15, %v4833_v39, %v4829_v12 }
 0xb15   : > { %v4849_v42 = vsel %vm10721_vm3, %v4848_v50, %v4844_v9  ;;  %v4862_v41 = vand.u32 2147483648, %v10518_v4  ;;  %v10757_v54 = vadd.f32 1.0, %v7201_v49  ;;  %v4855_v3 = vadd.f32 %v10594_v31, %v4854_v21  ;;  %v12230_v50 = vld [vmem:[#allocation26_spill] sm:$0xff] }
 0xb16   : > { %v7205_v28 = vpop.eup %7204  ;;  %vm4857_vm5 = vweird.f32 %v10594_v31  ;;  %7208 = vrcp.f32 %v10732_v2  ;;  %v10763_v46 = vadd.f32 %v3938_v38, %v9255_v52  ;;  %v4868_v43 = vsub.f32 1.0, %v4867_v48  ;;  %v12235_v38 = vld [vmem:[#allocation39_spill] sm:$0xff] }
 0xb17   : > { %v4882_v51 = vmul.f32 %v10744_v15, %v10637_v1  ;;  %7210 = vrcp.f32 %v10742_v62  ;;  %v10769_v40 = vadd.f32 %v3987_v20, %v9271_v32  ;;  %v10772_v13 = vmul.f32 %v4834_v36, %v10296_v60  ;;  %vm10782_vm7 = vmor %vm4856_vm4, %vm4857_vm5 }
 0xb18   : > { %vm10774_vm6 = vcmp.eq.f32.partialorder %v4860_v16, 8.507059e+37  ;;  %v4877_v8 = vand.u32 2147483648, %v10586_v44  ;;  %v6479_v53 = vmul.f32 -1.702, %v10750_v10  ;;  %v4875_v14 = vand.u32 2147483647, %v10586_v44 }
 0xb19   : > { %v4892_v60 = vand.u32 2147483648, %v10637_v1  ;;  %7212 = vrcp.f32 %v10757_v54  ;;  %v10789_v30 = vadd.f32 1.0, %v7205_v28  ;;  %v10794_v5 = vmul.f32 %v4849_v42, %v10305_v47  ;;  %v12237_v42 = vld [vmem:[#allocation25_spill] sm:$0xff] }
 0xb1a   : > { %v10791_v26 = vpop.eup %7206  ;;  %v4859_v4 = vsel %vm10782_vm7, %v10594_v31, %v4855_v3  ;;  %v4863_v33 = vor.u32 1.1754944e-38, %v4862_v41  ;;  %v6480_v34 = vmul.f32 -1.702, %v10763_v46  ;;  %v4869_v55 = vmul.f32 %v10682_v17, %v4868_v43  ;;  %v12238_v41 = vld [vmem:[#allocation40_spill] sm:$0xff] }
 0xb1b   : > { %v4883_v24 = vsub.f32 1.0, %v4882_v51  ;;  %v6481_v56 = vmul.f32 -1.702, %v10769_v40  ;;  %v10803_v58 = vadd.f32 %v4036_v37, %v9273_v7  ;;  %vm4871_vm8 = vweird.f32 %v10586_v44 }
 0xb1c   : > { %v10805_v39 = vpop.eup %7208  ;;  %v4878_v47 = vor.u32 1.1754944e-38, %v4877_v8  ;;  %v4890_v0 = vand.u32 2147483647, %v10637_v1  ;;  %v4259_v11 = vmul.f32 1.442695, %v6479_v53  ;;  %v12229_v31 = vpack.c.bf16 %v10329_v35, %v10191_v45  ;;  %v3891_v45 = vpop.f32.mrf.mxu0  ;;  %v12234_v35 = vld [vmem:[#allocation44_spill] sm:$0xff] }
 0xb1d   : > { %v12231_v18 = vpack.c.bf16 %v10407_v59, %v12230_v50  ;;  %v10815_v49 = vpop.eup %7210  ;;  %vm10817_vm9 = vcmp.eq.f32.partialorder %v4875_v14, 8.507059e+37  ;;  %v10821_v9 = vor.u32 1.1754944e-38, %v4892_v60  ;;  %v4897_v21 = vmul.f32 %v10791_v26, %v10710_v25  ;;  %v3940_v53 = vpop.f32.mrf.mxu1  ;;  %v12240_v60 = vld [vmem:[#allocation41_spill] sm:$0xff] }
 0xb1e   : > { %5705 = vmatmul.bf16.gmra.mxu0 %v12229_v31  ;;  %v4907_v48 = vand.u32 2147483648, %v10710_v25  ;;  %7214 = vrcp.f32 %v10789_v30  ;;  %v12236_v59 = vpack.c.bf16 %v12234_v35, %v12235_v38  ;;  %v4864_v16 = vsel %vm10774_vm6, %v4863_v33, %v4859_v4  ;;  %v3989_v38 = vpop.f32.mrf.mxu2 }
 0xb1f   : > { %5754 = vmatmul.bf16.gmra.mxu1 %v12231_v18  ;;  %vm4872_vm10 = vweird.f32 %v10682_v17  ;;  %vm4886_vm11 = vweird.f32 %v10637_v1  ;;  %v4905_v20 = vand.u32 2147483647, %v10710_v25  ;;  %v4261_v36 = vmul.f32 1.442695, %v6480_v34  ;;  %v10838_v3 = vpop.eup %7212 }
 0xb20   : > { %5803 = vmatmul.bf16.gmra.mxu2 %v12236_v59  ;;  %v12239_v28 = vpack.c.bf16 %v12237_v42, %v12238_v41  ;;  %v4870_v43 = vadd.f32 %v10682_v17, %v4869_v55  ;;  %v4884_v51 = vmul.f32 %v10744_v15, %v4883_v24  ;;  %v4263_v8 = vmul.f32 1.442695, %v6481_v56  ;;  %vm10860_vm13 = vmor %vm4871_vm8, %vm4872_vm10 }
 0xb21   : > { %v6482_v63 = vmul.f32 -1.702, %v10803_v58  ;;  %v4912_v37 = vmul.f32 %v10805_v39, %v10732_v2  ;;  %v4927_v61 = vmul.f32 %v10815_v49, %v10742_v62  ;;  %7216 = vpow2.f32 %v4259_v11 }
 0xb22   : > { %5852 = vmatmul.bf16.gmra.mxu3 %v12239_v28  ;;  %v10848_v14 = vadd.f32 %v3891_v45, %v9253_v29  ;;  %v10851_v4 = vmul.f32 %v4864_v16, %v12240_v60  ;;  %vm4887_vm12 = vweird.f32 %v10744_v15  ;;  %v4898_v33 = vsub.f32 1.0, %v4897_v21 }
 0xb23   : > { %v10854_v34 = vor.u32 1.1754944e-38, %v4907_v48  ;;  %vm10864_vm14 = vcmp.eq.f32.partialorder %v4890_v0, 8.507059e+37  ;;  %v4922_v56 = vand.u32 2147483648, %v10732_v2  ;;  %v4942_v11 = vmul.f32 %v10838_v3, %v10757_v54  ;;  %vm10898_vm3 = vmor %vm4886_vm11, %vm4887_vm12 }
 0xb24   : > { %7218 = vpow2.f32 %v4261_v36  ;;  %v10872_v31 = vadd.f32 %v3940_v53, %v9255_v52  ;;  %v10874_v50 = vpop.eup %7214  ;;  %v4874_v44 = vsel %vm10860_vm13, %v10682_v17, %v4870_v43  ;;  %vm4901_vm15 = vweird.f32 %v10710_v25 }
 0xb25   : > { %v4937_v0 = vand.u32 2147483648, %v10742_v62  ;;  %7220 = vpow2.f32 %v4263_v8  ;;  %v4265_v18 = vmul.f32 1.442695, %v6482_v63  ;;  %v4885_v21 = vadd.f32 %v10744_v15, %v4884_v51  ;;  %v4038_v51 = vpop.f32.mrf.mxu3 }
 0xb26   : > { %v4913_v48 = vsub.f32 1.0, %v4912_v37  ;;  %v4928_v45 = vsub.f32 1.0, %v4927_v61  ;;  %v6483_v35 = vmul.f32 -1.702, %v10848_v14  ;;  %v4899_v59 = vmul.f32 %v10791_v26, %v4898_v33 }
 0xb27   : > { %vm4902_vm0 = vweird.f32 %v10791_v26  ;;  %vm4916_vm1 = vweird.f32 %v10732_v2  ;;  %v4920_v17 = vand.u32 2147483647, %v10732_v2  ;;  %v4935_v16 = vand.u32 2147483647, %v10742_v62  ;;  %v7217_v36 = vpop.eup %7216 }
 0xb28   : > { %v4879_v42 = vsel %vm10817_vm9, %v4878_v47, %v4874_v44  ;;  %vm4931_vm2 = vweird.f32 %v10742_v62  ;;  %v4943_v41 = vsub.f32 1.0, %v4942_v11  ;;  %v4957_v28 = vmul.f32 %v10874_v50, %v10789_v30  ;;  %vm10944_vm9 = vmor %vm4901_vm15, %vm4902_vm0 }
 0xb29   : > { %v6484_v43 = vmul.f32 -1.702, %v10872_v31  ;;  %v4923_v63 = vor.u32 1.1754944e-38, %v4922_v56  ;;  %v4938_v12 = vor.u32 1.1754944e-38, %v4937_v0  ;;  %7222 = vpow2.f32 %v4265_v18  ;;  %v12249_v56 = vld [vmem:[#allocation42_spill] sm:$0xff] }
 0xb2a   : > { %v10903_v47 = vadd.f32 %v3989_v38, %v9271_v32  ;;  %v7219_v53 = vpop.eup %7218  ;;  %v4889_v37 = vsel %vm10898_vm3, %v10744_v15, %v4885_v21  ;;  %vm10908_vm4 = vcmp.eq.f32.partialorder %v4905_v20, 8.507059e+37  ;;  %v4914_v1 = vmul.f32 %v10805_v39, %v4913_v48 }
 0xb2b   : > { %v4929_v60 = vmul.f32 %v10815_v49, %v4928_v45  ;;  %v4267_v33 = vmul.f32 1.442695, %v6483_v35  ;;  %v7221_v55 = vpop.eup %7220  ;;  %v10915_v11 = vmul.f32 %v4879_v42, %v12249_v56  ;;  %v4900_v44 = vadd.f32 %v10791_v26, %v4899_v59 }
 0xb2c   : > { %v10918_v0 = vadd.f32 1.0, %v7217_v36  ;;  %v10921_v18 = vadd.f32 %v4038_v51, %v9273_v7  ;;  %vm4917_vm5 = vweird.f32 %v10805_v39  ;;  %vm10924_vm6 = vcmp.eq.f32.partialorder %v4920_v17, 8.507059e+37 }
 0xb2d   : > { %vm10928_vm7 = vcmp.eq.f32.partialorder %v4935_v16, 8.507059e+37  ;;  %v4944_v21 = vmul.f32 %v10838_v3, %v4943_v41  ;;  %v4958_v48 = vsub.f32 1.0, %v4957_v28  ;;  %v4269_v45 = vmul.f32 1.442695, %v6484_v43  ;;  %vm10962_vm10 = vmor %vm4916_vm1, %vm4917_vm5 }
 0xb2e   : > { %12250 = vst [vmem:[#allocation30_spill] sm:$0xff] %v10921_v18  ;;  %v4894_v35 = vsel %vm10864_vm14, %v10821_v9, %v4889_v37  ;;  %vm4932_vm8 = vweird.f32 %v10815_v49  ;;  %v10937_v38 = vadd.f32 1.0, %v7219_v53  ;;  %v6485_v59 = vmul.f32 -1.702, %v10903_v47  ;;  %v3894_v53 = vpop.f32.mrf.mxu0 }
 0xb2f   : > { %v4915_v16 = vadd.f32 %v10805_v39, %v4914_v1  ;;  %v4930_v36 = vadd.f32 %v10815_v49, %v4929_v60  ;;  %v10950_v24 = vadd.f32 1.0, %v7221_v55  ;;  %7224 = vpow2.f32 %v4267_v33  ;;  %v7223_v9 = vpop.eup %7222  ;;  %vm10973_vm12 = vmor %vm4931_vm2, %vm4932_vm8  ;;  %v12261_v60 = vld [vmem:[#allocation43_spill] sm:$0xff] }
 0xb30   : > { %v4904_v42 = vsel %vm10944_vm9, %v10791_v26, %v4900_v44  ;;  %v4952_v41 = vand.u32 2147483648, %v10757_v54  ;;  %7226 = vrcp.f32 %v10918_v0  ;;  %v6486_v25 = vmul.f32 -1.702, %v10921_v18 }
 0xb31   : > { %v4945_v43 = vadd.f32 %v10838_v3, %v4944_v21  ;;  %vm4947_vm11 = vweird.f32 %v10838_v3  ;;  %v4959_v26 = vmul.f32 %v10874_v50, %v4958_v48  ;;  %7228 = vpow2.f32 %v4269_v45 }
 0xb32   : > { %vm4946_vm13 = vweird.f32 %v10757_v54  ;;  %v4950_v2 = vand.u32 2147483647, %v10757_v54  ;;  %7230 = vrcp.f32 %v10937_v38  ;;  %v4271_v8 = vmul.f32 1.442695, %v6485_v59 }
 0xb33   : > { %v4919_v37 = vsel %vm10962_vm10, %v10805_v39, %v4915_v16  ;;  %v4934_v62 = vsel %vm10973_vm12, %v10815_v49, %v4930_v36  ;;  %7232 = vrcp.f32 %v10950_v24  ;;  %v10987_v1 = vadd.f32 1.0, %v7223_v9  ;;  %vm10997_vm14 = vmor %vm4946_vm13, %vm4947_vm11  ;;  %v12266_v16 = vld [vmem:[#allocation45_spill] sm:$0xff] }
 0xb34   : > { %v10990_v33 = vmul.f32 %v4894_v35, %v12261_v60  ;;  %v4909_v54 = vsel %vm10908_vm4, %v10854_v34, %v4904_v42  ;;  %v4953_v39 = vor.u32 1.1754944e-38, %v4952_v41  ;;  %v4273_v56 = vmul.f32 1.442695, %v6486_v25  ;;  %v12271_v42 = vld [vmem:[#allocation34_spill] sm:$0xff] }
 0xb35   : > { %v7225_v49 = vpop.eup %7224  ;;  %v4949_v44 = vsel %vm10997_vm14, %v10838_v3, %v4945_v43  ;;  %v4960_v21 = vadd.f32 %v10874_v50, %v4959_v26  ;;  %vm4962_vm15 = vweird.f32 %v10874_v50  ;;  %v11007_v61 = vadd.f32 %v3894_v53, %v9253_v29  ;;  %v3943_v43 = vpop.f32.mrf.mxu1 }
 0xb36   : > { %12262 = vst [vmem:[#allocation38_spill] sm:$0xff] %v10990_v33  ;;  %v11009_v34 = vpop.eup %7226  ;;  %v4924_v48 = vsel %vm10924_vm6, %v4923_v63, %v4919_v37  ;;  %v4939_v45 = vsel %vm10928_vm7, %v4938_v12, %v4934_v62  ;;  %v4967_v35 = vand.u32 2147483648, %v10789_v30  ;;  %7234 = vpow2.f32 %v4271_v8  ;;  %v3992_v53 = vpop.f32.mrf.mxu2 }
 0xb37   : > { %12265 = vst [vmem:[#allocation35_spill] sm:$0xff] %v11007_v61  ;;  %v7229_v59 = vpop.eup %7228  ;;  %vm4951_vm0 = vcmp.eq.f32.partialorder %v4950_v2, 8.507059e+37  ;;  %vm4961_vm1 = vweird.f32 %v10789_v30  ;;  %v4965_v3 = vand.u32 2147483647, %v10789_v30  ;;  %7236 = vrcp.f32 %v10987_v1  ;;  %v12270_v30 = vld [vmem:[#allocation29_spill] sm:$0xff] }
 0xb38   : > { %v11019_v17 = vpop.eup %7230  ;;  %v11022_v36 = vmul.f32 %v4909_v54, %v12266_v16  ;;  %v4954_v63 = vsel %vm4951_vm0, %v4953_v39, %v4949_v44  ;;  %vm11026_vm2 = vmor %vm4961_vm1, %vm4962_vm15  ;;  %v11030_v15 = vadd.f32 1.0, %v7225_v49  ;;  %7238 = vpow2.f32 %v4273_v56 }
 0xb39   : > { %v11032_v20 = vpop.eup %7232  ;;  %v11035_v9 = vmul.f32 %v4924_v48, %v12270_v30  ;;  %v11038_v41 = vmul.f32 %v4939_v45, %v12271_v42  ;;  %v4964_v25 = vsel %vm11026_vm2, %v10874_v50, %v4960_v21  ;;  %v6487_v28 = vmul.f32 -1.702, %v11007_v61 }
 0xb3a   : > { %12267 = vst [vmem:[#allocation31_spill] sm:$0xff] %v11022_v36  ;;  %v4968_v26 = vor.u32 1.1754944e-38, %v4967_v35  ;;  %v4982_v51 = vand.u32 2147483648, %v10918_v0  ;;  %v4997_v2 = vand.u32 2147483648, %v10937_v38  ;;  %v11046_v8 = vadd.f32 1.0, %v7229_v59 }
 0xb3b   : > { %v11049_v37 = vmul.f32 %v4954_v63, %v10562_v19  ;;  %vm4966_vm3 = vcmp.eq.f32.partialorder %v4965_v3, 8.507059e+37  ;;  %v4972_v62 = vmul.f32 %v11009_v34, %v10918_v0  ;;  %v4980_v50 = vand.u32 2147483647, %v10918_v0 }
 0xb3c   : > { %v7235_v60 = vpop.eup %7234  ;;  %v4969_v54 = vsel %vm4966_vm3, %v4968_v26, %v4964_v25  ;;  %v4987_v55 = vmul.f32 %v11019_v17, %v10937_v38  ;;  %v5002_v39 = vmul.f32 %v11032_v20, %v10950_v24  ;;  %7240 = vrcp.f32 %v11030_v15 }
 0xb3d   : > { %12272 = vst [vmem:[#allocation36_spill] sm:$0xff] %v11049_v37  ;;  %v11059_v56 = vpop.eup %7236  ;;  %v4995_v19 = vand.u32 2147483647, %v10937_v38  ;;  %v4275_v49 = vmul.f32 1.442695, %v6487_v28  ;;  %v11063_v44 = vadd.f32 %v3943_v43, %v9255_v52  ;;  %v11066_v21 = vadd.f32 %v3992_v53, %v9271_v32  ;;  %v3896_v43 = vpop.f32.mrf.mxu0 }
 0xb3e   : > { %v7239_v48 = vpop.eup %7238  ;;  %v11068_v45 = vor.u32 1.1754944e-38, %v4982_v51  ;;  %v11070_v35 = vor.u32 1.1754944e-38, %v4997_v2  ;;  %v5012_v59 = vand.u32 2147483648, %v10950_v24  ;;  %7242 = vrcp.f32 %v11046_v8 }
 0xb3f   : > { %12273 = vst [vmem:[#allocation32_spill] sm:$0xff] %v11063_v44  ;;  %v11075_v3 = vmul.f32 %v4969_v54, %v10590_v22  ;;  %v4973_v16 = vsub.f32 1.0, %v4972_v62  ;;  %v5027_v63 = vand.u32 2147483648, %v10987_v1  ;;  %v11078_v12 = vadd.f32 1.0, %v7235_v60  ;;  %v4041_v54 = vpop.f32.mrf.mxu3 }
 0xb40   : > { %12274 = vst [vmem:[#allocation26_spill] sm:$0xff] %v11066_v21  ;;  %v4988_v30 = vsub.f32 1.0, %v4987_v55  ;;  %v5003_v42 = vsub.f32 1.0, %v5002_v39  ;;  %v5017_v25 = vmul.f32 %v11059_v56, %v10987_v1  ;;  %v6488_v28 = vmul.f32 -1.702, %v11063_v44 }
 0xb41   : > { %12275 = vst [vmem:[#allocation44_spill] sm:$0xff] %v11075_v3  ;;  %vm4976_vm4 = vweird.f32 %v10918_v0  ;;  %v5010_v26 = vand.u32 2147483647, %v10950_v24  ;;  %v11085_v51 = vadd.f32 1.0, %v7239_v48  ;;  %7244 = vpow2.f32 %v4275_v49  ;;  %v3945_v49 = vpop.f32.mrf.mxu1 }
 0xb42   : > { %v6489_v22 = vmul.f32 -1.702, %v11066_v21  ;;  %v11088_v2 = vpop.eup %7240  ;;  %vm4977_vm5 = vweird.f32 %v11009_v34  ;;  %vm4991_vm6 = vweird.f32 %v10937_v38  ;;  %v11092_v53 = vor.u32 1.1754944e-38, %v5012_v59 }
 0xb43   : > { %v5025_v62 = vand.u32 2147483647, %v10987_v1  ;;  %v4277_v60 = vmul.f32 1.442695, %v6488_v28  ;;  %v4974_v55 = vmul.f32 %v11009_v34, %v4973_v16  ;;  %vm4992_vm7 = vweird.f32 %v11019_v17  ;;  %vm11153_vm14 = vmor %vm4976_vm4, %vm4977_vm5 }
 0xb44   : > { %vm5006_vm8 = vweird.f32 %v10950_v24  ;;  %7246 = vrcp.f32 %v11078_v12  ;;  %v11100_v39 = vadd.f32 %v3896_v43, %v9253_v29  ;;  %v11102_v48 = vpop.eup %7242  ;;  %v4989_v59 = vmul.f32 %v11019_v17, %v4988_v30  ;;  %vm11168_vm0 = vmor %vm4991_vm6, %vm4992_vm7 }
 0xb45   : > { %v5004_v21 = vmul.f32 %v11032_v20, %v5003_v42  ;;  %v5018_v28 = vsub.f32 1.0, %v5017_v25  ;;  %v11106_v44 = vor.u32 1.1754944e-38, %v5027_v63  ;;  %v5032_v16 = vmul.f32 %v11088_v2, %v11030_v15  ;;  %v3994_v63 = vpop.f32.mrf.mxu2  ;;  %v12279_v25 = vld [vmem:[#allocation37_spill] sm:$0xff] }
 0xb46   : > { %7248 = vrcp.f32 %v11085_v51  ;;  %v4279_v61 = vmul.f32 1.442695, %v6489_v22  ;;  %v11112_v3 = vadd.f32 %v4041_v54, %v9273_v7  ;;  %vm11114_vm9 = vcmp.eq.f32.partialorder %v4980_v50, 8.507059e+37 }
 0xb47   : > { %v5042_v30 = vand.u32 2147483648, %v11030_v15  ;;  %7250 = vpow2.f32 %v4277_v60  ;;  %v11120_v42 = vadd.f32 %v3945_v49, %v9255_v52  ;;  %v5407_v29 = vpack.c.bf16 %v10735_v27, %v12279_v25  ;;  %v7245_v36 = vpop.eup %7244  ;;  %v12284_v25 = vld [vmem:[#allocation33_spill] sm:$0xff] }
 0xb48   : > { %12276 = vst [vmem:[#allocation39_spill] sm:$0xff] %v11112_v3  ;;  %v4975_v22 = vadd.f32 %v11009_v34, %v4974_v55  ;;  %vm11125_vm10 = vcmp.eq.f32.partialorder %v4995_v19, 8.507059e+37  ;;  %vm5007_vm11 = vweird.f32 %v11032_v20  ;;  %vm11130_vm12 = vcmp.eq.f32.partialorder %v5010_v26, 8.507059e+37 }
 0xb49   : > { %vm5021_vm13 = vweird.f32 %v10987_v1  ;;  %v5047_v60 = vmul.f32 %v11102_v48, %v11046_v8  ;;  %v6491_v27 = vmul.f32 -1.702, %v11100_v39  ;;  %v4990_v49 = vadd.f32 %v11019_v17, %v4989_v59  ;;  %5710 = vmatmul.bf16.gmra.mxu0 %v5407_v29  ;;  %vm11189_vm2 = vmor %vm5006_vm8, %vm5007_vm11 }
 0xb4a   : > { %v5005_v19 = vadd.f32 %v11032_v20, %v5004_v21  ;;  %v5019_v55 = vmul.f32 %v11059_v56, %v5018_v28  ;;  %v5408_v26 = vpack.c.bf16 %v10738_v6, %v12284_v25  ;;  %v11143_v52 = vpop.eup %7246  ;;  %v5033_v37 = vsub.f32 1.0, %v5032_v16 }
 0xb4b   : > { %7252 = vpow2.f32 %v4279_v61  ;;  %v6490_v33 = vmul.f32 -1.702, %v11112_v3  ;;  %v11147_v18 = vadd.f32 %v3994_v63, %v9271_v32  ;;  %vm5022_vm15 = vweird.f32 %v11059_v56 }
 0xb4c   : > { %v5040_v29 = vand.u32 2147483647, %v11030_v15  ;;  %v11159_v6 = vadd.f32 1.0, %v7245_v36  ;;  %v6492_v61 = vmul.f32 -1.702, %v11120_v42  ;;  %5759 = vmatmul.bf16.gmra.mxu1 %v5408_v26  ;;  %v11162_v59 = vpop.eup %7248  ;;  %vm11172_vm1 = vcmp.eq.f32.partialorder %v5025_v62, 8.507059e+37  ;;  %vm11223_vm5 = vmor %vm5021_vm13, %vm5022_vm15 }
 0xb4d   : > { %v11176_v16 = vor.u32 1.1754944e-38, %v5042_v30  ;;  %v5048_v36 = vsub.f32 1.0, %v5047_v60  ;;  %v5055_v63 = vand.u32 2147483647, %v11046_v8  ;;  %v4283_v25 = vmul.f32 1.442695, %v6491_v27  ;;  %v7251_v26 = vpop.eup %7250 }
 0xb4e   : > { %v4979_v3 = vsel %vm11153_vm14, %v11009_v34, %v4975_v22  ;;  %v4994_v38 = vsel %vm11168_vm0, %v11019_v17, %v4990_v49  ;;  %v5020_v30 = vadd.f32 %v11059_v56, %v5019_v55  ;;  %vm5036_vm3 = vweird.f32 %v11030_v15 }
 0xb4f   : > { %v5062_v60 = vmul.f32 %v11143_v52, %v11078_v12  ;;  %v5009_v34 = vsel %vm11189_vm2, %v11032_v20, %v5005_v19  ;;  %v5034_v17 = vmul.f32 %v11088_v2, %v5033_v37  ;;  %vm5051_vm4 = vweird.f32 %v11046_v8 }
 0xb50   : > { %v4281_v24 = vmul.f32 1.442695, %v6490_v33  ;;  %v6493_v22 = vmul.f32 -1.702, %v11147_v18  ;;  %v5057_v27 = vand.u32 2147483648, %v11046_v8  ;;  %v5077_v49 = vmul.f32 %v11162_v59, %v11085_v51 }
 0xb51   : > { %7254 = vrcp.f32 %v11159_v6  ;;  %v4285_v55 = vmul.f32 1.442695, %v6492_v61  ;;  %v7253_v21 = vpop.eup %7252  ;;  %v4984_v20 = vsel %vm11114_vm9, %v11068_v45, %v4979_v3  ;;  %v5049_v37 = vmul.f32 %v11102_v48, %v5048_v36  ;;  %v4043_v61 = vpop.f32.mrf.mxu3 }
 0xb52   : > { %v11211_v19 = vadd.f32 1.0, %v7251_v26  ;;  %7256 = vpow2.f32 %v4283_v25  ;;  %v4999_v33 = vsel %vm11125_vm10, %v11070_v35, %v4994_v38  ;;  %v5014_v0 = vsel %vm11130_vm12, %v11092_v53, %v5009_v34 }
 0xb53   : > { %vm5037_vm6 = vweird.f32 %v11088_v2  ;;  %vm11228_vm7 = vcmp.eq.f32.partialorder %v5040_v29, 8.507059e+37  ;;  %v5063_v3 = vsub.f32 1.0, %v5062_v60  ;;  %v5024_v35 = vsel %vm11223_vm5, %v11059_v56, %v5020_v30 }
 0xb54   : > { %v5035_v53 = vadd.f32 %v11088_v2, %v5034_v17  ;;  %7258 = vpow2.f32 %v4281_v24  ;;  %v4287_v54 = vmul.f32 1.442695, %v6493_v22  ;;  %v5078_v1 = vsub.f32 1.0, %v5077_v49  ;;  %vm11266_vm10 = vmor %vm5036_vm3, %vm5037_vm6 }
 0xb55   : > { %v11236_v50 = vadd.f32 1.0, %v7253_v21  ;;  %7260 = vpow2.f32 %v4285_v55  ;;  %v5409_v29 = vpack.c.bf16 %v10772_v13, %v10691_v23  ;;  %v11241_v36 = vmul.f32 %v4984_v20, %v10750_v10 }
 0xb56   : > { %v5050_v25 = vadd.f32 %v11102_v48, %v5049_v37  ;;  %vm5052_vm8 = vweird.f32 %v11102_v48  ;;  %7262 = vrcp.f32 %v11211_v19  ;;  %v11249_v26 = vmul.f32 %v4999_v33, %v10763_v46 }
 0xb57   : > { %v11246_v56 = vpop.eup %7254  ;;  %v5029_v38 = vsel %vm11172_vm1, %v11106_v44, %v5024_v35  ;;  %vm11254_vm9 = vcmp.eq.f32.partialorder %v5055_v63, 8.507059e+37  ;;  %v5064_v10 = vmul.f32 %v11143_v52, %v5063_v3  ;;  %5808 = vmatmul.bf16.gmra.mxu2 %v5409_v29  ;;  %v11260_v62 = vmul.f32 %v5014_v0, %v10769_v40  ;;  %vm11280_vm11 = vmor %vm5051_vm4, %vm5052_vm8 }
 0xb58   : > { %v7257_v13 = vpop.eup %7256  ;;  %v5058_v44 = vor.u32 1.1754944e-38, %v5057_v27  ;;  %7264 = vpow2.f32 %v4287_v54  ;;  %v11271_v28 = vadd.f32 %v4043_v61, %v9273_v7  ;;  %v5039_v63 = vsel %vm11266_vm10, %v11088_v2, %v5035_v53 }
 0xb59   : > { %v5070_v15 = vand.u32 2147483647, %v11078_v12  ;;  %v5079_v30 = vmul.f32 %v11162_v59, %v5078_v1  ;;  %7266 = vrcp.f32 %v11236_v50  ;;  %v11288_v34 = vmul.f32 %v5029_v38, %v10803_v58 }
 0xb5a   : > { %v7259_v60 = vpop.eup %7258  ;;  %v5054_v2 = vsel %vm11280_vm11, %v11102_v48, %v5050_v25  ;;  %vm5066_vm12 = vweird.f32 %v11078_v12  ;;  %v5092_v8 = vmul.f32 %v11246_v56, %v11159_v6  ;;  %v5065_v24 = vadd.f32 %v11143_v52, %v5064_v10 }
 0xb5b   : > { %v7261_v17 = vpop.eup %7260  ;;  %vm5067_vm13 = vweird.f32 %v11143_v52  ;;  %v11298_v22 = vadd.f32 1.0, %v7257_v13  ;;  %v5410_v58 = vpack.c.bf16 %v10794_v5, %v10713_v57  ;;  %v5044_v48 = vsel %vm11228_vm7, %v11176_v16, %v5039_v63 }
 0xb5c   : > { %v11302_v27 = vpop.eup %7262  ;;  %v5072_v49 = vand.u32 2147483648, %v11078_v12  ;;  %v5085_v55 = vand.u32 2147483647, %v11085_v51  ;;  %v6494_v21 = vmul.f32 -1.702, %v11271_v28  ;;  %vm11310_vm14 = vcmp.eq.f32.partialorder %v5070_v15, 8.507059e+37  ;;  %vm11323_vm0 = vmor %vm5066_vm12, %vm5067_vm13 }
 0xb5d   : > { %v5080_v37 = vadd.f32 %v11162_v59, %v5079_v30  ;;  %vm5082_vm15 = vweird.f32 %v11162_v59  ;;  %v5087_v57 = vand.u32 2147483648, %v11085_v51  ;;  %5857 = vmatmul.bf16.gmra.mxu3 %v5410_v58  ;;  %v5059_v16 = vsel %vm11254_vm9, %v5058_v44, %v5054_v2  ;;  %v12312_v58 = vld [vmem:[#allocation38_spill] sm:$0xff] }
 0xb5e   : > { %v7265_v5 = vpop.eup %7264  ;;  %vm5081_vm1 = vweird.f32 %v11085_v51  ;;  %v5093_v0 = vsub.f32 1.0, %v5092_v8  ;;  %v11328_v43 = vadd.f32 1.0, %v7261_v17  ;;  %v5069_v3 = vsel %vm11323_vm0, %v11143_v52, %v5065_v24  ;;  %v12323_v17 = vld [vmem:[#allocation28_spill] sm:$0xff] }
 0xb5f   : > { %v11330_v45 = vpop.eup %7266  ;;  %v5107_v35 = vmul.f32 %v11302_v27, %v11211_v19  ;;  %v11337_v53 = vadd.f32 1.0, %v7259_v60  ;;  %7268 = vrcp.f32 %v11298_v22  ;;  %v11341_v12 = vmul.f32 %v5044_v48, %v10848_v14  ;;  %vm11345_vm2 = vmor %vm5081_vm1, %vm5082_vm15  ;;  %v12313_v48 = vld [vmem:[#allocation36_spill] sm:$0xff] }
 0xb60   : > { %v5073_v51 = vor.u32 1.1754944e-38, %v5072_v49  ;;  %vm5086_vm3 = vcmp.eq.f32.partialorder %v5085_v55, 8.507059e+37  ;;  %v4289_v1 = vmul.f32 1.442695, %v6494_v21  ;;  %v11350_v52 = vmul.f32 %v5059_v16, %v10872_v31 }
 0xb61   : > { %v5084_v61 = vsel %vm11345_vm2, %v11162_v59, %v5080_v37  ;;  %v5088_v29 = vor.u32 1.1754944e-38, %v5087_v57  ;;  %v11355_v25 = vadd.f32 1.0, %v7265_v5  ;;  %v5094_v38 = vmul.f32 %v11246_v56, %v5093_v0 }
 0xb62   : > { %v5074_v14 = vsel %vm11310_vm14, %v5073_v51, %v5069_v3  ;;  %v5122_v23 = vmul.f32 %v11330_v45, %v11236_v50  ;;  %7270 = vrcp.f32 %v11328_v43  ;;  %v5100_v31 = vand.u32 2147483647, %v11159_v6 }
 0xb63   : > { %v5102_v10 = vand.u32 2147483648, %v11159_v6  ;;  %v5108_v13 = vsub.f32 1.0, %v5107_v35  ;;  %7272 = vrcp.f32 %v11337_v53  ;;  %v5089_v59 = vsel %vm5086_vm3, %v5088_v29, %v5084_v61  ;;  %v12319_v61 = vld [vmem:[#allocation44_spill] sm:$0xff] }
 0xb64   : > { %v5115_v46 = vand.u32 2147483647, %v11211_v19  ;;  %v5117_v44 = vand.u32 2147483648, %v11211_v19  ;;  %7274 = vpow2.f32 %v4289_v1  ;;  %v5132_v40 = vand.u32 2147483648, %v11236_v50  ;;  %v12318_v1 = vld [vmem:[#allocation31_spill] sm:$0xff] }
 0xb65   : > { %v11368_v63 = vpop.eup %7268  ;;  %7276 = vrcp.f32 %v11355_v25  ;;  %v5411_v15 = vpack.c.bf16 %v11035_v9, %v10851_v4  ;;  %v5412_v30 = vpack.c.bf16 %v11038_v41, %v10915_v11  ;;  %v5095_v60 = vadd.f32 %v11246_v56, %v5094_v38  ;;  %v12311_v9 = vld [vmem:[#allocation30_spill] sm:$0xff] }
 0xb66   : > { %vm5096_vm4 = vweird.f32 %v11159_v6  ;;  %vm5097_vm5 = vweird.f32 %v11246_v56  ;;  %v5123_v2 = vsub.f32 1.0, %v5122_v23  ;;  %v11380_v8 = vmul.f32 %v5074_v14, %v10903_v47 }
 0xb67   : > { %vm11382_vm6 = vcmp.eq.f32.partialorder %v5100_v31, 8.507059e+37  ;;  %v5103_v24 = vor.u32 1.1754944e-38, %v5102_v10  ;;  %v5109_v4 = vmul.f32 %v11302_v27, %v5108_v13  ;;  %5715 = vmatmul.bf16.gmra.mxu0 %v5411_v15  ;;  %5764 = vmatmul.bf16.gmra.mxu1 %v5412_v30  ;;  %v11390_v41 = vmul.f32 %v5089_v59, %v12311_v9  ;;  %vm11401_vm8 = vmor %vm5096_vm4, %vm5097_vm5  ;;  %v3899_v13 = vpop.f32.mrf.mxu0  ;;  %v12322_v15 = vld [vmem:[#allocation27_spill] sm:$0xff] }
 0xb68   : > { %v11387_v11 = vpop.eup %7270  ;;  %vm5111_vm7 = vweird.f32 %v11211_v19  ;;  %v5152_v47 = vmul.f32 %v11368_v63, %v11298_v22  ;;  %v5413_v49 = vpack.c.bf16 %v12313_v48, %v12312_v58  ;;  %vm11405_vm9 = vcmp.eq.f32.partialorder %v5115_v46, 8.507059e+37 }
 0xb69   : > { %v11397_v55 = vpop.eup %7272  ;;  %v5118_v37 = vor.u32 1.1754944e-38, %v5117_v44  ;;  %vm5126_vm10 = vweird.f32 %v11236_v50  ;;  %v5130_v57 = vand.u32 2147483647, %v11236_v50  ;;  %v11411_v5 = vor.u32 1.1754944e-38, %v5132_v40 }
 0xb6a   : > { %v7275_v16 = vpop.eup %7274  ;;  %v5099_v6 = vsel %vm11401_vm8, %v11246_v56, %v5095_v60  ;;  %vm5112_vm11 = vweird.f32 %v11302_v27  ;;  %v5124_v33 = vmul.f32 %v11330_v45, %v5123_v2  ;;  %v5162_v0 = vand.u32 2147483648, %v11298_v22  ;;  %5813 = vmatmul.bf16.gmra.mxu2 %v5413_v49  ;;  %v3948_v60 = vpop.f32.mrf.mxu1 }
 0xb6b   : > { %v11419_v3 = vpop.eup %7276  ;;  %v5110_v35 = vadd.f32 %v11302_v27, %v5109_v4  ;;  %v5167_v51 = vmul.f32 %v11387_v11, %v11328_v43  ;;  %v11424_v54 = vadd.f32 1.0, %v7275_v16  ;;  %v5414_v29 = vpack.c.bf16 %v12319_v61, %v12318_v1  ;;  %vm11443_vm13 = vmor %vm5111_vm7, %vm5112_vm11  ;;  %v3997_v4 = vpop.f32.mrf.mxu2 }
 0xb6c   : > { %v5137_v56 = vmul.f32 %v11397_v55, %v11337_v53  ;;  %v5145_v14 = vand.u32 2147483647, %v11337_v53  ;;  %v5147_v38 = vand.u32 2147483648, %v11337_v53  ;;  %v5153_v23 = vsub.f32 1.0, %v5152_v47 }
 0xb6d   : > { %v11434_v31 = vsel %vm11382_vm6, %v5103_v24, %v5099_v6  ;;  %vm5127_vm12 = vweird.f32 %v11330_v45  ;;  %v5160_v10 = vand.u32 2147483647, %v11298_v22  ;;  %7278 = vrcp.f32 %v11424_v54  ;;  %5862 = vmatmul.bf16.gmra.mxu3 %v5414_v29 }
 0xb6e   : > { %v11448_v46 = vadd.f32 %v11330_v45, %v5124_v33  ;;  %v11450_v44 = vor.u32 1.1754944e-38, %v5162_v0  ;;  %v5182_v40 = vmul.f32 %v11419_v3, %v11355_v25  ;;  %v11455_v30 = vadd.f32 %v3899_v13, %v12322_v15  ;;  %vm11482_vm1 = vmor %vm5126_vm10, %vm5127_vm12 }
 0xb6f   : > { %v5114_v19 = vsel %vm11443_vm13, %v11302_v27, %v5110_v35  ;;  %vm5156_vm14 = vweird.f32 %v11298_v22  ;;  %vm5157_vm15 = vweird.f32 %v11368_v63  ;;  %v5168_v2 = vsub.f32 1.0, %v5167_v51  ;;  %v4046_v51 = vpop.f32.mrf.mxu3 }
 0xb70   : > { %v11463_v24 = vadd.f32 %v3948_v60, %v12323_v17  ;;  %v5138_v9 = vsub.f32 1.0, %v5137_v56  ;;  %v5154_v47 = vmul.f32 %v11368_v63, %v5153_v23  ;;  %v6495_v58 = vmul.f32 -1.702, %v11455_v30  ;;  %vm11525_vm6 = vmor %vm5156_vm14, %vm5157_vm15 }
 0xb71   : > { %v11468_v48 = vadd.f32 %v3997_v4, %v9271_v32  ;;  %vm5171_vm0 = vweird.f32 %v11328_v43  ;;  %v5175_v27 = vand.u32 2147483647, %v11328_v43  ;;  %v5177_v49 = vand.u32 2147483648, %v11328_v43 }
 0xb72   : > { %v6496_v21 = vmul.f32 -1.702, %v11463_v24  ;;  %v11476_v16 = vsel %vm11405_vm9, %v5118_v37, %v5114_v19  ;;  %v5183_v33 = vsub.f32 1.0, %v5182_v40  ;;  %v4291_v0 = vmul.f32 1.442695, %v6495_v58 }
 0xb73   : > { %v6497_v35 = vmul.f32 -1.702, %v11468_v48  ;;  %v11487_v1 = vpop.eup %7278  ;;  %v5129_v20 = vsel %vm11482_vm1, %v11330_v45, %v11448_v46  ;;  %v5169_v37 = vmul.f32 %v11387_v11, %v5168_v2  ;;  %v11495_v29 = vadd.f32 %v4046_v51, %v9273_v7  ;;  %v3901_v2 = vpop.f32.mrf.mxu0 }
 0xb74   : > { %v4293_v61 = vmul.f32 1.442695, %v6496_v21  ;;  %v5139_v56 = vmul.f32 %v11397_v55, %v5138_v9  ;;  %v5155_v23 = vadd.f32 %v11368_v63, %v5154_v47  ;;  %vm11499_vm2 = vcmp.eq.f32.partialorder %v5160_v10, 8.507059e+37 }
 0xb75   : > { %v5197_v59 = vmul.f32 %v11487_v1, %v11424_v54  ;;  %7280 = vpow2.f32 %v4291_v0  ;;  %vm11505_vm3 = vcmp.eq.f32.partialorder %v5175_v27, 8.507059e+37  ;;  %v5415_v60 = vpack.c.bf16 %v11341_v12, %v11241_v36  ;;  %v3950_v12 = vpop.f32.mrf.mxu1 }
 0xb76   : > { %v5416_v19 = vpack.c.bf16 %v11350_v52, %v11249_v26  ;;  %7282 = vpow2.f32 %v4293_v61  ;;  %v6498_v10 = vmul.f32 -1.702, %v11495_v29  ;;  %v5184_v4 = vmul.f32 %v11419_v3, %v5183_v33 }
 0xb77   : > { %v5198_v9 = vsub.f32 1.0, %v5197_v59  ;;  %v4295_v47 = vmul.f32 1.442695, %v6497_v35  ;;  %v11516_v58 = vadd.f32 %v3901_v2, %v12322_v15  ;;  %vm5142_vm4 = vweird.f32 %v11397_v55  ;;  %5720 = vmatmul.bf16.gmra.mxu0 %v5415_v60 }
 0xb78   : > { %v5170_v27 = vadd.f32 %v11387_v11, %v5169_v37  ;;  %vm5172_vm5 = vweird.f32 %v11387_v11  ;;  %v5178_v36 = vor.u32 1.1754944e-38, %v5177_v49  ;;  %5769 = vmatmul.bf16.gmra.mxu1 %v5416_v19  ;;  %v4297_v26 = vmul.f32 1.442695, %v6498_v10 }
 0xb79   : > { %vm5186_vm7 = vweird.f32 %v11355_v25  ;;  %v5417_v15 = vpack.c.bf16 %v11380_v8, %v11260_v62  ;;  %v6499_v21 = vmul.f32 -1.702, %v11516_v58  ;;  %v11534_v49 = vadd.f32 %v3950_v12, %v12323_v17  ;;  %vm11553_vm11 = vmor %vm5171_vm0, %vm5172_vm5  ;;  %v12343_v12 = vld [vmem:[#allocation32_spill] sm:$0xff] }
 0xb7a   : > { %vm11538_vm8 = vcmp.eq.f32.partialorder %v5130_v57, 8.507059e+37  ;;  %vm5141_vm9 = vweird.f32 %v11337_v53  ;;  %v5159_v22 = vsel %vm11525_vm6, %v11368_v63, %v5155_v23  ;;  %vm5187_vm10 = vweird.f32 %v11419_v3 }
 0xb7b   : > { %v5192_v62 = vand.u32 2147483648, %v11355_v25  ;;  %v5199_v8 = vmul.f32 %v11487_v1, %v5198_v9  ;;  %v7281_v17 = vpop.eup %7280  ;;  %v5185_v57 = vadd.f32 %v11419_v3, %v5184_v4  ;;  %5818 = vmatmul.bf16.gmra.mxu2 %v5417_v15  ;;  %7284 = vpow2.f32 %v4295_v47  ;;  %vm11576_vm12 = vmor %vm5186_vm7, %vm5187_vm10 }
 0xb7c   : > { %v4299_v63 = vmul.f32 1.442695, %v6499_v21  ;;  %v6500_v0 = vmul.f32 -1.702, %v11534_v49  ;;  %v7283_v35 = vpop.eup %7282  ;;  %v5174_v51 = vsel %vm11553_vm11, %v11387_v11, %v5170_v27  ;;  %v5418_v37 = vpack.c.bf16 %v11390_v41, %v11288_v34  ;;  %v3999_v27 = vpop.f32.mrf.mxu2  ;;  %v12346_v21 = vld [vmem:[#allocation26_spill] sm:$0xff] }
 0xb7d   : > { %v11564_v43 = vadd.f32 1.0, %v7281_v17  ;;  %7286 = vpow2.f32 %v4297_v26  ;;  %v5190_v61 = vand.u32 2147483647, %v11355_v25  ;;  %v11567_v23 = vadd.f32 1.0, %v7283_v35  ;;  %v12347_v35 = vld [vmem:[#allocation39_spill] sm:$0xff] }
 0xb7e   : > { %7288 = vpow2.f32 %v4299_v63  ;;  %v4301_v59 = vmul.f32 1.442695, %v6500_v0  ;;  %v5164_v60 = vsel %vm11499_vm2, %v11450_v44, %v5159_v22  ;;  %v5200_v34 = vadd.f32 %v11487_v1, %v5199_v8  ;;  %5867 = vmatmul.bf16.gmra.mxu3 %v5418_v37 }
 0xb7f   : > { %vm5202_vm13 = vweird.f32 %v11487_v1  ;;  %7290 = vrcp.f32 %v11564_v43  ;;  %v5179_v41 = vsel %vm11505_vm3, %v5178_v36, %v5174_v51  ;;  %v5189_v44 = vsel %vm11576_vm12, %v11419_v3, %v5185_v57  ;;  %v12342_v36 = vld [vmem:[#allocation35_spill] sm:$0xff]  ;;  %vm11628_vm3 = vmor %vm5141_vm9, %vm5142_vm4 }
 0xb80   : > { %v5207_v25 = vand.u32 2147483648, %v11424_v54  ;;  %7292 = vrcp.f32 %v11567_v23  ;;  %v5140_v13 = vadd.f32 %v11397_v55, %v5139_v56  ;;  %v5193_v19 = vor.u32 1.1754944e-38, %v5192_v62 }
 0xb81   : > { %vm5201_vm14 = vweird.f32 %v11424_v54  ;;  %v5205_v10 = vand.u32 2147483647, %v11424_v54  ;;  %v7285_v2 = vpop.eup %7284  ;;  %vm11595_vm15 = vcmp.eq.f32.partialorder %v5145_v14, 8.507059e+37  ;;  %v5148_v3 = vor.u32 1.1754944e-38, %v5147_v38 }
 0xb82   : > { %vm5191_vm0 = vcmp.eq.f32.partialorder %v5190_v61, 8.507059e+37  ;;  %vm11603_vm2 = vmor %vm5201_vm14, %vm5202_vm13  ;;  %7294 = vpow2.f32 %v4301_v59  ;;  %v5383_v54 = vmul.f32 %v5164_v60, %v11100_v39  ;;  %v5384_v9 = vmul.f32 %v5179_v41, %v11120_v42  ;;  %v4048_v60 = vpop.f32.mrf.mxu3 }
 0xb83   : > { %v7287_v4 = vpop.eup %7286  ;;  %v5194_v14 = vsel %vm5191_vm0, %v5193_v19, %v5189_v44  ;;  %v5204_v47 = vsel %vm11603_vm2, %v11487_v1, %v5200_v34  ;;  %v5379_v26 = vmul.f32 %v11434_v31, %v12342_v36  ;;  %v5380_v52 = vmul.f32 %v11476_v16, %v12343_v12 }
 0xb84   : > { %v7289_v38 = vpop.eup %7288  ;;  %v5134_v39 = vsel %vm11538_vm8, %v11411_v5, %v5129_v20  ;;  %v5208_v31 = vor.u32 1.1754944e-38, %v5207_v25  ;;  %v5144_v16 = vsel %vm11628_vm3, %v11397_v55, %v5140_v13  ;;  %vm5206_vm1 = vcmp.eq.f32.partialorder %v5205_v10, 8.507059e+37  ;;  %v5794_v36 = vpop.f32.mrf.mxu2 }
 0xb85   : > { %v11632_v1 = vpop.eup %7290  ;;  %v11637_v45 = vadd.f32 1.0, %v7285_v2  ;;  %v11639_v46 = vadd.f32 1.0, %v7289_v38  ;;  %v5385_v53 = vmul.f32 %v5194_v14, %v11147_v18  ;;  %v11647_v15 = vadd.f32 %v3999_v27, %v9271_v32  ;;  %v11695_v38 = vld [vmem:[%s732_s7] ss:$0 sm:$0xff]  ;;  %s12380_s7 = sld [smem:[#allocation3_spill]] }
 0xb86   : > { %v11641_v5 = vpop.eup %7292  ;;  %v5209_v6 = vsel %vm5206_vm1, %v5208_v31, %v5204_v47  ;;  %v5212_v20 = vmul.f32 %v11632_v1, %v11564_v43  ;;  %v5381_v33 = vmul.f32 %v5134_v39, %v12346_v21  ;;  %v5419_v22 = vpack.c.bf16 %v5383_v54, %v5379_v26  ;;  %v5745_v54 = vpop.f32.mrf.mxu1 }
 0xb87   : > { %v5420_v55 = vpack.c.bf16 %v5384_v9, %v5380_v52  ;;  %v11650_v62 = vadd.f32 1.0, %v7287_v4  ;;  %v5149_v17 = vsel %vm11595_vm15, %v5148_v3, %v5144_v16  ;;  %v5227_v18 = vmul.f32 %v11641_v5, %v11567_v23  ;;  %v5696_v4 = vpop.f32.mrf.mxu0 }
 0xb88   : > { %v7295_v8 = vpop.eup %7294  ;;  %v5213_v50 = vsub.f32 1.0, %v5212_v20  ;;  %7296 = vrcp.f32 %v11639_v46  ;;  %v5386_v57 = vmul.f32 %v5209_v6, %v11271_v28  ;;  %5725 = vmatmul.bf16.gmra.mxu0 %v5419_v22  ;;  %v5421_v63 = vpack.c.bf16 %v5385_v53, %v5381_v33 }
 0xb89   : > { %5774 = vmatmul.bf16.gmra.mxu1 %v5420_v55  ;;  %7298 = vrcp.f32 %v11637_v45  ;;  %v11659_v32 = vadd.f32 1.0, %v7295_v8  ;;  %v6501_v0 = vmul.f32 -1.702, %v11647_v15  ;;  %v5382_v51 = vmul.f32 %v5149_v17, %v12347_v35 }
 0xb8a   : > { %v5214_v37 = vmul.f32 %v11632_v1, %v5213_v50  ;;  %7300 = vrcp.f32 %v11650_v62  ;;  %v5220_v61 = vand.u32 2147483647, %v11564_v43  ;;  %v5222_v28 = vand.u32 2147483648, %v11564_v43  ;;  %v5843_v33 = vpop.f32.mrf.mxu3 }
 0xb8b   : > { %5823 = vmatmul.bf16.gmra.mxu2 %v5421_v63  ;;  %v5228_v59 = vsub.f32 1.0, %v5227_v18  ;;  %7302 = vrcp.f32 %v11659_v32  ;;  %v5422_v11 = vpack.c.bf16 %v5386_v57, %v5382_v51  ;;  %v5237_v34 = vand.u32 2147483648, %v11567_v23  ;;  %p6631_p8 = scmp.ne.s32.totalorder %s12380_s7, 1 }
 0xb8c   : > { %vm5216_vm4 = vweird.f32 %v11564_v43  ;;  %v5235_v44 = vand.u32 2147483647, %v11567_v23  ;;  %v4303_v25 = vmul.f32 1.442695, %v6501_v0  ;;  %v11672_v13 = vadd.f32 %v4048_v60, %v9273_v7 }
 0xb8d   : > { %v5215_v10 = vadd.f32 %v11632_v1, %v5214_v37  ;;  %vm5217_vm5 = vweird.f32 %v11632_v1  ;;  %vm5231_vm6 = vweird.f32 %v11567_v23  ;;  %vm11680_vm7 = vcmp.eq.f32.partialorder %v5220_v61, 8.507059e+37 }
 0xb8e   : > { %v7297_v41 = vpop.eup %7296  ;;  %5872 = vmatmul.bf16.gmra.mxu3 %v5422_v11  ;;  %v5223_v3 = vor.u32 1.1754944e-38, %v5222_v28  ;;  %v5229_v7 = vmul.f32 %v11641_v5, %v5228_v59  ;;  %v5280_v56 = vand.u32 2147483647, %v11639_v46  ;;  %vm5232_vm8 = vweird.f32 %v11641_v5  ;;  %vm11701_vm9 = vmor %vm5216_vm4, %vm5217_vm5  ;;  %v5747_v28 = vpop.f32.mrf.mxu1 }
 0xb8f   : > { %v11674_v19 = vpop.eup %7298  ;;  %v5272_v2 = vmul.f32 %v7297_v41, %v11639_v46  ;;  %v5238_v14 = vor.u32 1.1754944e-38, %v5237_v34  ;;  %v5282_v27 = vand.u32 2147483648, %v11639_v46  ;;  %vm11705_vm10 = vcmp.eq.f32.partialorder %v5235_v44, 8.507059e+37  ;;  %vm11735_vm15 = vmor %vm5231_vm6, %vm5232_vm8  ;;  %v5698_v23 = vpop.f32.mrf.mxu0 }
 0xb90   : > { %v11686_v9 = vpop.eup %7300  ;;  %v5242_v39 = vmul.f32 %v11674_v19, %v11637_v45  ;;  %vm5276_vm11 = vweird.f32 %v11639_v46  ;;  %7304 = vpow2.f32 %v4303_v25  ;;  %v6502_v42 = vmul.f32 -1.702, %v11672_v13 }
 0xb91   : > { %v5273_v47 = vsub.f32 1.0, %v5272_v2  ;;  %v7303_v26 = vpop.eup %7302  ;;  %v5219_v43 = vsel %vm11701_vm9, %v11632_v1, %v5215_v10  ;;  %vm5277_vm12 = vweird.f32 %v7297_v41  ;;  %v5230_v53 = vadd.f32 %v11641_v5, %v5229_v7 }
 0xb92   : > { %v5287_v16 = vmul.f32 %v7303_v26, %v11659_v32  ;;  %v5257_v6 = vmul.f32 %v11686_v9, %v11650_v62  ;;  %vm11720_vm13 = vcmp.eq.f32.partialorder %v5280_v56, 8.507059e+37  ;;  %v4305_v21 = vmul.f32 1.442695, %v6502_v42  ;;  %vm5278_vm14 = vmor %vm5276_vm11, %vm5277_vm12 }
 0xb93   : > { %v5274_v31 = vmul.f32 %v7297_v41, %v5273_v47  ;;  %v5283_v55 = vor.u32 1.1754944e-38, %v5282_v27  ;;  %v5697_v1 = vadd.f32 %v11695_v38, %v5696_v4  ;;  %v5224_v17 = vsel %vm11680_vm7, %v5223_v3, %v5219_v43 }
 0xb94   : > { %v5288_v8 = vsub.f32 1.0, %v5287_v16  ;;  %v5295_v50 = vand.u32 2147483647, %v11659_v32  ;;  %v5297_v18 = vand.u32 2147483648, %v11659_v32  ;;  %7306 = vpow2.f32 %v4305_v21  ;;  %v12359_v21 = vld [vmem:[#allocation10_spill] sm:$0xff] }
 0xb95   : > { %v5275_v22 = vadd.f32 %v7297_v41, %v5274_v31  ;;  %vm5292_vm0 = vweird.f32 %v7303_v26  ;;  %v5746_v35 = vadd.f32 %v5745_v54, %v5697_v1  ;;  %v5234_v46 = vsel %vm11735_vm15, %v11641_v5, %v5230_v53 }
 0xb96   : > { %v5289_v0 = vmul.f32 %v7303_v26, %v5288_v8  ;;  %v7305_v51 = vpop.eup %7304  ;;  %v5243_v37 = vsub.f32 1.0, %v5242_v39  ;;  %vm5291_vm2 = vweird.f32 %v11659_v32  ;;  %v5387_v44 = vmul.f32 %v5224_v17, %v11455_v30  ;;  %v5845_v30 = vpop.f32.mrf.mxu3 }
 0xb97   : > { %v5279_v63 = vsel %vm5278_vm14, %v7297_v41, %v5275_v22  ;;  %v11746_v11 = vadd.f32 1.0, %v7305_v51  ;;  %v5795_v34 = vadd.f32 %v5794_v36, %v5746_v35  ;;  %v5796_v41 = vpop.f32.mrf.mxu2  ;;  %v5258_v25 = vsub.f32 1.0, %v5257_v6  ;;  %vm5293_vm3 = vmor %vm5291_vm2, %vm5292_vm0  ;;  %v12358_v36 = vld [vmem:[#allocation9_spill] sm:$0xff]  ;;  %v5701_v39 = vpop.f32.mrf.mxu0 }
 0xb98   : > { %v5284_v61 = vsel %vm11720_vm13, %v5283_v55, %v5279_v63  ;;  %v5290_v60 = vadd.f32 %v7303_v26, %v5289_v0  ;;  %v5298_v5 = vor.u32 1.1754944e-38, %v5297_v18  ;;  %v5699_v10 = vadd.f32 %v11695_v38, %v5698_v23  ;;  %v5750_v42 = vpop.f32.mrf.mxu1 }
 0xb99   : > { %v5391_v59 = vmul.f32 %v5284_v61, %v11516_v58  ;;  %v5239_v32 = vsel %vm11705_vm10, %v5238_v14, %v5234_v46  ;;  %vm5296_vm1 = vcmp.eq.f32.partialorder %v5295_v50, 8.507059e+37  ;;  %7308 = vrcp.f32 %v11746_v11 }
 0xb9a   : > { %v5294_v2 = vsel %vm5293_vm3, %v7303_v26, %v5290_v60  ;;  %v7307_v58 = vpop.eup %7306  ;;  %v5244_v40 = vmul.f32 %v11674_v19, %v5243_v37  ;;  %v5844_v7 = vadd.f32 %v5843_v33, %v5795_v34  ;;  %v5748_v56 = vadd.f32 %v5747_v28, %v5699_v10  ;;  %v12366_v10 = vld [vmem:[#allocation11_spill] sm:$0xff] }
 0xb9b   : > { %v5299_v3 = vsel %vm5296_vm1, %v5298_v5, %v5294_v2  ;;  %v11756_v54 = vadd.f32 1.0, %v7307_v58  ;;  %v5423_v47 = vpack.c.bf16 %v5391_v59, %v5387_v44  ;;  %v5388_v27 = vmul.f32 %v5239_v32, %v11463_v24 }
 0xb9c   : > { %v5392_v4 = vmul.f32 %v5299_v3, %v11534_v49  ;;  %v11760_v14 = vadd.f32 %v5844_v7, %v12358_v36  ;;  %v5797_v26 = vadd.f32 %v5796_v41, %v5748_v56  ;;  %v5259_v12 = vmul.f32 %v11686_v9, %v5258_v25 }
 0xb9d   : > { %7310 = vrcp.f32 %v11756_v54  ;;  %5730 = vmatmul.bf16.gmra.mxu0 %v5423_v47  ;;  %v5245_v52 = vadd.f32 %v11674_v19, %v5244_v40  ;;  %vm5247_vm4 = vweird.f32 %v11674_v19  ;;  %v5252_v31 = vand.u32 2147483648, %v11637_v45 }
 0xb9e   : > { %5899 = vst [vmem:[#allocation2 + $0x30] sm:$0xff] %v11760_v14  ;;  %v5846_v49 = vadd.f32 %v5845_v30, %v5797_v26  ;;  %v5424_v43 = vpack.c.bf16 %v5392_v4, %v5388_v27  ;;  %v5702_v16 = vadd.f32 %v11695_v38, %v5701_v39  ;;  %vm5246_vm5 = vweird.f32 %v11637_v45  ;;  %v5848_v50 = vpop.f32.mrf.mxu3 }
 0xb9f   : > { %v7309_v24 = vpop.eup %7308  ;;  %v5799_v53 = vpop.f32.mrf.mxu2  ;;  %v5250_v6 = vand.u32 2147483647, %v11637_v45  ;;  %vm11777_vm6 = vmor %vm5246_vm5, %vm5247_vm4  ;;  %v5260_v55 = vadd.f32 %v11686_v9, %v5259_v12  ;;  %vm5262_vm7 = vweird.f32 %v11686_v9  ;;  %vm5261_vm8 = vweird.f32 %v11650_v62 }
 0xba0   : > { %v5302_v20 = vmul.f32 %v7309_v24, %v11746_v11  ;;  %v11773_v33 = vadd.f32 %v5846_v49, %v12359_v21  ;;  %5779 = vmatmul.bf16.gmra.mxu1 %v5424_v43  ;;  %v5751_v8 = vadd.f32 %v5750_v42, %v5702_v16  ;;  %v5249_v45 = vsel %vm11777_vm6, %v11674_v19, %v5245_v52  ;;  %vm11791_vm10 = vmor %vm5261_vm8, %vm5262_vm7  ;;  %v5703_v41 = vpop.f32.mrf.mxu0  ;;  %v5752_v44 = vpop.f32.mrf.mxu1 }
 0xba1   : > { %v5310_v17 = vand.u32 2147483647, %v11746_v11  ;;  %v5253_v57 = vor.u32 1.1754944e-38, %v5252_v31  ;;  %v5265_v63 = vand.u32 2147483647, %v11650_v62  ;;  %v5312_v0 = vand.u32 2147483648, %v11746_v11 }
 0xba2   : > { %v5303_v1 = vsub.f32 1.0, %v5302_v20  ;;  %5900 = vst [vmem:[#allocation2] sm:$0xff] %v11773_v33  ;;  %v5800_v35 = vadd.f32 %v5799_v53, %v5751_v8  ;;  %vm5251_vm9 = vcmp.eq.f32.partialorder %v5250_v6, 8.507059e+37  ;;  %vm5307_vm11 = vweird.f32 %v7309_v24 }
 0xba3   : > { %v7311_v18 = vpop.eup %7310  ;;  %v5254_v37 = vsel %vm5251_vm9, %v5253_v57, %v5249_v45  ;;  %v5264_v61 = vsel %vm11791_vm10, %v11686_v9, %v5260_v55  ;;  %v5267_v23 = vand.u32 2147483648, %v11650_v62  ;;  %vm5306_vm12 = vweird.f32 %v11746_v11  ;;  %v12368_v55 = vld [vmem:[#allocation13_spill] sm:$0xff] }
 0xba4   : > { %v5304_v19 = vmul.f32 %v7309_v24, %v5303_v1  ;;  %v5317_v46 = vmul.f32 %v7311_v18, %v11756_v54  ;;  %v5849_v28 = vadd.f32 %v5848_v50, %v5800_v35  ;;  %vm11801_vm13 = vcmp.eq.f32.partialorder %v5310_v17, 8.507059e+37  ;;  %vm5308_vm14 = vmor %vm5306_vm12, %vm5307_vm11 }
 0xba5   : > { %v5313_v25 = vor.u32 1.1754944e-38, %v5312_v0  ;;  %v5327_v5 = vand.u32 2147483648, %v11756_v54  ;;  %v5704_v62 = vadd.f32 %v11695_v38, %v5703_v41  ;;  %vm5322_vm15 = vweird.f32 %v7311_v18 }
 0xba6   : > { %v5305_v59 = vadd.f32 %v7309_v24, %v5304_v19  ;;  %v5318_v34 = vsub.f32 1.0, %v5317_v46  ;;  %v11807_v32 = vadd.f32 %v5849_v28, %v12366_v10  ;;  %v5325_v11 = vand.u32 2147483647, %v11756_v54  ;;  %v5850_v47 = vpop.f32.mrf.mxu3 }
 0xba7   : > { %v5801_v9 = vpop.f32.mrf.mxu2  ;;  %vm5266_vm0 = vcmp.eq.f32.partialorder %v5265_v63, 8.507059e+37  ;;  %v5268_v40 = vor.u32 1.1754944e-38, %v5267_v23  ;;  %v5753_v7 = vadd.f32 %v5752_v44, %v5704_v62  ;;  %v5389_v56 = vmul.f32 %v5254_v37, %v11468_v48  ;;  %v12369_v63 = vld [vmem:[#allocation14_spill] sm:$0xff]  ;;  %v12370_v44 = vld [vmem:[#allocation15_spill] sm:$0xff] }
 0xba8   : > { %v5309_v2 = vsel %vm5308_vm14, %v7309_v24, %v5305_v59  ;;  %v5319_v58 = vmul.f32 %v7311_v18, %v5318_v34  ;;  %5901 = vst [vmem:[#allocation2 + $0x58] sm:$0xff] %v11807_v32  ;;  %vm5321_vm2 = vweird.f32 %v11756_v54  ;;  %v5328_v36 = vor.u32 1.1754944e-38, %v5327_v5  ;;  %v5706_v48 = vpop.f32.mrf.mxu0  ;;  %v5755_v24 = vpop.f32.mrf.mxu1 }
 0xba9   : > { %v5314_v3 = vsel %vm11801_vm13, %v5313_v25, %v5309_v2  ;;  %v5269_v27 = vsel %vm5266_vm0, %v5268_v40, %v5264_v61  ;;  %vm5323_vm3 = vmor %vm5321_vm2, %vm5322_vm15  ;;  %v5802_v26 = vadd.f32 %v5801_v9, %v5753_v7  ;;  %vm5326_vm1 = vcmp.eq.f32.partialorder %v5325_v11, 8.507059e+37  ;;  %v12371_v40 = vld [vmem:[#allocation16_spill] sm:$0xff] }
 0xbaa   : > { %v5393_v30 = vmul.f32 %v5314_v3, %v11647_v15  ;;  %v5320_v4 = vadd.f32 %v7311_v18, %v5319_v58  ;;  %v5390_v42 = vmul.f32 %v5269_v27, %v11495_v29  ;;  %v12367_v15 = vld [vmem:[#allocation12_spill] sm:$0xff]  ;;  %v5707_v54 = vadd.f32 %v11695_v38, %v5706_v48 }
 0xbab   : > { %v5851_v39 = vadd.f32 %v5850_v47, %v5802_v26 }
 0xbac   : > { %v5324_v12 = vsel %vm5323_vm3, %v7311_v18, %v5320_v4  ;;  %v5425_v52 = vpack.c.bf16 %v5393_v30, %v5389_v56  ;;  %v5756_v6 = vadd.f32 %v5755_v24, %v5707_v54 }
 0xbad   : > { %v5329_v49 = vsel %vm5326_vm1, %v5328_v36, %v5324_v12  ;;  %v11820_v31 = vadd.f32 %v5851_v39, %v12367_v15  ;;  %v12372_v12 = vld [vmem:[#allocation17_spill] sm:$0xff] }
 0xbae   : > { %v5394_v43 = vmul.f32 %v5329_v49, %v11672_v13  ;;  %5828 = vmatmul.bf16.gmra.mxu2 %v5425_v52  ;;  %v5853_v20 = vpop.f32.mrf.mxu3 }
 0xbaf   : > { %v5804_v16 = vpop.f32.mrf.mxu2  ;;  %5902 = vst [vmem:[#allocation2 + $0x18] sm:$0xff] %v11820_v31 }
 0xbb0   : > { %v5426_v53 = vpack.c.bf16 %v5394_v43, %v5390_v42  ;;  %v5805_v21 = vadd.f32 %v5804_v16, %v5756_v6  ;;  %v5708_v29 = vpop.f32.mrf.mxu0  ;;  %v5757_v45 = vpop.f32.mrf.mxu1  ;;  %v12373_v16 = vld [vmem:[#allocation18_spill] sm:$0xff] }
 0xbb1   : > { %v5709_v8 = vadd.f32 %v11695_v38, %v5708_v29 }
 0xbb2   : > { %5877 = vmatmul.bf16.gmra.mxu3 %v5426_v53  ;;  %v5854_v22 = vadd.f32 %v5853_v20, %v5805_v21 }
 0xbb3   : > { %v5758_v17 = vadd.f32 %v5757_v45, %v5709_v8 }
 0xbb4   : > { %v11825_v13 = vadd.f32 %v5854_v22, %v12368_v55 }
 0xbb6   : > { %5903 = vst [vmem:[#allocation2 + $0x50] sm:$0xff] %v11825_v13  ;;  %v5855_v18 = vpop.f32.mrf.mxu3 }
 0xbb7   : > { %v5806_v1 = vpop.f32.mrf.mxu2 }
 0xbb8   : > { %v5807_v50 = vadd.f32 %v5806_v1, %v5758_v17  ;;  %v12374_v1 = vld [vmem:[#allocation19_spill] sm:$0xff] }
 0xbba   : > { %v5856_v57 = vadd.f32 %v5855_v18, %v5807_v50 }
 0xbbc   : > { %v11830_v0 = vadd.f32 %v5856_v57, %v12369_v63 }
 0xbbe   : > { %5904 = vst [vmem:[#allocation2 + $0x68] sm:$0xff] %v11830_v0 }
 0xbc6   : > { %v5711_v35 = vpop.f32.mrf.mxu0 }
 0xbc7   : > { %v5712_v19 = vadd.f32 %v11695_v38, %v5711_v35 }
 0xbc9   : > { %v5760_v51 = vpop.f32.mrf.mxu1 }
 0xbca   : > { %v5761_v23 = vadd.f32 %v5760_v51, %v5712_v19 }
 0xbce   : > { %v5713_v46 = vpop.f32.mrf.mxu0 }
 0xbcf   : > { %v5714_v59 = vadd.f32 %v11695_v38, %v5713_v46 }
 0xbd1   : > { %v5762_v61 = vpop.f32.mrf.mxu1 }
 0xbd2   : > { %v5763_v5 = vadd.f32 %v5762_v61, %v5714_v59 }
 0xbda   : > { %v5809_v37 = vpop.f32.mrf.mxu2 }
 0xbdb   : > { %v5810_v28 = vadd.f32 %v5809_v37, %v5761_v23  ;;  %v12375_v37 = vld [vmem:[#allocation20_spill] sm:$0xff] }
 0xbe0   : > { %v5858_v60 = vpop.f32.mrf.mxu3 }
 0xbe1   : > { %v5859_v34 = vadd.f32 %v5858_v60, %v5810_v28 }
 0xbe2   : > { %v5811_v41 = vpop.f32.mrf.mxu2 }
 0xbe3   : > { %v11836_v25 = vadd.f32 %v5859_v34, %v12370_v44  ;;  %v5812_v9 = vadd.f32 %v5811_v41, %v5763_v5  ;;  %v12376_v5 = vld [vmem:[#allocation21_spill] sm:$0xff] }
 0xbe4   : > { %v5716_v10 = vpop.f32.mrf.mxu0  ;;  %v5765_v62 = vpop.f32.mrf.mxu1 }
 0xbe5   : > { %5905 = vst [vmem:[#allocation2 + $0x8] sm:$0xff] %v11836_v25  ;;  %v5717_v58 = vadd.f32 %v11695_v38, %v5716_v10 }
 0xbe7   : > { %v5766_v7 = vadd.f32 %v5765_v62, %v5717_v58 }
 0xbe8   : > { %v5860_v2 = vpop.f32.mrf.mxu3 }
 0xbe9   : > { %v5861_v11 = vadd.f32 %v5860_v2, %v5812_v9 }
 0xbeb   : > { %v11841_v3 = vadd.f32 %v5861_v11, %v12371_v40 }
 0xbec   : > { %v5718_v56 = vpop.f32.mrf.mxu0  ;;  %v5767_v30 = vpop.f32.mrf.mxu1 }
 0xbed   : > { %5906 = vst [vmem:[#allocation2 + $0x48] sm:$0xff] %v11841_v3  ;;  %v5814_v4 = vpop.f32.mrf.mxu2  ;;  %v5719_v36 = vadd.f32 %v11695_v38, %v5718_v56 }
 0xbee   : > { %v5815_v47 = vadd.f32 %v5814_v4, %v5766_v7  ;;  %v12377_v7 = vld [vmem:[#allocation22_spill] sm:$0xff] }
 0xbef   : > { %v5768_v49 = vadd.f32 %v5767_v30, %v5719_v36 }
 0xbf0   : > { %v5863_v27 = vpop.f32.mrf.mxu3 }
 0xbf1   : > { %v5864_v26 = vadd.f32 %v5863_v27, %v5815_v47 }
 0xbf3   : > { %v11846_v52 = vadd.f32 %v5864_v26, %v12372_v12 }
 0xbf4   : > { %v5721_v39 = vpop.f32.mrf.mxu0 }
 0xbf5   : > { %5907 = vst [vmem:[#allocation2 + $0x40] sm:$0xff] %v11846_v52  ;;  %v5816_v42 = vpop.f32.mrf.mxu2  ;;  %v5770_v43 = vpop.f32.mrf.mxu1  ;;  %v5722_v15 = vadd.f32 %v11695_v38, %v5721_v39 }
 0xbf6   : > { %v5817_v48 = vadd.f32 %v5816_v42, %v5768_v49 }
 0xbf7   : > { %v5771_v6 = vadd.f32 %v5770_v43, %v5722_v15 }
 0xbf8   : > { %v5865_v24 = vpop.f32.mrf.mxu3 }
 0xbf9   : > { %v5866_v54 = vadd.f32 %v5865_v24, %v5817_v48  ;;  %v12378_v24 = vld [vmem:[#allocation23_spill] sm:$0xff] }
 0xbfb   : > { %v11851_v53 = vadd.f32 %v5866_v54, %v12373_v16 }
 0xbfc   : > { %v5723_v20 = vpop.f32.mrf.mxu0 }
 0xbfd   : > { %5908 = vst [vmem:[#allocation2 + $0x20] sm:$0xff] %v11851_v53  ;;  %v5772_v29 = vpop.f32.mrf.mxu1  ;;  %v5724_v8 = vadd.f32 %v11695_v38, %v5723_v20 }
 0xbfe   : > { %v5819_v21 = vpop.f32.mrf.mxu2 }
 0xbff   : > { %v5820_v22 = vadd.f32 %v5819_v21, %v5771_v6  ;;  %v5773_v50 = vadd.f32 %v5772_v29, %v5724_v8  ;;  %v12379_v21 = vld [vmem:[#allocation24_spill] sm:$0xff] }
 0xc01   : > { %v5868_v55 = vpop.f32.mrf.mxu3 }
 0xc02   : > { %v5869_v45 = vadd.f32 %v5868_v55, %v5820_v22 }
 0xc04   : > { %v5893_v17 = vadd.f32 %v5869_v45, %v12374_v1 }
 0xc05   : > { %v5726_v18 = vpop.f32.mrf.mxu0 }
 0xc06   : > { %5909 = vst [vmem:[#allocation2 + $0x10] sm:$0xff] %v5893_v17  ;;  %v5821_v57 = vpop.f32.mrf.mxu2  ;;  %v5727_v51 = vadd.f32 %v11695_v38, %v5726_v18  ;;  %v5775_v46 = vpop.f32.mrf.mxu1 }
 0xc07   : > { %v5822_v63 = vadd.f32 %v5821_v57, %v5773_v50 }
 0xc08   : > { %v5776_v23 = vadd.f32 %v5775_v46, %v5727_v51 }
 0xc09   : > { %v5870_v35 = vpop.f32.mrf.mxu3 }
 0xc0a   : > { %v5871_v19 = vadd.f32 %v5870_v35, %v5822_v63 }
 0xc0c   : > { %v5894_v61 = vadd.f32 %v5871_v19, %v12375_v37 }
 0xc0d   : > { %v5728_v59 = vpop.f32.mrf.mxu0 }
 0xc0e   : > { %5910 = vst [vmem:[#allocation2 + $0x38] sm:$0xff] %v5894_v61  ;;  %v5824_v28 = vpop.f32.mrf.mxu2  ;;  %v5729_v41 = vadd.f32 %v11695_v38, %v5728_v59  ;;  %v5777_v62 = vpop.f32.mrf.mxu1 }
 0xc0f   : > { %v5825_v60 = vadd.f32 %v5824_v28, %v5776_v23 }
 0xc10   : > { %v5778_v9 = vadd.f32 %v5777_v62, %v5729_v41 }
 0xc11   : > { %v5873_v34 = vpop.f32.mrf.mxu3 }
 0xc12   : > { %v5874_v44 = vadd.f32 %v5873_v34, %v5825_v60 }
 0xc14   : > { %v5895_v10 = vadd.f32 %v5874_v44, %v12376_v5 }
 0xc16   : > { %5911 = vst [vmem:[#allocation2 + $0x60] sm:$0xff] %v5895_v10  ;;  %v5826_v2 = vpop.f32.mrf.mxu2 }
 0xc17   : > { %v5827_v58 = vadd.f32 %v5826_v2, %v5778_v9 }
 0xc19   : > { %v5875_v11 = vpop.f32.mrf.mxu3 }
 0xc1a   : > { %v5876_v40 = vadd.f32 %v5875_v11, %v5827_v58  ;;  %v5731_v30 = vpop.f32.mrf.mxu0 }
 0xc1b   : > { %v5732_v4 = vadd.f32 %v11695_v38, %v5731_v30 }
 0xc1c   : > { %v5896_v56 = vadd.f32 %v5876_v40, %v12377_v7 }
 0xc1d   : > { %v5780_v47 = vpop.f32.mrf.mxu1 }
 0xc1e   : > { %5912 = vst [vmem:[#allocation2 + $0x70] sm:$0xff] %v5896_v56  ;;  %v5781_v27 = vadd.f32 %v5780_v47, %v5732_v4 }
 0xc22   : > { %v5733_v36 = vpop.f32.mrf.mxu0 }
 0xc23   : > { %v5734_v49 = vadd.f32 %v11695_v38, %v5733_v36 }
 0xc25   : > { %v5782_v43 = vpop.f32.mrf.mxu1 }
 0xc26   : > { %v5783_v48 = vadd.f32 %v5782_v43, %v5734_v49 }
 0xc31   : > { %v5829_v26 = vpop.f32.mrf.mxu2 }
 0xc32   : > { %v5830_v12 = vadd.f32 %v5829_v26, %v5781_v27 }
 0xc35   : > { %v5878_v39 = vpop.f32.mrf.mxu3 }
 0xc36   : > { %v5879_v42 = vadd.f32 %v5878_v39, %v5830_v12 }
 0xc38   : > { %v5897_v15 = vadd.f32 %v5879_v42, %v12378_v24 }
 0xc39   : > { %v5831_v54 = vpop.f32.mrf.mxu2 }
 0xc3a   : > { %5913 = vst [vmem:[#allocation2 + $0x78] sm:$0xff] %v5897_v15  ;;  %v5832_v16 = vadd.f32 %v5831_v54, %v5783_v48 }
 0xc3d   : > { %v5880_v6 = vpop.f32.mrf.mxu3 }
 0xc3e   : > { %v5881_v20 = vadd.f32 %v5880_v6, %v5832_v16  ;;  %5918 = sbr.rel (%p6631_p8) target bundleno = 3155 (0xc53), region = 92 }
 0xc40   : > { %v5898_v22 = vadd.f32 %v5881_v20, %v12379_v21 }
 0xc42   : > { %5914 = vst [vmem:[#allocation2 + $0x28] sm:$0xff] %v5898_v22 }
 0xc43   : > { %5919 = vst [vmem:[%s7565_s6] sm:$0xff] %v11760_v14 }
 0xc44   : > { %5923 = vst [vmem:[%s7565_s6 + $0x20] sm:$0xff] %v11825_v13 }
 0xc45   : > { %5920 = vst [vmem:[%s7565_s6 + $0x8] sm:$0xff] %v11773_v33 }
 0xc46   : > { %5924 = vst [vmem:[%s7565_s6 + $0x28] sm:$0xff] %v11830_v0 }
 0xc47   : > { %5927 = vst [vmem:[%s7565_s6 + $0x40] sm:$0xff] %v11846_v52 }
 0xc48   : > { %5921 = vst [vmem:[%s7565_s6 + $0x10] sm:$0xff] %v11807_v32 }
 0xc49   : > { %5925 = vst [vmem:[%s7565_s6 + $0x30] sm:$0xff] %v11836_v25 }
 0xc4a   : > { %5928 = vst [vmem:[%s7565_s6 + $0x48] sm:$0xff] %v11851_v53 }
 0xc4b   : > { %5931 = vst [vmem:[%s7565_s6 + $0x60] sm:$0xff] %v5895_v10 }
 0xc4c   : > { %5922 = vst [vmem:[%s7565_s6 + $0x18] sm:$0xff] %v11820_v31 }
 0xc4d   : > { %5926 = vst [vmem:[%s7565_s6 + $0x38] sm:$0xff] %v11841_v3 }
 0xc4e   : > { %5929 = vst [vmem:[%s7565_s6 + $0x50] sm:$0xff] %v5893_v17 }
 0xc4f   : > { %5932 = vst [vmem:[%s7565_s6 + $0x68] sm:$0xff] %v5896_v56 }
 0xc50   : > { %5930 = vst [vmem:[%s7565_s6 + $0x58] sm:$0xff] %v5894_v61 }
 0xc51   : > { %5933 = vst [vmem:[%s7565_s6 + $0x70] sm:$0xff] %v5897_v15 }
 0xc52   : > { %5934 = vst [vmem:[%s7565_s6 + $0x78] sm:$0xff] %v5898_v22 }
 0xc53 PF: > { %s12381_s29 = sld [smem:[#allocation6_spill]] }
 0xc54   : > { %s12382_s21 = sld [smem:[#allocation4_spill]] }
 0xc55   : > { %s12383_s22 = sld [smem:[#allocation5_spill]] }
 0xc56   : > { %s12384_s23 = sld [smem:[#allocation7_spill]] }
 0xc57   : > { %s12385_s24 = sld [smem:[#allocation8_spill]] }
 0xc59   : > { %s26_s25 = sadd.s32 1, %s12381_s29  }
 0xc5a   : > { %p23_p9 = scmp.ge.s32.totalorder %s26_s25, 6  }
 0xc5c   :  { %25 = sbr.rel (!%p23_p9) target bundleno = 11 (0xb), region = 158 }

// kernel: clip4clip_forward.6
= control target key start
LH: loop header
LB: loop body
LE: loop exit
PB: predicated region body
PF: predicated region fallthrough
CT: control target
= control target key end

     0   :  { %s3021_s29 = smov 0   ;;  %s3023_s30 = smov 0   ;;  %s3577_s0 = inlined_call_operand.vmem [shape: f32[2,8,128], index: 0, kind: input, shape index: {}]   ;;  %s3578_s1 = inlined_call_operand.vmem [shape: f32[8,8], index: 1, kind: input, shape index: {}]   ;;  %s3579_s2 = inlined_call_operand.vmem [shape: f32[2,1,128], index: 2, kind: input, shape index: {}]   ;;  %s3580_s3 = inlined_call_operand.vmem [shape: f32[2,1,128], index: 3, kind: input, shape index: {}]   ;;  %s3581_s4 = inlined_call_operand.vmem [shape: bf16[2,128,384], index: 4, kind: input, shape index: {}]   ;;  %s3582_s5 = inlined_call_operand.vmem [shape: f32[2,1,384], index: 5, kind: input, shape index: {}]   ;;  %s3583_s6 = inlined_call_operand.vmem [shape: bf16[2,128,128], index: 6, kind: input, shape index: {}]   ;;  %s3584_s7 = inlined_call_operand.vmem [shape: f32[2,1,128], index: 7, kind: input, shape index: {}]   ;;  %s3585_s8 = inlined_call_operand.vmem [shape: f32[2,1,128], index: 8, kind: input, shape index: {}]   ;;  %s3586_s9 = inlined_call_operand.vmem [shape: f32[2,1,128], index: 9, kind: input, shape index: {}]   ;;  %s3587_s10 = inlined_call_operand.vmem [shape: bf16[2,128,512], index: 10, kind: input, shape index: {}]   ;;  %s3588_s11 = inlined_call_operand.vmem [shape: f32[2,1,512], index: 11, kind: input, shape index: {}]   ;;  %s3589_s12 = inlined_call_operand.vmem [shape: bf16[2,512,128], index: 12, kind: input, shape index: {}]   ;;  %s3590_s13 = inlined_call_operand.vmem [shape: f32[2,1,128], index: 13, kind: input, shape index: {}]   ;;  %s3591_s14 = inlined_call_operand.vmem [shape: f32[2,8,128], index: 14, kind: output, shape index: {}]  }
   0x1   :  { %3595 = sst [smem:[#allocation6_spill]] %s3578_s1  ;;  %s3025_s15 = smov 0  }
   0x2   :  { %3596 = sst [smem:[#allocation7_spill]] %s3580_s3 }
   0x3   :  { %3597 = sst [smem:[#allocation8_spill]] %s3581_s4 }
   0x4   :  { %3598 = sst [smem:[#allocation9_spill]] %s3583_s6 }
   0x5   :  { %3599 = sst [smem:[#allocation10_spill]] %s3591_s14 }
   0x6 LB: > { %3600 = sst [smem:[#allocation3_spill]] %s2938_s30  ;;  %s33_s16 = sadd.s32 1, %s2938_s30  ;;  %s2942_s15 = sphi %s3025_s15, %s24_s15   ;;  %s2938_s30 = sphi %s3023_s30, %s3629_s30   ;;  %s2934_s29 = sphi %s3021_s29, %s3628_s29  }
   0x7   : > { %3601 = sst [smem:[#allocation4_spill]] %s2942_s15  ;;  %p2309_p0 = scmp.ge.s32.totalorder %s2942_s15, 1 }
   0x8   : > { %p34_p1 = scmp.ge.s32.totalorder %s33_s16, 2  ;;  %p531_p2 = scmp.lt.s32.totalorder %s2942_s15, 3 }
   0xa   : > { %s3631_s16 = smov (%p34_p1, %s33_s16), 0  ;;  %p532_p3 = pnand %p2309_p0, %p531_p2 }
   0xb   : > { %3602 = sst [smem:[#allocation5_spill]] %s3631_s16  ;;  %p629_p4 = scmp.lt.s32.totalorder (!%p532_p3), %s2934_s29, 1 }
   0xc   : > { %535 = sbr.rel (%p532_p3) target bundleno = 1937 (0x791), region = 76  ;;  %s3604_s6 = sld [smem:[#allocation9_spill]] (!%p532_p3) }
   0xd   : > { %s3605_s4 = sld [smem:[#allocation8_spill]] (!%p532_p3)  ;;  %p2318_p5 = scmp.ne.s32.totalorder (!%p532_p3), %s2934_s29, 0 }
  0x11   : > { %s3043_s17 = scalar_select %p629_p4, %s2934_s29, 1 }
  0x13   : > { %s2823_s24 = smul.u32 192, %s3043_s17  ;;  %s2724_s25 = sshll.u32 %s3043_s17, 6 }
  0x14   : > { %s2824_s26 = smul.u32 3, %s3043_s17  ;;  %s3059_s18 = scalar_lea.vmem %s3604_s6, %s2724_s25 }
  0x15   : > { %s3064_s30 = scalar_lea.vmem %s3605_s4, %s2823_s24  ;;  %s654_s27 = scalar_lea.vmem %s3585_s8, %s3043_s17 }
  0x16   : > { %s3073_s23 = scalar_lea.vmem %s3582_s5, %s2824_s26  ;;  %s2725_s16 = sshll.u32 %s3043_s17, 8 }
  0x17   : > { %s3087_s4 = scalar_lea.vmem %s3587_s10, %s2725_s16  ;;  %s2315_s15 = sshll.u32 %s3043_s17, 2 }
  0x18   : > { %s3093_s26 = scalar_lea.vmem %s3588_s11, %s2315_s15  ;;  %s3098_s1 = scalar_lea.vmem %s3589_s12, %s2725_s16 }
  0x19   : > { %s674_s28 = scalar_lea.vmem %s3590_s13, %s3043_s17  ;;  %685 = sbr.rel (%p2318_p5) target bundleno = 33 (0x21), region = 80 }
  0x1e   : > { %v686_v0 = vld [vmem:[%s3577_s0] sm:$0xff]  ;;  %v687_v1 = vld [vmem:[%s3577_s0 + $0x8] sm:$0xff] }
  0x1f   : > { %688 = vst [vmem:[#allocation2] sm:$0xff] %v686_v0 }
  0x20   : > { %689 = vst [vmem:[#allocation2 + $0x8] sm:$0xff] %v687_v1 }
  0x21 PF: > { %v2944_v4 = vmov 128.0   ;;  %v2405_v19 = vld [vmem:[%s3064_s30 + $0xa8] sm:$0xf]  ;;  %v2749_v20 = vld [vmem:[%s3064_s30 + $0xb0] sm:$0xf0]  ;;  %s3606_s16 = scalar_lea.vmem %s3579_s2, %s3043_s17  ;;  %s3607_s21 = sld [smem:[#allocation7_spill]] }
  0x22   : > { %2862 = vrcp.f32 %v2944_v4  ;;  %v2748_v21 = vld [vmem:[%s3064_s30 + $0xac] sm:$0xf]  ;;  %v2406_v22 = vor.u32 %v2749_v20, %v2405_v19  ;;  %v2407_v23 = vld [vmem:[%s3064_s30 + $0xb4] sm:$0xf0]  ;;  %v2413_v24 = vld [vmem:[%s3064_s30 + $0xb0] sm:$0xf]  ;;  %s3610_s6 = scalar_lea.vmem %s3584_s7, %s3043_s17  ;;  %s3611_s15 = scalar_lea.vmem %s3586_s9, %s3043_s17 }
  0x23   : > { %v2750_v25 = vld [vmem:[%s3064_s30 + $0xb8] sm:$0xf0]  ;;  %v2410_v26 = vor.u32 %v2748_v21, %v2407_v23  ;;  %v2393_v28 = vld [vmem:[%s3064_s30 + $0x90] sm:$0xf]  ;;  %v2745_v30 = vld [vmem:[%s3064_s30 + $0x94] sm:$0xf] }
  0x24   : > { %v2414_v27 = vor.u32 %v2750_v25, %v2413_v24  ;;  %920 = vmatpush.bf16.msra.mxu0 %v2406_v22  ;;  %v2746_v29 = vld [vmem:[%s3064_s30 + $0x98] sm:$0xf0]  ;;  %v2395_v32 = vld [vmem:[%s3064_s30 + $0x9c] sm:$0xf0]  ;;  %v2401_v33 = vld [vmem:[%s3064_s30 + $0x98] sm:$0xf] }
  0x25   : > { %934 = vmatpush.bf16.msra.mxu1 %v2410_v26  ;;  %v2394_v31 = vor.u32 %v2746_v29, %v2393_v28  ;;  %v2747_v34 = vld [vmem:[%s3064_s30 + $0xa0] sm:$0xf0]  ;;  %v2398_v35 = vor.u32 %v2745_v30, %v2395_v32  ;;  %v2381_v37 = vld [vmem:[%s3064_s30 + $0x78] sm:$0xf]  ;;  %v2742_v39 = vld [vmem:[%s3064_s30 + $0x7c] sm:$0xf] }
  0x26   : > { %v3111_v2 = vld [vmem:[#allocation2] sm:$0xff]  ;;  %948 = vmatpush.bf16.msra.mxu2 %v2414_v27  ;;  %v2402_v36 = vor.u32 %v2747_v34, %v2401_v33  ;;  %v2383_v41 = vld [vmem:[%s3064_s30 + $0x84] sm:$0xf0]  ;;  %v2744_v43 = vld [vmem:[%s3064_s30 + $0x88] sm:$0xf0]  ;;  %vm967_vm7 = vcmask 523264  }
  0x27   : > { %694 = vadd.xlane.f32.xlu0 %v3111_v2  ;;  %v3114_v3 = vld [vmem:[#allocation2 + $0x8] sm:$0xff]  ;;  %v2743_v38 = vld [vmem:[%s3064_s30 + $0x80] sm:$0xf0]  ;;  %v2389_v42 = vld [vmem:[%s3064_s30 + $0x80] sm:$0xf]  ;;  %v2386_v44 = vor.u32 %v2742_v39, %v2383_v41  ;;  %s3608_s22 = scalar_lea.vmem %s3607_s21, %s3043_s17  ;;  %vm1040_vm8 = vcmask 1043456  }
  0x28   : > { %v2863_v5 = vpop.eup %2862  ;;  %921 = vmatpush.bf16.msra.mxu0 %v2394_v31  ;;  %v2382_v40 = vor.u32 %v2743_v38, %v2381_v37  ;;  %v2390_v45 = vor.u32 %v2744_v43, %v2389_v42  ;;  %v2369_v46 = vld [vmem:[%s3064_s30 + $0x60] sm:$0xf]  ;;  %v2740_v47 = vld [vmem:[%s3064_s30 + $0x68] sm:$0xf0]  ;;  %v2739_v48 = vld [vmem:[%s3064_s30 + $0x64] sm:$0xf] }
  0x29   : > { %v699_v6 = vmul.f32 128.0, %v2863_v5  ;;  %vm703_vm0 = vweird.f32 %v2863_v5  ;;  %935 = vmatpush.bf16.msra.mxu1 %v2398_v35  ;;  %v2370_v49 = vor.u32 %v2740_v47, %v2369_v46  ;;  %v2371_v50 = vld [vmem:[%s3064_s30 + $0x6c] sm:$0xf0]  ;;  %v2377_v51 = vld [vmem:[%s3064_s30 + $0x68] sm:$0xf]  ;;  %s3609_s24 = sld [smem:[#allocation6_spill]] }
  0x2a   : > { %949 = vmatpush.bf16.msra.mxu2 %v2402_v36  ;;  %v2741_v52 = vld [vmem:[%s3064_s30 + $0x70] sm:$0xf0]  ;;  %v2374_v53 = vor.u32 %v2739_v48, %v2371_v50  ;;  %v2357_v55 = vld [vmem:[%s3064_s30 + $0x48] sm:$0xf]  ;;  %v2736_v57 = vld [vmem:[%s3064_s30 + $0x4c] sm:$0xf] }
  0x2b   : > { %v700_v7 = vsub.f32 1.0, %v699_v6  ;;  %v2378_v54 = vor.u32 %v2741_v52, %v2377_v51  ;;  %v2737_v56 = vld [vmem:[%s3064_s30 + $0x50] sm:$0xf0]  ;;  %v2359_v59 = vld [vmem:[%s3064_s30 + $0x54] sm:$0xf0]  ;;  %vm1010_vm9 = vcmask 64512  }
  0x2c   : > { %922 = vmatpush.bf16.msra.mxu0 %v2382_v40  ;;  %v2358_v58 = vor.u32 %v2737_v56, %v2357_v55  ;;  %v2365_v60 = vld [vmem:[%s3064_s30 + $0x50] sm:$0xf]  ;;  %v2738_v61 = vld [vmem:[%s3064_s30 + $0x58] sm:$0xf0]  ;;  %v2362_v62 = vor.u32 %v2736_v57, %v2359_v59  ;;  %v2733_v4 = vld [vmem:[%s3064_s30 + $0x34] sm:$0xf] }
  0x2d   : > { %v701_v8 = vmul.f32 %v2863_v5, %v700_v7  ;;  %936 = vmatpush.bf16.msra.mxu1 %v2386_v44  ;;  %v2366_v63 = vor.u32 %v2738_v61, %v2365_v60  ;;  %v2345_v0 = vld [vmem:[%s3064_s30 + $0x30] sm:$0xf]  ;;  %v2734_v1 = vld [vmem:[%s3064_s30 + $0x38] sm:$0xf0]  ;;  %v2347_v6 = vld [vmem:[%s3064_s30 + $0x3c] sm:$0xf0] }
  0x2e   : > { %950 = vmatpush.bf16.msra.mxu2 %v2390_v45  ;;  %v2353_v7 = vld [vmem:[%s3064_s30 + $0x38] sm:$0xf]  ;;  %v2341_v19 = vld [vmem:[%s3064_s30 + $0x20] sm:$0xf]  ;;  %v2732_v20 = vld [vmem:[%s3064_s30 + $0x28] sm:$0xf0] }
  0x2f   : > { %696 = vadd.xlane.f32.xlu0 %v3114_v3  ;;  %v702_v9 = vadd.f32 %v2863_v5, %v701_v8  ;;  %v2735_v8 = vld [vmem:[%s3064_s30 + $0x40] sm:$0xf0]  ;;  %v2342_v22 = vor.u32 %v2732_v20, %v2341_v19  ;;  %v2321_v23 = vld [vmem:[%s3064_s30] sm:$0xf]  ;;  %v2728_v24 = vld [vmem:[%s3064_s30 + $0x8] sm:$0xf0] }
  0x30   : > { %923 = vmatpush.bf16.msra.mxu0 %v2370_v49  ;;  %v2727_v25 = vld [vmem:[%s3064_s30 + $0x4] sm:$0xf]  ;;  %v2322_v27 = vor.u32 %v2728_v24, %v2321_v23  ;;  %v2323_v28 = vld [vmem:[%s3064_s30 + $0xc] sm:$0xf0]  ;;  %v2329_v29 = vld [vmem:[%s3064_s30 + $0x8] sm:$0xf] }
  0x31   : > { %v3117_v10 = vsel %vm703_vm0, %v2863_v5, %v702_v9  ;;  %937 = vmatpush.bf16.msra.mxu1 %v2374_v53  ;;  %v2346_v5 = vor.u32 %v2734_v1, %v2345_v0  ;;  %v2350_v9 = vor.u32 %v2733_v4, %v2347_v6  ;;  %v2729_v30 = vld [vmem:[%s3064_s30 + $0x10] sm:$0xf0]  ;;  %v2326_v32 = vor.u32 %v2727_v25, %v2323_v28  ;;  %v2856_v51 = vld [vmem:[%s3606_s16] ss:$0 sm:$0xff]  ;;  %p2719_p6 = scmp.ne.s32.totalorder %s2934_s29, 1 }
  0x32   : > { %951 = vmatpush.bf16.msra.mxu2 %v2378_v54  ;;  %v2330_v33 = vor.u32 %v2729_v30, %v2329_v29  ;;  %v2857_v56 = vld [vmem:[%s3608_s22] ss:$0 sm:$0xff] }
  0x33   : > { %v784_v60 = vld [vmem:[%s3073_s23] sm:$0x7]  ;;  %s2945_s23 = smov 64  }
  0x34   : > { %924 = vmatpush.bf16.msra.mxu0 %v2358_v58  ;;  %v787_v61 = vperm.slane %v784_v60, 1 }
  0x35   : > { %938 = vmatpush.bf16.msra.mxu1 %v2362_v62  ;;  %v786_v62 = vperm.slane %v784_v60, 0 }
  0x36   : > { %952 = vmatpush.bf16.msra.mxu2 %v2366_v63 }
  0x38   : > { %925 = vmatpush.bf16.msra.mxu0 %v2346_v5  ;;  %v788_v5 = vperm.slane %v784_v60, 2 }
  0x39   : > { %939 = vmatpush.bf16.msra.mxu1 %v2350_v9 }
  0x9a   : > { %v695_v11 = vpop.xlane.xlu0 %694 }
  0x9b   : > { %v705_v12 = vmul.f32 %v3117_v10, %v695_v11  ;;  %v2354_v11 = vor.u32 %v2735_v8, %v2353_v7 }
  0x9d   : > { %v3121_v13 = vsub.f32 %v3111_v2, %v705_v12  ;;  %953 = vmatpush.bf16.msra.mxu2 %v2354_v11  ;;  %v2333_v12 = vld [vmem:[%s3064_s30 + $0x18] sm:$0xf] }
  0x9f   : > { %v709_v14 = vmul.f32 %v3121_v13, %v3121_v13 }
  0xa1   : > { %711 = vadd.xlane.f32.xlu1 %v709_v14  ;;  %v2731_v14 = vld [vmem:[%s3064_s30 + $0x20] sm:$0xf0]  ;;  %954 = vmatpush.bf16.msra.mxu2 %v2342_v22 }
  0xa2   : > { %v697_v15 = vpop.xlane.xlu0 %696 }
  0xa3   : > { %v706_v16 = vmul.f32 %v3117_v10, %v697_v15  ;;  %v2730_v15 = vld [vmem:[%s3064_s30 + $0x1c] sm:$0xf] }
  0xa5   : > { %v3127_v17 = vsub.f32 %v3114_v3, %v706_v16  ;;  %v2334_v16 = vor.u32 %v2731_v14, %v2333_v12  ;;  %955 = vmatpush.bf16.msra.mxu2 %v2330_v33 }
  0xa7   : > { %v710_v18 = vmul.f32 %v3127_v17, %v3127_v17  ;;  %926 = vmatpush.bf16.msra.mxu0 %v2334_v16 }
  0xa9   : > { %713 = vadd.xlane.f32.xlu1 %v710_v18  ;;  %v2335_v18 = vld [vmem:[%s3064_s30 + $0x24] sm:$0xf0] }
  0xaa   : > { %v2338_v21 = vor.u32 %v2730_v15, %v2335_v18 }
  0xab   : > { %927 = vmatpush.bf16.msra.mxu0 %v2322_v27 }
  0xac   : > { %940 = vmatpush.bf16.msra.mxu1 %v2338_v21 }
  0xb0   : > { %941 = vmatpush.bf16.msra.mxu1 %v2326_v32 }
 0x114   : > { %v712_v26 = vpop.xlane.xlu1 %711 }
 0x115   : > { %v715_v31 = vmul.f32 %v712_v26, %v3117_v10 }
 0x117   : > { %v717_v34 = vadd.f32 1e-05, %v715_v31 }
 0x119   : > { %2864 = vrsqrt.f32 %v717_v34  ;;  %vm725_vm2 = vweird.f32 %v717_v34 }
 0x11c   : > { %v714_v35 = vpop.xlane.xlu1 %713 }
 0x11d   : > { %v716_v36 = vmul.f32 %v714_v35, %v3117_v10 }
 0x11f   : > { %v2865_v37 = vpop.eup %2864  ;;  %v718_v38 = vadd.f32 1e-05, %v716_v36 }
 0x120   : > { %v720_v39 = vmul.f32 %v2865_v37, %v717_v34  ;;  %vm726_vm1 = vweird.f32 %v2865_v37 }
 0x121   : > { %2866 = vrsqrt.f32 %v718_v38  ;;  %vm727_vm3 = vmor %vm725_vm2, %vm726_vm1  ;;  %vm735_vm5 = vweird.f32 %v718_v38 }
 0x122   : > { %v721_v40 = vmul.f32 %v2865_v37, %v720_v39 }
 0x124   : > { %v722_v41 = vmul.f32 0.5, %v721_v40 }
 0x126   : > { %v723_v42 = vsub.f32 1.5, %v722_v41  ;;  %v962_v41 = vld [vmem:[%s3609_s24] sm:$0xff] }
 0x127   : > { %v2867_v43 = vpop.eup %2866 }
 0x128   : > { %v724_v44 = vmul.f32 %v2865_v37, %v723_v42  ;;  %v730_v45 = vmul.f32 %v2867_v43, %v718_v38  ;;  %vm736_vm4 = vweird.f32 %v2867_v43 }
 0x129   : > { %vm737_vm6 = vmor %vm735_vm5, %vm736_vm4 }
 0x12a   : > { %v731_v46 = vmul.f32 %v2867_v43, %v730_v45  ;;  %v728_v47 = vsel %vm727_vm3, %v2865_v37, %v724_v44 }
 0x12b   : > { %v739_v50 = vmul.f32 %v728_v47, %v3121_v13 }
 0x12c   : > { %v732_v48 = vmul.f32 0.5, %v731_v46 }
 0x12d   : > { %v744_v55 = vmul.f32 %v2856_v51, %v739_v50 }
 0x12e   : > { %v733_v49 = vsub.f32 1.5, %v732_v48 }
 0x12f   : > { %v749_v13 = vadd.f32 %v2857_v56, %v744_v55 }
 0x130   : > { %v734_v52 = vmul.f32 %v2867_v43, %v733_v49 }
 0x132   : > { %v738_v53 = vsel %vm737_vm6, %v2867_v43, %v734_v52 }
 0x133   : > { %v740_v54 = vmul.f32 %v738_v53, %v3127_v17 }
 0x135   : > { %v745_v57 = vmul.f32 %v2856_v51, %v740_v54 }
 0x137   : > { %v750_v58 = vadd.f32 %v2857_v56, %v745_v57 }
 0x139   : > { %v751_v59 = vpack.c.bf16 %v750_v58, %v749_v13 }
 0x13b   : > { %928 = vmatmul.bf16.vlgmr.msra.gmra.mxu0 %v751_v59  ;;  %942 = vmatmul.bf16.vlgmr.msra.gmra.mxu1 %v751_v59 }
 0x13c   : > { %956 = vmatmul.bf16.vlgmr.msra.gmra.mxu2 %v751_v59 }
 0x1b8   : > { %v929_v63 = vpop.f32.mrf.mxu0  ;;  %v943_v0 = vpop.f32.mrf.mxu1 }
 0x1b9   : > { %v944_v1 = vadd.f32 %v943_v0, %v787_v61  ;;  %v930_v4 = vadd.f32 %v929_v63, %v786_v62 }
 0x1bb   : > { %v965_v17 = vpack.c.bf16 %v944_v1, %v944_v1  ;;  %v963_v11 = vpack.c.bf16 %v930_v4, %v930_v4 }
 0x1bd   : > { %v972_v6 = vsel %vm967_vm7, %v965_v17, 0  ;;  %v1082_v7 = vunpack.c.l.b16 %v965_v17  ;;  %v1077_v22 = vunpack.c.l.b16 %v963_v11 }
 0x1be   : > { %981 = vmatpush.bf16.xpose.msra.mxu3 %v972_v6 }
 0x1bf   : > { %v957_v8 = vpop.f32.mrf.mxu2  ;;  %v1083_v9 = vpack.c.b16 %v1082_v7, %v1082_v7  ;;  %v1078_v30 = vpack.c.b16 %v1077_v22, %v1077_v22 }
 0x1c0   : > { %v958_v12 = vadd.f32 %v957_v8, %v788_v5  ;;  %v931_v14 = vpop.f32.mrf.mxu0  ;;  %v945_v15 = vpop.f32.mrf.mxu1 }
 0x1c1   : > { %v932_v16 = vadd.f32 %v931_v14, %v786_v62  ;;  %v946_v18 = vadd.f32 %v945_v15, %v787_v61  ;;  %1084 = vrot.lane.b32.xlu2 %v1083_v9, %s2945_s23 }
 0x1c2   : > { %v1035_v19 = vpack.c.bf16 %v958_v12, %v958_v12 }
 0x1c3   : > { %v964_v20 = vpack.c.bf16 %v932_v16, %v932_v16  ;;  %v966_v21 = vpack.c.bf16 %v946_v18, %v946_v18 }
 0x1c4   : > { %v1042_v26 = vsel %vm1040_vm8, %v1035_v19, 0  ;;  %v1163_v56 = vunpack.c.l.b16 %v1035_v19 }
 0x1c5   : > { %v1106_v23 = vunpack.c.l.b16 %v964_v20  ;;  %v1111_v24 = vunpack.c.l.b16 %v966_v21  ;;  %2415 = vmatmul.msk.bf16.vlgmr.msra.gmra.mxu3 %vm967_vm7, %v963_v11  ;;  %v991_v25 = vsel %vm967_vm7, %v966_v21, 0 }
 0x1c6   : > { %1000 = vmatpush.bf16.xpose.msrb.mxu3 %v991_v25  ;;  %v1164_v58 = vpack.c.b16 %v1163_v56, %v1163_v56  ;;  %v2752_v56 = vld [vmem:[%s3059_s18 + $0x8] sm:$0xff] }
 0x1c7   : > { %v1107_v27 = vpack.c.b16 %v1106_v23, %v1106_v23  ;;  %v1112_v28 = vpack.c.b16 %v1111_v24, %v1111_v24  ;;  %v959_v29 = vpop.f32.mrf.mxu2 }
 0x1c8   : > { %v960_v31 = vadd.f32 %v959_v29, %v788_v5 }
 0x1c9   : > { %1113 = vrot.lane.b32.xlu0 %v1112_v28, %s2945_s23  ;;  %1108 = vrot.lane.b32.xlu1 %v1107_v27, %s2945_s23 }
 0x1ca   : > { %v3201_v32 = vpack.c.bf16 %v960_v31, %v960_v31  ;;  %1079 = vrot.lane.b32.xlu2 %v1078_v30, %s2945_s23 }
 0x1cc   : > { %v1061_v33 = vsel %vm1040_vm8, %v3201_v32, 0  ;;  %v1187_v19 = vunpack.c.l.b16 %v3201_v32 }
 0x1cd   : > { %1070 = vmatpush.bf16.msrb.mxu0 %v1061_v33 }
 0x1ce   : > { %1051 = vmatpush.bf16.msra.mxu3 %v1042_v26 }
 0x1d5   : > { %2416 = vmatmul.msk.bf16.vlgmr.msrb.gmra.mxu3 %vm967_vm7, %v964_v20  ;;  %v1188_v20 = vpack.c.b16 %v1187_v19, %v1187_v19  ;;  %v2569_v19 = vld [vmem:[%s3087_s4 + $0xe0] sm:$0xf] }
 0x21b   : > { %v1085_v34 = vpop.permute.xlu2 %1084 }
 0x21c   : > { %v1090_v35 = vsel %vm967_vm7, %v1085_v34, 0 }
 0x21d   : > { %1099 = vmatpush.bf16.xpose.msrb.mxu2 %v1090_v35 }
 0x224   : > { %v1080_v36 = vpop.permute.xlu2 %1079 }
 0x225   : > { %2419 = vmatmul.msk.bf16.vlgmr.msrb.gmra.mxu2 %vm967_vm7, %v1080_v36 }
 0x23b   : > { %v1114_v37 = vpop.permute.xlu0 %1113  ;;  %v1109_v39 = vpop.permute.xlu1 %1108 }
 0x23c   : > { %v1119_v38 = vsel %vm967_vm7, %v1114_v37, 0 }
 0x23d   : > { %1128 = vmatpush.bf16.xpose.msra.mxu2 %v1119_v38 }
 0x244   : > { %2420 = vmatmul.msk.bf16.vlgmr.msra.gmra.mxu2 %vm967_vm7, %v1109_v39 }
 0x248   : > { %v983_v40 = vpop.f32.mrf.mxu3 }
 0x249   : > { %v1006_v42 = vmul.f32 0.125, %v983_v40 }
 0x24b   : > { %v1008_v43 = vadd.f32 %v1006_v42, %v962_v41 }
 0x24d   : > { %v1011_v44 = vsel %vm1010_vm9, %v1008_v43, -inf }
 0x24e   : > { %1012 = vmax.xlane.f32.xlu2 %v1011_v44 }
 0x250   : > { %v985_v45 = vpop.f32.mrf.mxu3 }
 0x258   : > { %v1002_v46 = vpop.f32.mrf.mxu3 }
 0x259   : > { %v1007_v47 = vmul.f32 0.125, %v1002_v46 }
 0x25b   : > { %v1009_v48 = vadd.f32 %v1007_v47, %v962_v41 }
 0x25d   : > { %v1014_v49 = vsel %vm1010_vm9, %v1009_v48, -inf }
 0x25e   : > { %1015 = vmax.xlane.f32.xlu0 %v1014_v49  ;;  %v2758_v49 = vld [vmem:[%s3059_s18 + $0x38] sm:$0xff] }
 0x25f   : > { %1289 = vmatpush.bf16.msrb.mxu1 %v2758_v49  ;;  %v2782_v49 = vld [vmem:[%s3087_s4 + $0xb4] sm:$0xf0] }
 0x260   : > { %v1004_v50 = vpop.f32.mrf.mxu3 }
 0x261   : > { %v2757_v50 = vld [vmem:[%s3059_s18 + $0x30] sm:$0xff] }
 0x263   : > { %1290 = vmatpush.bf16.msrb.mxu1 %v2757_v50 }
 0x2a8   : > { %v1101_v51 = vpop.f32.mrf.mxu2 }
 0x2a9   : > { %v1134_v52 = vmul.f32 0.125, %v1101_v51  ;;  %v2756_v51 = vld [vmem:[%s3059_s18 + $0x28] sm:$0xff] }
 0x2aa   : > { %1291 = vmatpush.bf16.msrb.mxu1 %v2756_v51 }
 0x2ab   : > { %v1136_v53 = vadd.f32 %v1134_v52, %v962_v41 }
 0x2ad   : > { %v1138_v54 = vsel %vm1010_vm9, %v1136_v53, -inf }
 0x2ae   : > { %1139 = vmax.xlane.f32.xlu1 %v1138_v54  ;;  %v2754_v54 = vld [vmem:[%s3059_s18 + $0x18] sm:$0xff] }
 0x2b0   : > { %v1103_v55 = vpop.f32.mrf.mxu2 }
 0x2b1   : > { %v2753_v55 = vld [vmem:[%s3059_s18 + $0x10] sm:$0xff] }
 0x2c1   : > { %v1013_v57 = vpop.xlane.xlu2 %1012 }
 0x2c2   : > { %v1017_v13 = vsub.f32 %v1008_v43, %v1013_v57 }
 0x2c4   : > { %v1019_v59 = vmul.f32 1.442695, %v1017_v13 }
 0x2c6   : > { %2868 = vpow2.f32 %v1019_v59  ;;  %v2751_v59 = vld [vmem:[%s3059_s18] sm:$0xff] }
 0x2c7   : > { %1165 = vrot.lane.b32.xlu1 %v1164_v58, %s2945_s23  ;;  %v1130_v60 = vpop.f32.mrf.mxu2 }
 0x2c8   : > { %v1135_v61 = vmul.f32 0.125, %v1130_v60 }
 0x2ca   : > { %v1137_v62 = vadd.f32 %v1135_v61, %v962_v41 }
 0x2cc   : > { %v1141_v63 = vsel %vm1010_vm9, %v1137_v62, -inf  ;;  %v2869_v1 = vpop.eup %2868 }
 0x2cd   : > { %1142 = vmax.xlane.f32.xlu2 %v1141_v63  ;;  %v1023_v6 = vsel %vm1010_vm9, %v2869_v1, 0.0 }
 0x2cf   : > { %v1132_v0 = vpop.f32.mrf.mxu2 }
 0x2d1   : > { %v1016_v17 = vpop.xlane.xlu0 %1015 }
 0x2d2   : > { %v1018_v4 = vsub.f32 %v1009_v48, %v1016_v17  ;;  %v2858_v17 = vld [vmem:[%s3610_s6] ss:$0 sm:$0xff] }
 0x2d4   : > { %v1021_v5 = vmul.f32 1.442695, %v1018_v4 }
 0x2d5   : > { %1024 = vadd.xlane.f32.xlu2 %v1023_v6 }
 0x2d6   : > { %2870 = vpow2.f32 %v1021_v5 }
 0x2dc   : > { %v2871_v7 = vpop.eup %2870 }
 0x2dd   : > { %v1026_v8 = vsel %vm1010_vm9, %v2871_v7, 0.0 }
 0x2de   : > { %1027 = vadd.xlane.f32.xlu2 %v1026_v8 }
 0x321   : > { %v1140_v9 = vpop.xlane.xlu1 %1139 }
 0x322   : > { %v1144_v11 = vsub.f32 %v1136_v53, %v1140_v9  ;;  %v2755_v53 = vld [vmem:[%s3059_s18 + $0x20] sm:$0xff] }
 0x323   : > { %1292 = vmatpush.bf16.msrb.mxu1 %v2755_v53  ;;  %v2547_v53 = vld [vmem:[%s3087_s4 + $0xb8] sm:$0xf0] }
 0x324   : > { %v1146_v12 = vmul.f32 1.442695, %v1144_v11 }
 0x326   : > { %2872 = vpow2.f32 %v1146_v12 }
 0x327   : > { %1293 = vmatpush.bf16.msrb.mxu1 %v2754_v54 }
 0x32b   : > { %1294 = vmatpush.bf16.msrb.mxu1 %v2753_v55  ;;  %v2521_v55 = vld [vmem:[%s3087_s4 + $0x80] sm:$0xf] }
 0x32c   : > { %v2873_v14 = vpop.eup %2872 }
 0x32d   : > { %v1150_v15 = vsel %vm1010_vm9, %v2873_v14, 0.0 }
 0x32e   : > { %1151 = vadd.xlane.f32.xlu0 %v1150_v15 }
 0x32f   : > { %1295 = vmatpush.bf16.msrb.mxu1 %v2752_v56  ;;  %v2777_v56 = vld [vmem:[%s3087_s4 + $0x8c] sm:$0xf0] }
 0x333   : > { %1296 = vmatpush.bf16.msrb.mxu1 %v2751_v59  ;;  %v2529_v59 = vld [vmem:[%s3087_s4 + $0x88] sm:$0xf] }
 0x339   : > { %v1166_v16 = vpop.permute.xlu1 %1165 }
 0x33a   : > { %v1171_v18 = vsel %vm1040_vm8, %v1166_v16, 0 }
 0x33b   : > { %1180 = vmatpush.bf16.msrb.mxu3 %v1171_v18 }
 0x340   : > { %v1143_v21 = vpop.xlane.xlu2 %1142 }
 0x341   : > { %v1145_v22 = vsub.f32 %v1137_v62, %v1143_v21  ;;  %v2787_v21 = vld [vmem:[%s3087_s4 + $0xe4] sm:$0xf] }
 0x342   : > { %1189 = vrot.lane.b32.xlu0 %v1188_v20, %s2945_s23  ;;  %v2789_v20 = vld [vmem:[%s3087_s4 + $0xec] sm:$0xf0] }
 0x343   : > { %v1148_v23 = vmul.f32 1.442695, %v1145_v22  ;;  %v2570_v22 = vor.u32 %v2789_v20, %v2569_v19  ;;  %v2489_v20 = vld [vmem:[%s3087_s4 + $0x40] sm:$0xf] }
 0x345   : > { %2874 = vpow2.f32 %v1148_v23  ;;  %v2571_v23 = vld [vmem:[%s3087_s4 + $0xf0] sm:$0xf0]  ;;  %1560 = vmatpush.bf16.msrb.mxu2 %v2570_v22  ;;  %v2767_v22 = vld [vmem:[%s3087_s4 + $0x44] sm:$0xf] }
 0x348   : > { %v1025_v24 = vpop.xlane.xlu2 %1024 }
 0x349   : > { %2876 = vrcp.f32 %v1025_v24  ;;  %v2577_v24 = vld [vmem:[%s3087_s4 + $0xe8] sm:$0xf] }
 0x34b   : > { %v2875_v25 = vpop.eup %2874 }
 0x34c   : > { %v1153_v26 = vsel %vm1010_vm9, %v2875_v25, 0.0 }
 0x34d   : > { %1154 = vadd.xlane.f32.xlu2 %v1153_v26  ;;  %v2574_v26 = vor.u32 %v2787_v21, %v2571_v23  ;;  %v2769_v21 = vld [vmem:[%s3087_s4 + $0x4c] sm:$0xf0] }
 0x34e   : > { %v2490_v23 = vor.u32 %v2769_v21, %v2489_v20 }
 0x34f   : > { %v2877_v27 = vpop.eup %2876 }
 0x350   : > { %v1031_v28 = vmul.f32 %v2877_v27, %v2869_v1 }
 0x351   : > { %v1028_v29 = vpop.xlane.xlu2 %1027 }
 0x352   : > { %v1033_v30 = vpack.c.bf16 %v1031_v28, %v1031_v28  ;;  %2878 = vrcp.f32 %v1028_v29  ;;  %v2788_v28 = vld [vmem:[%s3087_s4 + $0xec] sm:$0xf]  ;;  %v2579_v29 = vld [vmem:[%s3087_s4 + $0xf8] sm:$0xf0] }
 0x354   : > { %2417 = vmatmul.msk.bf16.vlgmr.msra.gmra.mxu3 %vm1010_vm9, %v1033_v30  ;;  %v2582_v30 = vor.u32 %v2788_v28, %v2579_v29  ;;  %v2768_v29 = vld [vmem:[%s3087_s4 + $0x4c] sm:$0xf] }
 0x355   : > { %1574 = vmatpush.bf16.msra.mxu3 %v2574_v26  ;;  %v2770_v26 = vld [vmem:[%s3087_s4 + $0x54] sm:$0xf0] }
 0x356   : > { %1602 = vmatpush.bf16.msra.mxu1 %v2582_v30  ;;  %v2499_v30 = vld [vmem:[%s3087_s4 + $0x58] sm:$0xf0] }
 0x358   : > { %v2879_v31 = vpop.eup %2878 }
 0x359   : > { %v1032_v32 = vmul.f32 %v2879_v31, %v2871_v7  ;;  %v2553_v31 = vld [vmem:[%s3087_s4 + $0xc0] sm:$0xf] }
 0x35b   : > { %v1034_v33 = vpack.c.bf16 %v1032_v32, %v1032_v32  ;;  %v2785_v32 = vld [vmem:[%s3087_s4 + $0xcc] sm:$0xf0] }
 0x35d   : > { %2418 = vmatmul.msk.bf16.vlgmr.msrb.gmra.mxu0 %vm1010_vm9, %v1034_v33  ;;  %v2783_v33 = vld [vmem:[%s3087_s4 + $0xc4] sm:$0xf] }
 0x3a1   : > { %v1152_v34 = vpop.xlane.xlu0 %1151 }
 0x3a2   : > { %2880 = vrcp.f32 %v1152_v34  ;;  %v2554_v34 = vor.u32 %v2785_v32, %v2553_v31  ;;  %v2502_v31 = vor.u32 %v2768_v29, %v2499_v30  ;;  %v2473_v32 = vld [vmem:[%s3087_s4 + $0x20] sm:$0xf]  ;;  %v2821_v29 = vld [vmem:[%s3098_s1 + $0xf0] sm:$0xff] }
 0x3a4   : > { %1561 = vmatpush.bf16.msrb.mxu2 %v2554_v34  ;;  %v2763_v34 = vld [vmem:[%s3087_s4 + $0x24] sm:$0xf] }
 0x3a8   : > { %v2881_v35 = vpop.eup %2880 }
 0x3a9   : > { %v1158_v36 = vmul.f32 %v2881_v35, %v2873_v14  ;;  %v2555_v35 = vld [vmem:[%s3087_s4 + $0xd0] sm:$0xf0] }
 0x3ab   : > { %v1160_v37 = vpack.c.bf16 %v1158_v36, %v1158_v36  ;;  %v2561_v36 = vld [vmem:[%s3087_s4 + $0xc8] sm:$0xf] }
 0x3ad   : > { %2421 = vmatmul.msk.bf16.vlgmr.msrb.gmra.mxu3 %vm1010_vm9, %v1160_v37  ;;  %v2786_v37 = vld [vmem:[%s3087_s4 + $0xd4] sm:$0xf0] }
 0x3b4   : > { %v1190_v38 = vpop.permute.xlu0 %1189 }
 0x3b5   : > { %v1195_v39 = vsel %vm1040_vm8, %v1190_v38, 0  ;;  %v2558_v38 = vor.u32 %v2783_v33, %v2555_v35  ;;  %v2765_v33 = vld [vmem:[%s3087_s4 + $0x2c] sm:$0xf0] }
 0x3b6   : > { %1204 = vmatpush.bf16.msra.mxu0 %v1195_v39  ;;  %v2562_v39 = vor.u32 %v2786_v37, %v2561_v36  ;;  %v2474_v35 = vor.u32 %v2765_v33, %v2473_v32  ;;  %v2475_v36 = vld [vmem:[%s3087_s4 + $0x30] sm:$0xf0]  ;;  %v2481_v37 = vld [vmem:[%s3087_s4 + $0x28] sm:$0xf] }
 0x3b7   : > { %1575 = vmatpush.bf16.msra.mxu3 %v2558_v38  ;;  %v2766_v38 = vld [vmem:[%s3087_s4 + $0x34] sm:$0xf0] }
 0x3c0   : > { %v1155_v40 = vpop.xlane.xlu2 %1154 }
 0x3c1   : > { %2882 = vrcp.f32 %v1155_v40  ;;  %v2784_v40 = vld [vmem:[%s3087_s4 + $0xcc] sm:$0xf] }
 0x3c7   : > { %v2883_v41 = vpop.eup %2882 }
 0x3c8   : > { %v1159_v42 = vmul.f32 %v2883_v41, %v2875_v25  ;;  %v2790_v25 = vld [vmem:[%s3087_s4 + $0xf4] sm:$0xf0]  ;;  %v2563_v41 = vld [vmem:[%s3087_s4 + $0xd8] sm:$0xf0] }
 0x3c9   : > { %v2578_v27 = vor.u32 %v2790_v25, %v2577_v24  ;;  %v2491_v24 = vld [vmem:[%s3087_s4 + $0x50] sm:$0xf0]  ;;  %v2497_v25 = vld [vmem:[%s3087_s4 + $0x48] sm:$0xf] }
 0x3ca   : > { %v1161_v43 = vpack.c.bf16 %v1159_v42, %v1159_v42  ;;  %v2566_v42 = vor.u32 %v2784_v40, %v2563_v41  ;;  %v2498_v28 = vor.u32 %v2770_v26, %v2497_v25  ;;  %v2478_v40 = vor.u32 %v2763_v34, %v2475_v36  ;;  %v2822_v25 = vld [vmem:[%s3098_s1 + $0xf8] sm:$0xff] }
 0x3cb   : > { %1588 = vmatpush.bf16.msrb.mxu0 %v2578_v27  ;;  %v2494_v27 = vor.u32 %v2767_v22, %v2491_v24  ;;  %v2482_v41 = vor.u32 %v2766_v38, %v2481_v37  ;;  %v3346_v24 = vld [vmem:[%s3093_s26] sm:$0xf]  ;;  %v2798_v34 = vld [vmem:[%s3098_s1 + $0x38] sm:$0xff] }
 0x3cc   : > { %2422 = vmatmul.msk.bf16.vlgmr.msra.gmra.mxu0 %vm1010_vm9, %v1161_v43  ;;  %v2537_v43 = vld [vmem:[%s3087_s4 + $0xa0] sm:$0xf]  ;;  %1603 = vmatpush.bf16.msra.mxu1 %v2566_v42  ;;  %v2764_v42 = vld [vmem:[%s3087_s4 + $0x2c] sm:$0xf]  ;;  %v1394_v26 = vperm.slane %v3346_v24, 2  ;;  %v1392_v36 = vperm.slane %v3346_v24, 0 }
 0x3cd   : > { %v1393_v37 = vperm.slane %v3346_v24, 1 }
 0x3cf   : > { %1589 = vmatpush.bf16.msrb.mxu0 %v2562_v39 }
 0x3d7   : > { %v1053_v44 = vpop.f32.mrf.mxu3 }
 0x3da   : > { %v1072_v45 = vpop.f32.mrf.mxu0 }
 0x3df   : > { %v1055_v46 = vpop.f32.mrf.mxu3 }
 0x3e2   : > { %v1074_v47 = vpop.f32.mrf.mxu0 }
 0x3e3   : > { %v2539_v47 = vld [vmem:[%s3087_s4 + $0xb0] sm:$0xf0] }
 0x430   : > { %v1182_v48 = vpop.f32.mrf.mxu3 }
 0x438   : > { %v1184_v52 = vpop.f32.mrf.mxu3 }
 0x439   : > { %v2780_v52 = vld [vmem:[%s3087_s4 + $0xac] sm:$0xf] }
 0x43a   : > { %v2550_v54 = vor.u32 %v2780_v52, %v2547_v53  ;;  %v2465_v52 = vld [vmem:[%s3087_s4 + $0x8] sm:$0xf]  ;;  %v2762_v53 = vld [vmem:[%s3087_s4 + $0x14] sm:$0xf0] }
 0x43c   : > { %1604 = vmatpush.bf16.msra.mxu1 %v2550_v54  ;;  %v2760_v54 = vld [vmem:[%s3087_s4 + $0xc] sm:$0xf] }
 0x449   : > { %v1206_v57 = vpop.f32.mrf.mxu0 }
 0x44a   : > { %v2851_v13 = vpack.i.bf16 %v1206_v57, %v1182_v48  ;;  %v2545_v48 = vld [vmem:[%s3087_s4 + $0xa8] sm:$0xf]  ;;  %v2775_v57 = vld [vmem:[%s3087_s4 + $0x84] sm:$0xf] }
 0x44b   : > { %v2546_v51 = vor.u32 %v2782_v49, %v2545_v48  ;;  %v2759_v48 = vld [vmem:[%s3087_s4 + $0x4] sm:$0xf]  ;;  %v2459_v49 = vld [vmem:[%s3087_s4 + $0x10] sm:$0xf0] }
 0x44c   : > { %2852 = vrot.lane.b32.xlu2 %v2851_v13, %s2945_s23  ;;  %v2522_v13 = vor.u32 %v2777_v56, %v2521_v55  ;;  %v2466_v56 = vor.u32 %v2762_v53, %v2465_v52 }
 0x44d   : > { %1590 = vmatpush.bf16.msrb.mxu0 %v2546_v51  ;;  %v2462_v51 = vor.u32 %v2759_v48, %v2459_v49 }
 0x451   : > { %v1208_v58 = vpop.f32.mrf.mxu0 }
 0x452   : > { %v2523_v58 = vld [vmem:[%s3087_s4 + $0x90] sm:$0xf0] }
 0x4a6   : > { %v2853_v60 = vpop.permute.xlu2 %2852 }
 0x4a7   : > { %v2855_v61 = vunpack.i.h.bf16 %v2853_v60  ;;  %v2854_v62 = vunpack.i.l.bf16 %v2853_v60  ;;  %v2778_v60 = vld [vmem:[%s3087_s4 + $0x94] sm:$0xf0] }
 0x4a9   : > { %v1218_v63 = vsel %vm967_vm7, %v1053_v44, %v2854_v62  ;;  %v1219_v0 = vsel %vm967_vm7, %v1072_v45, %v2855_v61  ;;  %v2781_v44 = vld [vmem:[%s3087_s4 + $0xac] sm:$0xf0]  ;;  %v2779_v45 = vld [vmem:[%s3087_s4 + $0xa4] sm:$0xf]  ;;  %v2526_v61 = vor.u32 %v2775_v57, %v2523_v58  ;;  %v2530_v62 = vor.u32 %v2778_v60, %v2529_v59  ;;  %v2467_v57 = vld [vmem:[%s3087_s4 + $0x18] sm:$0xf0] }
 0x4aa   : > { %v1220_v1 = vpack.c.bf16 %v1219_v0, %v1218_v63  ;;  %v2538_v46 = vor.u32 %v2781_v44, %v2537_v43  ;;  %v2542_v50 = vor.u32 %v2779_v45, %v2539_v47  ;;  %v2776_v63 = vld [vmem:[%s3087_s4 + $0x8c] sm:$0xf]  ;;  %v2531_v0 = vld [vmem:[%s3087_s4 + $0x98] sm:$0xf0]  ;;  %v2457_v44 = vld [vmem:[%s3087_s4] sm:$0xf] }
 0x4ab   : > { %1591 = vmatpush.bf16.msrb.mxu0 %v2530_v62  ;;  %v2483_v43 = vld [vmem:[%s3087_s4 + $0x38] sm:$0xf0]  ;;  %v2761_v47 = vld [vmem:[%s3087_s4 + $0xc] sm:$0xf0] }
 0x4ac   : > { %1297 = vmatmul.bf16.vlgmr.msrb.gmra.mxu1 %v1220_v1  ;;  %1562 = vmatpush.bf16.msrb.mxu2 %v2538_v46  ;;  %v2534_v1 = vor.u32 %v2776_v63, %v2531_v0  ;;  %v2486_v46 = vor.u32 %v2764_v42, %v2483_v43 }
 0x4ad   : > { %1576 = vmatpush.bf16.msra.mxu3 %v2542_v50  ;;  %v2458_v50 = vor.u32 %v2761_v47, %v2457_v44  ;;  %v2805_v47 = vld [vmem:[%s3098_s1 + $0x70] sm:$0xff] }
 0x4ae   : > { %1605 = vmatpush.bf16.msra.mxu1 %v2534_v1 }
 0x4b0   : > { %1563 = vmatpush.bf16.msrb.mxu2 %v2522_v13  ;;  %v2470_v13 = vor.u32 %v2760_v54, %v2467_v57 }
 0x4b1   : > { %1577 = vmatpush.bf16.msra.mxu3 %v2526_v61 }
 0x529   : > { %v1298_v4 = vpop.f32.mrf.mxu1 }
 0x52a   : > { %v1299_v5 = vadd.f32 %v2858_v17, %v1298_v4  ;;  %v2773_v4 = vld [vmem:[%s3087_s4 + $0x6c] sm:$0xf0] }
 0x52c   : > { %v3248_v6 = vadd.f32 %v1299_v5, %v3111_v2  ;;  %v2771_v5 = vld [vmem:[%s3087_s4 + $0x64] sm:$0xf] }
 0x52e   : > { %1307 = vadd.xlane.f32.xlu0 %v3248_v6 }
 0x531   : > { %v1300_v7 = vpop.f32.mrf.mxu1 }
 0x532   : > { %v1301_v8 = vadd.f32 %v2858_v17, %v1300_v7  ;;  %v2505_v17 = vld [vmem:[%s3087_s4 + $0x60] sm:$0xf] }
 0x533   : > { %v2506_v7 = vor.u32 %v2773_v4, %v2505_v17 }
 0x534   : > { %v3252_v9 = vadd.f32 %v1301_v8, %v3114_v3  ;;  %v2507_v8 = vld [vmem:[%s3087_s4 + $0x70] sm:$0xf0] }
 0x535   : > { %1564 = vmatpush.bf16.msrb.mxu2 %v2506_v7 }
 0x536   : > { %1309 = vadd.xlane.f32.xlu1 %v3252_v9 }
 0x539   : > { %1565 = vmatpush.bf16.msrb.mxu2 %v2490_v23 }
 0x53d   : > { %1566 = vmatpush.bf16.msrb.mxu2 %v2474_v35  ;;  %v2806_v35 = vld [vmem:[%s3098_s1 + $0x78] sm:$0xff] }
 0x541   : > { %1567 = vmatpush.bf16.msrb.mxu2 %v2458_v50  ;;  %v2811_v50 = vld [vmem:[%s3098_s1 + $0xa0] sm:$0xff] }
 0x545   : > { %2048 = vmatpush.bf16.msra.mxu2 %v2798_v34 }
 0x5a1   : > { %v1308_v11 = vpop.xlane.xlu0 %1307 }
 0x5a2   : > { %v1311_v12 = vmul.f32 %v1308_v11, %v3117_v10  ;;  %v2513_v11 = vld [vmem:[%s3087_s4 + $0x68] sm:$0xf] }
 0x5a4   : > { %v3257_v2 = vsub.f32 %v3248_v6, %v1311_v12  ;;  %v2774_v12 = vld [vmem:[%s3087_s4 + $0x74] sm:$0xf0] }
 0x5a6   : > { %v1315_v14 = vmul.f32 %v3257_v2, %v3257_v2 }
 0x5a8   : > { %1317 = vadd.xlane.f32.xlu2 %v1315_v14  ;;  %v2510_v14 = vor.u32 %v2771_v5, %v2507_v8 }
 0x5a9   : > { %v1310_v15 = vpop.xlane.xlu1 %1309 }
 0x5aa   : > { %v1312_v3 = vmul.f32 %v1310_v15, %v3117_v10  ;;  %v2514_v15 = vor.u32 %v2774_v12, %v2513_v11  ;;  %1578 = vmatpush.bf16.msra.mxu3 %v2510_v14  ;;  %v2859_v14 = vld [vmem:[%s654_s27] ss:$0 sm:$0xff] }
 0x5ac   : > { %v3263_v16 = vsub.f32 %v3252_v9, %v1312_v3  ;;  %v2772_v3 = vld [vmem:[%s3087_s4 + $0x6c] sm:$0xf]  ;;  %1592 = vmatpush.bf16.msrb.mxu0 %v2514_v15 }
 0x5ae   : > { %v1316_v18 = vmul.f32 %v3263_v16, %v3263_v16  ;;  %1579 = vmatpush.bf16.msra.mxu3 %v2494_v27  ;;  %v1395_v27 = vperm.slane %v3346_v24, 3  ;;  %v2800_v24 = vld [vmem:[%s3098_s1 + $0x48] sm:$0xff] }
 0x5b0   : > { %1319 = vadd.xlane.f32.xlu0 %v1316_v18  ;;  %v2515_v18 = vld [vmem:[%s3087_s4 + $0x78] sm:$0xf0]  ;;  %1593 = vmatpush.bf16.msrb.mxu0 %v2498_v28  ;;  %v2813_v28 = vld [vmem:[%s3098_s1 + $0xb0] sm:$0xff] }
 0x5b1   : > { %v2518_v19 = vor.u32 %v2772_v3, %v2515_v18 }
 0x5b2   : > { %1580 = vmatpush.bf16.msra.mxu3 %v2478_v40  ;;  %v2812_v40 = vld [vmem:[%s3098_s1 + $0xa8] sm:$0xff] }
 0x5b3   : > { %1606 = vmatpush.bf16.msra.mxu1 %v2518_v19 }
 0x5b4   : > { %1594 = vmatpush.bf16.msrb.mxu0 %v2482_v41  ;;  %v2820_v41 = vld [vmem:[%s3098_s1 + $0xe8] sm:$0xff] }
 0x5b6   : > { %1581 = vmatpush.bf16.msra.mxu3 %v2462_v51  ;;  %v2819_v51 = vld [vmem:[%s3098_s1 + $0xe0] sm:$0xff] }
 0x5b7   : > { %1607 = vmatpush.bf16.msra.mxu1 %v2502_v31 }
 0x5b8   : > { %1595 = vmatpush.bf16.msrb.mxu0 %v2466_v56 }
 0x5ba   : > { %2062 = vmatpush.bf16.msrb.mxu3 %v2806_v35 }
 0x5bb   : > { %1608 = vmatpush.bf16.msra.mxu1 %v2486_v46  ;;  %v2797_v46 = vld [vmem:[%s3098_s1 + $0x30] sm:$0xff] }
 0x5bc   : > { %2049 = vmatpush.bf16.msra.mxu2 %v2797_v46 }
 0x5be   : > { %2063 = vmatpush.bf16.msrb.mxu3 %v2805_v47 }
 0x5bf   : > { %1609 = vmatpush.bf16.msra.mxu1 %v2470_v13  ;;  %v2796_v13 = vld [vmem:[%s3098_s1 + $0x28] sm:$0xff] }
 0x5c0   : > { %2050 = vmatpush.bf16.msra.mxu2 %v2796_v13 }
 0x5c3   : > { %2090 = vmatpush.bf16.msrb.mxu1 %v2822_v25  ;;  %v2816_v25 = vld [vmem:[%s3098_s1 + $0xc8] sm:$0xff] }
 0x5c7   : > { %2091 = vmatpush.bf16.msrb.mxu1 %v2821_v29 }
 0x5cb   : > { %2092 = vmatpush.bf16.msrb.mxu1 %v2820_v41 }
 0x5cf   : > { %2093 = vmatpush.bf16.msrb.mxu1 %v2819_v51 }
 0x61b   : > { %v1318_v39 = vpop.xlane.xlu2 %1317 }
 0x61c   : > { %v1321_v45 = vmul.f32 %v1318_v39, %v3117_v10 }
 0x61e   : > { %v1323_v55 = vadd.f32 1e-05, %v1321_v45 }
 0x620   : > { %2884 = vrsqrt.f32 %v1323_v55  ;;  %vm1331_vm11 = vweird.f32 %v1323_v55 }
 0x623   : > { %v1320_v58 = vpop.xlane.xlu0 %1319 }
 0x624   : > { %v1322_v59 = vmul.f32 %v1320_v58, %v3117_v10  ;;  %v2804_v58 = vld [vmem:[%s3098_s1 + $0x68] sm:$0xff] }
 0x625   : > { %2064 = vmatpush.bf16.msrb.mxu3 %v2804_v58 }
 0x626   : > { %v2885_v60 = vpop.eup %2884  ;;  %v1324_v61 = vadd.f32 1e-05, %v1322_v59 }
 0x627   : > { %v1326_v62 = vmul.f32 %v2885_v60, %v1323_v55  ;;  %vm1332_vm10 = vweird.f32 %v2885_v60 }
 0x628   : > { %2886 = vrsqrt.f32 %v1324_v61  ;;  %vm1333_vm12 = vmor %vm1331_vm11, %vm1332_vm10  ;;  %vm1341_vm14 = vweird.f32 %v1324_v61 }
 0x629   : > { %v1327_v63 = vmul.f32 %v2885_v60, %v1326_v62 }
 0x62b   : > { %v1328_v0 = vmul.f32 0.5, %v1327_v63  ;;  %v2810_v63 = vld [vmem:[%s3098_s1 + $0x98] sm:$0xff] }
 0x62d   : > { %v1329_v1 = vsub.f32 1.5, %v1328_v0  ;;  %v2818_v0 = vld [vmem:[%s3098_s1 + $0xd8] sm:$0xff] }
 0x62e   : > { %v2887_v17 = vpop.eup %2886  ;;  %2094 = vmatpush.bf16.msrb.mxu1 %v2818_v0 }
 0x62f   : > { %v1330_v4 = vmul.f32 %v2885_v60, %v1329_v1  ;;  %v1336_v5 = vmul.f32 %v2887_v17, %v1324_v61  ;;  %vm1342_vm13 = vweird.f32 %v2887_v17 }
 0x630   : > { %vm1343_vm15 = vmor %vm1341_vm14, %vm1342_vm13 }
 0x631   : > { %v1337_v7 = vmul.f32 %v2887_v17, %v1336_v5  ;;  %v1334_v8 = vsel %vm1333_vm12, %v2885_v60, %v1330_v4  ;;  %v2795_v5 = vld [vmem:[%s3098_s1 + $0x20] sm:$0xff] }
 0x632   : > { %v1345_v10 = vmul.f32 %v1334_v8, %v3257_v2  ;;  %v2860_v2 = vld [vmem:[%s3611_s15] ss:$0 sm:$0xff]  ;;  %2051 = vmatpush.bf16.msra.mxu2 %v2795_v5 }
 0x633   : > { %v1338_v11 = vmul.f32 0.5, %v1337_v7  ;;  %v2803_v7 = vld [vmem:[%s3098_s1 + $0x60] sm:$0xff] }
 0x634   : > { %v1350_v19 = vmul.f32 %v2859_v14, %v1345_v10  ;;  %2065 = vmatpush.bf16.msrb.mxu3 %v2803_v7 }
 0x635   : > { %v1339_v12 = vsub.f32 1.5, %v1338_v11 }
 0x636   : > { %v1355_v21 = vadd.f32 %v2860_v2, %v1350_v19  ;;  %v2802_v19 = vld [vmem:[%s3098_s1 + $0x58] sm:$0xff] }
 0x637   : > { %v1340_v15 = vmul.f32 %v2887_v17, %v1339_v12 }
 0x638   : > { %2066 = vmatpush.bf16.msrb.mxu3 %v2802_v19 }
 0x639   : > { %v1344_v3 = vsel %vm1343_vm15, %v2887_v17, %v1340_v15  ;;  %v2809_v15 = vld [vmem:[%s3098_s1 + $0x90] sm:$0xff] }
 0x63a   : > { %v1346_v18 = vmul.f32 %v1344_v3, %v3263_v16  ;;  %v2814_v16 = vld [vmem:[%s3098_s1 + $0xb8] sm:$0xff]  ;;  %v2817_v3 = vld [vmem:[%s3098_s1 + $0xd0] sm:$0xff] }
 0x63b   : > { %2076 = vmatpush.bf16.msra.mxu0 %v2814_v16  ;;  %2095 = vmatpush.bf16.msrb.mxu1 %v2817_v3 }
 0x63c   : > { %v1351_v20 = vmul.f32 %v2859_v14, %v1346_v18  ;;  %v2794_v18 = vld [vmem:[%s3098_s1 + $0x18] sm:$0xff] }
 0x63d   : > { %2052 = vmatpush.bf16.msra.mxu2 %v2794_v18 }
 0x63e   : > { %v1356_v22 = vadd.f32 %v2860_v2, %v1351_v20 }
 0x63f   : > { %2077 = vmatpush.bf16.msra.mxu0 %v2813_v28  ;;  %v2801_v28 = vld [vmem:[%s3098_s1 + $0x50] sm:$0xff]  ;;  %2096 = vmatpush.bf16.msrb.mxu1 %v2816_v25 }
 0x640   : > { %v1357_v23 = vpack.c.bf16 %v1356_v22, %v1355_v21  ;;  %v2808_v22 = vld [vmem:[%s3098_s1 + $0x88] sm:$0xff]  ;;  %2067 = vmatpush.bf16.msrb.mxu3 %v2801_v28 }
 0x642   : > { %1568 = vmatmul.bf16.vlgmr.msrb.gmra.mxu2 %v1357_v23  ;;  %1582 = vmatmul.bf16.vlgmr.msra.gmra.mxu3 %v1357_v23 }
 0x643   : > { %1596 = vmatmul.bf16.vlgmr.msrb.gmra.mxu0 %v1357_v23  ;;  %1610 = vmatmul.bf16.vlgmr.msra.gmra.mxu1 %v1357_v23 }
 0x644   : > { %2078 = vmatpush.bf16.msra.mxu0 %v2812_v40  ;;  %2068 = vmatpush.bf16.msrb.mxu3 %v2800_v24 }
 0x648   : > { %2079 = vmatpush.bf16.msra.mxu0 %v2811_v50 }
 0x64c   : > { %2080 = vmatpush.bf16.msra.mxu0 %v2810_v63 }
 0x650   : > { %2081 = vmatpush.bf16.msra.mxu0 %v2809_v15 }
 0x654   : > { %2082 = vmatpush.bf16.msra.mxu0 %v2808_v22 }
 0x6c0   : > { %v1597_v30 = vpop.f32.mrf.mxu0  ;;  %v1611_v31 = vpop.f32.mrf.mxu1 }
 0x6c1   : > { %v3354_v32 = vadd.f32 %v1597_v30, %v1394_v26  ;;  %v3356_v33 = vadd.f32 %v1611_v31, %v1395_v27 }
 0x6c3   : > { %v2585_v38 = vmul.f32 -1.702, %v3354_v32  ;;  %v2586_v39 = vmul.f32 -1.702, %v3356_v33 }
 0x6c5   : > { %v1636_v42 = vmul.f32 1.442695, %v2585_v38  ;;  %v1638_v43 = vmul.f32 1.442695, %v2586_v39  ;;  %v1569_v44 = vpop.f32.mrf.mxu2  ;;  %v1583_v45 = vpop.f32.mrf.mxu3  ;;  %v2815_v38 = vld [vmem:[%s3098_s1 + $0xc0] sm:$0xff] }
 0x6c6   : > { %v3368_v48 = vadd.f32 %v1569_v44, %v1392_v36  ;;  %v3372_v49 = vadd.f32 %v1583_v45, %v1393_v37  ;;  %v2792_v44 = vld [vmem:[%s3098_s1 + $0x8] sm:$0xff]  ;;  %2097 = vmatpush.bf16.msrb.mxu1 %v2815_v38 }
 0x6c7   : > { %2888 = vpow2.f32 %v1636_v42 }
 0x6c8   : > { %2890 = vpow2.f32 %v1638_v43  ;;  %v2583_v52 = vmul.f32 -1.702, %v3368_v48  ;;  %v2584_v53 = vmul.f32 -1.702, %v3372_v49  ;;  %v1599_v54 = vpop.f32.mrf.mxu0  ;;  %v1613_v55 = vpop.f32.mrf.mxu1 }
 0x6c9   : > { %v3378_v56 = vadd.f32 %v1599_v54, %v1394_v26  ;;  %v3380_v57 = vadd.f32 %v1613_v55, %v1395_v27  ;;  %v2793_v27 = vld [vmem:[%s3098_s1 + $0x10] sm:$0xff] }
 0x6ca   : > { %v1632_v59 = vmul.f32 1.442695, %v2583_v52  ;;  %v1634_v60 = vmul.f32 1.442695, %v2584_v53  ;;  %2053 = vmatpush.bf16.msra.mxu2 %v2793_v27  ;;  %v2791_v52 = vld [vmem:[%s3098_s1] sm:$0xff] }
 0x6cb   : > { %v2589_v61 = vmul.f32 -1.702, %v3378_v56  ;;  %v2590_v62 = vmul.f32 -1.702, %v3380_v57  ;;  %v2799_v53 = vld [vmem:[%s3098_s1 + $0x40] sm:$0xff] }
 0x6cc   : > { %2892 = vpow2.f32 %v1632_v59  ;;  %2069 = vmatpush.bf16.msrb.mxu3 %v2799_v53 }
 0x6cd   : > { %v2889_v1 = vpop.eup %2888  ;;  %v1644_v17 = vmul.f32 1.442695, %v2589_v61  ;;  %v1571_v4 = vpop.f32.mrf.mxu2  ;;  %2894 = vpow2.f32 %v1634_v60  ;;  %v1646_v12 = vmul.f32 1.442695, %v2590_v62 }
 0x6ce   : > { %v2891_v8 = vpop.eup %2890  ;;  %v3390_v11 = vadd.f32 1.0, %v2889_v1  ;;  %v3392_v10 = vadd.f32 %v1571_v4, %v1392_v36  ;;  %v1585_v16 = vpop.f32.mrf.mxu3  ;;  %v2807_v36 = vld [vmem:[%s3098_s1 + $0x80] sm:$0xff]  ;;  %2054 = vmatpush.bf16.msra.mxu2 %v2792_v44 }
 0x6cf   : > { %v3394_v14 = vadd.f32 1.0, %v2891_v8  ;;  %2896 = vpow2.f32 %v1644_v17  ;;  %v3418_v35 = vadd.f32 %v1585_v16, %v1393_v37  ;;  %2083 = vmatpush.bf16.msra.mxu0 %v2807_v36 }
 0x6d0   : > { %2898 = vrcp.f32 %v3390_v11  ;;  %v2587_v20 = vmul.f32 -1.702, %v3392_v10  ;;  %v1695_v51 = vand.u32 2147483647, %v3390_v11  ;;  %v1697_v54 = vand.u32 2147483648, %v3390_v11 }
 0x6d1   : > { %2900 = vrcp.f32 %v3394_v14  ;;  %v2588_v45 = vmul.f32 -1.702, %v3418_v35  ;;  %v1710_v55 = vand.u32 2147483647, %v3394_v14  ;;  %v1712_v13 = vand.u32 2147483648, %v3394_v14 }
 0x6d2   : > { %v2893_v2 = vpop.eup %2892  ;;  %2902 = vpow2.f32 %v1646_v12  ;;  %v1640_v30 = vmul.f32 1.442695, %v2587_v20  ;;  %2055 = vmatpush.bf16.msra.mxu2 %v2791_v52  ;;  %vm1691_vm1 = vweird.f32 %v3390_v11  ;;  %vm3451_vm2 = vcmp.eq.f32.partialorder %v1695_v51, 8.507059e+37 }
 0x6d3   : > { %v3403_v21 = vadd.f32 1.0, %v2893_v2  ;;  %v2895_v23 = vpop.eup %2894  ;;  %v1642_v58 = vmul.f32 1.442695, %v2588_v45  ;;  %vm1706_vm3 = vweird.f32 %v3394_v14  ;;  %v1698_v1 = vor.u32 1.1754944e-38, %v1697_v54 }
 0x6d4   : > { %v3424_v42 = vadd.f32 1.0, %v2895_v23  ;;  %vm3456_vm4 = vcmp.eq.f32.partialorder %v1710_v55, 8.507059e+37  ;;  %v1713_v4 = vor.u32 1.1754944e-38, %v1712_v13 }
 0x6d5   : > { %v2897_v26 = vpop.eup %2896  ;;  %2904 = vrcp.f32 %v3403_v21  ;;  %v1667_v20 = vand.u32 2147483648, %v3403_v21  ;;  %v1665_v55 = vand.u32 2147483647, %v3403_v21 }
 0x6d6   : > { %v3409_v29 = vpop.eup %2898  ;;  %v3426_v43 = vadd.f32 1.0, %v2897_v26  ;;  %2906 = vpow2.f32 %v1640_v30 }
 0x6d7   : > { %v3411_v31 = vpop.eup %2900  ;;  %v1687_v34 = vmul.f32 %v3409_v29, %v3390_v11  ;;  %vm1692_vm0 = vweird.f32 %v3409_v29 }
 0x6d8   : > { %v2903_v39 = vpop.eup %2902  ;;  %v1702_v40 = vmul.f32 %v3411_v31, %v3394_v14  ;;  %2908 = vrcp.f32 %v3426_v43  ;;  %vm3463_vm5 = vmor %vm1691_vm1, %vm1692_vm0  ;;  %vm1707_vm6 = vweird.f32 %v3411_v31  ;;  %v1755_v11 = vand.u32 2147483647, %v3426_v43 }
 0x6d9   : > { %v1688_v41 = vsub.f32 1.0, %v1687_v34  ;;  %v3430_v37 = vadd.f32 1.0, %v2903_v39  ;;  %2910 = vrcp.f32 %v3424_v42  ;;  %vm1751_vm7 = vweird.f32 %v3426_v43  ;;  %vm3488_vm9 = vmor %vm1706_vm3, %vm1707_vm6 }
 0x6da   : > { %v1703_v47 = vsub.f32 1.0, %v1702_v40  ;;  %v1757_v22 = vand.u32 2147483648, %v3426_v43  ;;  %vm3493_vm11 = vcmp.eq.f32.partialorder %v1755_v11, 8.507059e+37  ;;  %vm1661_vm0 = vweird.f32 %v3403_v21 }
 0x6db   : > { %v1689_v46 = vmul.f32 %v3409_v29, %v1688_v41  ;;  %v3435_v50 = vpop.eup %2904  ;;  %2912 = vrcp.f32 %v3430_v37  ;;  %v1772_v14 = vand.u32 2147483648, %v3430_v37  ;;  %v1770_v41 = vand.u32 2147483647, %v3430_v37 }
 0x6dc   : > { %v2907_v59 = vpop.eup %2906  ;;  %v1704_v61 = vmul.f32 %v3411_v31, %v1703_v47  ;;  %v1657_v62 = vmul.f32 %v3435_v50, %v3403_v21  ;;  %2914 = vpow2.f32 %v1642_v58  ;;  %vm1662_vm10 = vweird.f32 %v3435_v50 }
 0x6dd   : > { %v1690_v60 = vadd.f32 %v3409_v29, %v1689_v46  ;;  %v3469_v12 = vadd.f32 1.0, %v2907_v59  ;;  %v1758_v39 = vor.u32 1.1754944e-38, %v1757_v22  ;;  %vm1766_vm14 = vweird.f32 %v3430_v37 }
 0x6de   : > { %v2909_v63 = vpop.eup %2908  ;;  %v1705_v18 = vadd.f32 %v3411_v31, %v1704_v61  ;;  %v1658_v19 = vsub.f32 1.0, %v1657_v62  ;;  %v1773_v54 = vor.u32 1.1754944e-38, %v1772_v14  ;;  %vm1771_vm1 = vcmp.eq.f32.partialorder %v1770_v41, 8.507059e+37  ;;  %v2861_v14 = vld [vmem:[%s674_s28] ss:$0 sm:$0xff]  ;;  %s3626_s28 = sld [smem:[#allocation10_spill]] (!%p2719_p6) }
 0x6df   : > { %v1747_v5 = vmul.f32 %v2909_v63, %v3426_v43  ;;  %v3461_v7 = vpop.eup %2910  ;;  %v1694_v3 = vsel %vm3463_vm5, %v3409_v29, %v1690_v60  ;;  %vm1752_vm8 = vweird.f32 %v2909_v63  ;;  %2916 = vrcp.f32 %v3469_v12 }
 0x6e0   : > { %v1672_v16 = vmul.f32 %v3461_v7, %v3424_v42  ;;  %v1699_v26 = vsel %vm3451_vm2, %v1698_v1, %v1694_v3  ;;  %v1709_v30 = vsel %vm3488_vm9, %v3411_v31, %v1705_v18  ;;  %v1659_v34 = vmul.f32 %v3435_v50, %v1658_v19  ;;  %vm1753_vm12 = vmor %vm1751_vm7, %vm1752_vm8 }
 0x6e1   : > { %v2913_v15 = vpop.eup %2912  ;;  %v1748_v2 = vsub.f32 1.0, %v1747_v5  ;;  %v1778_v31 = vmul.f32 %v1699_v26, %v3354_v32  ;;  %v1714_v46 = vsel %vm3456_vm4, %v1713_v4, %v1709_v30  ;;  %vm3523_vm2 = vmor %vm1661_vm0, %vm1662_vm10  ;;  %v1668_v21 = vor.u32 1.1754944e-38, %v1667_v20 }
 0x6e2   : > { %v1762_v23 = vmul.f32 %v2913_v15, %v3430_v37  ;;  %v2915_v38 = vpop.eup %2914  ;;  %vm1767_vm13 = vweird.f32 %v2913_v15  ;;  %v1673_v44 = vsub.f32 1.0, %v1672_v16  ;;  %v1660_v52 = vadd.f32 %v3435_v50, %v1659_v34 }
 0x6e3   : > { %v1749_v25 = vmul.f32 %v2909_v63, %v1748_v2  ;;  %v3506_v45 = vadd.f32 1.0, %v2915_v38  ;;  %vm1768_vm15 = vmor %vm1766_vm14, %vm1767_vm13  ;;  %v1779_v60 = vmul.f32 %v1714_v46, %v3356_v33  ;;  %v1727_v0 = vand.u32 2147483648, %v3469_v12 }
 0x6e4   : > { %v1763_v29 = vsub.f32 1.0, %v1762_v23  ;;  %v1674_v13 = vmul.f32 %v3461_v7, %v1673_v44  ;;  %v1725_v33 = vand.u32 2147483647, %v3469_v12  ;;  %vm1666_vm4 = vcmp.eq.f32.partialorder %v1665_v55, 8.507059e+37 }
 0x6e5   : > { %v1750_v36 = vadd.f32 %v2909_v63, %v1749_v25  ;;  %v2917_v51 = vpop.eup %2916  ;;  %2918 = vrcp.f32 %v3506_v45  ;;  %vm1677_vm5 = vweird.f32 %v3461_v7  ;;  %vm1721_vm6 = vweird.f32 %v3469_v12 }
 0x6e6   : > { %v1764_v40 = vmul.f32 %v2913_v15, %v1763_v29  ;;  %v1717_v32 = vmul.f32 %v2917_v51, %v3469_v12  ;;  %vm1722_vm3 = vweird.f32 %v2917_v51  ;;  %v1675_v5 = vadd.f32 %v3461_v7, %v1674_v13 }
 0x6e7   : > { %v1754_v24 = vsel %vm1753_vm12, %v2909_v63, %v1750_v36  ;;  %v1664_v63 = vsel %vm3523_vm2, %v3435_v50, %v1660_v52  ;;  %vm1676_vm7 = vweird.f32 %v3424_v42  ;;  %v1682_v11 = vand.u32 2147483648, %v3424_v42  ;;  %vm1723_vm8 = vmor %vm1721_vm6, %vm1722_vm3 }
 0x6e8   : > { %v1759_v43 = vsel %vm3493_vm11, %v1758_v39, %v1754_v24  ;;  %v1765_v47 = vadd.f32 %v2913_v15, %v1764_v40  ;;  %v1718_v62 = vsub.f32 1.0, %v1717_v32  ;;  %vm3539_vm9 = vmor %vm1676_vm7, %vm1677_vm5  ;;  %v1680_v18 = vand.u32 2147483647, %v3424_v42 }
 0x6e9   : > { %v1782_v53 = vmul.f32 %v1759_v43, %v3378_v56  ;;  %vm1726_vm10 = vcmp.eq.f32.partialorder %v1725_v33, 8.507059e+37  ;;  %v1679_v20 = vsel %vm3539_vm9, %v3461_v7, %v1675_v5  ;;  %v1742_v23 = vand.u32 2147483648, %v3506_v45 }
 0x6ea   : > { %v1769_v37 = vsel %vm1768_vm15, %v2913_v15, %v1765_v47  ;;  %v1719_v17 = vmul.f32 %v2917_v51, %v1718_v62  ;;  %v1728_v15 = vor.u32 1.1754944e-38, %v1727_v0  ;;  %v1740_v26 = vand.u32 2147483647, %v3506_v45 }
 0x6eb   : > { %v1786_v58 = vpack.c.bf16 %v1782_v53, %v1778_v31  ;;  %v1774_v59 = vsel %vm1771_vm1, %v1773_v54, %v1769_v37  ;;  %v2919_v4 = vpop.eup %2918  ;;  %v1683_v27 = vor.u32 1.1754944e-38, %v1682_v11  ;;  %vm1681_vm12 = vcmp.eq.f32.partialorder %v1680_v18, 8.507059e+37 }
 0x6ec   : > { %v1783_v61 = vmul.f32 %v1774_v59, %v3380_v57  ;;  %v1669_v57 = vsel %vm1666_vm4, %v1668_v21, %v1664_v63  ;;  %v1720_v8 = vadd.f32 %v2917_v51, %v1719_v17  ;;  %v1732_v50 = vmul.f32 %v2919_v4, %v3506_v45 }
 0x6ed   : > { %2084 = vmatmul.bf16.vlgmr.msra.gmra.mxu0 %v1786_v58  ;;  %v1776_v12 = vmul.f32 %v1669_v57, %v3368_v48  ;;  %vm1737_vm11 = vweird.f32 %v2919_v4  ;;  %vm1736_vm13 = vweird.f32 %v3506_v45  ;;  %v1684_v48 = vsel %vm1681_vm12, %v1683_v27, %v1679_v20 }
 0x6ee   : > { %v1787_v1 = vpack.c.bf16 %v1783_v61, %v1779_v60  ;;  %v1724_v19 = vsel %vm1723_vm8, %v2917_v51, %v1720_v8  ;;  %v1733_v2 = vsub.f32 1.0, %v1732_v50  ;;  %vm1738_vm14 = vmor %vm1736_vm13, %vm1737_vm11  ;;  %v1743_v29 = vor.u32 1.1754944e-38, %v1742_v23 }
 0x6ef   : > { %v1729_v22 = vsel %vm1726_vm10, %v1728_v15, %v1724_v19  ;;  %vm1741_vm15 = vcmp.eq.f32.partialorder %v1740_v26, 8.507059e+37 }
 0x6f0   : > { %2098 = vmatmul.bf16.vlgmr.msrb.gmra.mxu1 %v1787_v1  ;;  %v1780_v16 = vmul.f32 %v1729_v22, %v3392_v10  ;;  %v1734_v25 = vmul.f32 %v2919_v4, %v1733_v2  ;;  %v1777_v10 = vmul.f32 %v1684_v48, %v3372_v49 }
 0x6f2   : > { %v1784_v42 = vpack.c.bf16 %v1780_v16, %v1776_v12  ;;  %v1735_v28 = vadd.f32 %v2919_v4, %v1734_v25 }
 0x6f4   : > { %v1739_v7 = vsel %vm1738_vm14, %v2919_v4, %v1735_v28  ;;  %2056 = vmatmul.bf16.vlgmr.msra.gmra.mxu2 %v1784_v42 }
 0x6f5   : > { %v1744_v30 = vsel %vm1741_vm15, %v1743_v29, %v1739_v7 }
 0x6f6   : > { %v1781_v34 = vmul.f32 %v1744_v30, %v3418_v35 }
 0x6f8   : > { %v1785_v36 = vpack.c.bf16 %v1781_v34, %v1777_v10 }
 0x6fa   : > { %2070 = vmatmul.bf16.vlgmr.msrb.gmra.mxu3 %v1785_v36 }
 0x76a   : > { %v2085_v40 = vpop.f32.mrf.mxu0 }
 0x76d   : > { %v2099_v24 = vpop.f32.mrf.mxu1 }
 0x772   : > { %v2087_v51 = vpop.f32.mrf.mxu0 }
 0x775   : > { %v2101_v53 = vpop.f32.mrf.mxu1 }
 0x777   : > { %v2057_v38 = vpop.f32.mrf.mxu2 }
 0x778   : > { %v2058_v39 = vadd.f32 %v2861_v14, %v2057_v38 }
 0x77d   : > { %v2071_v41 = vpop.f32.mrf.mxu3 }
 0x77e   : > { %v2072_v44 = vadd.f32 %v2071_v41, %v2058_v39 }
 0x77f   : > { %v2059_v45 = vpop.f32.mrf.mxu2 }
 0x780   : > { %v2086_v31 = vadd.f32 %v2085_v40, %v2072_v44  ;;  %v2060_v43 = vadd.f32 %v2861_v14, %v2059_v45 }
 0x782   : > { %v2100_v46 = vadd.f32 %v2099_v24, %v2086_v31 }
 0x784   : > { %v2104_v49 = vadd.f32 %v2100_v46, %v3248_v6 }
 0x785   : > { %v2073_v35 = vpop.f32.mrf.mxu3 }
 0x786   : > { %2106 = vst [vmem:[#allocation2] sm:$0xff] %v2104_v49  ;;  %v2074_v47 = vadd.f32 %v2073_v35, %v2060_v43 }
 0x788   : > { %v2088_v52 = vadd.f32 %v2087_v51, %v2074_v47 }
 0x78a   : > { %v2102_v54 = vadd.f32 %v2101_v53, %v2088_v52  ;;  %2111 = sbr.rel (%p2719_p6) target bundleno = 1937 (0x791), region = 84 }
 0x78c   : > { %v2105_v37 = vadd.f32 %v2102_v54, %v3252_v9 }
 0x78e   : > { %2107 = vst [vmem:[#allocation2 + $0x8] sm:$0xff] %v2105_v37 }
 0x78f   : > { %2112 = vst [vmem:[%s3626_s28] sm:$0xff] %v2104_v49 }
 0x790   : > { %2113 = vst [vmem:[%s3626_s28 + $0x8] sm:$0xff] %v2105_v37 }
 0x791 PF: > { %s3627_s22 = sld [smem:[#allocation4_spill]] }
 0x792   : > { %s3628_s29 = sld [smem:[#allocation3_spill]] }
 0x793   : > { %s3629_s30 = sld [smem:[#allocation5_spill]] }
 0x797   : > { %s24_s15 = sadd.s32 1, %s3627_s22  }
 0x798   : > { %p21_p7 = scmp.ge.s32.totalorder %s24_s15, 4  }
 0x79a   :  { %23 = sbr.rel (!%p21_p7) target bundleno = 6 (0x6), region = 150 }

// kernel: clip4clip_forward.7
= control target key start
LH: loop header
LB: loop body
LE: loop exit
PB: predicated region body
PF: predicated region fallthrough
CT: control target
= control target key end

     0   :  { %vm20_vm0 = vcmask 1041408   ;;  %v106_v2 = vmov 128.0   ;;  %s194_s0 = inlined_call_operand.vmem [shape: f32[2,128], index: 0, kind: input, shape index: {}]   ;;  %s195_s3 = inlined_call_operand.vmem [shape: f32[128,128], index: 3, kind: input, shape index: {}]   ;;  %s196_s1 = inlined_call_operand.vmem [shape: f32[1,128], index: 1, kind: input, shape index: {}]   ;;  %s197_s2 = inlined_call_operand.vmem [shape: f32[1,128], index: 2, kind: input, shape index: {}]   ;;  %s198_s4 = inlined_call_operand.vmem [shape: f32[2,128], index: 4, kind: output, shape index: {}]  }
   0x1   :  { %v17_v0 = vld [vmem:[%s194_s0] sm:$0x3]  ;;  %102 = vrcp.f32 %v106_v2  ;;  %v73_v3 = vld [vmem:[%s195_s3 + $0x78] sm:$0xff]  ;;  %v72_v4 = vld [vmem:[%s195_s3 + $0x70] sm:$0xff] }
   0x2   :  { %v21_v1 = vsel %vm20_vm0, %v17_v0, 0.0  ;;  %74 = vmatpush.msra.mxu0 %v73_v3  ;;  %v71_v16 = vld [vmem:[%s195_s3 + $0x68] sm:$0xff]  ;;  %v70_v17 = vld [vmem:[%s195_s3 + $0x60] sm:$0xff]  ;;  %v69_v18 = vld [vmem:[%s195_s3 + $0x58] sm:$0xff] }
   0x3   :  { %22 = vadd.xlane.f32.xlu0 %v21_v1  ;;  %v68_v19 = vld [vmem:[%s195_s3 + $0x50] sm:$0xff]  ;;  %v67_v20 = vld [vmem:[%s195_s3 + $0x48] sm:$0xff]  ;;  %v66_v21 = vld [vmem:[%s195_s3 + $0x40] sm:$0xff] }
   0x4   :  { %75 = vmatpush.msra.mxu0 %v72_v4  ;;  %v65_v22 = vld [vmem:[%s195_s3 + $0x38] sm:$0xff]  ;;  %v64_v23 = vld [vmem:[%s195_s3 + $0x30] sm:$0xff]  ;;  %v63_v24 = vld [vmem:[%s195_s3 + $0x28] sm:$0xff] }
   0x5   :  { %v62_v25 = vld [vmem:[%s195_s3 + $0x20] sm:$0xff]  ;;  %v61_v26 = vld [vmem:[%s195_s3 + $0x18] sm:$0xff]  ;;  %v60_v27 = vld [vmem:[%s195_s3 + $0x10] sm:$0xff] }
   0x6   :  { %76 = vmatpush.msra.mxu0 %v71_v16  ;;  %v59_v28 = vld [vmem:[%s195_s3 + $0x8] sm:$0xff]  ;;  %v58_v29 = vld [vmem:[%s195_s3] sm:$0xff] }
   0x7   :  { %v103_v5 = vpop.eup %102  ;;  %v100_v39 = vld [vmem:[%s196_s1] ss:$0 sm:$0xff] }
   0x8   :  { %v25_v6 = vmul.f32 128.0, %v103_v5  ;;  %vm29_vm1 = vweird.f32 %v103_v5  ;;  %77 = vmatpush.msra.mxu0 %v70_v17  ;;  %v101_v42 = vld [vmem:[%s197_s2] ss:$0 sm:$0xff] }
   0xa   :  { %v26_v7 = vsub.f32 1.0, %v25_v6  ;;  %78 = vmatpush.msra.mxu0 %v69_v18 }
   0xc   :  { %v27_v8 = vmul.f32 %v103_v5, %v26_v7  ;;  %79 = vmatpush.msra.mxu0 %v68_v19 }
   0xe   :  { %v28_v9 = vadd.f32 %v103_v5, %v27_v8  ;;  %80 = vmatpush.msra.mxu0 %v67_v20 }
  0x10   :  { %v30_v10 = vsel %vm29_vm1, %v103_v5, %v28_v9  ;;  %81 = vmatpush.msra.mxu0 %v66_v21 }
  0x12   :  { %82 = vmatpush.msra.mxu0 %v65_v22 }
  0x14   :  { %83 = vmatpush.msra.mxu0 %v64_v23 }
  0x16   :  { %84 = vmatpush.msra.mxu0 %v63_v24 }
  0x18   :  { %85 = vmatpush.msra.mxu0 %v62_v25 }
  0x1a   :  { %86 = vmatpush.msra.mxu0 %v61_v26 }
  0x1c   :  { %87 = vmatpush.msra.mxu0 %v60_v27 }
  0x1e   :  { %88 = vmatpush.msra.mxu0 %v59_v28 }
  0x20   :  { %89 = vmatpush.msra.mxu0 %v58_v29 }
  0x76   :  { %v23_v11 = vpop.xlane.xlu0 %22 }
  0x77   :  { %v31_v12 = vmul.f32 %v30_v10, %v23_v11 }
  0x79   :  { %v32_v13 = vsub.f32 %v17_v0, %v31_v12 }
  0x7b   :  { %v33_v14 = vmul.f32 %v32_v13, %v32_v13 }
  0x7d   :  { %v34_v15 = vsel %vm20_vm0, %v33_v14, 0.0 }
  0x7e   :  { %35 = vadd.xlane.f32.xlu0 %v34_v15 }
  0xf1   :  { %v36_v30 = vpop.xlane.xlu0 %35 }
  0xf2   :  { %v37_v31 = vmul.f32 %v36_v30, %v30_v10 }
  0xf4   :  { %v38_v32 = vadd.f32 1e-05, %v37_v31 }
  0xf6   :  { %104 = vrsqrt.f32 %v38_v32  ;;  %vm45_vm3 = vweird.f32 %v38_v32 }
  0xfc   :  { %v105_v33 = vpop.eup %104 }
  0xfd   :  { %v40_v34 = vmul.f32 %v105_v33, %v38_v32  ;;  %vm46_vm2 = vweird.f32 %v105_v33 }
  0xfe   :  { %vm47_vm4 = vmor %vm45_vm3, %vm46_vm2 }
  0xff   :  { %v41_v35 = vmul.f32 %v105_v33, %v40_v34 }
 0x101   :  { %v42_v36 = vmul.f32 0.5, %v41_v35 }
 0x103   :  { %v43_v37 = vsub.f32 1.5, %v42_v36 }
 0x105   :  { %v44_v38 = vmul.f32 %v105_v33, %v43_v37 }
 0x107   :  { %v48_v40 = vsel %vm47_vm4, %v105_v33, %v44_v38 }
 0x108   :  { %v49_v41 = vmul.f32 %v48_v40, %v32_v13 }
 0x10a   :  { %v53_v43 = vmul.f32 %v100_v39, %v49_v41 }
 0x10c   :  { %v57_v44 = vadd.f32 %v101_v42, %v53_v43 }
 0x10e   :  { %90 = vmatmul.f32.vlgmr.msra.gmra.mxu0 %v57_v44 }
 0x18b   :  { %v91_v45 = vpop.f32.mrf.mxu0 }
 0x18c   :  { %94 = vst [vmem:[%s198_s4] sm:$0x3] %v91_v45 }

// kernel: clip4clip_forward.11
= control target key start
LH: loop header
LB: loop body
LE: loop exit
PB: predicated region body
PF: predicated region fallthrough
CT: control target
= control target key end

     0   :  { %s539_s0 = inlined_call_operand.vmem [shape: f32[2,128], index: 0, kind: input, shape index: {}]   ;;  %s540_s1 = inlined_call_operand.vmem [shape: f32[2,4,128], index: 1, kind: input, shape index: {}]   ;;  %s541_s2 = inlined_call_operand.vmem [shape: f32[2,4,1], index: 2, kind: input, shape index: {}]   ;;  %s542_s3 = inlined_call_operand.<no memory space> [shape: f32[1,1], index: 3, kind: input, shape index: {}]   ;;  %s543_s4 = inlined_call_operand.hbm [shape: f32[1,1], index: 4, kind: output, shape index: {}]  }
   0x1   :  { %v9_v0 = vstv %s542_s3 }
   0x2   :  { %10 = vst [vmem:[#allocation2] sm:$0x1] %v9_v0 }
   0x3   :  { %v470_v1 = vld [vmem:[%s540_s1 + $0x4] sm:$0xf]  ;;  %vm43_vm0 = vcmask 1043456   ;;  %v20_v2 = vld [vmem:[%s539_s0] sm:$0x3]  ;;  %vm26_vm1 = vcmask 1041408  }
   0x4   :  { %v42_v3 = vmul.f32 %v470_v1, %v470_v1  ;;  %v25_v4 = vmul.f32 %v20_v2, %v20_v2 }
   0x5   :  { %11 = vsyncpa [#allocation4], 0  ;;  %v480_v5 = vld [vmem:[%s540_s1] sm:$0xf]  ;;  %v24_v11 = vld [vmem:[%s541_s2 + $0x4] sm:$0xf] }
   0x6   :  { %v47_v6 = vsel %vm43_vm0, %v42_v3, 0.0  ;;  %v27_v7 = vsel %vm26_vm1, %v25_v4, 0.0  ;;  %v41_v8 = vmul.f32 %v480_v5, %v480_v5  ;;  %v23_v10 = vld [vmem:[%s541_s2] sm:$0xf]  ;;  %v436_v12 = vmov 0   ;;  %s438_s30 = smov [#allocation3]  }
   0x7   :  { %48 = vadd.xlane.f32.xlu1 %v47_v6  ;;  %28 = vadd.xlane.f32.xlu0 %v27_v7  ;;  %vm166_vm2 = vcmp.gt.f32.partialorder %v24_v11, 0.5  ;;  %vm165_vm3 = vcmp.gt.f32.partialorder %v23_v10, 0.5  ;;  %vm126_vm13 = vcmask 11264   ;;  %s351_s5 = sshll.u32 %s438_s30, 4  ;;  %s353_s9 = sshll.u32 %s543_s4, 4  ;;  %s352_s5 = int_to_ptr.vmem [resolvable:$true] %s351_s5  ;;  %s354_s9 = int_to_ptr.hbm [resolvable:$true] %s353_s9 }
   0x8   :  { %v44_v9 = vsel %vm43_vm0, %v41_v8, 0.0  ;;  %371 = vset.pattern.permute.xlu1 %v436_v12  ;;  %372 = vset.pattern.permute.xlu2 %v436_v12  ;;  %v170_v14 = vsel %vm166_vm2, 1, %v436_v12  ;;  %v169_v18 = vsel %vm165_vm3, 1, %v436_v12 }
   0x9   :  { %119 = vperm.xlu2 %372, %v24_v11   ;;  %v219_v13 = vld [vmem:[#allocation2] sm:$0x1]  ;;  %373 = vset.pattern.permute.xlu0 %v436_v12 }
   0xa   :  { %v220_v17 = vmul.f32 1.442695, %v219_v13 }
   0xf   :  { %45 = vadd.xlane.f32.xlu0 %v44_v9 }
  0x11   :  { %172 = vperm.xlu2 %372, %v169_v18  }
  0x20   :  { %114 = vperm.xlu1 %371, %v23_v10  }
  0x23   :  { %175 = vperm.xlu0 %373, %v170_v14  }
  0x63   :  { %v120_v45 = vpop.permute.xlu2 %119 }
  0x7a   :  { %v49_v15 = vpop.xlane.xlu1 %48  ;;  %v29_v16 = vpop.xlane.xlu0 %28 }
  0x7b   :  { %374 = vrsqrt.f32 %v49_v15  ;;  %vm66_vm5 = vweird.f32 %v49_v15  ;;  %vm36_vm7 = vweird.f32 %v29_v16 }
  0x7c   :  { %376 = vrsqrt.f32 %v29_v16 }
  0x7d   :  { %378 = vpow2.f32 %v220_v17 }
  0x81   :  { %v375_v19 = vpop.eup %374 }
  0x82   :  { %v377_v20 = vpop.eup %376  ;;  %v61_v21 = vmul.f32 %v375_v19, %v49_v15  ;;  %v46_v22 = vpop.xlane.xlu0 %45  ;;  %vm67_vm6 = vweird.f32 %v375_v19 }
  0x83   :  { %v31_v23 = vmul.f32 %v377_v20, %v29_v16  ;;  %380 = vrsqrt.f32 %v46_v22  ;;  %v379_v26 = vpop.eup %378  ;;  %vm37_vm4 = vweird.f32 %v377_v20  ;;  %vm68_vm9 = vmor %vm66_vm5, %vm67_vm6  ;;  %vm56_vm11 = vweird.f32 %v46_v22 }
  0x84   :  { %v62_v24 = vmul.f32 %v375_v19, %v61_v21  ;;  %240 = vperm.xlu2 %372, %v379_v26   ;;  %vm38_vm8 = vmor %vm36_vm7, %vm37_vm4  ;;  %vm250_vm6 = vcmask 15360  }
  0x85   :  { %v32_v25 = vmul.f32 %v377_v20, %v31_v23 }
  0x86   :  { %v63_v27 = vmul.f32 0.5, %v62_v24 }
  0x87   :  { %v33_v28 = vmul.f32 0.5, %v32_v25  ;;  %v173_v25 = vpop.permute.xlu2 %172 }
  0x88   :  { %v64_v29 = vsub.f32 1.5, %v63_v27  ;;  %vm177_vm5 = vcmp.eq.s32.totalorder %v173_v25, 1 }
  0x89   :  { %v381_v30 = vpop.eup %380  ;;  %v34_v31 = vsub.f32 1.5, %v33_v28 }
  0x8a   :  { %v51_v32 = vmul.f32 %v381_v30, %v46_v22  ;;  %v65_v33 = vmul.f32 %v375_v19, %v64_v29  ;;  %vm57_vm10 = vweird.f32 %v381_v30 }
  0x8b   :  { %v35_v34 = vmul.f32 %v377_v20, %v34_v31  ;;  %vm58_vm12 = vmor %vm56_vm11, %vm57_vm10  ;;  %vm344_vm11 = vcmask 0  }
  0x8c   :  { %v52_v35 = vmul.f32 %v381_v30, %v51_v32  ;;  %v69_v39 = vsel %vm68_vm9, %v375_v19, %v65_v33  ;;  %vm270_vm9 = vcmask 8192  }
  0x8d   :  { %v39_v36 = vsel %vm38_vm8, %v377_v20, %v35_v34  ;;  %v71_v41 = vmul.f32 %v69_v39, %v470_v1 }
  0x8e   :  { %v53_v37 = vmul.f32 0.5, %v52_v35  ;;  %v40_v38 = vmul.f32 %v39_v36, %v20_v2 }
  0x90   :  { %v54_v40 = vsub.f32 1.5, %v53_v37  ;;  %87 = vmatpush.xpose.msra.mxu0 %v40_v38  ;;  %107 = vmatpush.xpose.msra.mxu1 %v40_v38 }
  0x92   :  { %v55_v42 = vmul.f32 %v381_v30, %v54_v40  ;;  %v115_v48 = vpop.permute.xlu1 %114 }
  0x93   :  { %108 = vmatmul.f32.vlgmr.msra.gmra.mxu1 %v71_v41 }
  0x94   :  { %v59_v43 = vsel %vm58_vm12, %v381_v30, %v55_v42 }
  0x95   :  { %v70_v44 = vmul.f32 %v59_v43, %v480_v5  ;;  %v176_v15 = vpop.permute.xlu0 %175 }
  0x96   :  { %vm178_vm3 = vcmp.eq.s32.totalorder %v176_v15, 1 }
  0x97   :  { %88 = vmatmul.f32.vlgmr.msra.gmra.mxu0 %v70_v44 }
 0x110   :  { %v492_v46 = vpop.f32.mrf.mxu1 }
 0x111   :  { %v123_v47 = vmul.f32 %v120_v45, %v492_v46 }
 0x113   :  { %v125_v49 = vmul.f32 %v123_v47, %v123_v47 }
 0x114   :  { %v495_v50 = vpop.f32.mrf.mxu0 }
 0x115   :  { %v134_v51 = vsel %vm126_vm13, %v125_v49, 0.0  ;;  %v122_v52 = vmul.f32 %v115_v48, %v495_v50 }
 0x116   :  { %v135_v53 = vrot.slane %v134_v51, 4 }
 0x117   :  { %v124_v54 = vmul.f32 %v122_v52, %v122_v52 }
 0x118   :  { %v136_v55 = vadd.f32 %v135_v53, %v134_v51 }
 0x119   :  { %v127_v56 = vsel %vm126_vm13, %v124_v54, 0.0 }
 0x11a   :  { %v137_v57 = vrot.slane %v136_v55, 2  ;;  %v128_v58 = vrot.slane %v127_v56, 4 }
 0x11c   :  { %v138_v59 = vadd.f32 %v137_v57, %v136_v55  ;;  %v129_v60 = vadd.f32 %v128_v58, %v127_v56 }
 0x11e   :  { %v139_v61 = vrot.slane %v138_v59, 1  ;;  %v130_v62 = vrot.slane %v129_v60, 2 }
 0x120   :  { %v140_v63 = vadd.f32 %v139_v61, %v138_v59  ;;  %v131_v0 = vadd.f32 %v130_v62, %v129_v60 }
 0x122   :  { %v142_v1 = vadd.f32 1e-12, %v140_v63  ;;  %v132_v2 = vrot.slane %v131_v0, 1 }
 0x124   :  { %382 = vrsqrt.f32 %v142_v1  ;;  %v133_v3 = vadd.f32 %v132_v2, %v131_v0  ;;  %vm159_vm15 = vweird.f32 %v142_v1 }
 0x126   :  { %v141_v4 = vadd.f32 1e-12, %v133_v3 }
 0x128   :  { %384 = vrsqrt.f32 %v141_v4  ;;  %vm149_vm2 = vweird.f32 %v141_v4 }
 0x12a   :  { %v383_v5 = vpop.eup %382 }
 0x12b   :  { %v154_v6 = vmul.f32 %v383_v5, %v142_v1  ;;  %vm160_vm14 = vweird.f32 %v383_v5 }
 0x12c   :  { %vm161_vm0 = vmor %vm159_vm15, %vm160_vm14 }
 0x12d   :  { %v155_v7 = vmul.f32 %v383_v5, %v154_v6 }
 0x12e   :  { %v385_v8 = vpop.eup %384 }
 0x12f   :  { %v156_v9 = vmul.f32 0.5, %v155_v7  ;;  %v144_v10 = vmul.f32 %v385_v8, %v141_v4  ;;  %vm150_vm1 = vweird.f32 %v385_v8 }
 0x130   :  { %vm151_vm4 = vmor %vm149_vm2, %vm150_vm1 }
 0x131   :  { %v157_v11 = vsub.f32 1.5, %v156_v9  ;;  %v145_v12 = vmul.f32 %v385_v8, %v144_v10 }
 0x133   :  { %v158_v13 = vmul.f32 %v383_v5, %v157_v11  ;;  %v146_v14 = vmul.f32 0.5, %v145_v12 }
 0x135   :  { %v162_v16 = vsel %vm161_vm0, %v383_v5, %v158_v13  ;;  %v147_v17 = vsub.f32 1.5, %v146_v14  ;;  %v241_v13 = vpop.permute.xlu2 %240 }
 0x136   :  { %v164_v18 = vmul.f32 %v162_v16, %v123_v47  ;;  %v243_v16 = vperm.slane %v241_v13, 0 }
 0x137   :  { %v148_v19 = vmul.f32 %v385_v8, %v147_v17 }
 0x138   :  { %v168_v20 = vmul.f32 6.0, %v164_v18 }
 0x139   :  { %v152_v21 = vsel %vm151_vm4, %v385_v8, %v148_v19 }
 0x13a   :  { %v163_v22 = vmul.f32 %v152_v21, %v122_v52  ;;  %v180_v23 = vsel %vm178_vm3, %v168_v20, -1e+20 }
 0x13b   :  { %v188_v24 = vsel %vm126_vm13, %v180_v23, -inf }
 0x13c   :  { %v167_v26 = vmul.f32 6.0, %v163_v22  ;;  %v189_v27 = vrot.slane %v188_v24, 4 }
 0x13e   :  { %v179_v28 = vsel %vm177_vm5, %v167_v26, -1e+20  ;;  %v190_v29 = vmax.f32 %v188_v24, %v189_v27 }
 0x13f   :  { %v181_v30 = vsel %vm126_vm13, %v179_v28, -inf }
 0x140   :  { %v182_v31 = vrot.slane %v181_v30, 4  ;;  %v191_v32 = vrot.slane %v190_v29, 2 }
 0x142   :  { %v183_v33 = vmax.f32 %v181_v30, %v182_v31  ;;  %v192_v34 = vmax.f32 %v190_v29, %v191_v32 }
 0x144   :  { %v184_v35 = vrot.slane %v183_v33, 2  ;;  %v193_v36 = vrot.slane %v192_v34, 1 }
 0x146   :  { %v185_v37 = vmax.f32 %v183_v33, %v184_v35  ;;  %v194_v38 = vmax.f32 %v192_v34, %v193_v36 }
 0x148   :  { %v186_v39 = vrot.slane %v185_v37, 1  ;;  %v196_v40 = vsub.f32 %v180_v23, %v194_v38 }
 0x14a   :  { %v187_v41 = vmax.f32 %v185_v37, %v186_v39  ;;  %v199_v42 = vmul.f32 1.442695, %v196_v40  ;;  %v246_v37 = vlaneseq }
 0x14c   :  { %v195_v43 = vsub.f32 %v179_v28, %v187_v41  ;;  %386 = vpow2.f32 %v199_v42  ;;  %v247_v42 = vand.u32 127, %v246_v37 }
 0x14e   :  { %v197_v44 = vmul.f32 1.442695, %v195_v43  ;;  %vm248_vm7 = vcmp.eq.s32.totalorder %v247_v42, 0  ;;  %vm249_vm8 = vcmp.eq.s32.totalorder %v247_v42, 1 }
 0x150   :  { %388 = vpow2.f32 %v197_v44 }
 0x152   :  { %v387_v45 = vpop.eup %386 }
 0x153   :  { %v208_v47 = vsel %vm126_vm13, %v387_v45, 0.0 }
 0x154   :  { %v209_v48 = vrot.slane %v208_v47, 4 }
 0x156   :  { %v389_v49 = vpop.eup %388  ;;  %v210_v51 = vadd.f32 %v209_v48, %v208_v47 }
 0x157   :  { %v201_v52 = vsel %vm126_vm13, %v389_v49, 0.0 }
 0x158   :  { %v202_v53 = vrot.slane %v201_v52, 4  ;;  %v211_v54 = vrot.slane %v210_v51, 2 }
 0x15a   :  { %v203_v55 = vadd.f32 %v202_v53, %v201_v52  ;;  %v212_v56 = vadd.f32 %v211_v54, %v210_v51 }
 0x15c   :  { %v204_v57 = vrot.slane %v203_v55, 2  ;;  %v213_v58 = vrot.slane %v212_v56, 1 }
 0x15e   :  { %v205_v59 = vadd.f32 %v204_v57, %v203_v55  ;;  %v214_v60 = vadd.f32 %v213_v58, %v212_v56  ;;  %v437_v57 = vmov 2.0  }
 0x160   :  { %v206_v61 = vrot.slane %v205_v59, 1  ;;  %390 = vrcp.f32 %v214_v60 }
 0x162   :  { %v207_v62 = vadd.f32 %v206_v61, %v205_v59 }
 0x164   :  { %392 = vrcp.f32 %v207_v62 }
 0x166   :  { %v391_v63 = vpop.eup %390 }
 0x167   :  { %v218_v0 = vmul.f32 %v391_v63, %v387_v45 }
 0x169   :  { %v223_v1 = vmul.f32 %v218_v0, %v492_v46 }
 0x16a   :  { %v393_v2 = vpop.eup %392 }
 0x16b   :  { %v217_v3 = vmul.f32 %v393_v2, %v389_v49  ;;  %v231_v4 = vsel %vm126_vm13, %v223_v1, 0.0 }
 0x16c   :  { %v232_v5 = vrot.slane %v231_v4, 4 }
 0x16d   :  { %v222_v6 = vmul.f32 %v217_v3, %v495_v50 }
 0x16e   :  { %v233_v7 = vadd.f32 %v232_v5, %v231_v4 }
 0x16f   :  { %v224_v8 = vsel %vm126_vm13, %v222_v6, 0.0 }
 0x170   :  { %v225_v9 = vrot.slane %v224_v8, 4  ;;  %v234_v10 = vrot.slane %v233_v7, 2 }
 0x172   :  { %v226_v11 = vadd.f32 %v225_v9, %v224_v8  ;;  %v235_v12 = vadd.f32 %v234_v10, %v233_v7 }
 0x174   :  { %v227_v14 = vrot.slane %v226_v11, 2  ;;  %v236_v15 = vrot.slane %v235_v12, 1 }
 0x176   :  { %v228_v17 = vadd.f32 %v227_v14, %v226_v11  ;;  %v237_v46 = vadd.f32 %v236_v15, %v235_v12 }
 0x178   :  { %v229_v18 = vrot.slane %v228_v17, 1  ;;  %v508_v19 = vmul.f32 %v243_v16, %v237_v46 }
 0x17a   :  { %v230_v20 = vadd.f32 %v229_v18, %v228_v17  ;;  %v252_v50 = vsel %vm250_vm6, %v508_v19, -inf }
 0x17b   :  { %295 = vmax.xlane.f32.xlu1 %v252_v50 }
 0x17c   :  { %v512_v21 = vmul.f32 %v243_v16, %v230_v20 }
 0x17e   :  { %v251_v22 = vsel %vm250_vm6, %v512_v21, -inf }
 0x17f   :  { %293 = vmax.xlane.f32.xlu2 %v251_v22  ;;  %v253_v23 = vmax.f32 %v251_v22, %v252_v50 }
 0x181   :  { %v254_v24 = vsub.f32 %v512_v21, %v253_v23  ;;  %v255_v25 = vsub.f32 %v508_v19, %v253_v23 }
 0x183   :  { %v256_v26 = vmul.f32 1.442695, %v254_v24  ;;  %v258_v27 = vmul.f32 1.442695, %v255_v25 }
 0x185   :  { %394 = vpow2.f32 %v256_v26 }
 0x186   :  { %396 = vpow2.f32 %v258_v27 }
 0x18b   :  { %v395_v28 = vpop.eup %394 }
 0x18c   :  { %v397_v29 = vpop.eup %396  ;;  %v260_v30 = vsel %vm250_vm6, %v395_v28, 0.0 }
 0x18d   :  { %v261_v31 = vsel %vm250_vm6, %v397_v29, 0.0 }
 0x18e   :  { %v262_v32 = vadd.f32 %v261_v31, %v260_v30 }
 0x190   :  { %398 = vlog2.f32 %v262_v32 }
 0x196   :  { %v399_v33 = vpop.eup %398 }
 0x197   :  { %v264_v35 = vmul.f32 0.6931472, %v399_v33 }
 0x199   :  { %v265_v40 = vadd.f32 %v264_v35, %v253_v23 }
 0x19b   :  { %v266_v44 = vsub.f32 %v512_v21, %v265_v40  ;;  %v267_v45 = vsub.f32 %v508_v19, %v265_v40 }
 0x19d   :  { %v268_v49 = vsel %vm248_vm7, %v266_v44, 0.0  ;;  %v269_v51 = vsel %vm249_vm8, %v267_v45, 0.0 }
 0x19e   :  { %v271_v54 = vsel %vm270_vm9, %v268_v49, 0.0  ;;  %v272_v55 = vsel %vm270_vm9, %v269_v51, 0.0 }
 0x19f   :  { %v273_v56 = vadd.f32 %v272_v55, %v271_v54 }
 0x1ee   :  { %v296_v34 = vpop.xlane.xlu1 %295 }
 0x1ef   :  { %v298_v36 = vsub.f32 %v508_v19, %v296_v34 }
 0x1f1   :  { %v301_v38 = vmul.f32 1.442695, %v298_v36 }
 0x1f2   :  { %v294_v39 = vpop.xlane.xlu2 %293 }
 0x1f3   :  { %400 = vpow2.f32 %v301_v38  ;;  %v297_v41 = vsub.f32 %v512_v21, %v294_v39 }
 0x1f5   :  { %v299_v43 = vmul.f32 1.442695, %v297_v41 }
 0x1f7   :  { %402 = vpow2.f32 %v299_v43 }
 0x1f8   :  { %404 = vrcp.f32 %v437_v57 }
 0x1f9   :  { %v401_v47 = vpop.eup %400 }
 0x1fa   :  { %v306_v48 = vsel %vm250_vm6, %v401_v47, 0.0 }
 0x1fb   :  { %307 = vadd.xlane.f32.xlu2 %v306_v48 }
 0x1fd   :  { %v403_v52 = vpop.eup %402 }
 0x1fe   :  { %v303_v53 = vsel %vm250_vm6, %v403_v52, 0.0  ;;  %v405_v58 = vpop.eup %404 }
 0x1ff   :  { %304 = vadd.xlane.f32.xlu0 %v303_v53  ;;  %v285_v60 = vmul.f32 2.0, %v405_v58  ;;  %vm289_vm10 = vweird.f32 %v405_v58 }
 0x201   :  { %v286_v63 = vsub.f32 1.0, %v285_v60 }
 0x203   :  { %274 = vadd.xlane.f32.xlu2 %v273_v56  ;;  %v287_v6 = vmul.f32 %v405_v58, %v286_v63 }
 0x205   :  { %v288_v12 = vadd.f32 %v405_v58, %v287_v6 }
 0x207   :  { %v290_v46 = vsel %vm289_vm10, %v405_v58, %v288_v12 }
 0x26e   :  { %v308_v59 = vpop.xlane.xlu2 %307 }
 0x26f   :  { %406 = vlog2.f32 %v308_v59 }
 0x272   :  { %v305_v61 = vpop.xlane.xlu0 %304 }
 0x273   :  { %408 = vlog2.f32 %v305_v61 }
 0x275   :  { %v407_v62 = vpop.eup %406 }
 0x276   :  { %v312_v0 = vmul.f32 0.6931472, %v407_v62  ;;  %v275_v1 = vpop.xlane.xlu2 %274 }
 0x277   :  { %v276_v2 = vrot.slane %v275_v1, 4 }
 0x278   :  { %v314_v3 = vadd.f32 %v312_v0, %v296_v34 }
 0x279   :  { %v409_v4 = vpop.eup %408  ;;  %v277_v5 = vadd.f32 %v276_v2, %v275_v1 }
 0x27a   :  { %v310_v7 = vmul.f32 0.6931472, %v409_v4  ;;  %v316_v8 = vsub.f32 %v508_v19, %v314_v3 }
 0x27b   :  { %v278_v9 = vrot.slane %v277_v5, 2 }
 0x27c   :  { %v313_v10 = vadd.f32 %v310_v7, %v294_v39  ;;  %v318_v14 = vsel %vm249_vm8, %v316_v8, 0.0 }
 0x27d   :  { %v279_v11 = vadd.f32 %v278_v9, %v277_v5  ;;  %v320_v20 = vsel %vm270_vm9, %v318_v14, 0.0 }
 0x27e   :  { %v315_v13 = vsub.f32 %v512_v21, %v313_v10 }
 0x27f   :  { %v280_v15 = vrot.slane %v279_v11, 1 }
 0x280   :  { %v317_v16 = vsel %vm248_vm7, %v315_v13, 0.0 }
 0x281   :  { %v281_v17 = vadd.f32 %v280_v15, %v279_v11  ;;  %v319_v18 = vsel %vm270_vm9, %v317_v16, 0.0 }
 0x282   :  { %v321_v50 = vadd.f32 %v320_v20, %v319_v18 }
 0x283   :  { %362 = vpush %v281_v17 }
 0x284   :  { %364 = vpush %v290_v46  ;;  %322 = vadd.xlane.f32.xlu1 %v321_v50 }
 0x2b4   :  { %s363_s1 = spop %362 }
 0x2b5   :  { %s283_s2 = ssub.f32 0.0, %s363_s1  ;;  %s365_s25 = spop %364 }
 0x2b7   :  { %s292_s28 = smul.f32 %s365_s25, %s283_s2 }
 0x2f7   :  { %v323_v19 = vpop.xlane.xlu1 %322 }
 0x2f8   :  { %v324_v22 = vrot.slane %v323_v19, 4 }
 0x2fa   :  { %v325_v23 = vadd.f32 %v324_v22, %v323_v19 }
 0x2fc   :  { %v326_v24 = vrot.slane %v325_v23, 2 }
 0x2fe   :  { %v327_v21 = vadd.f32 %v326_v24, %v325_v23 }
 0x300   :  { %v328_v25 = vrot.slane %v327_v21, 1 }
 0x302   :  { %v329_v26 = vadd.f32 %v328_v25, %v327_v21 }
 0x304   :  { %366 = vpush %v329_v26 }
 0x335   :  { %s367_s26 = spop %366 }
 0x336   :  { %s331_s27 = ssub.f32 0.0, %s367_s26 }
 0x338   :  { %s340_s29 = smul.f32 %s365_s25, %s331_s27 }
 0x33a   :  { %s341_s6 = sadd.f32 %s340_s29, %s292_s28 }
 0x33c   :  { %s342_s10 = smul.f32 0.5, %s341_s6 }
 0x33e   :  { %v343_v27 = vstv %s342_s10 }
 0x33f   :  { %345 = vst.msk [vmem:[#allocation3] sm:$0x1] %vm344_vm11, %v343_v27 }
 0x340   :  { %356 = dma.vmem_to_hbm [thread:$0]  %s352_s5, 16, %s354_s9, [#allocation4]  }
 0x341   :  { %434 = dma.done.wait [#allocation4], 16  }
 0x342   :  { %435 = vsyncadd [#allocation4], 4294967280 }
 0x343   :  { %361 = vsyncpa [#allocation4], 1 }

</bundles_post_ra>
